<compile_context>
chip_gen: v6e
topology: v6e:2x2x1
jax: 0.10.0
libtpu: 0.0.40
codegen_flags: <defaults>
</compile_context>

<pallas_src>
import functools
import math

import jax
import jax.numpy as jnp
from jax import lax
from jax.experimental import pallas as pl
from jax.experimental.pallas import tpu as pltpu

N_TOKENS = 4  # token slots per timestep: (state, rgb, ego, action)


# ----------------------------------------------------------------------------
# In-kernel helpers
# ----------------------------------------------------------------------------

def _mm(x, w):
    """x @ W.T with W stored PyTorch-style (out, in).

    Operands are fed to the MXU in bf16; accumulation is f32.  Contract dim 1
    of both operands so no in-kernel transpose is needed.
    """
    return lax.dot_general(
        x.astype(jnp.bfloat16), w.astype(jnp.bfloat16),
        dimension_numbers=(((1,), (1,)), ((), ())),
        preferred_element_type=jnp.float32)


def _layer_norm(z, w, b, eps=1e-5):
    mu = jnp.mean(z, axis=-1, keepdims=True)
    var = jnp.mean((z - mu) ** 2, axis=-1, keepdims=True)
    return (z - mu) * lax.rsqrt(var + eps) * w + b


# ----------------------------------------------------------------------------
# The fused kernel: feature encoder + PE + transformer + policy head
# ----------------------------------------------------------------------------

def _clip_adapter_kernel(states_ref, rgb_ref, ego_ref, eps_ref,
                         state_w_ref, state_b_ref,
                         img_w_ref, img_b_ref,
                         ego_w_ref, ego_b_ref,
                         act_tok_ref, pe_ref,
                         wqkv_ref, bqkv_ref, wo_ref, bo_ref,
                         ln1w_ref, ln1b_ref,
                         w1_ref, b1_ref, w2_ref, b2_ref,
                         ln2w_ref, ln2b_ref,
                         fc1w_ref, fc1b_ref, fc2w_ref, fc2b_ref,
                         pmw_ref, pmb_ref, psw_ref, psb_ref,
                         o_ref, *, num_heads):
    bt, s, sd = states_ref.shape           # batch tile, seq, state_dim
    f = rgb_ref.shape[-1]                   # flattened image feature dim
    d = state_w_ref.shape[0]                # token_dim
    t = N_TOKENS * s                        # tokens per batch element
    rows = bt * t                           # folded matmul M
    num_layers = wqkv_ref.shape[0]
    dff = w1_ref.shape[1]
    dh = d // num_heads
    scale = 1.0 / math.sqrt(dh)
    ffn_chunk = 512 if (dff > 512 and dff % 512 == 0) else dff

    # ---- feature encoder: batch*seq rows folded into matmul M -------------
    st = _mm(states_ref[...].reshape(bt * s, sd), state_w_ref[...]) + state_b_ref[...]
    img = _mm(rgb_ref[...].reshape(bt * s, f), img_w_ref[...]) + img_b_ref[...]
    ego = _mm(ego_ref[...].reshape(bt * s, f), ego_w_ref[...]) + ego_b_ref[...]

    # ---- token assembly (slot-blocked per batch element) + PE -------------
    pe = pe_ref[...]                                           # (S, D) f32
    act_pe = jnp.broadcast_to(act_tok_ref[...], (s, d)) + pe
    parts = []
    for j in range(bt):
        r = slice(j * s, (j + 1) * s)
        parts += [st[r] + pe, img[r] + pe, ego[r] + pe, act_pe]
    x = jnp.concatenate(parts, axis=0)                         # (rows, D) f32

    # ---- transformer encoder (post-norm, relu FFN), all layers resident ---
    for l in range(num_layers):                                # unrolled
        qkv = _mm(x, wqkv_ref[l]) + bqkv_ref[l]                # (rows, 3D)
        q = qkv[:, 0:d]
        k = qkv[:, d:2 * d]
        v = qkv[:, 2 * d:3 * d]
        wo = wo_ref[l]

        # Per-sample, per-head attention; each head's context is folded
        # straight through the head's slice of the output projection.
        attn_parts = []
        for j in range(bt):
            rs = slice(j * t, (j + 1) * t)
            acc = jnp.zeros((t, d), jnp.float32)
            for h in range(num_heads):
                cs = slice(h * dh, (h + 1) * dh)
                sc = lax.dot_general(
                    q[rs, cs].astype(jnp.bfloat16),
                    k[rs, cs].astype(jnp.bfloat16),
                    dimension_numbers=(((1,), (1,)), ((), ())),
                    preferred_element_type=jnp.float32) * scale
                sc = sc - jnp.max(sc, axis=-1, keepdims=True)
                p = jnp.exp(sc)
                p = p * pl.reciprocal(jnp.sum(p, axis=-1, keepdims=True),
                                      approx=True)
                ctx = jnp.dot(p.astype(jnp.bfloat16),
                              v[rs, cs].astype(jnp.bfloat16),
                              preferred_element_type=jnp.float32)
                acc = acc + _mm(ctx, wo[:, cs])
            attn_parts.append(acc)
        attn = attn_parts[0] if bt == 1 else jnp.concatenate(attn_parts, axis=0)

        x = _layer_norm(x + attn + bo_ref[l], ln1w_ref[l], ln1b_ref[l])

        # FFN with the hidden dim chunked to bound the live intermediate.
        ff = jnp.zeros((rows, d), jnp.float32)
        for c0 in range(0, dff, ffn_chunk):
            h1 = jnp.maximum(
                _mm(x, w1_ref[l, c0:c0 + ffn_chunk, :])
                + b1_ref[l, :, c0:c0 + ffn_chunk], 0.0)
            ff = ff + _mm(h1, w2_ref[l, :, c0:c0 + ffn_chunk])
        x = _layer_norm(x + ff + b2_ref[l], ln2w_ref[l], ln2b_ref[l])

    # ---- action-token gather (last S rows of each batch block) + policy ---
    a_parts = [x[j * t + (N_TOKENS - 1) * s: j * t + N_TOKENS * s, :]
               for j in range(bt)]
    a_tok = a_parts[0] if bt == 1 else jnp.concatenate(a_parts, axis=0)
    hid = jnp.maximum(_mm(a_tok, fc1w_ref[...]) + fc1b_ref[...], 0.0)
    hid = jnp.maximum(_mm(hid, fc2w_ref[...]) + fc2b_ref[...], 0.0)
    mean = _mm(hid, pmw_ref[...]) + pmb_ref[...]
    std = jnp.exp(0.5 * (_mm(hid, psw_ref[...]) + psb_ref[...]))
    for j in range(bt):
        r = slice(j * s, (j + 1) * s)
        o_ref[j] = mean[r] + std[r] * eps_ref[j]


# ----------------------------------------------------------------------------
# Wrapper
# ----------------------------------------------------------------------------

def _pick_batch_tile(b, t_rows, target_rows=256):
    """Largest divisor of b with bt*t_rows <= target_rows (MXU M ~256 on
    v6e/v7x); keep >= 2 grid steps when b >= 2 so both v7x TCs stay busy."""
    best = 1
    for bt in range(1, b + 1):
        if b % bt or bt * t_rows > target_rows:
            continue
        if b >= 2 and b // bt < 2:
            continue
        best = bt
    return best


def pallas_clip_adapter_forward(states, rgb, ego, eps, params, *, num_heads):
    b, s, _ = states.shape
    a = params["pi_mean_w"].shape[0]
    bt = _pick_batch_tile(b, N_TOKENS * s)

    weights = [params["state_w"], params["state_b"],
               params["img_w"], params["img_b"],
               params["ego_w"], params["ego_b"],
               params["action_token"], params["pos_enc"],
               params["wqkv"], params["bqkv"], params["wo"], params["bo"],
               params["ln1_w"], params["ln1_b"],
               params["w1"], params["b1"], params["w2"], params["b2"],
               params["ln2_w"], params["ln2_b"],
               params["fc1_w"], params["fc1_b"],
               params["fc2_w"], params["fc2_b"],
               params["pi_mean_w"], params["pi_mean_b"],
               params["pi_std_w"], params["pi_std_b"]]

    def batch_spec(shape):
        nd = len(shape)
        return pl.BlockSpec((bt,) + tuple(shape[1:]),
                            lambda i, nd=nd: (i,) + (0,) * (nd - 1))

    def full_spec(arr):
        zeros = (0,) * arr.ndim
        return pl.BlockSpec(arr.shape, lambda i, zeros=zeros: zeros)

    in_specs = ([batch_spec(states.shape), batch_spec(rgb.shape),
                 batch_spec(ego.shape), batch_spec(eps.shape)]
                + [full_spec(w) for w in weights])

    return pl.pallas_call(
        functools.partial(_clip_adapter_kernel, num_heads=num_heads),
        grid=(b // bt,),
        out_shape=jax.ShapeDtypeStruct((b, s, a), jnp.float32),
        in_specs=in_specs,
        out_specs=pl.BlockSpec((bt, s, a), lambda i: (i, 0, 0)),
        compiler_params=pltpu.CompilerParams(
            dimension_semantics=("parallel",)),
    )(states, rgb, ego, eps, *weights)


# ----------------------------------------------------------------------------
# Parameter init, positional encoding, full forward
# ----------------------------------------------------------------------------

def sinusoidal_pos_encoding(max_len, d_model):
    position = jnp.arange(max_len, dtype=jnp.float32)[:, None]
    div_term = jnp.exp(jnp.arange(0, d_model, 2, dtype=jnp.float32)
                       * (-math.log(10000.0) / d_model))
    pe = jnp.zeros((max_len, d_model), jnp.float32)
    pe = pe.at[:, 0::2].set(jnp.sin(position * div_term))
    pe = pe.at[:, 1::2].set(jnp.cos(position * div_term))
    return pe


def _init_linear(key, dout, din, scale=0.05, w_dtype=jnp.bfloat16):
    kw, kb = jax.random.split(key)
    w = (scale * jax.random.normal(kw, (dout, din), jnp.float32)).astype(w_dtype)
    b = scale * jax.random.normal(kb, (1, dout), jnp.float32)
    return w, b


def init_params(key, *, token_dim=128, state_dim=8, action_dim=7,
                num_layers=2, sequence_length=5, dim_feedforward=2048,
                image_flat_dim=768):
    keys = iter(jax.random.split(key, 16 + 4 * num_layers))
    p = {}

    # TODO(synk): image encoders are flatten->Linear stand-ins (weights bf16).
    p["img_w"], p["img_b"] = _init_linear(next(keys), token_dim, image_flat_dim)
    p["ego_w"], p["ego_b"] = _init_linear(next(keys), token_dim, image_flat_dim)
    p["state_w"], p["state_b"] = _init_linear(next(keys), token_dim, state_dim)
    p["action_token"] = jax.random.uniform(next(keys), (1, token_dim),
                                           jnp.float32)

    # Per-timestep sinusoidal PE (S, D); broadcast over the 4 token slots in
    # the kernel, matching the reference's unsqueeze(0).unsqueeze(2).
    p["pos_enc"] = sinusoidal_pos_encoding(sequence_length, token_dim)

    wqkv, bqkv, wo, bo, w1, b1, w2, b2 = ([] for _ in range(8))
    for _ in range(num_layers):
        w_, b_ = _init_linear(next(keys), 3 * token_dim, token_dim)
        wqkv.append(w_); bqkv.append(b_)
        w_, b_ = _init_linear(next(keys), token_dim, token_dim)
        wo.append(w_); bo.append(b_)
        w_, b_ = _init_linear(next(keys), dim_feedforward, token_dim)
        w1.append(w_); b1.append(b_)
        w_, b_ = _init_linear(next(keys), token_dim, dim_feedforward)
        w2.append(w_); b2.append(b_)
    p["wqkv"] = jnp.stack(wqkv); p["bqkv"] = jnp.stack(bqkv)
    p["wo"] = jnp.stack(wo); p["bo"] = jnp.stack(bo)
    p["w1"] = jnp.stack(w1); p["b1"] = jnp.stack(b1)
    p["w2"] = jnp.stack(w2); p["b2"] = jnp.stack(b2)
    p["ln1_w"] = jnp.ones((num_layers, 1, token_dim), jnp.float32)
    p["ln1_b"] = jnp.zeros((num_layers, 1, token_dim), jnp.float32)
    p["ln2_w"] = jnp.ones((num_layers, 1, token_dim), jnp.float32)
    p["ln2_b"] = jnp.zeros((num_layers, 1, token_dim), jnp.float32)

    # Policy head.
    p["fc1_w"], p["fc1_b"] = _init_linear(next(keys), 128, token_dim)
    p["fc2_w"], p["fc2_b"] = _init_linear(next(keys), 32, 128)
    p["pi_mean_w"], p["pi_mean_b"] = _init_linear(next(keys), action_dim, 32)
    p["pi_std_w"], p["pi_std_b"] = _init_linear(next(keys), action_dim, 32)
    return p


def clip_adapter_transformer_forward(params, data, eps_key, *, num_heads=4):
    joint = data["joint_states"]
    grip = data["gripper_states"]
    b, s = joint.shape[:2]
    a = params["pi_mean_w"].shape[0]

    states = jnp.concatenate([joint, grip], axis=-1)            # (B, S, 8)
    rgb = data["image_rgb"].reshape(b, s, -1).astype(jnp.bfloat16)
    ego = data["image_ego"].reshape(b, s, -1).astype(jnp.bfloat16)

    # Reparameterization noise: reference uses torch.rand_like (uniform [0,1)).
    eps = jax.random.uniform(eps_key, (b, s, a), jnp.float32)

    return pallas_clip_adapter_forward(states, rgb, ego, eps, params,
                                       num_heads=num_heads)     # (B, S, A)


# ----------------------------------------------------------------------------
# Demo
# ----------------------------------------------------------------------------

if __name__ == "__main__":
    TOKEN_DIM = 128        # module default (lane-dense on TPU)
    STATE_DIM = 8          # joint(7) + gripper(1)
    ACTION_DIM = 7
    NUM_HEADS = 4
    NUM_LAYERS = 2
    SEQ = 5                # module default sequence_length
    DIM_FF = 2048          # nn.TransformerEncoderLayer default
    B, C, H, W = 2, 3, 16, 16

    root = jax.random.PRNGKey(0)
    k_param, k_j, k_g, k_rgb, k_ego, k_eps = jax.random.split(root, 6)

    params = init_params(
        k_param, token_dim=TOKEN_DIM, state_dim=STATE_DIM,
        action_dim=ACTION_DIM, num_layers=NUM_LAYERS,
        sequence_length=SEQ, dim_feedforward=DIM_FF,
        image_flat_dim=C * H * W)

    data = {
        "joint_states": jax.random.normal(k_j, (B, SEQ, 7), jnp.float32),
        "gripper_states": jax.random.normal(k_g, (B, SEQ, 1), jnp.float32),
        "image_rgb": jax.random.normal(k_rgb, (B, SEQ, C, H, W), jnp.float32),
        "image_ego": jax.random.normal(k_ego, (B, SEQ, C, H, W), jnp.float32),
    }

    fwd = jax.jit(functools.partial(clip_adapter_transformer_forward,
                                    num_heads=NUM_HEADS))
    action = fwd(params, data, k_eps)
    action = jax.block_until_ready(action)

    assert action.shape == (B, SEQ, ACTION_DIM), action.shape
    assert bool(jnp.all(jnp.isfinite(action)))
    print("KERNEL_OK")
</pallas_src>

<mosaic_0001>
module attributes {stable_mosaic.version = 11 : i64} {
  func.func @_clip_adapter_kernel(%arg0: i32, %arg1: memref<1x5x8xf32, #tpu.memory_space<vmem>>, %arg2: memref<1x5x768xbf16, #tpu.memory_space<vmem>>, %arg3: memref<1x5x768xbf16, #tpu.memory_space<vmem>>, %arg4: memref<1x5x7xf32, #tpu.memory_space<vmem>>, %arg5: memref<128x8xbf16, #tpu.memory_space<vmem>>, %arg6: memref<1x128xf32, #tpu.memory_space<vmem>>, %arg7: memref<128x768xbf16, #tpu.memory_space<vmem>>, %arg8: memref<1x128xf32, #tpu.memory_space<vmem>>, %arg9: memref<128x768xbf16, #tpu.memory_space<vmem>>, %arg10: memref<1x128xf32, #tpu.memory_space<vmem>>, %arg11: memref<1x128xf32, #tpu.memory_space<vmem>>, %arg12: memref<5x128xf32, #tpu.memory_space<vmem>>, %arg13: memref<2x384x128xbf16, #tpu.memory_space<vmem>>, %arg14: memref<2x1x384xf32, #tpu.memory_space<vmem>>, %arg15: memref<2x128x128xbf16, #tpu.memory_space<vmem>>, %arg16: memref<2x1x128xf32, #tpu.memory_space<vmem>>, %arg17: memref<2x1x128xf32, #tpu.memory_space<vmem>>, %arg18: memref<2x1x128xf32, #tpu.memory_space<vmem>>, %arg19: memref<2x2048x128xbf16, #tpu.memory_space<vmem>>, %arg20: memref<2x1x2048xf32, #tpu.memory_space<vmem>>, %arg21: memref<2x128x2048xbf16, #tpu.memory_space<vmem>>, %arg22: memref<2x1x128xf32, #tpu.memory_space<vmem>>, %arg23: memref<2x1x128xf32, #tpu.memory_space<vmem>>, %arg24: memref<2x1x128xf32, #tpu.memory_space<vmem>>, %arg25: memref<128x128xbf16, #tpu.memory_space<vmem>>, %arg26: memref<1x128xf32, #tpu.memory_space<vmem>>, %arg27: memref<32x128xbf16, #tpu.memory_space<vmem>>, %arg28: memref<1x32xf32, #tpu.memory_space<vmem>>, %arg29: memref<7x32xbf16, #tpu.memory_space<vmem>>, %arg30: memref<1x7xf32, #tpu.memory_space<vmem>>, %arg31: memref<7x32xbf16, #tpu.memory_space<vmem>>, %arg32: memref<1x7xf32, #tpu.memory_space<vmem>>, %arg33: memref<1x5x7xf32, #tpu.memory_space<vmem>>) attributes {dimension_semantics = [#tpu.dimension_semantics<parallel>], iteration_bounds = array<i64: 2>, scalar_prefetch = 0 : i64, scratch_operands = 0 : i64, tpu.core_type = #tpu.core_type<tc>, window_params = [{transform_indices = @transform_0, window_bounds = array<i64: 1, 5, 8>}, {transform_indices = @transform_1, window_bounds = array<i64: 1, 5, 768>}, {transform_indices = @transform_2, window_bounds = array<i64: 1, 5, 768>}, {transform_indices = @transform_3, window_bounds = array<i64: 1, 5, 7>}, {pipeline_mode = #tpu.pipeline_mode<synchronous>, transform_indices = @transform_4, window_bounds = array<i64: 128, 8>}, {pipeline_mode = #tpu.pipeline_mode<synchronous>, transform_indices = @transform_5, window_bounds = array<i64: 1, 128>}, {pipeline_mode = #tpu.pipeline_mode<synchronous>, transform_indices = @transform_6, window_bounds = array<i64: 128, 768>}, {pipeline_mode = #tpu.pipeline_mode<synchronous>, transform_indices = @transform_7, window_bounds = array<i64: 1, 128>}, {pipeline_mode = #tpu.pipeline_mode<synchronous>, transform_indices = @transform_8, window_bounds = array<i64: 128, 768>}, {pipeline_mode = #tpu.pipeline_mode<synchronous>, transform_indices = @transform_9, window_bounds = array<i64: 1, 128>}, {pipeline_mode = #tpu.pipeline_mode<synchronous>, transform_indices = @transform_10, window_bounds = array<i64: 1, 128>}, {pipeline_mode = #tpu.pipeline_mode<synchronous>, transform_indices = @transform_11, window_bounds = array<i64: 5, 128>}, {pipeline_mode = #tpu.pipeline_mode<synchronous>, transform_indices = @transform_12, window_bounds = array<i64: 2, 384, 128>}, {pipeline_mode = #tpu.pipeline_mode<synchronous>, transform_indices = @transform_13, window_bounds = array<i64: 2, 1, 384>}, {pipeline_mode = #tpu.pipeline_mode<synchronous>, transform_indices = @transform_14, window_bounds = array<i64: 2, 128, 128>}, {pipeline_mode = #tpu.pipeline_mode<synchronous>, transform_indices = @transform_15, window_bounds = array<i64: 2, 1, 128>}, {pipeline_mode = #tpu.pipeline_mode<synchronous>, transform_indices = @transform_16, window_bounds = array<i64: 2, 1, 128>}, {pipeline_mode = #tpu.pipeline_mode<synchronous>, transform_indices = @transform_17, window_bounds = array<i64: 2, 1, 128>}, {pipeline_mode = #tpu.pipeline_mode<synchronous>, transform_indices = @transform_18, window_bounds = array<i64: 2, 2048, 128>}, {pipeline_mode = #tpu.pipeline_mode<synchronous>, transform_indices = @transform_19, window_bounds = array<i64: 2, 1, 2048>}, {pipeline_mode = #tpu.pipeline_mode<synchronous>, transform_indices = @transform_20, window_bounds = array<i64: 2, 128, 2048>}, {pipeline_mode = #tpu.pipeline_mode<synchronous>, transform_indices = @transform_21, window_bounds = array<i64: 2, 1, 128>}, {pipeline_mode = #tpu.pipeline_mode<synchronous>, transform_indices = @transform_22, window_bounds = array<i64: 2, 1, 128>}, {pipeline_mode = #tpu.pipeline_mode<synchronous>, transform_indices = @transform_23, window_bounds = array<i64: 2, 1, 128>}, {pipeline_mode = #tpu.pipeline_mode<synchronous>, transform_indices = @transform_24, window_bounds = array<i64: 128, 128>}, {pipeline_mode = #tpu.pipeline_mode<synchronous>, transform_indices = @transform_25, window_bounds = array<i64: 1, 128>}, {pipeline_mode = #tpu.pipeline_mode<synchronous>, transform_indices = @transform_26, window_bounds = array<i64: 32, 128>}, {pipeline_mode = #tpu.pipeline_mode<synchronous>, transform_indices = @transform_27, window_bounds = array<i64: 1, 32>}, {pipeline_mode = #tpu.pipeline_mode<synchronous>, transform_indices = @transform_28, window_bounds = array<i64: 7, 32>}, {pipeline_mode = #tpu.pipeline_mode<synchronous>, transform_indices = @transform_29, window_bounds = array<i64: 1, 7>}, {pipeline_mode = #tpu.pipeline_mode<synchronous>, transform_indices = @transform_30, window_bounds = array<i64: 7, 32>}, {pipeline_mode = #tpu.pipeline_mode<synchronous>, transform_indices = @transform_31, window_bounds = array<i64: 1, 7>}, {transform_indices = @transform_32, window_bounds = array<i64: 1, 5, 7>}]} {
    %c0 = arith.constant 0 : index
    %c0_0 = arith.constant 0 : index
    %c0_1 = arith.constant 0 : index
    %0 = vector.load %arg1[%c0, %c0_0, %c0_1] : memref<1x5x8xf32, #tpu.memory_space<vmem>>, vector<1x5x8xf32>
    %1 = vector.shape_cast %0 : vector<1x5x8xf32> to vector<5x8xf32>
    %c0_2 = arith.constant 0 : index
    %c0_3 = arith.constant 0 : index
    %2 = vector.load %arg5[%c0_2, %c0_3] : memref<128x8xbf16, #tpu.memory_space<vmem>>, vector<128x8xbf16>
    %3 = arith.truncf %1 : vector<5x8xf32> to vector<5x8xbf16>
    %cst = arith.constant dense<0.000000e+00> : vector<5x128xf32>
    %4 = tpu.matmul %3, %2, %cst {dimension_numbers = #tpu.dot_dimension_numbers<[1], [1], [0], [0], [0, 0, 1, 0], [], []>} : vector<5x8xbf16>, vector<128x8xbf16>, vector<5x128xf32> -> vector<5x128xf32>
    %c0_4 = arith.constant 0 : index
    %c0_5 = arith.constant 0 : index
    %5 = vector.load %arg6[%c0_4, %c0_5] : memref<1x128xf32, #tpu.memory_space<vmem>>, vector<1x128xf32>
    %6 = vector.broadcast %5 : vector<1x128xf32> to vector<5x128xf32>
    %7 = arith.addf %4, %6 : vector<5x128xf32>
    %c0_6 = arith.constant 0 : index
    %c0_7 = arith.constant 0 : index
    %c0_8 = arith.constant 0 : index
    %8 = vector.load %arg2[%c0_6, %c0_7, %c0_8] : memref<1x5x768xbf16, #tpu.memory_space<vmem>>, vector<1x5x768xbf16>
    %9 = vector.shape_cast %8 : vector<1x5x768xbf16> to vector<5x768xbf16>
    %c0_9 = arith.constant 0 : index
    %c0_10 = arith.constant 0 : index
    %10 = vector.load %arg7[%c0_9, %c0_10] : memref<128x768xbf16, #tpu.memory_space<vmem>>, vector<128x768xbf16>
    %cst_11 = arith.constant dense<0.000000e+00> : vector<5x128xf32>
    %11 = tpu.matmul %9, %10, %cst_11 {dimension_numbers = #tpu.dot_dimension_numbers<[1], [1], [0], [0], [0, 0, 1, 0], [], []>} : vector<5x768xbf16>, vector<128x768xbf16>, vector<5x128xf32> -> vector<5x128xf32>
    %c0_12 = arith.constant 0 : index
    %c0_13 = arith.constant 0 : index
    %12 = vector.load %arg8[%c0_12, %c0_13] : memref<1x128xf32, #tpu.memory_space<vmem>>, vector<1x128xf32>
    %13 = vector.broadcast %12 : vector<1x128xf32> to vector<5x128xf32>
    %14 = arith.addf %11, %13 : vector<5x128xf32>
    %c0_14 = arith.constant 0 : index
    %c0_15 = arith.constant 0 : index
    %c0_16 = arith.constant 0 : index
    %15 = vector.load %arg3[%c0_14, %c0_15, %c0_16] : memref<1x5x768xbf16, #tpu.memory_space<vmem>>, vector<1x5x768xbf16>
    %16 = vector.shape_cast %15 : vector<1x5x768xbf16> to vector<5x768xbf16>
    %c0_17 = arith.constant 0 : index
    %c0_18 = arith.constant 0 : index
    %17 = vector.load %arg9[%c0_17, %c0_18] : memref<128x768xbf16, #tpu.memory_space<vmem>>, vector<128x768xbf16>
    %cst_19 = arith.constant dense<0.000000e+00> : vector<5x128xf32>
    %18 = tpu.matmul %16, %17, %cst_19 {dimension_numbers = #tpu.dot_dimension_numbers<[1], [1], [0], [0], [0, 0, 1, 0], [], []>} : vector<5x768xbf16>, vector<128x768xbf16>, vector<5x128xf32> -> vector<5x128xf32>
    %c0_20 = arith.constant 0 : index
    %c0_21 = arith.constant 0 : index
    %19 = vector.load %arg10[%c0_20, %c0_21] : memref<1x128xf32, #tpu.memory_space<vmem>>, vector<1x128xf32>
    %20 = vector.broadcast %19 : vector<1x128xf32> to vector<5x128xf32>
    %21 = arith.addf %18, %20 : vector<5x128xf32>
    %c0_22 = arith.constant 0 : index
    %c0_23 = arith.constant 0 : index
    %22 = vector.load %arg12[%c0_22, %c0_23] : memref<5x128xf32, #tpu.memory_space<vmem>>, vector<5x128xf32>
    %c0_24 = arith.constant 0 : index
    %c0_25 = arith.constant 0 : index
    %23 = vector.load %arg11[%c0_24, %c0_25] : memref<1x128xf32, #tpu.memory_space<vmem>>, vector<1x128xf32>
    %24 = vector.shape_cast %23 : vector<1x128xf32> to vector<1x128xf32>
    %25 = vector.broadcast %24 : vector<1x128xf32> to vector<5x128xf32>
    %26 = arith.addf %25, %22 : vector<5x128xf32>
    %27 = arith.addf %7, %22 : vector<5x128xf32>
    %28 = arith.addf %14, %22 : vector<5x128xf32>
    %29 = arith.addf %21, %22 : vector<5x128xf32>
    %30 = tpu.concatenate %27, %28, %29, %26 in 0 : vector<5x128xf32>, vector<5x128xf32>, vector<5x128xf32>, vector<5x128xf32> -> vector<20x128xf32>
    %c0_26 = arith.constant 0 : index
    %c0_27 = arith.constant 0 : index
    %c0_28 = arith.constant 0 : index
    %31 = vector.load %arg13[%c0_26, %c0_27, %c0_28] : memref<2x384x128xbf16, #tpu.memory_space<vmem>>, vector<1x384x128xbf16>
    %32 = vector.shape_cast %31 : vector<1x384x128xbf16> to vector<384x128xbf16>
    %33 = arith.truncf %30 : vector<20x128xf32> to vector<20x128xbf16>
    %cst_29 = arith.constant dense<0.000000e+00> : vector<20x384xf32>
    %34 = tpu.matmul %33, %32, %cst_29 {dimension_numbers = #tpu.dot_dimension_numbers<[1], [1], [0], [0], [0, 0, 1, 0], [], []>} : vector<20x128xbf16>, vector<384x128xbf16>, vector<20x384xf32> -> vector<20x384xf32>
    %c0_30 = arith.constant 0 : index
    %c0_31 = arith.constant 0 : index
    %c0_32 = arith.constant 0 : index
    %35 = vector.load %arg14[%c0_30, %c0_31, %c0_32] : memref<2x1x384xf32, #tpu.memory_space<vmem>>, vector<1x1x384xf32>
    %36 = vector.shape_cast %35 : vector<1x1x384xf32> to vector<1x384xf32>
    %37 = vector.broadcast %36 : vector<1x384xf32> to vector<20x384xf32>
    %38 = arith.addf %34, %37 : vector<20x384xf32>
    %39 = vector.extract_strided_slice %38 {offsets = [0, 0], sizes = [20, 128], strides = [1, 1]} : vector<20x384xf32> to vector<20x128xf32>
    %40 = vector.extract_strided_slice %38 {offsets = [0, 128], sizes = [20, 128], strides = [1, 1]} : vector<20x384xf32> to vector<20x128xf32>
    %41 = vector.extract_strided_slice %38 {offsets = [0, 256], sizes = [20, 128], strides = [1, 1]} : vector<20x384xf32> to vector<20x128xf32>
    %c0_33 = arith.constant 0 : index
    %c0_34 = arith.constant 0 : index
    %c0_35 = arith.constant 0 : index
    %42 = vector.load %arg15[%c0_33, %c0_34, %c0_35] : memref<2x128x128xbf16, #tpu.memory_space<vmem>>, vector<1x128x128xbf16>
    %43 = vector.shape_cast %42 : vector<1x128x128xbf16> to vector<128x128xbf16>
    %cst_36 = arith.constant 0.000000e+00 : f32
    %44 = vector.broadcast %cst_36 : f32 to vector<20x128xf32>
    %45 = vector.extract_strided_slice %39 {offsets = [0, 0], sizes = [20, 32], strides = [1, 1]} : vector<20x128xf32> to vector<20x32xf32>
    %46 = arith.truncf %45 : vector<20x32xf32> to vector<20x32xbf16>
    %47 = vector.extract_strided_slice %40 {offsets = [0, 0], sizes = [20, 32], strides = [1, 1]} : vector<20x128xf32> to vector<20x32xf32>
    %48 = arith.truncf %47 : vector<20x32xf32> to vector<20x32xbf16>
    %cst_37 = arith.constant dense<0.000000e+00> : vector<20x20xf32>
    %49 = tpu.matmul %46, %48, %cst_37 {dimension_numbers = #tpu.dot_dimension_numbers<[1], [1], [0], [0], [0, 0, 1, 0], [], []>} : vector<20x32xbf16>, vector<20x32xbf16>, vector<20x20xf32> -> vector<20x20xf32>
    %cst_38 = arith.constant 0.176776692 : f32
    %50 = vector.broadcast %cst_38 : f32 to vector<20x20xf32>
    %51 = arith.mulf %49, %50 : vector<20x20xf32>
    %cst_39 = arith.constant dense<0xFF800000> : vector<20xf32>
    %52 = vector.multi_reduction <maximumf>, %51, %cst_39 [1] : vector<20x20xf32> to vector<20xf32>
    %53 = vector.shape_cast %52 : vector<20xf32> to vector<20x1xf32>
    %54 = vector.broadcast %53 : vector<20x1xf32> to vector<20x20xf32>
    %55 = arith.subf %51, %54 : vector<20x20xf32>
    %56 = math.exp %55 : vector<20x20xf32>
    %cst_40 = arith.constant dense<0.000000e+00> : vector<20xf32>
    %57 = vector.multi_reduction <add>, %56, %cst_40 [1] : vector<20x20xf32> to vector<20xf32>
    %58 = vector.shape_cast %57 : vector<20xf32> to vector<20x1xf32>
    %59 = tpu.reciprocal %58 {approx = true} : vector<20x1xf32> -> vector<20x1xf32>
    %60 = vector.broadcast %59 : vector<20x1xf32> to vector<20x20xf32>
    %61 = arith.mulf %56, %60 : vector<20x20xf32>
    %62 = arith.truncf %61 : vector<20x20xf32> to vector<20x20xbf16>
    %63 = vector.extract_strided_slice %41 {offsets = [0, 0], sizes = [20, 32], strides = [1, 1]} : vector<20x128xf32> to vector<20x32xf32>
    %64 = arith.truncf %63 : vector<20x32xf32> to vector<20x32xbf16>
    %cst_41 = arith.constant dense<0.000000e+00> : vector<20x32xf32>
    %65 = tpu.matmul %62, %64, %cst_41 {dimension_numbers = #tpu.dot_dimension_numbers<[1], [0], [0], [1], [0, 0, 1, 1], [], []>} : vector<20x20xbf16>, vector<20x32xbf16>, vector<20x32xf32> -> vector<20x32xf32>
    %66 = vector.extract_strided_slice %43 {offsets = [0, 0], sizes = [128, 32], strides = [1, 1]} : vector<128x128xbf16> to vector<128x32xbf16>
    %67 = arith.truncf %65 : vector<20x32xf32> to vector<20x32xbf16>
    %cst_42 = arith.constant dense<0.000000e+00> : vector<20x128xf32>
    %68 = tpu.matmul %67, %66, %cst_42 {dimension_numbers = #tpu.dot_dimension_numbers<[1], [1], [0], [0], [0, 0, 1, 0], [], []>} : vector<20x32xbf16>, vector<128x32xbf16>, vector<20x128xf32> -> vector<20x128xf32>
    %69 = arith.addf %44, %68 : vector<20x128xf32>
    %70 = vector.extract_strided_slice %39 {offsets = [0, 32], sizes = [20, 32], strides = [1, 1]} : vector<20x128xf32> to vector<20x32xf32>
    %71 = arith.truncf %70 : vector<20x32xf32> to vector<20x32xbf16>
    %72 = vector.extract_strided_slice %40 {offsets = [0, 32], sizes = [20, 32], strides = [1, 1]} : vector<20x128xf32> to vector<20x32xf32>
    %73 = arith.truncf %72 : vector<20x32xf32> to vector<20x32xbf16>
    %cst_43 = arith.constant dense<0.000000e+00> : vector<20x20xf32>
    %74 = tpu.matmul %71, %73, %cst_43 {dimension_numbers = #tpu.dot_dimension_numbers<[1], [1], [0], [0], [0, 0, 1, 0], [], []>} : vector<20x32xbf16>, vector<20x32xbf16>, vector<20x20xf32> -> vector<20x20xf32>
    %cst_44 = arith.constant 0.176776692 : f32
    %75 = vector.broadcast %cst_44 : f32 to vector<20x20xf32>
    %76 = arith.mulf %74, %75 : vector<20x20xf32>
    %cst_45 = arith.constant dense<0xFF800000> : vector<20xf32>
    %77 = vector.multi_reduction <maximumf>, %76, %cst_45 [1] : vector<20x20xf32> to vector<20xf32>
    %78 = vector.shape_cast %77 : vector<20xf32> to vector<20x1xf32>
    %79 = vector.broadcast %78 : vector<20x1xf32> to vector<20x20xf32>
    %80 = arith.subf %76, %79 : vector<20x20xf32>
    %81 = math.exp %80 : vector<20x20xf32>
    %cst_46 = arith.constant dense<0.000000e+00> : vector<20xf32>
    %82 = vector.multi_reduction <add>, %81, %cst_46 [1] : vector<20x20xf32> to vector<20xf32>
    %83 = vector.shape_cast %82 : vector<20xf32> to vector<20x1xf32>
    %84 = tpu.reciprocal %83 {approx = true} : vector<20x1xf32> -> vector<20x1xf32>
    %85 = vector.broadcast %84 : vector<20x1xf32> to vector<20x20xf32>
    %86 = arith.mulf %81, %85 : vector<20x20xf32>
    %87 = arith.truncf %86 : vector<20x20xf32> to vector<20x20xbf16>
    %88 = vector.extract_strided_slice %41 {offsets = [0, 32], sizes = [20, 32], strides = [1, 1]} : vector<20x128xf32> to vector<20x32xf32>
    %89 = arith.truncf %88 : vector<20x32xf32> to vector<20x32xbf16>
    %cst_47 = arith.constant dense<0.000000e+00> : vector<20x32xf32>
    %90 = tpu.matmul %87, %89, %cst_47 {dimension_numbers = #tpu.dot_dimension_numbers<[1], [0], [0], [1], [0, 0, 1, 1], [], []>} : vector<20x20xbf16>, vector<20x32xbf16>, vector<20x32xf32> -> vector<20x32xf32>
    %91 = vector.extract_strided_slice %43 {offsets = [0, 32], sizes = [128, 32], strides = [1, 1]} : vector<128x128xbf16> to vector<128x32xbf16>
    %92 = arith.truncf %90 : vector<20x32xf32> to vector<20x32xbf16>
    %cst_48 = arith.constant dense<0.000000e+00> : vector<20x128xf32>
    %93 = tpu.matmul %92, %91, %cst_48 {dimension_numbers = #tpu.dot_dimension_numbers<[1], [1], [0], [0], [0, 0, 1, 0], [], []>} : vector<20x32xbf16>, vector<128x32xbf16>, vector<20x128xf32> -> vector<20x128xf32>
    %94 = arith.addf %69, %93 : vector<20x128xf32>
    %95 = vector.extract_strided_slice %39 {offsets = [0, 64], sizes = [20, 32], strides = [1, 1]} : vector<20x128xf32> to vector<20x32xf32>
    %96 = arith.truncf %95 : vector<20x32xf32> to vector<20x32xbf16>
    %97 = vector.extract_strided_slice %40 {offsets = [0, 64], sizes = [20, 32], strides = [1, 1]} : vector<20x128xf32> to vector<20x32xf32>
    %98 = arith.truncf %97 : vector<20x32xf32> to vector<20x32xbf16>
    %cst_49 = arith.constant dense<0.000000e+00> : vector<20x20xf32>
    %99 = tpu.matmul %96, %98, %cst_49 {dimension_numbers = #tpu.dot_dimension_numbers<[1], [1], [0], [0], [0, 0, 1, 0], [], []>} : vector<20x32xbf16>, vector<20x32xbf16>, vector<20x20xf32> -> vector<20x20xf32>
    %cst_50 = arith.constant 0.176776692 : f32
    %100 = vector.broadcast %cst_50 : f32 to vector<20x20xf32>
    %101 = arith.mulf %99, %100 : vector<20x20xf32>
    %cst_51 = arith.constant dense<0xFF800000> : vector<20xf32>
    %102 = vector.multi_reduction <maximumf>, %101, %cst_51 [1] : vector<20x20xf32> to vector<20xf32>
    %103 = vector.shape_cast %102 : vector<20xf32> to vector<20x1xf32>
    %104 = vector.broadcast %103 : vector<20x1xf32> to vector<20x20xf32>
    %105 = arith.subf %101, %104 : vector<20x20xf32>
    %106 = math.exp %105 : vector<20x20xf32>
    %cst_52 = arith.constant dense<0.000000e+00> : vector<20xf32>
    %107 = vector.multi_reduction <add>, %106, %cst_52 [1] : vector<20x20xf32> to vector<20xf32>
    %108 = vector.shape_cast %107 : vector<20xf32> to vector<20x1xf32>
    %109 = tpu.reciprocal %108 {approx = true} : vector<20x1xf32> -> vector<20x1xf32>
    %110 = vector.broadcast %109 : vector<20x1xf32> to vector<20x20xf32>
    %111 = arith.mulf %106, %110 : vector<20x20xf32>
    %112 = arith.truncf %111 : vector<20x20xf32> to vector<20x20xbf16>
    %113 = vector.extract_strided_slice %41 {offsets = [0, 64], sizes = [20, 32], strides = [1, 1]} : vector<20x128xf32> to vector<20x32xf32>
    %114 = arith.truncf %113 : vector<20x32xf32> to vector<20x32xbf16>
    %cst_53 = arith.constant dense<0.000000e+00> : vector<20x32xf32>
    %115 = tpu.matmul %112, %114, %cst_53 {dimension_numbers = #tpu.dot_dimension_numbers<[1], [0], [0], [1], [0, 0, 1, 1], [], []>} : vector<20x20xbf16>, vector<20x32xbf16>, vector<20x32xf32> -> vector<20x32xf32>
    %116 = vector.extract_strided_slice %43 {offsets = [0, 64], sizes = [128, 32], strides = [1, 1]} : vector<128x128xbf16> to vector<128x32xbf16>
    %117 = arith.truncf %115 : vector<20x32xf32> to vector<20x32xbf16>
    %cst_54 = arith.constant dense<0.000000e+00> : vector<20x128xf32>
    %118 = tpu.matmul %117, %116, %cst_54 {dimension_numbers = #tpu.dot_dimension_numbers<[1], [1], [0], [0], [0, 0, 1, 0], [], []>} : vector<20x32xbf16>, vector<128x32xbf16>, vector<20x128xf32> -> vector<20x128xf32>
    %119 = arith.addf %94, %118 : vector<20x128xf32>
    %120 = vector.extract_strided_slice %39 {offsets = [0, 96], sizes = [20, 32], strides = [1, 1]} : vector<20x128xf32> to vector<20x32xf32>
    %121 = arith.truncf %120 : vector<20x32xf32> to vector<20x32xbf16>
    %122 = vector.extract_strided_slice %40 {offsets = [0, 96], sizes = [20, 32], strides = [1, 1]} : vector<20x128xf32> to vector<20x32xf32>
    %123 = arith.truncf %122 : vector<20x32xf32> to vector<20x32xbf16>
    %cst_55 = arith.constant dense<0.000000e+00> : vector<20x20xf32>
    %124 = tpu.matmul %121, %123, %cst_55 {dimension_numbers = #tpu.dot_dimension_numbers<[1], [1], [0], [0], [0, 0, 1, 0], [], []>} : vector<20x32xbf16>, vector<20x32xbf16>, vector<20x20xf32> -> vector<20x20xf32>
    %cst_56 = arith.constant 0.176776692 : f32
    %125 = vector.broadcast %cst_56 : f32 to vector<20x20xf32>
    %126 = arith.mulf %124, %125 : vector<20x20xf32>
    %cst_57 = arith.constant dense<0xFF800000> : vector<20xf32>
    %127 = vector.multi_reduction <maximumf>, %126, %cst_57 [1] : vector<20x20xf32> to vector<20xf32>
    %128 = vector.shape_cast %127 : vector<20xf32> to vector<20x1xf32>
    %129 = vector.broadcast %128 : vector<20x1xf32> to vector<20x20xf32>
    %130 = arith.subf %126, %129 : vector<20x20xf32>
    %131 = math.exp %130 : vector<20x20xf32>
    %cst_58 = arith.constant dense<0.000000e+00> : vector<20xf32>
    %132 = vector.multi_reduction <add>, %131, %cst_58 [1] : vector<20x20xf32> to vector<20xf32>
    %133 = vector.shape_cast %132 : vector<20xf32> to vector<20x1xf32>
    %134 = tpu.reciprocal %133 {approx = true} : vector<20x1xf32> -> vector<20x1xf32>
    %135 = vector.broadcast %134 : vector<20x1xf32> to vector<20x20xf32>
    %136 = arith.mulf %131, %135 : vector<20x20xf32>
    %137 = arith.truncf %136 : vector<20x20xf32> to vector<20x20xbf16>
    %138 = vector.extract_strided_slice %41 {offsets = [0, 96], sizes = [20, 32], strides = [1, 1]} : vector<20x128xf32> to vector<20x32xf32>
    %139 = arith.truncf %138 : vector<20x32xf32> to vector<20x32xbf16>
    %cst_59 = arith.constant dense<0.000000e+00> : vector<20x32xf32>
    %140 = tpu.matmul %137, %139, %cst_59 {dimension_numbers = #tpu.dot_dimension_numbers<[1], [0], [0], [1], [0, 0, 1, 1], [], []>} : vector<20x20xbf16>, vector<20x32xbf16>, vector<20x32xf32> -> vector<20x32xf32>
    %141 = vector.extract_strided_slice %43 {offsets = [0, 96], sizes = [128, 32], strides = [1, 1]} : vector<128x128xbf16> to vector<128x32xbf16>
    %142 = arith.truncf %140 : vector<20x32xf32> to vector<20x32xbf16>
    %cst_60 = arith.constant dense<0.000000e+00> : vector<20x128xf32>
    %143 = tpu.matmul %142, %141, %cst_60 {dimension_numbers = #tpu.dot_dimension_numbers<[1], [1], [0], [0], [0, 0, 1, 0], [], []>} : vector<20x32xbf16>, vector<128x32xbf16>, vector<20x128xf32> -> vector<20x128xf32>
    %144 = arith.addf %119, %143 : vector<20x128xf32>
    %145 = arith.addf %30, %144 : vector<20x128xf32>
    %c0_61 = arith.constant 0 : index
    %c0_62 = arith.constant 0 : index
    %c0_63 = arith.constant 0 : index
    %146 = vector.load %arg16[%c0_61, %c0_62, %c0_63] : memref<2x1x128xf32, #tpu.memory_space<vmem>>, vector<1x1x128xf32>
    %147 = vector.shape_cast %146 : vector<1x1x128xf32> to vector<1x128xf32>
    %148 = vector.broadcast %147 : vector<1x128xf32> to vector<20x128xf32>
    %149 = arith.addf %145, %148 : vector<20x128xf32>
    %c0_64 = arith.constant 0 : index
    %c0_65 = arith.constant 0 : index
    %c0_66 = arith.constant 0 : index
    %150 = vector.load %arg17[%c0_64, %c0_65, %c0_66] : memref<2x1x128xf32, #tpu.memory_space<vmem>>, vector<1x1x128xf32>
    %151 = vector.shape_cast %150 : vector<1x1x128xf32> to vector<1x128xf32>
    %c0_67 = arith.constant 0 : index
    %c0_68 = arith.constant 0 : index
    %c0_69 = arith.constant 0 : index
    %152 = vector.load %arg18[%c0_67, %c0_68, %c0_69] : memref<2x1x128xf32, #tpu.memory_space<vmem>>, vector<1x1x128xf32>
    %153 = vector.shape_cast %152 : vector<1x1x128xf32> to vector<1x128xf32>
    %cst_70 = arith.constant dense<0.000000e+00> : vector<20xf32>
    %154 = vector.multi_reduction <add>, %149, %cst_70 [1] : vector<20x128xf32> to vector<20xf32>
    %155 = vector.shape_cast %154 : vector<20xf32> to vector<20x1xf32>
    %cst_71 = arith.constant 1.280000e+02 : f32
    %156 = vector.broadcast %cst_71 : f32 to vector<20x1xf32>
    %157 = arith.divf %155, %156 : vector<20x1xf32>
    %158 = vector.broadcast %157 : vector<20x1xf32> to vector<20x128xf32>
    %159 = arith.subf %149, %158 : vector<20x128xf32>
    %160 = arith.mulf %159, %159 : vector<20x128xf32>
    %cst_72 = arith.constant dense<0.000000e+00> : vector<20xf32>
    %161 = vector.multi_reduction <add>, %160, %cst_72 [1] : vector<20x128xf32> to vector<20xf32>
    %162 = vector.shape_cast %161 : vector<20xf32> to vector<20x1xf32>
    %cst_73 = arith.constant 1.280000e+02 : f32
    %163 = vector.broadcast %cst_73 : f32 to vector<20x1xf32>
    %164 = arith.divf %162, %163 : vector<20x1xf32>
    %165 = vector.broadcast %157 : vector<20x1xf32> to vector<20x128xf32>
    %166 = arith.subf %149, %165 : vector<20x128xf32>
    %cst_74 = arith.constant 9.99999974E-6 : f32
    %167 = vector.broadcast %cst_74 : f32 to vector<20x1xf32>
    %168 = arith.addf %164, %167 : vector<20x1xf32>
    %169 = math.rsqrt %168 : vector<20x1xf32>
    %170 = vector.broadcast %169 : vector<20x1xf32> to vector<20x128xf32>
    %171 = arith.mulf %166, %170 : vector<20x128xf32>
    %172 = vector.broadcast %151 : vector<1x128xf32> to vector<20x128xf32>
    %173 = arith.mulf %171, %172 : vector<20x128xf32>
    %174 = vector.broadcast %153 : vector<1x128xf32> to vector<20x128xf32>
    %175 = arith.addf %173, %174 : vector<20x128xf32>
    %cst_75 = arith.constant 0.000000e+00 : f32
    %176 = vector.broadcast %cst_75 : f32 to vector<20x128xf32>
    %c0_76 = arith.constant 0 : index
    %c0_77 = arith.constant 0 : index
    %c0_78 = arith.constant 0 : index
    %177 = vector.load %arg19[%c0_76, %c0_77, %c0_78] : memref<2x2048x128xbf16, #tpu.memory_space<vmem>>, vector<1x512x128xbf16>
    %178 = vector.shape_cast %177 : vector<1x512x128xbf16> to vector<512x128xbf16>
    %179 = arith.truncf %175 : vector<20x128xf32> to vector<20x128xbf16>
    %cst_79 = arith.constant dense<0.000000e+00> : vector<20x512xf32>
    %180 = tpu.matmul %179, %178, %cst_79 {dimension_numbers = #tpu.dot_dimension_numbers<[1], [1], [0], [0], [0, 0, 1, 0], [], []>} : vector<20x128xbf16>, vector<512x128xbf16>, vector<20x512xf32> -> vector<20x512xf32>
    %c0_80 = arith.constant 0 : index
    %c0_81 = arith.constant 0 : index
    %c0_82 = arith.constant 0 : index
    %181 = vector.load %arg20[%c0_80, %c0_81, %c0_82] : memref<2x1x2048xf32, #tpu.memory_space<vmem>>, vector<1x1x512xf32>
    %182 = vector.shape_cast %181 : vector<1x1x512xf32> to vector<1x512xf32>
    %183 = vector.broadcast %182 : vector<1x512xf32> to vector<20x512xf32>
    %184 = arith.addf %180, %183 : vector<20x512xf32>
    %cst_83 = arith.constant 0.000000e+00 : f32
    %185 = vector.broadcast %cst_83 : f32 to vector<20x512xf32>
    %186 = arith.maximumf %184, %185 : vector<20x512xf32>
    %c0_84 = arith.constant 0 : index
    %c0_85 = arith.constant 0 : index
    %c0_86 = arith.constant 0 : index
    %187 = vector.load %arg21[%c0_84, %c0_85, %c0_86] : memref<2x128x2048xbf16, #tpu.memory_space<vmem>>, vector<1x128x512xbf16>
    %188 = vector.shape_cast %187 : vector<1x128x512xbf16> to vector<128x512xbf16>
    %189 = arith.truncf %186 : vector<20x512xf32> to vector<20x512xbf16>
    %cst_87 = arith.constant dense<0.000000e+00> : vector<20x128xf32>
    %190 = tpu.matmul %189, %188, %cst_87 {dimension_numbers = #tpu.dot_dimension_numbers<[1], [1], [0], [0], [0, 0, 1, 0], [], []>} : vector<20x512xbf16>, vector<128x512xbf16>, vector<20x128xf32> -> vector<20x128xf32>
    %191 = arith.addf %176, %190 : vector<20x128xf32>
    %c0_88 = arith.constant 0 : index
    %c512 = arith.constant 512 : index
    %c0_89 = arith.constant 0 : index
    %192 = vector.load %arg19[%c0_88, %c512, %c0_89] : memref<2x2048x128xbf16, #tpu.memory_space<vmem>>, vector<1x512x128xbf16>
    %193 = vector.shape_cast %192 : vector<1x512x128xbf16> to vector<512x128xbf16>
    %194 = arith.truncf %175 : vector<20x128xf32> to vector<20x128xbf16>
    %cst_90 = arith.constant dense<0.000000e+00> : vector<20x512xf32>
    %195 = tpu.matmul %194, %193, %cst_90 {dimension_numbers = #tpu.dot_dimension_numbers<[1], [1], [0], [0], [0, 0, 1, 0], [], []>} : vector<20x128xbf16>, vector<512x128xbf16>, vector<20x512xf32> -> vector<20x512xf32>
    %c0_91 = arith.constant 0 : index
    %c0_92 = arith.constant 0 : index
    %c512_93 = arith.constant 512 : index
    %196 = vector.load %arg20[%c0_91, %c0_92, %c512_93] : memref<2x1x2048xf32, #tpu.memory_space<vmem>>, vector<1x1x512xf32>
    %197 = vector.shape_cast %196 : vector<1x1x512xf32> to vector<1x512xf32>
    %198 = vector.broadcast %197 : vector<1x512xf32> to vector<20x512xf32>
    %199 = arith.addf %195, %198 : vector<20x512xf32>
    %cst_94 = arith.constant 0.000000e+00 : f32
    %200 = vector.broadcast %cst_94 : f32 to vector<20x512xf32>
    %201 = arith.maximumf %199, %200 : vector<20x512xf32>
    %c0_95 = arith.constant 0 : index
    %c0_96 = arith.constant 0 : index
    %c512_97 = arith.constant 512 : index
    %202 = vector.load %arg21[%c0_95, %c0_96, %c512_97] : memref<2x128x2048xbf16, #tpu.memory_space<vmem>>, vector<1x128x512xbf16>
    %203 = vector.shape_cast %202 : vector<1x128x512xbf16> to vector<128x512xbf16>
    %204 = arith.truncf %201 : vector<20x512xf32> to vector<20x512xbf16>
    %cst_98 = arith.constant dense<0.000000e+00> : vector<20x128xf32>
    %205 = tpu.matmul %204, %203, %cst_98 {dimension_numbers = #tpu.dot_dimension_numbers<[1], [1], [0], [0], [0, 0, 1, 0], [], []>} : vector<20x512xbf16>, vector<128x512xbf16>, vector<20x128xf32> -> vector<20x128xf32>
    %206 = arith.addf %191, %205 : vector<20x128xf32>
    %c0_99 = arith.constant 0 : index
    %c1024 = arith.constant 1024 : index
    %c0_100 = arith.constant 0 : index
    %207 = vector.load %arg19[%c0_99, %c1024, %c0_100] : memref<2x2048x128xbf16, #tpu.memory_space<vmem>>, vector<1x512x128xbf16>
    %208 = vector.shape_cast %207 : vector<1x512x128xbf16> to vector<512x128xbf16>
    %209 = arith.truncf %175 : vector<20x128xf32> to vector<20x128xbf16>
    %cst_101 = arith.constant dense<0.000000e+00> : vector<20x512xf32>
    %210 = tpu.matmul %209, %208, %cst_101 {dimension_numbers = #tpu.dot_dimension_numbers<[1], [1], [0], [0], [0, 0, 1, 0], [], []>} : vector<20x128xbf16>, vector<512x128xbf16>, vector<20x512xf32> -> vector<20x512xf32>
    %c0_102 = arith.constant 0 : index
    %c0_103 = arith.constant 0 : index
    %c1024_104 = arith.constant 1024 : index
    %211 = vector.load %arg20[%c0_102, %c0_103, %c1024_104] : memref<2x1x2048xf32, #tpu.memory_space<vmem>>, vector<1x1x512xf32>
    %212 = vector.shape_cast %211 : vector<1x1x512xf32> to vector<1x512xf32>
    %213 = vector.broadcast %212 : vector<1x512xf32> to vector<20x512xf32>
    %214 = arith.addf %210, %213 : vector<20x512xf32>
    %cst_105 = arith.constant 0.000000e+00 : f32
    %215 = vector.broadcast %cst_105 : f32 to vector<20x512xf32>
    %216 = arith.maximumf %214, %215 : vector<20x512xf32>
    %c0_106 = arith.constant 0 : index
    %c0_107 = arith.constant 0 : index
    %c1024_108 = arith.constant 1024 : index
    %217 = vector.load %arg21[%c0_106, %c0_107, %c1024_108] : memref<2x128x2048xbf16, #tpu.memory_space<vmem>>, vector<1x128x512xbf16>
    %218 = vector.shape_cast %217 : vector<1x128x512xbf16> to vector<128x512xbf16>
    %219 = arith.truncf %216 : vector<20x512xf32> to vector<20x512xbf16>
    %cst_109 = arith.constant dense<0.000000e+00> : vector<20x128xf32>
    %220 = tpu.matmul %219, %218, %cst_109 {dimension_numbers = #tpu.dot_dimension_numbers<[1], [1], [0], [0], [0, 0, 1, 0], [], []>} : vector<20x512xbf16>, vector<128x512xbf16>, vector<20x128xf32> -> vector<20x128xf32>
    %221 = arith.addf %206, %220 : vector<20x128xf32>
    %c0_110 = arith.constant 0 : index
    %c1536 = arith.constant 1536 : index
    %c0_111 = arith.constant 0 : index
    %222 = vector.load %arg19[%c0_110, %c1536, %c0_111] : memref<2x2048x128xbf16, #tpu.memory_space<vmem>>, vector<1x512x128xbf16>
    %223 = vector.shape_cast %222 : vector<1x512x128xbf16> to vector<512x128xbf16>
    %224 = arith.truncf %175 : vector<20x128xf32> to vector<20x128xbf16>
    %cst_112 = arith.constant dense<0.000000e+00> : vector<20x512xf32>
    %225 = tpu.matmul %224, %223, %cst_112 {dimension_numbers = #tpu.dot_dimension_numbers<[1], [1], [0], [0], [0, 0, 1, 0], [], []>} : vector<20x128xbf16>, vector<512x128xbf16>, vector<20x512xf32> -> vector<20x512xf32>
    %c0_113 = arith.constant 0 : index
    %c0_114 = arith.constant 0 : index
    %c1536_115 = arith.constant 1536 : index
    %226 = vector.load %arg20[%c0_113, %c0_114, %c1536_115] : memref<2x1x2048xf32, #tpu.memory_space<vmem>>, vector<1x1x512xf32>
    %227 = vector.shape_cast %226 : vector<1x1x512xf32> to vector<1x512xf32>
    %228 = vector.broadcast %227 : vector<1x512xf32> to vector<20x512xf32>
    %229 = arith.addf %225, %228 : vector<20x512xf32>
    %cst_116 = arith.constant 0.000000e+00 : f32
    %230 = vector.broadcast %cst_116 : f32 to vector<20x512xf32>
    %231 = arith.maximumf %229, %230 : vector<20x512xf32>
    %c0_117 = arith.constant 0 : index
    %c0_118 = arith.constant 0 : index
    %c1536_119 = arith.constant 1536 : index
    %232 = vector.load %arg21[%c0_117, %c0_118, %c1536_119] : memref<2x128x2048xbf16, #tpu.memory_space<vmem>>, vector<1x128x512xbf16>
    %233 = vector.shape_cast %232 : vector<1x128x512xbf16> to vector<128x512xbf16>
    %234 = arith.truncf %231 : vector<20x512xf32> to vector<20x512xbf16>
    %cst_120 = arith.constant dense<0.000000e+00> : vector<20x128xf32>
    %235 = tpu.matmul %234, %233, %cst_120 {dimension_numbers = #tpu.dot_dimension_numbers<[1], [1], [0], [0], [0, 0, 1, 0], [], []>} : vector<20x512xbf16>, vector<128x512xbf16>, vector<20x128xf32> -> vector<20x128xf32>
    %236 = arith.addf %221, %235 : vector<20x128xf32>
    %237 = arith.addf %175, %236 : vector<20x128xf32>
    %c0_121 = arith.constant 0 : index
    %c0_122 = arith.constant 0 : index
    %c0_123 = arith.constant 0 : index
    %238 = vector.load %arg22[%c0_121, %c0_122, %c0_123] : memref<2x1x128xf32, #tpu.memory_space<vmem>>, vector<1x1x128xf32>
    %239 = vector.shape_cast %238 : vector<1x1x128xf32> to vector<1x128xf32>
    %240 = vector.broadcast %239 : vector<1x128xf32> to vector<20x128xf32>
    %241 = arith.addf %237, %240 : vector<20x128xf32>
    %c0_124 = arith.constant 0 : index
    %c0_125 = arith.constant 0 : index
    %c0_126 = arith.constant 0 : index
    %242 = vector.load %arg23[%c0_124, %c0_125, %c0_126] : memref<2x1x128xf32, #tpu.memory_space<vmem>>, vector<1x1x128xf32>
    %243 = vector.shape_cast %242 : vector<1x1x128xf32> to vector<1x128xf32>
    %c0_127 = arith.constant 0 : index
    %c0_128 = arith.constant 0 : index
    %c0_129 = arith.constant 0 : index
    %244 = vector.load %arg24[%c0_127, %c0_128, %c0_129] : memref<2x1x128xf32, #tpu.memory_space<vmem>>, vector<1x1x128xf32>
    %245 = vector.shape_cast %244 : vector<1x1x128xf32> to vector<1x128xf32>
    %cst_130 = arith.constant dense<0.000000e+00> : vector<20xf32>
    %246 = vector.multi_reduction <add>, %241, %cst_130 [1] : vector<20x128xf32> to vector<20xf32>
    %247 = vector.shape_cast %246 : vector<20xf32> to vector<20x1xf32>
    %cst_131 = arith.constant 1.280000e+02 : f32
    %248 = vector.broadcast %cst_131 : f32 to vector<20x1xf32>
    %249 = arith.divf %247, %248 : vector<20x1xf32>
    %250 = vector.broadcast %249 : vector<20x1xf32> to vector<20x128xf32>
    %251 = arith.subf %241, %250 : vector<20x128xf32>
    %252 = arith.mulf %251, %251 : vector<20x128xf32>
    %cst_132 = arith.constant dense<0.000000e+00> : vector<20xf32>
    %253 = vector.multi_reduction <add>, %252, %cst_132 [1] : vector<20x128xf32> to vector<20xf32>
    %254 = vector.shape_cast %253 : vector<20xf32> to vector<20x1xf32>
    %cst_133 = arith.constant 1.280000e+02 : f32
    %255 = vector.broadcast %cst_133 : f32 to vector<20x1xf32>
    %256 = arith.divf %254, %255 : vector<20x1xf32>
    %257 = vector.broadcast %249 : vector<20x1xf32> to vector<20x128xf32>
    %258 = arith.subf %241, %257 : vector<20x128xf32>
    %cst_134 = arith.constant 9.99999974E-6 : f32
    %259 = vector.broadcast %cst_134 : f32 to vector<20x1xf32>
    %260 = arith.addf %256, %259 : vector<20x1xf32>
    %261 = math.rsqrt %260 : vector<20x1xf32>
    %262 = vector.broadcast %261 : vector<20x1xf32> to vector<20x128xf32>
    %263 = arith.mulf %258, %262 : vector<20x128xf32>
    %264 = vector.broadcast %243 : vector<1x128xf32> to vector<20x128xf32>
    %265 = arith.mulf %263, %264 : vector<20x128xf32>
    %266 = vector.broadcast %245 : vector<1x128xf32> to vector<20x128xf32>
    %267 = arith.addf %265, %266 : vector<20x128xf32>
    %c1 = arith.constant 1 : index
    %c0_135 = arith.constant 0 : index
    %c0_136 = arith.constant 0 : index
    %268 = vector.load %arg13[%c1, %c0_135, %c0_136] : memref<2x384x128xbf16, #tpu.memory_space<vmem>>, vector<1x384x128xbf16>
    %269 = vector.shape_cast %268 : vector<1x384x128xbf16> to vector<384x128xbf16>
    %270 = arith.truncf %267 : vector<20x128xf32> to vector<20x128xbf16>
    %cst_137 = arith.constant dense<0.000000e+00> : vector<20x384xf32>
    %271 = tpu.matmul %270, %269, %cst_137 {dimension_numbers = #tpu.dot_dimension_numbers<[1], [1], [0], [0], [0, 0, 1, 0], [], []>} : vector<20x128xbf16>, vector<384x128xbf16>, vector<20x384xf32> -> vector<20x384xf32>
    %c1_138 = arith.constant 1 : index
    %c0_139 = arith.constant 0 : index
    %c0_140 = arith.constant 0 : index
    %272 = vector.load %arg14[%c1_138, %c0_139, %c0_140] : memref<2x1x384xf32, #tpu.memory_space<vmem>>, vector<1x1x384xf32>
    %273 = vector.shape_cast %272 : vector<1x1x384xf32> to vector<1x384xf32>
    %274 = vector.broadcast %273 : vector<1x384xf32> to vector<20x384xf32>
    %275 = arith.addf %271, %274 : vector<20x384xf32>
    %276 = vector.extract_strided_slice %275 {offsets = [0, 0], sizes = [20, 128], strides = [1, 1]} : vector<20x384xf32> to vector<20x128xf32>
    %277 = vector.extract_strided_slice %275 {offsets = [0, 128], sizes = [20, 128], strides = [1, 1]} : vector<20x384xf32> to vector<20x128xf32>
    %278 = vector.extract_strided_slice %275 {offsets = [0, 256], sizes = [20, 128], strides = [1, 1]} : vector<20x384xf32> to vector<20x128xf32>
    %c1_141 = arith.constant 1 : index
    %c0_142 = arith.constant 0 : index
    %c0_143 = arith.constant 0 : index
    %279 = vector.load %arg15[%c1_141, %c0_142, %c0_143] : memref<2x128x128xbf16, #tpu.memory_space<vmem>>, vector<1x128x128xbf16>
    %280 = vector.shape_cast %279 : vector<1x128x128xbf16> to vector<128x128xbf16>
    %cst_144 = arith.constant 0.000000e+00 : f32
    %281 = vector.broadcast %cst_144 : f32 to vector<20x128xf32>
    %282 = vector.extract_strided_slice %276 {offsets = [0, 0], sizes = [20, 32], strides = [1, 1]} : vector<20x128xf32> to vector<20x32xf32>
    %283 = arith.truncf %282 : vector<20x32xf32> to vector<20x32xbf16>
    %284 = vector.extract_strided_slice %277 {offsets = [0, 0], sizes = [20, 32], strides = [1, 1]} : vector<20x128xf32> to vector<20x32xf32>
    %285 = arith.truncf %284 : vector<20x32xf32> to vector<20x32xbf16>
    %cst_145 = arith.constant dense<0.000000e+00> : vector<20x20xf32>
    %286 = tpu.matmul %283, %285, %cst_145 {dimension_numbers = #tpu.dot_dimension_numbers<[1], [1], [0], [0], [0, 0, 1, 0], [], []>} : vector<20x32xbf16>, vector<20x32xbf16>, vector<20x20xf32> -> vector<20x20xf32>
    %cst_146 = arith.constant 0.176776692 : f32
    %287 = vector.broadcast %cst_146 : f32 to vector<20x20xf32>
    %288 = arith.mulf %286, %287 : vector<20x20xf32>
    %cst_147 = arith.constant dense<0xFF800000> : vector<20xf32>
    %289 = vector.multi_reduction <maximumf>, %288, %cst_147 [1] : vector<20x20xf32> to vector<20xf32>
    %290 = vector.shape_cast %289 : vector<20xf32> to vector<20x1xf32>
    %291 = vector.broadcast %290 : vector<20x1xf32> to vector<20x20xf32>
    %292 = arith.subf %288, %291 : vector<20x20xf32>
    %293 = math.exp %292 : vector<20x20xf32>
    %cst_148 = arith.constant dense<0.000000e+00> : vector<20xf32>
    %294 = vector.multi_reduction <add>, %293, %cst_148 [1] : vector<20x20xf32> to vector<20xf32>
    %295 = vector.shape_cast %294 : vector<20xf32> to vector<20x1xf32>
    %296 = tpu.reciprocal %295 {approx = true} : vector<20x1xf32> -> vector<20x1xf32>
    %297 = vector.broadcast %296 : vector<20x1xf32> to vector<20x20xf32>
    %298 = arith.mulf %293, %297 : vector<20x20xf32>
    %299 = arith.truncf %298 : vector<20x20xf32> to vector<20x20xbf16>
    %300 = vector.extract_strided_slice %278 {offsets = [0, 0], sizes = [20, 32], strides = [1, 1]} : vector<20x128xf32> to vector<20x32xf32>
    %301 = arith.truncf %300 : vector<20x32xf32> to vector<20x32xbf16>
    %cst_149 = arith.constant dense<0.000000e+00> : vector<20x32xf32>
    %302 = tpu.matmul %299, %301, %cst_149 {dimension_numbers = #tpu.dot_dimension_numbers<[1], [0], [0], [1], [0, 0, 1, 1], [], []>} : vector<20x20xbf16>, vector<20x32xbf16>, vector<20x32xf32> -> vector<20x32xf32>
    %303 = vector.extract_strided_slice %280 {offsets = [0, 0], sizes = [128, 32], strides = [1, 1]} : vector<128x128xbf16> to vector<128x32xbf16>
    %304 = arith.truncf %302 : vector<20x32xf32> to vector<20x32xbf16>
    %cst_150 = arith.constant dense<0.000000e+00> : vector<20x128xf32>
    %305 = tpu.matmul %304, %303, %cst_150 {dimension_numbers = #tpu.dot_dimension_numbers<[1], [1], [0], [0], [0, 0, 1, 0], [], []>} : vector<20x32xbf16>, vector<128x32xbf16>, vector<20x128xf32> -> vector<20x128xf32>
    %306 = arith.addf %281, %305 : vector<20x128xf32>
    %307 = vector.extract_strided_slice %276 {offsets = [0, 32], sizes = [20, 32], strides = [1, 1]} : vector<20x128xf32> to vector<20x32xf32>
    %308 = arith.truncf %307 : vector<20x32xf32> to vector<20x32xbf16>
    %309 = vector.extract_strided_slice %277 {offsets = [0, 32], sizes = [20, 32], strides = [1, 1]} : vector<20x128xf32> to vector<20x32xf32>
    %310 = arith.truncf %309 : vector<20x32xf32> to vector<20x32xbf16>
    %cst_151 = arith.constant dense<0.000000e+00> : vector<20x20xf32>
    %311 = tpu.matmul %308, %310, %cst_151 {dimension_numbers = #tpu.dot_dimension_numbers<[1], [1], [0], [0], [0, 0, 1, 0], [], []>} : vector<20x32xbf16>, vector<20x32xbf16>, vector<20x20xf32> -> vector<20x20xf32>
    %cst_152 = arith.constant 0.176776692 : f32
    %312 = vector.broadcast %cst_152 : f32 to vector<20x20xf32>
    %313 = arith.mulf %311, %312 : vector<20x20xf32>
    %cst_153 = arith.constant dense<0xFF800000> : vector<20xf32>
    %314 = vector.multi_reduction <maximumf>, %313, %cst_153 [1] : vector<20x20xf32> to vector<20xf32>
    %315 = vector.shape_cast %314 : vector<20xf32> to vector<20x1xf32>
    %316 = vector.broadcast %315 : vector<20x1xf32> to vector<20x20xf32>
    %317 = arith.subf %313, %316 : vector<20x20xf32>
    %318 = math.exp %317 : vector<20x20xf32>
    %cst_154 = arith.constant dense<0.000000e+00> : vector<20xf32>
    %319 = vector.multi_reduction <add>, %318, %cst_154 [1] : vector<20x20xf32> to vector<20xf32>
    %320 = vector.shape_cast %319 : vector<20xf32> to vector<20x1xf32>
    %321 = tpu.reciprocal %320 {approx = true} : vector<20x1xf32> -> vector<20x1xf32>
    %322 = vector.broadcast %321 : vector<20x1xf32> to vector<20x20xf32>
    %323 = arith.mulf %318, %322 : vector<20x20xf32>
    %324 = arith.truncf %323 : vector<20x20xf32> to vector<20x20xbf16>
    %325 = vector.extract_strided_slice %278 {offsets = [0, 32], sizes = [20, 32], strides = [1, 1]} : vector<20x128xf32> to vector<20x32xf32>
    %326 = arith.truncf %325 : vector<20x32xf32> to vector<20x32xbf16>
    %cst_155 = arith.constant dense<0.000000e+00> : vector<20x32xf32>
    %327 = tpu.matmul %324, %326, %cst_155 {dimension_numbers = #tpu.dot_dimension_numbers<[1], [0], [0], [1], [0, 0, 1, 1], [], []>} : vector<20x20xbf16>, vector<20x32xbf16>, vector<20x32xf32> -> vector<20x32xf32>
    %328 = vector.extract_strided_slice %280 {offsets = [0, 32], sizes = [128, 32], strides = [1, 1]} : vector<128x128xbf16> to vector<128x32xbf16>
    %329 = arith.truncf %327 : vector<20x32xf32> to vector<20x32xbf16>
    %cst_156 = arith.constant dense<0.000000e+00> : vector<20x128xf32>
    %330 = tpu.matmul %329, %328, %cst_156 {dimension_numbers = #tpu.dot_dimension_numbers<[1], [1], [0], [0], [0, 0, 1, 0], [], []>} : vector<20x32xbf16>, vector<128x32xbf16>, vector<20x128xf32> -> vector<20x128xf32>
    %331 = arith.addf %306, %330 : vector<20x128xf32>
    %332 = vector.extract_strided_slice %276 {offsets = [0, 64], sizes = [20, 32], strides = [1, 1]} : vector<20x128xf32> to vector<20x32xf32>
    %333 = arith.truncf %332 : vector<20x32xf32> to vector<20x32xbf16>
    %334 = vector.extract_strided_slice %277 {offsets = [0, 64], sizes = [20, 32], strides = [1, 1]} : vector<20x128xf32> to vector<20x32xf32>
    %335 = arith.truncf %334 : vector<20x32xf32> to vector<20x32xbf16>
    %cst_157 = arith.constant dense<0.000000e+00> : vector<20x20xf32>
    %336 = tpu.matmul %333, %335, %cst_157 {dimension_numbers = #tpu.dot_dimension_numbers<[1], [1], [0], [0], [0, 0, 1, 0], [], []>} : vector<20x32xbf16>, vector<20x32xbf16>, vector<20x20xf32> -> vector<20x20xf32>
    %cst_158 = arith.constant 0.176776692 : f32
    %337 = vector.broadcast %cst_158 : f32 to vector<20x20xf32>
    %338 = arith.mulf %336, %337 : vector<20x20xf32>
    %cst_159 = arith.constant dense<0xFF800000> : vector<20xf32>
    %339 = vector.multi_reduction <maximumf>, %338, %cst_159 [1] : vector<20x20xf32> to vector<20xf32>
    %340 = vector.shape_cast %339 : vector<20xf32> to vector<20x1xf32>
    %341 = vector.broadcast %340 : vector<20x1xf32> to vector<20x20xf32>
    %342 = arith.subf %338, %341 : vector<20x20xf32>
    %343 = math.exp %342 : vector<20x20xf32>
    %cst_160 = arith.constant dense<0.000000e+00> : vector<20xf32>
    %344 = vector.multi_reduction <add>, %343, %cst_160 [1] : vector<20x20xf32> to vector<20xf32>
    %345 = vector.shape_cast %344 : vector<20xf32> to vector<20x1xf32>
    %346 = tpu.reciprocal %345 {approx = true} : vector<20x1xf32> -> vector<20x1xf32>
    %347 = vector.broadcast %346 : vector<20x1xf32> to vector<20x20xf32>
    %348 = arith.mulf %343, %347 : vector<20x20xf32>
    %349 = arith.truncf %348 : vector<20x20xf32> to vector<20x20xbf16>
    %350 = vector.extract_strided_slice %278 {offsets = [0, 64], sizes = [20, 32], strides = [1, 1]} : vector<20x128xf32> to vector<20x32xf32>
    %351 = arith.truncf %350 : vector<20x32xf32> to vector<20x32xbf16>
    %cst_161 = arith.constant dense<0.000000e+00> : vector<20x32xf32>
    %352 = tpu.matmul %349, %351, %cst_161 {dimension_numbers = #tpu.dot_dimension_numbers<[1], [0], [0], [1], [0, 0, 1, 1], [], []>} : vector<20x20xbf16>, vector<20x32xbf16>, vector<20x32xf32> -> vector<20x32xf32>
    %353 = vector.extract_strided_slice %280 {offsets = [0, 64], sizes = [128, 32], strides = [1, 1]} : vector<128x128xbf16> to vector<128x32xbf16>
    %354 = arith.truncf %352 : vector<20x32xf32> to vector<20x32xbf16>
    %cst_162 = arith.constant dense<0.000000e+00> : vector<20x128xf32>
    %355 = tpu.matmul %354, %353, %cst_162 {dimension_numbers = #tpu.dot_dimension_numbers<[1], [1], [0], [0], [0, 0, 1, 0], [], []>} : vector<20x32xbf16>, vector<128x32xbf16>, vector<20x128xf32> -> vector<20x128xf32>
    %356 = arith.addf %331, %355 : vector<20x128xf32>
    %357 = vector.extract_strided_slice %276 {offsets = [0, 96], sizes = [20, 32], strides = [1, 1]} : vector<20x128xf32> to vector<20x32xf32>
    %358 = arith.truncf %357 : vector<20x32xf32> to vector<20x32xbf16>
    %359 = vector.extract_strided_slice %277 {offsets = [0, 96], sizes = [20, 32], strides = [1, 1]} : vector<20x128xf32> to vector<20x32xf32>
    %360 = arith.truncf %359 : vector<20x32xf32> to vector<20x32xbf16>
    %cst_163 = arith.constant dense<0.000000e+00> : vector<20x20xf32>
    %361 = tpu.matmul %358, %360, %cst_163 {dimension_numbers = #tpu.dot_dimension_numbers<[1], [1], [0], [0], [0, 0, 1, 0], [], []>} : vector<20x32xbf16>, vector<20x32xbf16>, vector<20x20xf32> -> vector<20x20xf32>
    %cst_164 = arith.constant 0.176776692 : f32
    %362 = vector.broadcast %cst_164 : f32 to vector<20x20xf32>
    %363 = arith.mulf %361, %362 : vector<20x20xf32>
    %cst_165 = arith.constant dense<0xFF800000> : vector<20xf32>
    %364 = vector.multi_reduction <maximumf>, %363, %cst_165 [1] : vector<20x20xf32> to vector<20xf32>
    %365 = vector.shape_cast %364 : vector<20xf32> to vector<20x1xf32>
    %366 = vector.broadcast %365 : vector<20x1xf32> to vector<20x20xf32>
    %367 = arith.subf %363, %366 : vector<20x20xf32>
    %368 = math.exp %367 : vector<20x20xf32>
    %cst_166 = arith.constant dense<0.000000e+00> : vector<20xf32>
    %369 = vector.multi_reduction <add>, %368, %cst_166 [1] : vector<20x20xf32> to vector<20xf32>
    %370 = vector.shape_cast %369 : vector<20xf32> to vector<20x1xf32>
    %371 = tpu.reciprocal %370 {approx = true} : vector<20x1xf32> -> vector<20x1xf32>
    %372 = vector.broadcast %371 : vector<20x1xf32> to vector<20x20xf32>
    %373 = arith.mulf %368, %372 : vector<20x20xf32>
    %374 = arith.truncf %373 : vector<20x20xf32> to vector<20x20xbf16>
    %375 = vector.extract_strided_slice %278 {offsets = [0, 96], sizes = [20, 32], strides = [1, 1]} : vector<20x128xf32> to vector<20x32xf32>
    %376 = arith.truncf %375 : vector<20x32xf32> to vector<20x32xbf16>
    %cst_167 = arith.constant dense<0.000000e+00> : vector<20x32xf32>
    %377 = tpu.matmul %374, %376, %cst_167 {dimension_numbers = #tpu.dot_dimension_numbers<[1], [0], [0], [1], [0, 0, 1, 1], [], []>} : vector<20x20xbf16>, vector<20x32xbf16>, vector<20x32xf32> -> vector<20x32xf32>
    %378 = vector.extract_strided_slice %280 {offsets = [0, 96], sizes = [128, 32], strides = [1, 1]} : vector<128x128xbf16> to vector<128x32xbf16>
    %379 = arith.truncf %377 : vector<20x32xf32> to vector<20x32xbf16>
    %cst_168 = arith.constant dense<0.000000e+00> : vector<20x128xf32>
    %380 = tpu.matmul %379, %378, %cst_168 {dimension_numbers = #tpu.dot_dimension_numbers<[1], [1], [0], [0], [0, 0, 1, 0], [], []>} : vector<20x32xbf16>, vector<128x32xbf16>, vector<20x128xf32> -> vector<20x128xf32>
    %381 = arith.addf %356, %380 : vector<20x128xf32>
    %382 = arith.addf %267, %381 : vector<20x128xf32>
    %c1_169 = arith.constant 1 : index
    %c0_170 = arith.constant 0 : index
    %c0_171 = arith.constant 0 : index
    %383 = vector.load %arg16[%c1_169, %c0_170, %c0_171] : memref<2x1x128xf32, #tpu.memory_space<vmem>>, vector<1x1x128xf32>
    %384 = vector.shape_cast %383 : vector<1x1x128xf32> to vector<1x128xf32>
    %385 = vector.broadcast %384 : vector<1x128xf32> to vector<20x128xf32>
    %386 = arith.addf %382, %385 : vector<20x128xf32>
    %c1_172 = arith.constant 1 : index
    %c0_173 = arith.constant 0 : index
    %c0_174 = arith.constant 0 : index
    %387 = vector.load %arg17[%c1_172, %c0_173, %c0_174] : memref<2x1x128xf32, #tpu.memory_space<vmem>>, vector<1x1x128xf32>
    %388 = vector.shape_cast %387 : vector<1x1x128xf32> to vector<1x128xf32>
    %c1_175 = arith.constant 1 : index
    %c0_176 = arith.constant 0 : index
    %c0_177 = arith.constant 0 : index
    %389 = vector.load %arg18[%c1_175, %c0_176, %c0_177] : memref<2x1x128xf32, #tpu.memory_space<vmem>>, vector<1x1x128xf32>
    %390 = vector.shape_cast %389 : vector<1x1x128xf32> to vector<1x128xf32>
    %cst_178 = arith.constant dense<0.000000e+00> : vector<20xf32>
    %391 = vector.multi_reduction <add>, %386, %cst_178 [1] : vector<20x128xf32> to vector<20xf32>
    %392 = vector.shape_cast %391 : vector<20xf32> to vector<20x1xf32>
    %cst_179 = arith.constant 1.280000e+02 : f32
    %393 = vector.broadcast %cst_179 : f32 to vector<20x1xf32>
    %394 = arith.divf %392, %393 : vector<20x1xf32>
    %395 = vector.broadcast %394 : vector<20x1xf32> to vector<20x128xf32>
    %396 = arith.subf %386, %395 : vector<20x128xf32>
    %397 = arith.mulf %396, %396 : vector<20x128xf32>
    %cst_180 = arith.constant dense<0.000000e+00> : vector<20xf32>
    %398 = vector.multi_reduction <add>, %397, %cst_180 [1] : vector<20x128xf32> to vector<20xf32>
    %399 = vector.shape_cast %398 : vector<20xf32> to vector<20x1xf32>
    %cst_181 = arith.constant 1.280000e+02 : f32
    %400 = vector.broadcast %cst_181 : f32 to vector<20x1xf32>
    %401 = arith.divf %399, %400 : vector<20x1xf32>
    %402 = vector.broadcast %394 : vector<20x1xf32> to vector<20x128xf32>
    %403 = arith.subf %386, %402 : vector<20x128xf32>
    %cst_182 = arith.constant 9.99999974E-6 : f32
    %404 = vector.broadcast %cst_182 : f32 to vector<20x1xf32>
    %405 = arith.addf %401, %404 : vector<20x1xf32>
    %406 = math.rsqrt %405 : vector<20x1xf32>
    %407 = vector.broadcast %406 : vector<20x1xf32> to vector<20x128xf32>
    %408 = arith.mulf %403, %407 : vector<20x128xf32>
    %409 = vector.broadcast %388 : vector<1x128xf32> to vector<20x128xf32>
    %410 = arith.mulf %408, %409 : vector<20x128xf32>
    %411 = vector.broadcast %390 : vector<1x128xf32> to vector<20x128xf32>
    %412 = arith.addf %410, %411 : vector<20x128xf32>
    %cst_183 = arith.constant 0.000000e+00 : f32
    %413 = vector.broadcast %cst_183 : f32 to vector<20x128xf32>
    %c1_184 = arith.constant 1 : index
    %c0_185 = arith.constant 0 : index
    %c0_186 = arith.constant 0 : index
    %414 = vector.load %arg19[%c1_184, %c0_185, %c0_186] : memref<2x2048x128xbf16, #tpu.memory_space<vmem>>, vector<1x512x128xbf16>
    %415 = vector.shape_cast %414 : vector<1x512x128xbf16> to vector<512x128xbf16>
    %416 = arith.truncf %412 : vector<20x128xf32> to vector<20x128xbf16>
    %cst_187 = arith.constant dense<0.000000e+00> : vector<20x512xf32>
    %417 = tpu.matmul %416, %415, %cst_187 {dimension_numbers = #tpu.dot_dimension_numbers<[1], [1], [0], [0], [0, 0, 1, 0], [], []>} : vector<20x128xbf16>, vector<512x128xbf16>, vector<20x512xf32> -> vector<20x512xf32>
    %c1_188 = arith.constant 1 : index
    %c0_189 = arith.constant 0 : index
    %c0_190 = arith.constant 0 : index
    %418 = vector.load %arg20[%c1_188, %c0_189, %c0_190] : memref<2x1x2048xf32, #tpu.memory_space<vmem>>, vector<1x1x512xf32>
    %419 = vector.shape_cast %418 : vector<1x1x512xf32> to vector<1x512xf32>
    %420 = vector.broadcast %419 : vector<1x512xf32> to vector<20x512xf32>
    %421 = arith.addf %417, %420 : vector<20x512xf32>
    %cst_191 = arith.constant 0.000000e+00 : f32
    %422 = vector.broadcast %cst_191 : f32 to vector<20x512xf32>
    %423 = arith.maximumf %421, %422 : vector<20x512xf32>
    %c1_192 = arith.constant 1 : index
    %c0_193 = arith.constant 0 : index
    %c0_194 = arith.constant 0 : index
    %424 = vector.load %arg21[%c1_192, %c0_193, %c0_194] : memref<2x128x2048xbf16, #tpu.memory_space<vmem>>, vector<1x128x512xbf16>
    %425 = vector.shape_cast %424 : vector<1x128x512xbf16> to vector<128x512xbf16>
    %426 = arith.truncf %423 : vector<20x512xf32> to vector<20x512xbf16>
    %cst_195 = arith.constant dense<0.000000e+00> : vector<20x128xf32>
    %427 = tpu.matmul %426, %425, %cst_195 {dimension_numbers = #tpu.dot_dimension_numbers<[1], [1], [0], [0], [0, 0, 1, 0], [], []>} : vector<20x512xbf16>, vector<128x512xbf16>, vector<20x128xf32> -> vector<20x128xf32>
    %428 = arith.addf %413, %427 : vector<20x128xf32>
    %c1_196 = arith.constant 1 : index
    %c512_197 = arith.constant 512 : index
    %c0_198 = arith.constant 0 : index
    %429 = vector.load %arg19[%c1_196, %c512_197, %c0_198] : memref<2x2048x128xbf16, #tpu.memory_space<vmem>>, vector<1x512x128xbf16>
    %430 = vector.shape_cast %429 : vector<1x512x128xbf16> to vector<512x128xbf16>
    %431 = arith.truncf %412 : vector<20x128xf32> to vector<20x128xbf16>
    %cst_199 = arith.constant dense<0.000000e+00> : vector<20x512xf32>
    %432 = tpu.matmul %431, %430, %cst_199 {dimension_numbers = #tpu.dot_dimension_numbers<[1], [1], [0], [0], [0, 0, 1, 0], [], []>} : vector<20x128xbf16>, vector<512x128xbf16>, vector<20x512xf32> -> vector<20x512xf32>
    %c1_200 = arith.constant 1 : index
    %c0_201 = arith.constant 0 : index
    %c512_202 = arith.constant 512 : index
    %433 = vector.load %arg20[%c1_200, %c0_201, %c512_202] : memref<2x1x2048xf32, #tpu.memory_space<vmem>>, vector<1x1x512xf32>
    %434 = vector.shape_cast %433 : vector<1x1x512xf32> to vector<1x512xf32>
    %435 = vector.broadcast %434 : vector<1x512xf32> to vector<20x512xf32>
    %436 = arith.addf %432, %435 : vector<20x512xf32>
    %cst_203 = arith.constant 0.000000e+00 : f32
    %437 = vector.broadcast %cst_203 : f32 to vector<20x512xf32>
    %438 = arith.maximumf %436, %437 : vector<20x512xf32>
    %c1_204 = arith.constant 1 : index
    %c0_205 = arith.constant 0 : index
    %c512_206 = arith.constant 512 : index
    %439 = vector.load %arg21[%c1_204, %c0_205, %c512_206] : memref<2x128x2048xbf16, #tpu.memory_space<vmem>>, vector<1x128x512xbf16>
    %440 = vector.shape_cast %439 : vector<1x128x512xbf16> to vector<128x512xbf16>
    %441 = arith.truncf %438 : vector<20x512xf32> to vector<20x512xbf16>
    %cst_207 = arith.constant dense<0.000000e+00> : vector<20x128xf32>
    %442 = tpu.matmul %441, %440, %cst_207 {dimension_numbers = #tpu.dot_dimension_numbers<[1], [1], [0], [0], [0, 0, 1, 0], [], []>} : vector<20x512xbf16>, vector<128x512xbf16>, vector<20x128xf32> -> vector<20x128xf32>
    %443 = arith.addf %428, %442 : vector<20x128xf32>
    %c1_208 = arith.constant 1 : index
    %c1024_209 = arith.constant 1024 : index
    %c0_210 = arith.constant 0 : index
    %444 = vector.load %arg19[%c1_208, %c1024_209, %c0_210] : memref<2x2048x128xbf16, #tpu.memory_space<vmem>>, vector<1x512x128xbf16>
    %445 = vector.shape_cast %444 : vector<1x512x128xbf16> to vector<512x128xbf16>
    %446 = arith.truncf %412 : vector<20x128xf32> to vector<20x128xbf16>
    %cst_211 = arith.constant dense<0.000000e+00> : vector<20x512xf32>
    %447 = tpu.matmul %446, %445, %cst_211 {dimension_numbers = #tpu.dot_dimension_numbers<[1], [1], [0], [0], [0, 0, 1, 0], [], []>} : vector<20x128xbf16>, vector<512x128xbf16>, vector<20x512xf32> -> vector<20x512xf32>
    %c1_212 = arith.constant 1 : index
    %c0_213 = arith.constant 0 : index
    %c1024_214 = arith.constant 1024 : index
    %448 = vector.load %arg20[%c1_212, %c0_213, %c1024_214] : memref<2x1x2048xf32, #tpu.memory_space<vmem>>, vector<1x1x512xf32>
    %449 = vector.shape_cast %448 : vector<1x1x512xf32> to vector<1x512xf32>
    %450 = vector.broadcast %449 : vector<1x512xf32> to vector<20x512xf32>
    %451 = arith.addf %447, %450 : vector<20x512xf32>
    %cst_215 = arith.constant 0.000000e+00 : f32
    %452 = vector.broadcast %cst_215 : f32 to vector<20x512xf32>
    %453 = arith.maximumf %451, %452 : vector<20x512xf32>
    %c1_216 = arith.constant 1 : index
    %c0_217 = arith.constant 0 : index
    %c1024_218 = arith.constant 1024 : index
    %454 = vector.load %arg21[%c1_216, %c0_217, %c1024_218] : memref<2x128x2048xbf16, #tpu.memory_space<vmem>>, vector<1x128x512xbf16>
    %455 = vector.shape_cast %454 : vector<1x128x512xbf16> to vector<128x512xbf16>
    %456 = arith.truncf %453 : vector<20x512xf32> to vector<20x512xbf16>
    %cst_219 = arith.constant dense<0.000000e+00> : vector<20x128xf32>
    %457 = tpu.matmul %456, %455, %cst_219 {dimension_numbers = #tpu.dot_dimension_numbers<[1], [1], [0], [0], [0, 0, 1, 0], [], []>} : vector<20x512xbf16>, vector<128x512xbf16>, vector<20x128xf32> -> vector<20x128xf32>
    %458 = arith.addf %443, %457 : vector<20x128xf32>
    %c1_220 = arith.constant 1 : index
    %c1536_221 = arith.constant 1536 : index
    %c0_222 = arith.constant 0 : index
    %459 = vector.load %arg19[%c1_220, %c1536_221, %c0_222] : memref<2x2048x128xbf16, #tpu.memory_space<vmem>>, vector<1x512x128xbf16>
    %460 = vector.shape_cast %459 : vector<1x512x128xbf16> to vector<512x128xbf16>
    %461 = arith.truncf %412 : vector<20x128xf32> to vector<20x128xbf16>
    %cst_223 = arith.constant dense<0.000000e+00> : vector<20x512xf32>
    %462 = tpu.matmul %461, %460, %cst_223 {dimension_numbers = #tpu.dot_dimension_numbers<[1], [1], [0], [0], [0, 0, 1, 0], [], []>} : vector<20x128xbf16>, vector<512x128xbf16>, vector<20x512xf32> -> vector<20x512xf32>
    %c1_224 = arith.constant 1 : index
    %c0_225 = arith.constant 0 : index
    %c1536_226 = arith.constant 1536 : index
    %463 = vector.load %arg20[%c1_224, %c0_225, %c1536_226] : memref<2x1x2048xf32, #tpu.memory_space<vmem>>, vector<1x1x512xf32>
    %464 = vector.shape_cast %463 : vector<1x1x512xf32> to vector<1x512xf32>
    %465 = vector.broadcast %464 : vector<1x512xf32> to vector<20x512xf32>
    %466 = arith.addf %462, %465 : vector<20x512xf32>
    %cst_227 = arith.constant 0.000000e+00 : f32
    %467 = vector.broadcast %cst_227 : f32 to vector<20x512xf32>
    %468 = arith.maximumf %466, %467 : vector<20x512xf32>
    %c1_228 = arith.constant 1 : index
    %c0_229 = arith.constant 0 : index
    %c1536_230 = arith.constant 1536 : index
    %469 = vector.load %arg21[%c1_228, %c0_229, %c1536_230] : memref<2x128x2048xbf16, #tpu.memory_space<vmem>>, vector<1x128x512xbf16>
    %470 = vector.shape_cast %469 : vector<1x128x512xbf16> to vector<128x512xbf16>
    %471 = arith.truncf %468 : vector<20x512xf32> to vector<20x512xbf16>
    %cst_231 = arith.constant dense<0.000000e+00> : vector<20x128xf32>
    %472 = tpu.matmul %471, %470, %cst_231 {dimension_numbers = #tpu.dot_dimension_numbers<[1], [1], [0], [0], [0, 0, 1, 0], [], []>} : vector<20x512xbf16>, vector<128x512xbf16>, vector<20x128xf32> -> vector<20x128xf32>
    %473 = arith.addf %458, %472 : vector<20x128xf32>
    %474 = arith.addf %412, %473 : vector<20x128xf32>
    %c1_232 = arith.constant 1 : index
    %c0_233 = arith.constant 0 : index
    %c0_234 = arith.constant 0 : index
    %475 = vector.load %arg22[%c1_232, %c0_233, %c0_234] : memref<2x1x128xf32, #tpu.memory_space<vmem>>, vector<1x1x128xf32>
    %476 = vector.shape_cast %475 : vector<1x1x128xf32> to vector<1x128xf32>
    %477 = vector.broadcast %476 : vector<1x128xf32> to vector<20x128xf32>
    %478 = arith.addf %474, %477 : vector<20x128xf32>
    %c1_235 = arith.constant 1 : index
    %c0_236 = arith.constant 0 : index
    %c0_237 = arith.constant 0 : index
    %479 = vector.load %arg23[%c1_235, %c0_236, %c0_237] : memref<2x1x128xf32, #tpu.memory_space<vmem>>, vector<1x1x128xf32>
    %480 = vector.shape_cast %479 : vector<1x1x128xf32> to vector<1x128xf32>
    %c1_238 = arith.constant 1 : index
    %c0_239 = arith.constant 0 : index
    %c0_240 = arith.constant 0 : index
    %481 = vector.load %arg24[%c1_238, %c0_239, %c0_240] : memref<2x1x128xf32, #tpu.memory_space<vmem>>, vector<1x1x128xf32>
    %482 = vector.shape_cast %481 : vector<1x1x128xf32> to vector<1x128xf32>
    %cst_241 = arith.constant dense<0.000000e+00> : vector<20xf32>
    %483 = vector.multi_reduction <add>, %478, %cst_241 [1] : vector<20x128xf32> to vector<20xf32>
    %484 = vector.shape_cast %483 : vector<20xf32> to vector<20x1xf32>
    %cst_242 = arith.constant 1.280000e+02 : f32
    %485 = vector.broadcast %cst_242 : f32 to vector<20x1xf32>
    %486 = arith.divf %484, %485 : vector<20x1xf32>
    %487 = vector.broadcast %486 : vector<20x1xf32> to vector<20x128xf32>
    %488 = arith.subf %478, %487 : vector<20x128xf32>
    %489 = arith.mulf %488, %488 : vector<20x128xf32>
    %cst_243 = arith.constant dense<0.000000e+00> : vector<20xf32>
    %490 = vector.multi_reduction <add>, %489, %cst_243 [1] : vector<20x128xf32> to vector<20xf32>
    %491 = vector.shape_cast %490 : vector<20xf32> to vector<20x1xf32>
    %cst_244 = arith.constant 1.280000e+02 : f32
    %492 = vector.broadcast %cst_244 : f32 to vector<20x1xf32>
    %493 = arith.divf %491, %492 : vector<20x1xf32>
    %494 = vector.broadcast %486 : vector<20x1xf32> to vector<20x128xf32>
    %495 = arith.subf %478, %494 : vector<20x128xf32>
    %cst_245 = arith.constant 9.99999974E-6 : f32
    %496 = vector.broadcast %cst_245 : f32 to vector<20x1xf32>
    %497 = arith.addf %493, %496 : vector<20x1xf32>
    %498 = math.rsqrt %497 : vector<20x1xf32>
    %499 = vector.broadcast %498 : vector<20x1xf32> to vector<20x128xf32>
    %500 = arith.mulf %495, %499 : vector<20x128xf32>
    %501 = vector.broadcast %480 : vector<1x128xf32> to vector<20x128xf32>
    %502 = arith.mulf %500, %501 : vector<20x128xf32>
    %503 = vector.broadcast %482 : vector<1x128xf32> to vector<20x128xf32>
    %504 = arith.addf %502, %503 : vector<20x128xf32>
    %505 = vector.extract_strided_slice %504 {offsets = [15, 0], sizes = [5, 128], strides = [1, 1]} : vector<20x128xf32> to vector<5x128xf32>
    %c0_246 = arith.constant 0 : index
    %c0_247 = arith.constant 0 : index
    %506 = vector.load %arg25[%c0_246, %c0_247] : memref<128x128xbf16, #tpu.memory_space<vmem>>, vector<128x128xbf16>
    %507 = arith.truncf %505 : vector<5x128xf32> to vector<5x128xbf16>
    %cst_248 = arith.constant dense<0.000000e+00> : vector<5x128xf32>
    %508 = tpu.matmul %507, %506, %cst_248 {dimension_numbers = #tpu.dot_dimension_numbers<[1], [1], [0], [0], [0, 0, 1, 0], [], []>} : vector<5x128xbf16>, vector<128x128xbf16>, vector<5x128xf32> -> vector<5x128xf32>
    %c0_249 = arith.constant 0 : index
    %c0_250 = arith.constant 0 : index
    %509 = vector.load %arg26[%c0_249, %c0_250] : memref<1x128xf32, #tpu.memory_space<vmem>>, vector<1x128xf32>
    %510 = vector.broadcast %509 : vector<1x128xf32> to vector<5x128xf32>
    %511 = arith.addf %508, %510 : vector<5x128xf32>
    %cst_251 = arith.constant 0.000000e+00 : f32
    %512 = vector.broadcast %cst_251 : f32 to vector<5x128xf32>
    %513 = arith.maximumf %511, %512 : vector<5x128xf32>
    %c0_252 = arith.constant 0 : index
    %c0_253 = arith.constant 0 : index
    %514 = vector.load %arg27[%c0_252, %c0_253] : memref<32x128xbf16, #tpu.memory_space<vmem>>, vector<32x128xbf16>
    %515 = arith.truncf %513 : vector<5x128xf32> to vector<5x128xbf16>
    %cst_254 = arith.constant dense<0.000000e+00> : vector<5x32xf32>
    %516 = tpu.matmul %515, %514, %cst_254 {dimension_numbers = #tpu.dot_dimension_numbers<[1], [1], [0], [0], [0, 0, 1, 0], [], []>} : vector<5x128xbf16>, vector<32x128xbf16>, vector<5x32xf32> -> vector<5x32xf32>
    %c0_255 = arith.constant 0 : index
    %c0_256 = arith.constant 0 : index
    %517 = vector.load %arg28[%c0_255, %c0_256] : memref<1x32xf32, #tpu.memory_space<vmem>>, vector<1x32xf32>
    %518 = vector.broadcast %517 : vector<1x32xf32> to vector<5x32xf32>
    %519 = arith.addf %516, %518 : vector<5x32xf32>
    %cst_257 = arith.constant 0.000000e+00 : f32
    %520 = vector.broadcast %cst_257 : f32 to vector<5x32xf32>
    %521 = arith.maximumf %519, %520 : vector<5x32xf32>
    %c0_258 = arith.constant 0 : index
    %c0_259 = arith.constant 0 : index
    %522 = vector.load %arg29[%c0_258, %c0_259] : memref<7x32xbf16, #tpu.memory_space<vmem>>, vector<7x32xbf16>
    %523 = arith.truncf %521 : vector<5x32xf32> to vector<5x32xbf16>
    %cst_260 = arith.constant dense<0.000000e+00> : vector<5x7xf32>
    %524 = tpu.matmul %523, %522, %cst_260 {dimension_numbers = #tpu.dot_dimension_numbers<[1], [1], [0], [0], [0, 0, 1, 0], [], []>} : vector<5x32xbf16>, vector<7x32xbf16>, vector<5x7xf32> -> vector<5x7xf32>
    %c0_261 = arith.constant 0 : index
    %c0_262 = arith.constant 0 : index
    %525 = vector.load %arg30[%c0_261, %c0_262] : memref<1x7xf32, #tpu.memory_space<vmem>>, vector<1x7xf32>
    %526 = vector.broadcast %525 : vector<1x7xf32> to vector<5x7xf32>
    %527 = arith.addf %524, %526 : vector<5x7xf32>
    %c0_263 = arith.constant 0 : index
    %c0_264 = arith.constant 0 : index
    %528 = vector.load %arg31[%c0_263, %c0_264] : memref<7x32xbf16, #tpu.memory_space<vmem>>, vector<7x32xbf16>
    %529 = arith.truncf %521 : vector<5x32xf32> to vector<5x32xbf16>
    %cst_265 = arith.constant dense<0.000000e+00> : vector<5x7xf32>
    %530 = tpu.matmul %529, %528, %cst_265 {dimension_numbers = #tpu.dot_dimension_numbers<[1], [1], [0], [0], [0, 0, 1, 0], [], []>} : vector<5x32xbf16>, vector<7x32xbf16>, vector<5x7xf32> -> vector<5x7xf32>
    %c0_266 = arith.constant 0 : index
    %c0_267 = arith.constant 0 : index
    %531 = vector.load %arg32[%c0_266, %c0_267] : memref<1x7xf32, #tpu.memory_space<vmem>>, vector<1x7xf32>
    %532 = vector.broadcast %531 : vector<1x7xf32> to vector<5x7xf32>
    %533 = arith.addf %530, %532 : vector<5x7xf32>
    %cst_268 = arith.constant 5.000000e-01 : f32
    %534 = vector.broadcast %cst_268 : f32 to vector<5x7xf32>
    %535 = arith.mulf %534, %533 : vector<5x7xf32>
    %536 = math.exp %535 : vector<5x7xf32>
    %c0_269 = arith.constant 0 : index
    %c0_270 = arith.constant 0 : index
    %c0_271 = arith.constant 0 : index
    %537 = vector.load %arg4[%c0_269, %c0_270, %c0_271] : memref<1x5x7xf32, #tpu.memory_space<vmem>>, vector<1x5x7xf32>
    %538 = vector.shape_cast %537 : vector<1x5x7xf32> to vector<5x7xf32>
    %539 = arith.mulf %536, %538 : vector<5x7xf32>
    %540 = arith.addf %527, %539 : vector<5x7xf32>
    %c0_272 = arith.constant 0 : index
    %c0_273 = arith.constant 0 : index
    %c0_274 = arith.constant 0 : index
    %541 = vector.load %arg33[%c0_272, %c0_273, %c0_274] : memref<1x5x7xf32, #tpu.memory_space<vmem>>, vector<1x5x7xf32>
    %542 = vector.shape_cast %541 : vector<1x5x7xf32> to vector<5x7xf32>
    %543 = vector.shape_cast %540 : vector<5x7xf32> to vector<1x5x7xf32>
    tpu.vector_store %arg33[%c0_272, %c0_273, %c0_274], %543 {strides = array<i32>} : memref<1x5x7xf32, #tpu.memory_space<vmem>>, vector<1x5x7xf32>,
    return
  }
  func.func @transform_0(%arg0: i32) -> (i32, i32, i32) {
    %c0_i32 = arith.constant 0 : i32
    %c0_i32_0 = arith.constant 0 : i32
    %c0_i32_1 = arith.constant 0 : i32
    return %arg0, %c0_i32, %c0_i32_0 : i32, i32, i32
  }
  func.func @transform_1(%arg0: i32) -> (i32, i32, i32) {
    %c0_i32 = arith.constant 0 : i32
    %c0_i32_0 = arith.constant 0 : i32
    %c0_i32_1 = arith.constant 0 : i32
    return %arg0, %c0_i32, %c0_i32_0 : i32, i32, i32
  }
  func.func @transform_2(%arg0: i32) -> (i32, i32, i32) {
    %c0_i32 = arith.constant 0 : i32
    %c0_i32_0 = arith.constant 0 : i32
    %c0_i32_1 = arith.constant 0 : i32
    return %arg0, %c0_i32, %c0_i32_0 : i32, i32, i32
  }
  func.func @transform_3(%arg0: i32) -> (i32, i32, i32) {
    %c0_i32 = arith.constant 0 : i32
    %c0_i32_0 = arith.constant 0 : i32
    %c0_i32_1 = arith.constant 0 : i32
    return %arg0, %c0_i32, %c0_i32_0 : i32, i32, i32
  }
  func.func @transform_4(%arg0: i32) -> (i32, i32) {
    %c0_i32 = arith.constant 0 : i32
    %c0_i32_0 = arith.constant 0 : i32
    %c0_i32_1 = arith.constant 0 : i32
    return %c0_i32, %c0_i32_0 : i32, i32
  }
  func.func @transform_5(%arg0: i32) -> (i32, i32) {
    %c0_i32 = arith.constant 0 : i32
    %c0_i32_0 = arith.constant 0 : i32
    %c0_i32_1 = arith.constant 0 : i32
    return %c0_i32, %c0_i32_0 : i32, i32
  }
  func.func @transform_6(%arg0: i32) -> (i32, i32) {
    %c0_i32 = arith.constant 0 : i32
    %c0_i32_0 = arith.constant 0 : i32
    %c0_i32_1 = arith.constant 0 : i32
    return %c0_i32, %c0_i32_0 : i32, i32
  }
  func.func @transform_7(%arg0: i32) -> (i32, i32) {
    %c0_i32 = arith.constant 0 : i32
    %c0_i32_0 = arith.constant 0 : i32
    %c0_i32_1 = arith.constant 0 : i32
    return %c0_i32, %c0_i32_0 : i32, i32
  }
  func.func @transform_8(%arg0: i32) -> (i32, i32) {
    %c0_i32 = arith.constant 0 : i32
    %c0_i32_0 = arith.constant 0 : i32
    %c0_i32_1 = arith.constant 0 : i32
    return %c0_i32, %c0_i32_0 : i32, i32
  }
  func.func @transform_9(%arg0: i32) -> (i32, i32) {
    %c0_i32 = arith.constant 0 : i32
    %c0_i32_0 = arith.constant 0 : i32
    %c0_i32_1 = arith.constant 0 : i32
    return %c0_i32, %c0_i32_0 : i32, i32
  }
  func.func @transform_10(%arg0: i32) -> (i32, i32) {
    %c0_i32 = arith.constant 0 : i32
    %c0_i32_0 = arith.constant 0 : i32
    %c0_i32_1 = arith.constant 0 : i32
    return %c0_i32, %c0_i32_0 : i32, i32
  }
  func.func @transform_11(%arg0: i32) -> (i32, i32) {
    %c0_i32 = arith.constant 0 : i32
    %c0_i32_0 = arith.constant 0 : i32
    %c0_i32_1 = arith.constant 0 : i32
    return %c0_i32, %c0_i32_0 : i32, i32
  }
  func.func @transform_12(%arg0: i32) -> (i32, i32, i32) {
    %c0_i32 = arith.constant 0 : i32
    %c0_i32_0 = arith.constant 0 : i32
    %c0_i32_1 = arith.constant 0 : i32
    %c0_i32_2 = arith.constant 0 : i32
    return %c0_i32, %c0_i32_0, %c0_i32_1 : i32, i32, i32
  }
  func.func @transform_13(%arg0: i32) -> (i32, i32, i32) {
    %c0_i32 = arith.constant 0 : i32
    %c0_i32_0 = arith.constant 0 : i32
    %c0_i32_1 = arith.constant 0 : i32
    %c0_i32_2 = arith.constant 0 : i32
    return %c0_i32, %c0_i32_0, %c0_i32_1 : i32, i32, i32
  }
  func.func @transform_14(%arg0: i32) -> (i32, i32, i32) {
    %c0_i32 = arith.constant 0 : i32
    %c0_i32_0 = arith.constant 0 : i32
    %c0_i32_1 = arith.constant 0 : i32
    %c0_i32_2 = arith.constant 0 : i32
    return %c0_i32, %c0_i32_0, %c0_i32_1 : i32, i32, i32
  }
  func.func @transform_15(%arg0: i32) -> (i32, i32, i32) {
    %c0_i32 = arith.constant 0 : i32
    %c0_i32_0 = arith.constant 0 : i32
    %c0_i32_1 = arith.constant 0 : i32
    %c0_i32_2 = arith.constant 0 : i32
    return %c0_i32, %c0_i32_0, %c0_i32_1 : i32, i32, i32
  }
  func.func @transform_16(%arg0: i32) -> (i32, i32, i32) {
    %c0_i32 = arith.constant 0 : i32
    %c0_i32_0 = arith.constant 0 : i32
    %c0_i32_1 = arith.constant 0 : i32
    %c0_i32_2 = arith.constant 0 : i32
    return %c0_i32, %c0_i32_0, %c0_i32_1 : i32, i32, i32
  }
  func.func @transform_17(%arg0: i32) -> (i32, i32, i32) {
    %c0_i32 = arith.constant 0 : i32
    %c0_i32_0 = arith.constant 0 : i32
    %c0_i32_1 = arith.constant 0 : i32
    %c0_i32_2 = arith.constant 0 : i32
    return %c0_i32, %c0_i32_0, %c0_i32_1 : i32, i32, i32
  }
  func.func @transform_18(%arg0: i32) -> (i32, i32, i32) {
    %c0_i32 = arith.constant 0 : i32
    %c0_i32_0 = arith.constant 0 : i32
    %c0_i32_1 = arith.constant 0 : i32
    %c0_i32_2 = arith.constant 0 : i32
    return %c0_i32, %c0_i32_0, %c0_i32_1 : i32, i32, i32
  }
  func.func @transform_19(%arg0: i32) -> (i32, i32, i32) {
    %c0_i32 = arith.constant 0 : i32
    %c0_i32_0 = arith.constant 0 : i32
    %c0_i32_1 = arith.constant 0 : i32
    %c0_i32_2 = arith.constant 0 : i32
    return %c0_i32, %c0_i32_0, %c0_i32_1 : i32, i32, i32
  }
  func.func @transform_20(%arg0: i32) -> (i32, i32, i32) {
    %c0_i32 = arith.constant 0 : i32
    %c0_i32_0 = arith.constant 0 : i32
    %c0_i32_1 = arith.constant 0 : i32
    %c0_i32_2 = arith.constant 0 : i32
    return %c0_i32, %c0_i32_0, %c0_i32_1 : i32, i32, i32
  }
  func.func @transform_21(%arg0: i32) -> (i32, i32, i32) {
    %c0_i32 = arith.constant 0 : i32
    %c0_i32_0 = arith.constant 0 : i32
    %c0_i32_1 = arith.constant 0 : i32
    %c0_i32_2 = arith.constant 0 : i32
    return %c0_i32, %c0_i32_0, %c0_i32_1 : i32, i32, i32
  }
  func.func @transform_22(%arg0: i32) -> (i32, i32, i32) {
    %c0_i32 = arith.constant 0 : i32
    %c0_i32_0 = arith.constant 0 : i32
    %c0_i32_1 = arith.constant 0 : i32
    %c0_i32_2 = arith.constant 0 : i32
    return %c0_i32, %c0_i32_0, %c0_i32_1 : i32, i32, i32
  }
  func.func @transform_23(%arg0: i32) -> (i32, i32, i32) {
    %c0_i32 = arith.constant 0 : i32
    %c0_i32_0 = arith.constant 0 : i32
    %c0_i32_1 = arith.constant 0 : i32
    %c0_i32_2 = arith.constant 0 : i32
    return %c0_i32, %c0_i32_0, %c0_i32_1 : i32, i32, i32
  }
  func.func @transform_24(%arg0: i32) -> (i32, i32) {
    %c0_i32 = arith.constant 0 : i32
    %c0_i32_0 = arith.constant 0 : i32
    %c0_i32_1 = arith.constant 0 : i32
    return %c0_i32, %c0_i32_0 : i32, i32
  }
  func.func @transform_25(%arg0: i32) -> (i32, i32) {
    %c0_i32 = arith.constant 0 : i32
    %c0_i32_0 = arith.constant 0 : i32
    %c0_i32_1 = arith.constant 0 : i32
    return %c0_i32, %c0_i32_0 : i32, i32
  }
  func.func @transform_26(%arg0: i32) -> (i32, i32) {
    %c0_i32 = arith.constant 0 : i32
    %c0_i32_0 = arith.constant 0 : i32
    %c0_i32_1 = arith.constant 0 : i32
    return %c0_i32, %c0_i32_0 : i32, i32
  }
  func.func @transform_27(%arg0: i32) -> (i32, i32) {
    %c0_i32 = arith.constant 0 : i32
    %c0_i32_0 = arith.constant 0 : i32
    %c0_i32_1 = arith.constant 0 : i32
    return %c0_i32, %c0_i32_0 : i32, i32
  }
  func.func @transform_28(%arg0: i32) -> (i32, i32) {
    %c0_i32 = arith.constant 0 : i32
    %c0_i32_0 = arith.constant 0 : i32
    %c0_i32_1 = arith.constant 0 : i32
    return %c0_i32, %c0_i32_0 : i32, i32
  }
  func.func @transform_29(%arg0: i32) -> (i32, i32) {
    %c0_i32 = arith.constant 0 : i32
    %c0_i32_0 = arith.constant 0 : i32
    %c0_i32_1 = arith.constant 0 : i32
    return %c0_i32, %c0_i32_0 : i32, i32
  }
  func.func @transform_30(%arg0: i32) -> (i32, i32) {
    %c0_i32 = arith.constant 0 : i32
    %c0_i32_0 = arith.constant 0 : i32
    %c0_i32_1 = arith.constant 0 : i32
    return %c0_i32, %c0_i32_0 : i32, i32
  }
  func.func @transform_31(%arg0: i32) -> (i32, i32) {
    %c0_i32 = arith.constant 0 : i32
    %c0_i32_0 = arith.constant 0 : i32
    %c0_i32_1 = arith.constant 0 : i32
    return %c0_i32, %c0_i32_0 : i32, i32
  }
  func.func @transform_32(%arg0: i32) -> (i32, i32, i32) {
    %c0_i32 = arith.constant 0 : i32
    %c0_i32_0 = arith.constant 0 : i32
    %c0_i32_1 = arith.constant 0 : i32
    return %arg0, %c0_i32, %c0_i32_0 : i32, i32, i32
  }
}

</mosaic_0001>

<bundles_post_ra>
// kernel: clip_adapter_transformer_forward.1
= control target key start
LH: loop header
LB: loop body
LE: loop exit
PB: predicated region body
PF: predicated region fallthrough
CT: control target
= control target key end

     0   :  { %s15074_s6 = smov 1   ;;  %s15075_s10 = smov 2   ;;  %s16890_s0 = inlined_call_operand.smem [shape: u32[33], index: -1, kind: input, shape index: {}] }
   0x1   :  { %s15148_s5 = sld [smem:[%s16890_s0]]   ;;  %s15076_s14 = smov 3  }
   0x2   :  { %s15153_s9 = sld [smem:[%s16890_s0 + %s15074_s6]]   ;;  %s15077_s18 = smov 4  }
   0x3   :  { %s15158_s13 = sld [smem:[%s16890_s0 + %s15075_s10]]   ;;  %s15078_s22 = smov 5  }
   0x4   :  { %s15163_s17 = sld [smem:[%s16890_s0 + %s15076_s14]]   ;;  %s15079_s26 = smov 6  }
   0x5   :  { %s15168_s21 = sld [smem:[%s16890_s0 + %s15077_s18]]   ;;  %s15080_s30 = smov 7  }
   0x6   :  { %s15173_s25 = sld [smem:[%s16890_s0 + %s15078_s22]]   ;;  %s15081_s4 = smov 8  }
   0x7   :  { %16908 = sst [smem:[#allocation41_spill]] %s15148_s5  ;;  %s15082_s10 = smov 9  }
   0x8   :  { %16909 = sst [smem:[#allocation42_spill]] %s15153_s9  ;;  %s15083_s15 = smov 10  }
   0x9   :  { %16910 = sst [smem:[#allocation43_spill]] %s15158_s13  ;;  %s15084_s20 = smov 11  }
   0xa   :  { %16911 = sst [smem:[#allocation44_spill]] %s15163_s17  ;;  %s15086_s1 = smov 13  }
   0xb   :  { %16912 = sst [smem:[#allocation45_spill]] %s15168_s21  ;;  %s15087_s7 = smov 14  }
   0xc   :  { %16913 = sst [smem:[#allocation46_spill]] %s15173_s25  ;;  %s15089_s22 = smov 16  }
   0xd   :  { %s15178_s29 = sld [smem:[%s16890_s0 + %s15079_s26]]   ;;  %s15085_s26 = smov 12  }
   0xe   :  { %s15183_s3 = sld [smem:[%s16890_s0 + %s15080_s30]]   ;;  %s15090_s28 = smov 17  }
   0xf   :  { %s15188_s8 = sld [smem:[%s16890_s0 + %s15081_s4]]  }
  0x10   :  { %s15193_s14 = sld [smem:[%s16890_s0 + %s15082_s10]]  }
  0x11   :  { %s15198_s19 = sld [smem:[%s16890_s0 + %s15083_s15]]   ;;  %s15088_s15 = smov 15  }
  0x12   :  { %s15203_s24 = sld [smem:[%s16890_s0 + %s15084_s20]]  }
  0x13   :  { %s15208_s30 = sld [smem:[%s16890_s0 + %s15085_s26]]  }
  0x14   :  { %16914 = sst [smem:[#allocation47_spill]] %s15183_s3 }
  0x15   :  { %s15213_s6 = sld [smem:[%s16890_s0 + %s15086_s1]]  }
  0x16   :  { %16915 = sst [smem:[#allocation48_spill]] %s15193_s14 }
  0x17   :  { %16916 = sst [smem:[#allocation49_spill]] %s15198_s19 }
  0x18   :  { %s15218_s12 = sld [smem:[%s16890_s0 + %s15087_s7]]   ;;  %s15091_s7 = smov 18  }
  0x19   :  { %s15223_s20 = sld [smem:[%s16890_s0 + %s15088_s15]]   ;;  %s15092_s15 = smov 19  }
  0x1a   :  { %s15228_s27 = sld [smem:[%s16890_s0 + %s15089_s22]]   ;;  %s15093_s22 = smov 20  }
  0x1b   :  { %s15233_s4 = sld [smem:[%s16890_s0 + %s15090_s28]]   ;;  %s15094_s28 = smov 21  }
  0x1c   :  { %s15238_s17 = sld [smem:[%s16890_s0 + %s15091_s7]]   ;;  %s15095_s7 = smov 22  }
  0x1d   :  { %s15253_s19 = sld [smem:[%s16890_s0 + %s15094_s28]]   ;;  %s15098_s28 = smov 25  }
  0x1e   :  { %16917 = sst [smem:[#allocation50_spill]] %s15218_s12 }
  0x1f   :  { %16918 = sst [smem:[#allocation51_spill]] %s15223_s20 }
  0x20   :  { %s15243_s20 = sld [smem:[%s16890_s0 + %s15092_s15]]   ;;  %s15096_s15 = smov 23  }
  0x21   :  { %16919 = sst [smem:[#allocation52_spill]] %s15233_s4 }
  0x22   :  { %16920 = sst [smem:[#allocation53_spill]] %s15238_s17 }
  0x23   :  { %s15248_s12 = sld [smem:[%s16890_s0 + %s15093_s22]]   ;;  %s15097_s22 = smov 24  }
  0x24   :  { %16921 = sst [smem:[#allocation54_spill]] %s15253_s19 }
  0x25   :  { %s15258_s17 = sld [smem:[%s16890_s0 + %s15095_s7]]   ;;  %s15099_s7 = smov 26  }
  0x26   :  { %s15263_s25 = sld [smem:[%s16890_s0 + %s15096_s15]]   ;;  %s15100_s15 = smov 27  }
  0x27   :  { %s15268_s13 = sld [smem:[%s16890_s0 + %s15097_s22]]   ;;  %s15101_s22 = smov 28  }
  0x28   :  { %s15273_s19 = sld [smem:[%s16890_s0 + %s15098_s28]]   ;;  %s15102_s28 = smov 29  }
  0x29   :  { %s15278_s5 = sld [smem:[%s16890_s0 + %s15099_s7]]   ;;  %s15103_s7 = smov 30  }
  0x2a   :  { %s15283_s9 = sld [smem:[%s16890_s0 + %s15100_s15]]   ;;  %s15104_s15 = smov 31  }
  0x2b   :  { %s15293_s21 = sld [smem:[%s16890_s0 + %s15102_s28]]  }
  0x2c   :  { %16922 = sst [smem:[#allocation55_spill]] %s15263_s25 }
  0x2d   :  { %16923 = sst [smem:[#allocation56_spill]] %s15268_s13 }
  0x2e   :  { %s15288_s13 = sld [smem:[%s16890_s0 + %s15101_s22]]   ;;  %s15105_s22 = smov 32  }
  0x2f   :  { %16924 = sst [smem:[#allocation57_spill]] %s15278_s5 }
  0x30   :  { %s15298_s5 = sld [smem:[%s16890_s0 + %s15103_s7]]  }
  0x31   :  { %s15303_s25 = sld [smem:[%s16890_s0 + %s15104_s15]]  }
  0x34   :  { %16925 = sst [smem:[#allocation58_spill]] %s15288_s13 }
  0x35   :  { %s15308_s13 = sld [smem:[%s16890_s0 + %s15105_s22]]  }
  0x36   :  { %70 = vsyncpa [#allocation3], 0 }
  0x37   :  { %71 = vsyncpa [#allocation5], 0 }
  0x38   :  { %72 = vsyncpa [#allocation8], 0 }
  0x39   :  { %73 = vsyncpa [#allocation11], 0 }
  0x3a   :  { %74 = vsyncpa [#allocation14], 0 }
  0x3b   :  { %75 = vsyncpa [#allocation17], 0 }
  0x3c   :  { %76 = vsyncpa [#allocation20], 0 }
  0x3d   :  { %77 = vsyncpa [#allocation23], 0 }
  0x3e   :  { %78 = vsyncpa [#allocation26], 0 }
  0x3f   :  { %79 = vsyncpa [#allocation29], 0  ;;  %s15310_s28 = smov 0  }
  0x40 LB: > { %s15106_s0 = smov [#allocation4]   ;;  %s15316_s2 = sadd.s32 4294967295, %s15072_s28   ;;  %s15072_s28 = sphi %s15310_s28, %s85_s28  }
  0x41   : > { %s840_s1 = sshll.u32 %s15106_s0, 4  ;;  %p11551_p0 = scmp.ge.s32.totalorder %s15072_s28, 1  ;;  %s841_s1 = int_to_ptr.vmem [resolvable:$true] %s840_s1 }
  0x42   : > { %p808_p1 = scmp.lt.s32.totalorder %s15072_s28, 3  ;;  %p16904_p2 = scmp.eq.s32.totalorder %s15316_s2, 0 }
  0x43   : > { %s15107_s10 = smov [#allocation7]   ;;  %s15108_s15 = smov [#allocation10]  }
  0x44   : > { %p15321_p3 = pnand %p11551_p0, %p808_p1  ;;  %s864_s11 = sshll.u32 %s15107_s10, 4  ;;  %s15327_s11 = int_to_ptr.vmem [resolvable:$true] %s864_s11 }
  0x45   : > { %s888_s16 = sshll.u32 %s15108_s15, 4  ;;  %s15109_s22 = smov [#allocation13]   ;;  %s15335_s16 = int_to_ptr.vmem [resolvable:$true] %s888_s16 }
  0x46   : > { %s16926_s7 = scalar_select %p15321_p3, 1, 0 }
  0x47   : > { %p13748_p4 = pneg %p15321_p3  ;;  %s15337_s23 = sshll.u32 %s15109_s22, 4  ;;  %s921_s23 = int_to_ptr.vmem [resolvable:$true] %s15337_s23 }
  0x48   : > { %s14543_s0 = scalar_lea.vmem %s841_s1, 16  ;;  %s14550_s10 = scalar_lea.vmem %s841_s1, 32 }
  0x49   : > { %p15331_p5 = pnand %p16904_p2, %p13748_p4  ;;  %p14544_p7 = scmp.ne.s32.totalorder %s841_s1, %s14543_s0 }
  0x4a   : > { %p14551_p10 = scmp.lt.s32.totalorder %s841_s1, %s841_s1  ;;  %p14552_p11 = scmp.lt.s32.totalorder %s14550_s10, %s14543_s0 }
  0x4b   : > { %p15341_p6 = pneg %p15331_p5 }
  0x4c   : > { %p14553_p12 = por %p14552_p11, %p14551_p10 }
  0x4d   : > { %p14546_p8 = pnand %p14544_p7, %p15341_p6 }
  0x4f   : > { %p14547_p9 = pneg %p14546_p8 }
  0x51   : > { %p14554_p13 = pnand %p14553_p12, %p14547_p9 }
  0x53   : > { %14557 = shalt.err (!%p14554_p13)
}
  0x54   : > { %s16929_s3 = sld [smem:[#allocation47_spill]]  ;;  %s14569_s15 = scalar_lea.vmem %s15327_s11, 16 }
  0x55   : > { %p14570_p0 = scmp.ne.s32.totalorder %s15327_s11, %s14569_s15  ;;  %s14576_s22 = scalar_lea.vmem %s15327_s11, 32 }
  0x56   : > { %p14577_p7 = scmp.lt.s32.totalorder %s15327_s11, %s15327_s11  ;;  %p14578_p8 = scmp.lt.s32.totalorder %s14576_s22, %s14569_s15 }
  0x57   : > { %p14572_p1 = pnand %p14570_p0, %p15341_p6 }
  0x58   : > { %p14579_p9 = por %p14578_p8, %p14577_p7 }
  0x59   : > { %p14573_p4 = pneg %p14572_p1 }
  0x5a   : > { %13754 = dma.hbm_to_vmem [thread:$0]  (!%p15331_p5), %s16929_s3, 16, %s841_s1, [#allocation5]  }
  0x5b   : > { %p14580_p10 = pnand %p14579_p9, %p14573_p4 }
  0x5d   : > { %14583 = shalt.err (!%p14580_p10)
}
  0x5e   : > { %s16930_s14 = sld [smem:[#allocation48_spill]]  ;;  %s14595_s1 = scalar_lea.vmem %s15335_s16, 6144 }
  0x5f   : > { %p14596_p11 = scmp.ne.s32.totalorder %s15335_s16, %s14595_s1  ;;  %p14603_p0 = scmp.lt.s32.totalorder %s15335_s16, %s15335_s16 }
  0x60   : > { %p14604_p1 = scmp.lt.s32.totalorder %s14595_s1, %s14595_s1 }
  0x61   : > { %p14598_p12 = pnand %p14596_p11, %p15341_p6 }
  0x62   : > { %p14605_p7 = por %p14604_p1, %p14603_p0 }
  0x63   : > { %p14599_p13 = pneg %p14598_p12 }
  0x64   : > { %13760 = dma.hbm_to_vmem [thread:$0]  (!%p15331_p5), %s16930_s14, 16, %s15327_s11, [#allocation8]  }
  0x65   : > { %p14606_p4 = pnand %p14605_p7, %p14599_p13 }
  0x67   : > { %14609 = shalt.err (!%p14606_p4)
}
  0x68   : > { %s16898_s0 = smov 64   ;;  %s16897_s10 = smov 4  }
  0x69   : > { %13766 = dma.hbm_to_vmem [thread:$0]  (!%p15331_p5), %s15208_s30, 6144, %s15335_s16, [#allocation11], %s16898_s0, %s16898_s0, %s16897_s10  }
  0x6a   : > { %s14621_s11 = scalar_lea.vmem %s921_s23, 32  ;;  %p14629_p11 = scmp.lt.s32.totalorder %s921_s23, %s921_s23 }
  0x6b   : > { %p14622_p8 = scmp.ne.s32.totalorder %s921_s23, %s14621_s11  ;;  %p14630_p12 = scmp.lt.s32.totalorder %s14621_s11, %s14621_s11 }
  0x6d   : > { %p14624_p9 = pnand %p14622_p8, %p15341_p6  ;;  %p14631_p13 = por %p14630_p12, %p14629_p11 }
  0x6f   : > { %p14625_p10 = pneg %p14624_p9 }
  0x71   : > { %p14632_p0 = pnand %p14631_p13, %p14625_p10 }
  0x73   : > { %14635 = shalt.err (!%p14632_p0)
}
  0x74   : > { %s16902_s15 = smov 16   ;;  %s16900_s22 = smov 1  }
  0x75   : > { %13772 = dma.hbm_to_vmem [thread:$0]  (!%p15331_p5), %s15228_s27, 32, %s921_s23, [#allocation14], %s16902_s15, %s16902_s15, %s16900_s22  }
  0x76   : > { %s15114_s16 = smov [#allocation16]  }
  0x77   : > { %s949_s1 = sshll.u32 %s15114_s16, 4  ;;  %s950_s1 = int_to_ptr.vmem [resolvable:$true] %s949_s1 }
  0x78   : > { %s14647_s10 = scalar_lea.vmem %s950_s1, 512  ;;  %p14655_p8 = scmp.lt.s32.totalorder %s950_s1, %s950_s1 }
  0x79   : > { %p14648_p1 = scmp.ne.s32.totalorder %s950_s1, %s14647_s10  ;;  %p14656_p9 = scmp.lt.s32.totalorder %s14647_s10, %s14647_s10 }
  0x7b   : > { %p14650_p7 = pnand %p14648_p1, %p15341_p6  ;;  %p14657_p10 = por %p14656_p9, %p14655_p8 }
  0x7d   : > { %p14651_p4 = pneg %p14650_p7 }
  0x7f   : > { %p14658_p11 = pnand %p14657_p10, %p14651_p4 }
  0x81   : > { %14661 = shalt.err (!%p14658_p11)
}
  0x82   : > { %s15115_s11 = smov 256   ;;  %s15116_s23 = smov [#allocation19]  }
  0x83   : > { %13778 = dma.hbm_to_vmem [thread:$0]  (!%p15331_p5), %s15243_s20, 512, %s950_s1, [#allocation17], %s15115_s11, %s15115_s11, %s16902_s15  }
  0x84   : > { %s978_s16 = sshll.u32 %s15116_s23, 4  ;;  %s15117_s0 = smov [#allocation22]   ;;  %s979_s16 = int_to_ptr.vmem [resolvable:$true] %s978_s16 }
  0x85   : > { %s1008_s22 = sshll.u32 %s15117_s0, 4  ;;  %s14673_s3 = scalar_lea.vmem %s979_s16, 32  ;;  %s1009_s22 = int_to_ptr.vmem [resolvable:$true] %s1008_s22 }
  0x86   : > { %p14674_p12 = scmp.ne.s32.totalorder %s979_s16, %s14673_s3  ;;  %p14681_p1 = scmp.lt.s32.totalorder %s979_s16, %s979_s16 }
  0x87   : > { %p14682_p7 = scmp.lt.s32.totalorder %s14673_s3, %s14673_s3 }
  0x88   : > { %p14676_p13 = pnand %p14674_p12, %p15341_p6 }
  0x89   : > { %p14683_p4 = por %p14682_p7, %p14681_p1 }
  0x8a   : > { %p14677_p0 = pneg %p14676_p13 }
  0x8c   : > { %p14684_p8 = pnand %p14683_p4, %p14677_p0 }
  0x8e   : > { %14687 = shalt.err (!%p14684_p8)
}
  0x8f   : > { %s16931_s10 = smov 1   ;;  %s14699_s0 = scalar_lea.vmem %s1009_s22, 16 }
  0x90   : > { %13784 = dma.hbm_to_vmem [thread:$0]  (!%p15331_p5), %s15258_s17, 32, %s979_s16, [#allocation20], %s16902_s15, %s16902_s15, %s16931_s10  }
  0x91   : > { %p14700_p9 = scmp.ne.s32.totalorder %s1009_s22, %s14699_s0  ;;  %s14706_s1 = scalar_lea.vmem %s1009_s22, 32 }
  0x92   : > { %p14707_p12 = scmp.lt.s32.totalorder %s1009_s22, %s1009_s22  ;;  %p14708_p13 = scmp.lt.s32.totalorder %s14706_s1, %s14699_s0 }
  0x93   : > { %p14702_p10 = pnand %p14700_p9, %p15341_p6 }
  0x94   : > { %p14709_p1 = por %p14708_p13, %p14707_p12 }
  0x95   : > { %p14703_p11 = pneg %p14702_p10 }
  0x97   : > { %p14710_p0 = pnand %p14709_p1, %p14703_p11 }
  0x99   : > { %14713 = shalt.err (!%p14710_p0)
}
  0x9a   : > { %13790 = dma.hbm_to_vmem [thread:$0]  (!%p15331_p5), %s15273_s19, 16, %s1009_s22, [#allocation23]  }
  0x9b   : > { %s15118_s3 = smov [#allocation25]   ;;  %s15119_s23 = smov [#allocation28]  }
  0x9c   : > { %s1032_s11 = sshll.u32 %s15118_s3, 4  ;;  %s1057_s16 = sshll.u32 %s15119_s23, 4  ;;  %s1033_s11 = int_to_ptr.vmem [resolvable:$true] %s1032_s11  ;;  %s1058_s16 = int_to_ptr.vmem [resolvable:$true] %s1057_s16 }
  0x9d   : > { %s14725_s15 = scalar_lea.vmem %s1033_s11, 16  ;;  %s14732_s14 = scalar_lea.vmem %s1033_s11, 32 }
  0x9e   : > { %p14726_p7 = scmp.ne.s32.totalorder %s1033_s11, %s14725_s15  ;;  %p14733_p9 = scmp.lt.s32.totalorder %s1033_s11, %s1033_s11 }
  0x9f   : > { %p14734_p10 = scmp.lt.s32.totalorder %s14732_s14, %s14725_s15 }
  0xa0   : > { %p14728_p4 = pnand %p14726_p7, %p15341_p6 }
  0xa1   : > { %p14735_p11 = por %p14734_p10, %p14733_p9 }
  0xa2   : > { %p14729_p8 = pneg %p14728_p4 }
  0xa4   : > { %p14736_p12 = pnand %p14735_p11, %p14729_p8 }
  0xa6   : > { %14739 = shalt.err (!%p14736_p12)
}
  0xa7   : > { %13796 = dma.hbm_to_vmem [thread:$0]  (!%p15331_p5), %s15283_s9, 16, %s1033_s11, [#allocation26]  }
  0xa8   : > { %s14751_s22 = scalar_lea.vmem %s1058_s16, 64  ;;  %p14759_p2 = scmp.lt.s32.totalorder %s1058_s16, %s1058_s16 }
  0xa9   : > { %p14752_p13 = scmp.ne.s32.totalorder %s1058_s16, %s14751_s22  ;;  %p14760_p7 = scmp.lt.s32.totalorder %s14751_s22, %s14751_s22 }
  0xab   : > { %p14754_p1 = pnand %p14752_p13, %p15341_p6  ;;  %p14761_p4 = por %p14760_p7, %p14759_p2 }
  0xad   : > { %p14755_p0 = pneg %p14754_p1 }
  0xaf   : > { %p14762_p3 = pnand %p14761_p4, %p14755_p0 }
  0xb1   : > { %14765 = shalt.err (!%p14762_p3)
}
  0xb2   : > { %13802 = dma.hbm_to_vmem [thread:$0]  (!%p15331_p5), %s15298_s5, 64, %s1058_s16, [#allocation29]  }
  0xb3   : > { %s15120_s14 = smov [#allocation2]  }
  0xb4   : > { %s826_s15 = sshll.u32 %s15120_s14, 4  ;;  %s827_s15 = int_to_ptr.vmem [resolvable:$true] %s826_s15 }
  0xb5   : > { %s14777_s0 = scalar_lea.vmem %s827_s15, 6144  ;;  %p14785_p11 = scmp.lt.s32.totalorder %s827_s15, %s827_s15 }
  0xb6   : > { %p14778_p8 = scmp.ne.s32.totalorder %s827_s15, %s14777_s0  ;;  %p14786_p12 = scmp.lt.s32.totalorder %s14777_s0, %s14777_s0 }
  0xb8   : > { %p14780_p9 = pnand %p14778_p8, %p15341_p6  ;;  %p14787_p13 = por %p14786_p12, %p14785_p11 }
  0xba   : > { %p14781_p10 = pneg %p14780_p9 }
  0xbc   : > { %p14788_p1 = pnand %p14787_p13, %p14781_p10 }
  0xbe   : > { %14791 = shalt.err (!%p14788_p1)
}
  0xbf   : > { %s15121_s1 = smov 384   ;;  %s15122_s3 = smov 24  }
  0xc0   : > { %13751 = dma.hbm_to_vmem [thread:$0]  (!%p15331_p5), %s15178_s29, 6144, %s827_s15, [#allocation3], %s15121_s1, %s15121_s1, %s15122_s3  }
  0xc1   : > { %s15123_s11 = smov [#allocation6]   ;;  %s15124_s16 = smov [#allocation9]  }
  0xc2   : > { %s850_s23 = sshll.u32 %s15123_s11, 4  ;;  %s878_s22 = sshll.u32 %s15124_s16, 4  ;;  %s851_s23 = int_to_ptr.vmem [resolvable:$true] %s850_s23  ;;  %s879_s22 = int_to_ptr.vmem [resolvable:$true] %s878_s22 }
  0xc3   : > { %s14803_s14 = scalar_lea.vmem %s851_s23, 6144  ;;  %p14811_p7 = scmp.lt.s32.totalorder %s851_s23, %s851_s23 }
  0xc4   : > { %p14804_p2 = scmp.ne.s32.totalorder %s851_s23, %s14803_s14  ;;  %p14812_p4 = scmp.lt.s32.totalorder %s14803_s14, %s14803_s14 }
  0xc6   : > { %p14806_p3 = pnand %p14804_p2, %p15341_p6  ;;  %p14813_p8 = por %p14812_p4, %p14811_p7 }
  0xc8   : > { %p14807_p0 = pneg %p14806_p3 }
  0xca   : > { %p14814_p9 = pnand %p14813_p8, %p14807_p0 }
  0xcc   : > { %14817 = shalt.err (!%p14814_p9)
}
  0xcd   : > { %13757 = dma.hbm_to_vmem [thread:$0]  (!%p15331_p5), %s15188_s8, 6144, %s851_s23, [#allocation5], %s15121_s1, %s15121_s1, %s15122_s3  }
  0xce   : > { %s14829_s15 = scalar_lea.vmem %s879_s22, 128  ;;  %p14837_p13 = scmp.lt.s32.totalorder %s879_s22, %s879_s22 }
  0xcf   : > { %p14830_p10 = scmp.ne.s32.totalorder %s879_s22, %s14829_s15  ;;  %p14838_p1 = scmp.lt.s32.totalorder %s14829_s15, %s14829_s15 }
  0xd1   : > { %p14832_p11 = pnand %p14830_p10, %p15341_p6  ;;  %p14839_p2 = por %p14838_p1, %p14837_p13 }
  0xd3   : > { %p14833_p12 = pneg %p14832_p11 }
  0xd5   : > { %p14840_p3 = pnand %p14839_p2, %p14833_p12 }
  0xd7   : > { %14843 = shalt.err (!%p14840_p3)
}
  0xd8   : > { %13763 = dma.hbm_to_vmem [thread:$0]  (!%p15331_p5), %s15203_s24, 128, %s879_s22, [#allocation8]  }
  0xd9   : > { %s15125_s0 = smov [#allocation12]  }
  0xda   : > { %s901_s11 = sshll.u32 %s15125_s0, 4  ;;  %s902_s11 = int_to_ptr.vmem [resolvable:$true] %s901_s11 }
  0xdb   : > { %s14855_s16 = scalar_lea.vmem %s902_s11, 96  ;;  %p14863_p8 = scmp.lt.s32.totalorder %s902_s11, %s902_s11 }
  0xdc   : > { %p14856_p0 = scmp.ne.s32.totalorder %s902_s11, %s14855_s16  ;;  %p14864_p9 = scmp.lt.s32.totalorder %s14855_s16, %s14855_s16 }
  0xde   : > { %p14858_p7 = pnand %p14856_p0, %p15341_p6  ;;  %p14865_p10 = por %p14864_p9, %p14863_p8 }
  0xe0   : > { %p14859_p4 = pneg %p14858_p7 }
  0xe2   : > { %p14866_p11 = pnand %p14865_p10, %p14859_p4 }
  0xe4   : > { %14869 = shalt.err (!%p14866_p11)
}
  0xe5   : > { %s15126_s1 = smov 48   ;;  %s15127_s3 = smov 3  }
  0xe6   : > { %13769 = dma.hbm_to_vmem [thread:$0]  (!%p15331_p5), %s15213_s6, 96, %s902_s11, [#allocation11], %s15126_s1, %s15126_s1, %s15127_s3  }
  0xe7   : > { %s15128_s23 = smov [#allocation15]   ;;  %s15129_s14 = smov [#allocation18]  }
  0xe8   : > { %s933_s22 = sshll.u32 %s15128_s23, 4  ;;  %s962_s15 = sshll.u32 %s15129_s14, 4  ;;  %s934_s22 = int_to_ptr.vmem [resolvable:$true] %s933_s22  ;;  %s963_s15 = int_to_ptr.vmem [resolvable:$true] %s962_s15 }
  0xe9   : > { %s14881_s0 = scalar_lea.vmem %s934_s22, 32  ;;  %p14889_p2 = scmp.lt.s32.totalorder %s934_s22, %s934_s22 }
  0xea   : > { %p14882_p12 = scmp.ne.s32.totalorder %s934_s22, %s14881_s0  ;;  %p14890_p3 = scmp.lt.s32.totalorder %s14881_s0, %s14881_s0 }
  0xec   : > { %p14884_p13 = pnand %p14882_p12, %p15341_p6  ;;  %p14891_p0 = por %p14890_p3, %p14889_p2 }
  0xee   : > { %p14885_p1 = pneg %p14884_p13 }
  0xf0   : > { %p14892_p7 = pnand %p14891_p0, %p14885_p1 }
  0xf2   : > { %14895 = shalt.err (!%p14892_p7)
}
  0xf3   : > { %s16932_s16 = smov 16   ;;  %s16933_s4 = sld [smem:[#allocation52_spill]] }
  0xf4   : > { %s14907_s11 = scalar_lea.vmem %s963_s15, 32768  ;;  %p14915_p10 = scmp.lt.s32.totalorder %s963_s15, %s963_s15 }
  0xf5   : > { %p14908_p4 = scmp.ne.s32.totalorder %s963_s15, %s14907_s11  ;;  %p14916_p11 = scmp.lt.s32.totalorder %s14907_s11, %s14907_s11 }
  0xf7   : > { %p14910_p8 = pnand %p14908_p4, %p15341_p6  ;;  %p14917_p12 = por %p14916_p11, %p14915_p10 }
  0xf9   : > { %13775 = dma.hbm_to_vmem [thread:$0]  (!%p15331_p5), %s16933_s4, 32, %s934_s22, [#allocation14], %s16932_s16, %s16932_s16, %s16931_s10  }
  0xfa   : > { %p14911_p9 = pneg %p14910_p8 }
  0xfc   : > { %p14918_p13 = pnand %p14917_p12, %p14911_p9 }
  0xfe   : > { %14921 = shalt.err (!%p14918_p13)
}
  0xff   : > { %s15130_s1 = smov 1024   ;;  %s16934_s3 = smov 64  }
 0x100   : > { %13781 = dma.hbm_to_vmem [thread:$0]  (!%p15331_p5), %s15248_s12, 32768, %s963_s15, [#allocation17], %s15130_s1, %s15130_s1, %s16934_s3  }
 0x101   : > { %s15131_s23 = smov [#allocation21]   ;;  %s15132_s14 = smov [#allocation24]  }
 0x102   : > { %s991_s22 = sshll.u32 %s15131_s23, 4  ;;  %s1018_s0 = sshll.u32 %s15132_s14, 4  ;;  %s992_s22 = int_to_ptr.vmem [resolvable:$true] %s991_s22  ;;  %s1019_s0 = int_to_ptr.vmem [resolvable:$true] %s1018_s0 }
 0x103   : > { %s14933_s4 = scalar_lea.vmem %s992_s22, 32  ;;  %p14941_p0 = scmp.lt.s32.totalorder %s992_s22, %s992_s22 }
 0x104   : > { %p14934_p1 = scmp.ne.s32.totalorder %s992_s22, %s14933_s4  ;;  %p14942_p7 = scmp.lt.s32.totalorder %s14933_s4, %s14933_s4 }
 0x106   : > { %p14936_p2 = pnand %p14934_p1, %p15341_p6  ;;  %p14943_p4 = por %p14942_p7, %p14941_p0 }
 0x108   : > { %p14937_p3 = pneg %p14936_p2 }
 0x10a   : > { %p14944_p8 = pnand %p14943_p4, %p14937_p3 }
 0x10c   : > { %14947 = shalt.err (!%p14944_p8)
}
 0x10d   : > { %s16935_s15 = sld [smem:[#allocation55_spill]]  ;;  %s14959_s11 = scalar_lea.vmem %s1019_s0, 256 }
 0x10e   : > { %p14960_p9 = scmp.ne.s32.totalorder %s1019_s0, %s14959_s11  ;;  %p14967_p12 = scmp.lt.s32.totalorder %s1019_s0, %s1019_s0 }
 0x10f   : > { %p14968_p13 = scmp.lt.s32.totalorder %s14959_s11, %s14959_s11 }
 0x110   : > { %p14962_p10 = pnand %p14960_p9, %p15341_p6 }
 0x111   : > { %p14969_p1 = por %p14968_p13, %p14967_p12 }
 0x112   : > { %p14963_p11 = pneg %p14962_p10 }
 0x113   : > { %13787 = dma.hbm_to_vmem [thread:$0]  (!%p15331_p5), %s16935_s15, 32, %s992_s22, [#allocation20], %s16932_s16, %s16932_s16, %s16931_s10  }
 0x114   : > { %p14970_p2 = pnand %p14969_p1, %p14963_p11 }
 0x116   : > { %14973 = shalt.err (!%p14970_p2)
}
 0x117   : > { %s16936_s4 = smov 4   ;;  %s16937_s1 = sld [smem:[#allocation57_spill]] }
 0x118   : > { %s15133_s23 = smov [#allocation27]   ;;  %s15134_s16 = smov [#allocation30]  }
 0x119   : > { %s1046_s10 = sshll.u32 %s15133_s23, 4  ;;  %s1068_s22 = sshll.u32 %s15134_s16, 4  ;;  %s1047_s10 = int_to_ptr.vmem [resolvable:$true] %s1046_s10  ;;  %s1069_s22 = int_to_ptr.vmem [resolvable:$true] %s1068_s22 }
 0x11a   : > { %s14985_s14 = scalar_lea.vmem %s1047_s10, 16  ;;  %s14992_s15 = scalar_lea.vmem %s1047_s10, 32 }
 0x11b   : > { %p14986_p3 = scmp.ne.s32.totalorder %s1047_s10, %s14985_s14  ;;  %p14993_p4 = scmp.lt.s32.totalorder %s1047_s10, %s1047_s10 }
 0x11c   : > { %p14994_p8 = scmp.lt.s32.totalorder %s14992_s15, %s14985_s14 }
 0x11d   : > { %13793 = dma.hbm_to_vmem [thread:$0]  (!%p15331_p5), %s16937_s1, 256, %s1019_s0, [#allocation23], %s16934_s3, %s16934_s3, %s16936_s4  }
 0x11e   : > { %p14988_p0 = pnand %p14986_p3, %p15341_p6  ;;  %p14995_p9 = por %p14994_p8, %p14993_p4 }
 0x120   : > { %p14989_p7 = pneg %p14988_p0 }
 0x122   : > { %p14996_p10 = pnand %p14995_p9, %p14989_p7 }
 0x124   : > { %14999 = shalt.err (!%p14996_p10)
}
 0x125   : > { %13799 = dma.hbm_to_vmem [thread:$0]  (!%p15331_p5), %s15293_s21, 16, %s1047_s10, [#allocation26]  }
 0x126   : > { %s15011_s3 = scalar_lea.vmem %s1069_s22, 16  ;;  %s15018_s0 = scalar_lea.vmem %s1069_s22, 32 }
 0x127   : > { %p15012_p11 = scmp.ne.s32.totalorder %s1069_s22, %s15011_s3  ;;  %p15019_p1 = scmp.lt.s32.totalorder %s1069_s22, %s1069_s22 }
 0x128   : > { %p15020_p2 = scmp.lt.s32.totalorder %s15018_s0, %s15011_s3 }
 0x129   : > { %p15014_p12 = pnand %p15012_p11, %p15341_p6 }
 0x12a   : > { %p15021_p3 = por %p15020_p2, %p15019_p1 }
 0x12b   : > { %p15015_p13 = pneg %p15014_p12 }
 0x12d   : > { %p15022_p0 = pnand %p15021_p3, %p15015_p13 }
 0x12f   : > { %15025 = shalt.err (!%p15022_p0)
}
 0x130   : > { %13805 = dma.hbm_to_vmem [thread:$0]  (!%p15331_p5), %s15303_s25, 16, %s1069_s22, [#allocation29]  }
 0x131   : > { %p16938_p7 = scmp.ne.s32.totalorder %s16926_s7, 0 }
 0x132   : > { %p16939_p4 = scmp.eq.s32.totalorder (!%p16938_p7), %s15316_s2, 0 }
 0x133   : > { %1111 = sbr.rel (%p16938_p7) target bundleno = 10217 (0x27e9), region = 148 }
 0x138   : > { %15031 = dma.done.wait (%p16939_p4), [#allocation3], 6144   ;;  %p16940_p8 = pmov %p16939_p4 }
 0x139   : > { %p16941_p6 = pmov %p16939_p4 }
 0x13a   : > { %15033 = vsyncadd (%p16940_p8), [#allocation3], 4294961152 }
 0x13b   : > { %15035 = dma.done.wait (%p16941_p6), [#allocation5], 6160   ;;  %p16942_p9 = pmov %p16939_p4 }
 0x13c   : > { %p16943_p10 = pmov %p16939_p4 }
 0x13d   : > { %15037 = vsyncadd (%p16942_p9), [#allocation5], 4294961136 }
 0x13e   : > { %15039 = dma.done.wait (%p16943_p10), [#allocation8], 144   ;;  %p16944_p5 = pmov %p16939_p4 }
 0x13f   : > { %p16945_p11 = pmov %p16939_p4 }
 0x140   : > { %15041 = vsyncadd (%p16944_p5), [#allocation8], 4294967152 }
 0x141   : > { %15043 = dma.done.wait (%p16945_p11), [#allocation11], 6240   ;;  %p16946_p12 = pmov %p16939_p4 }
 0x142   : > { %p16947_p13 = pmov %p16939_p4 }
 0x143   : > { %15045 = vsyncadd (%p16946_p12), [#allocation11], 4294961056 }
 0x144   : > { %15047 = dma.done.wait (%p16947_p13), [#allocation14], 64   ;;  %p16948_p1 = pmov %p16939_p4 }
 0x146   : > { %15049 = vsyncadd (%p16948_p1), [#allocation14], 4294967232  ;;  %p16949_p2 = pmov %p16948_p1 }
 0x147   : > { %p16950_p3 = pmov %p16948_p1 }
 0x148   : > { %15051 = dma.done.wait (%p16949_p2), [#allocation17], 33280  }
 0x149   : > { %15053 = vsyncadd (%p16950_p3), [#allocation17], 4294934016  ;;  %p16951_p0 = pmov %p16948_p1 }
 0x14b   : > { %15055 = dma.done.wait (%p16951_p0), [#allocation20], 64   ;;  %p16952_p7 = pmov %p16951_p0 }
 0x14c   : > { %p16953_p4 = pmov %p16951_p0 }
 0x14d   : > { %15057 = vsyncadd (%p16952_p7), [#allocation20], 4294967232 }
 0x14e   : > { %15059 = dma.done.wait (%p16953_p4), [#allocation23], 272   ;;  %p16954_p8 = pmov %p16951_p0 }
 0x14f   : > { %p16955_p6 = pmov %p16951_p0 }
 0x150   : > { %15061 = vsyncadd (%p16954_p8), [#allocation23], 4294967024 }
 0x151   : > { %15063 = dma.done.wait (%p16955_p6), [#allocation26], 32   ;;  %p16956_p9 = pmov %p16951_p0 }
 0x152   : > { %p16957_p10 = pmov %p16951_p0 }
 0x153   : > { %15065 = vsyncadd (%p16956_p9), [#allocation26], 4294967264 }
 0x154   : > { %15067 = dma.done.wait (%p16957_p10), [#allocation29], 80   ;;  %p16958_p5 = pmov %p16951_p0 }
 0x155   : > { %s16959_s7 = sld [smem:[#allocation45_spill]]  ;;  %v16906_v0 = vmov 0.0   ;;  %vm15136_vm0 = vmmov 0   ;;  %vm1365_vm1 = vcmask 64512   ;;  %v13919_v2 = vld [vmem:[#allocation2 + $0x154] ss:$24 sps:$4 sm:$0xff]  }
 0x156   : > { %15069 = vsyncadd (%p16958_p5), [#allocation29], 4294967216  ;;  %13195 = vmatprep.subr.bf16.mxu0 %v16906_v0  ;;  %13211 = vmatprep.mubr.msk.bf16.mxu0 %vm15136_vm0, %v16906_v0  ;;  %v13921_v4 = vld [vmem:[#allocation2 + $0x150] ss:$24 sps:$4 sm:$0xff]   ;;  %v13923_v6 = vld [vmem:[#allocation2 + $0x124] ss:$24 sps:$4 sm:$0xff]  }
 0x157   : > { %1752 = vmatprep.subr.bf16.mxu1 %v13919_v2  ;;  %s16960_s18 = sld [smem:[#allocation42_spill]]  ;;  %p1277_p11 = scmp.lt.s32.totalorder %s15316_s2, 1  ;;  %v13925_v8 = vld [vmem:[#allocation2 + $0x120] ss:$24 sps:$4 sm:$0xff]   ;;  %v13927_v9 = vld [vmem:[#allocation2 + $0xf4] ss:$24 sps:$4 sm:$0xff]  }
 0x158   : > { %1753 = vmatpush1.bf16.xpose.msra.mxu1 %v13921_v4  ;;  %v13929_v12 = vld [vmem:[#allocation2 + $0xf0] ss:$24 sps:$4 sm:$0xff]   ;;  %v13931_v13 = vld [vmem:[#allocation2 + $0xc4] ss:$24 sps:$4 sm:$0xff]   ;;  %v13933_v18 = vld [vmem:[#allocation2 + $0xc0] ss:$24 sps:$4 sm:$0xff]  }
 0x159   : > { %1754 = vmatprep.subr.bf16.mxu1 %v13923_v6  ;;  %s16975_s2 = smov (!%p1277_p11, %s15316_s2), 1  ;;  %v13935_v19 = vld [vmem:[#allocation2 + $0x94] ss:$24 sps:$4 sm:$0xff]   ;;  %v13937_v22 = vld [vmem:[#allocation2 + $0x90] ss:$24 sps:$4 sm:$0xff]   ;;  %s16961_s4 = sld [smem:[#allocation41_spill]] }
 0x15a   : > { %s13671_s26 = smul.u32 24, %s16975_s2  ;;  %v13939_v23 = vld [vmem:[#allocation2 + $0x64] ss:$24 sps:$4 sm:$0xff]   ;;  %v13941_v26 = vld [vmem:[#allocation2 + $0x60] ss:$24 sps:$4 sm:$0xff]   ;;  %s15551_s1 = sshll.u32 %s16975_s2, 3 }
 0x15b   : > { %v13918_v1 = vld [vmem:[%s16959_s7 + $0x38] sm:$0xff]   ;;  %v13922_v5 = vld [vmem:[%s16959_s7 + $0x30] sm:$0xff]   ;;  %v13926_v10 = vld [vmem:[%s16959_s7 + $0x28] sm:$0xff]   ;;  %s16962_s10 = sld [smem:[#allocation43_spill]]  ;;  %vm2332_vm2 = vcmask 1044480   ;;  %vm2334_vm3 = vcmask 1041408  }
 0x15c   : > { %v1391_v3 = vsel %vm1365_vm1, %v13918_v1, 0  ;;  %v1388_v7 = vsel %vm1365_vm1, %v13922_v5, 0  ;;  %v1385_v11 = vsel %vm1365_vm1, %v13926_v10, 0  ;;  %v13930_v14 = vld [vmem:[%s16959_s7 + $0x20] sm:$0xff]   ;;  %v13934_v20 = vld [vmem:[%s16959_s7 + $0x18] sm:$0xff]   ;;  %v13938_v24 = vld [vmem:[%s16959_s7 + $0x10] sm:$0xff]  }
 0x15d   : > { %13196 = vmatpush3.bf16.xpose.msra.mxu0 %v1391_v3  ;;  %s15533_s11 = scalar_lea.vmem %s16960_s18, %s13671_s26  ;;  %v1382_v17 = vsel %vm1365_vm1, %v13930_v14, 0  ;;  %v1379_v21 = vsel %vm1365_vm1, %v13934_v20, 0  ;;  %v1376_v25 = vsel %vm1365_vm1, %v13938_v24, 0  ;;  %v13943_v27 = vld [vmem:[#allocation2 + $0x34] ss:$24 sps:$4 sm:$0xff]   ;;  %v13946_v32 = vld [vmem:[%s16959_s7] sm:$0xff]  }
 0x15e   : > { %13197 = vmatprep.subr.bf16.mxu0 %v16906_v0  ;;  %v1433_v15 = vld [vmem:[%s15533_s11] sm:$0x77]  ;;  %v13942_v28 = vld [vmem:[%s16959_s7 + $0x8] sm:$0xff]   ;;  %v1370_v34 = vsel %vm1365_vm1, %v13946_v32, 0  ;;  %v13952_v35 = vld [vmem:[#allocation2 + $0x15c] ss:$24 sps:$4 sm:$0xff]  }
 0x15f   : > { %v11609_v16 = vcombine.high %v1433_v15, %v1433_v15  ;;  %v1373_v29 = vsel %vm1365_vm1, %v13942_v28, 0  ;;  %v13945_v30 = vld [vmem:[#allocation2 + $0x30] ss:$24 sps:$4 sm:$0xff]   ;;  %v13947_v31 = vld [vmem:[#allocation2 + $0x4] ss:$24 sps:$4 sm:$0xff]   ;;  %s1280_s23 = scalar_lea.vmem %s16961_s4, %s15551_s1  ;;  %v11608_v42 = vcombine.low %v1433_v15, %v1433_v15  ;;  %s16963_s2 = sld [smem:[#allocation46_spill]] }
 0x160   : > { %1755 = vmatpush1.bf16.xpose.msra.mxu1 %v13925_v8  ;;  %v13949_v33 = vld [vmem:[#allocation2] ss:$24 sps:$4 sm:$0xff]   ;;  %v13957_v36 = vld [vmem:[#allocation2 + $0x164] ss:$24 sps:$4 sm:$0xff]   ;;  %v15557_v41 = vld [vmem:[%s15533_s11 + $0x8] sm:$0x77] }
 0x161   : > { %1756 = vmatprep.subr.bf16.mxu1 %v13927_v9  ;;  %1784 = vmatprep.mubr.bf16.mxu1 %v11609_v16  ;;  %v1300_v37 = vld [vmem:[%s1280_s23] sm:$0x1f]  ;;  %v13950_v38 = vld [vmem:[#allocation2 + $0x158] ss:$24 sps:$4 sm:$0xff]   ;;  %v13963_v45 = vld [vmem:[#allocation2 + $0x134] ss:$24 sps:$4 sm:$0xff]   ;;  %v11611_v46 = vcombine.high %v15557_v41, %v15557_v41  ;;  %s15570_s16 = scalar_lea.vmem %s16962_s10, %s13671_s26  ;;  %v11610_v16 = vcombine.low %v15557_v41, %v15557_v41 }
 0x162   : > { %v1317_v39 = vpack.c.bf16 %v1300_v37, %v1300_v37  ;;  %v13955_v40 = vld [vmem:[#allocation2 + $0x160] ss:$24 sps:$4 sm:$0xff]   ;;  %v15560_v43 = vld [vmem:[%s15533_s11 + $0x10] sm:$0x77]  ;;  %v13960_v44 = vld [vmem:[#allocation2 + $0x12c] ss:$24 sps:$4 sm:$0xff]  }
 0x163   : > { %v11613_v47 = vcombine.high %v15560_v43, %v15560_v43  ;;  %v13958_v48 = vld [vmem:[#allocation2 + $0x128] ss:$24 sps:$4 sm:$0xff]   ;;  %v13966_v50 = vld [vmem:[#allocation2 + $0xfc] ss:$24 sps:$4 sm:$0xff]   ;;  %v13964_v52 = vld [vmem:[#allocation2 + $0xf8] ss:$24 sps:$4 sm:$0xff]  }
 0x164   : > { %v13961_v49 = vld [vmem:[#allocation2 + $0x130] ss:$24 sps:$4 sm:$0xff]   ;;  %v13969_v51 = vld [vmem:[#allocation2 + $0x104] ss:$24 sps:$4 sm:$0xff]   ;;  %v13967_v53 = vld [vmem:[#allocation2 + $0x100] ss:$24 sps:$4 sm:$0xff]  }
 0x165   : > { %13198 = vmatpush3.bf16.xpose.msra.mxu0 %v1388_v7  ;;  %v13972_v54 = vld [vmem:[#allocation2 + $0xcc] ss:$24 sps:$4 sm:$0xff]   ;;  %v13970_v56 = vld [vmem:[#allocation2 + $0xc8] ss:$24 sps:$4 sm:$0xff]   ;;  %v13978_v58 = vld [vmem:[#allocation2 + $0x9c] ss:$24 sps:$4 sm:$0xff]  }
 0x166   : > { %13199 = vmatprep.subr.bf16.mxu0 %v16906_v0  ;;  %v13975_v55 = vld [vmem:[#allocation2 + $0xd4] ss:$24 sps:$4 sm:$0xff]   ;;  %v13973_v57 = vld [vmem:[#allocation2 + $0xd0] ss:$24 sps:$4 sm:$0xff]   ;;  %v13981_v59 = vld [vmem:[#allocation2 + $0xa4] ss:$24 sps:$4 sm:$0xff]  }
 0x167   : > { %v13976_v60 = vld [vmem:[#allocation2 + $0x98] ss:$24 sps:$4 sm:$0xff]   ;;  %v13984_v62 = vld [vmem:[#allocation2 + $0x6c] ss:$24 sps:$4 sm:$0xff]   ;;  %v13982_v1 = vld [vmem:[#allocation2 + $0x68] ss:$24 sps:$4 sm:$0xff]  }
 0x168   : > { %1757 = vmatpush1.bf16.xpose.msra.mxu1 %v13929_v12  ;;  %v13979_v61 = vld [vmem:[#allocation2 + $0xa0] ss:$24 sps:$4 sm:$0xff]   ;;  %v13987_v63 = vld [vmem:[#allocation2 + $0x74] ss:$24 sps:$4 sm:$0xff]   ;;  %v13985_v2 = vld [vmem:[#allocation2 + $0x70] ss:$24 sps:$4 sm:$0xff]  }
 0x169   : > { %1758 = vmatprep.subr.bf16.mxu1 %v13931_v13  ;;  %v13990_v3 = vld [vmem:[#allocation2 + $0x3c] ss:$24 sps:$4 sm:$0xff]   ;;  %v13988_v5 = vld [vmem:[#allocation2 + $0x38] ss:$24 sps:$4 sm:$0xff]   ;;  %v13996_v7 = vld [vmem:[#allocation2 + $0xc] ss:$24 sps:$4 sm:$0xff]  }
 0x16a   : > { %v13993_v4 = vld [vmem:[#allocation2 + $0x44] ss:$24 sps:$4 sm:$0xff]   ;;  %v13991_v6 = vld [vmem:[#allocation2 + $0x40] ss:$24 sps:$4 sm:$0xff]   ;;  %v13999_v8 = vld [vmem:[#allocation2 + $0x14] ss:$24 sps:$4 sm:$0xff]  }
 0x16b   : > { %v13994_v9 = vld [vmem:[#allocation2 + $0x8] ss:$24 sps:$4 sm:$0xff]   ;;  %v14019_v28 = vld [vmem:[#allocation6 + $0xf8] ss:$24 sps:$4 sm:$0xff]   ;;  %v14042_v41 = vld [vmem:[#allocation6 + $0x34] ss:$24 sps:$4 sm:$0xff]  }
 0x16c   : > { %v13997_v10 = vld [vmem:[#allocation2 + $0x10] ss:$24 sps:$4 sm:$0xff]   ;;  %v14009_v12 = vld [vmem:[#allocation6 + $0x15c] ss:$24 sps:$4 sm:$0xff]   ;;  %s16964_s22 = sld [smem:[#allocation49_spill]]  ;;  %vm2336_vm4 = vcmask 1046528  }
 0x16d   : > { %13200 = vmatpush3.bf16.xpose.msra.mxu0 %v1385_v11  ;;  %v14004_v11 = vld [vmem:[#allocation6 + $0x154] ss:$24 sps:$4 sm:$0xff]   ;;  %v15573_v13 = vld [vmem:[%s15570_s16] sm:$0x77]  ;;  %v14002_v14 = vld [vmem:[#allocation6 + $0x150] ss:$24 sps:$4 sm:$0xff]  }
 0x16e   : > { %13201 = vmatprep.subr.bf16.mxu0 %v16906_v0  ;;  %v15576_v15 = vld [vmem:[%s15570_s16 + $0x8] sm:$0x77]  ;;  %vm2668_vm5 = vcmask 261120   ;;  %vm2739_vm6 = vcmask 158720   ;;  %vm2732_vm7 = vcmask 162816   ;;  %s16965_s14 = sld [smem:[#allocation50_spill]] }
 0x16f   : > { %v14015_v20 = vld [vmem:[#allocation6 + $0x12c] ss:$24 sps:$4 sm:$0xff]   ;;  %v14013_v24 = vld [vmem:[#allocation6 + $0x128] ss:$24 sps:$4 sm:$0xff]   ;;  %s15137_s15 = smov 96   ;;  %s15138_s3 = smov 64  }
 0x170   : > { %1759 = vmatpush1.bf16.xpose.msra.mxu1 %v13933_v18  ;;  %v14012_v18 = vld [vmem:[#allocation6 + $0x124] ss:$24 sps:$4 sm:$0xff]   ;;  %v14025_v32 = vld [vmem:[#allocation6 + $0xc8] ss:$24 sps:$4 sm:$0xff]   ;;  %s15139_s0 = smov 32   ;;  %s16966_s18 = sld [smem:[#allocation51_spill]] }
 0x171   : > { %1760 = vmatprep.subr.bf16.mxu1 %v13935_v19  ;;  %v11612_v19 = vcombine.low %v15560_v43, %v15560_v43  ;;  %v14036_v37 = vld [vmem:[#allocation6 + $0x64] ss:$24 sps:$4 sm:$0xff]   ;;  %v14040_v43 = vld [vmem:[#allocation6 + $0x30] ss:$24 sps:$4 sm:$0xff]   ;;  %s16967_s26 = sld [smem:[#allocation53_spill]]  ;;  %vm3771_vm8 = vcmask 1043456  }
 0x172   : > { %s16969_s11 = sld [smem:[#allocation54_spill]]  ;;  %vm11243_vm9 = vcmask 53248  }
 0x173   : > { %s16971_s4 = sld [smem:[#allocation56_spill]] }
 0x174   : > { %s16972_s23 = sld [smem:[#allocation58_spill]] }
 0x175   : > { %13202 = vmatpush3.bf16.xpose.msra.mxu0 %v1382_v17  ;;  %v14007_v17 = vld [vmem:[#allocation6 + $0x158] ss:$24 sps:$4 sm:$0xff]   ;;  %s16973_s10 = sld [smem:[#allocation44_spill]] }
 0x176   : > { %13203 = vmatprep.subr.bf16.mxu0 %v16906_v0 }
 0x178   : > { %1761 = vmatpush1.bf16.xpose.msra.mxu1 %v13937_v22  ;;  %v11666_v22 = vcombine.high %v15576_v15, %v15576_v15 }
 0x179   : > { %1762 = vmatprep.subr.bf16.mxu1 %v13939_v23  ;;  %v14010_v23 = vld [vmem:[#allocation6 + $0x120] ss:$24 sps:$4 sm:$0xff]  }
 0x17d   : > { %13204 = vmatpush3.bf16.xpose.msra.mxu0 %v1379_v21  ;;  %v11664_v21 = vcombine.high %v15573_v13, %v15573_v13 }
 0x17e   : > { %13205 = vmatprep.subr.bf16.mxu0 %v16906_v0 }
 0x180   : > { %1763 = vmatpush1.bf16.xpose.msra.mxu1 %v13941_v26  ;;  %v14021_v26 = vld [vmem:[#allocation6 + $0xfc] ss:$24 sps:$4 sm:$0xff]  }
 0x181   : > { %1764 = vmatprep.subr.bf16.mxu1 %v13943_v27  ;;  %v14016_v27 = vld [vmem:[#allocation6 + $0xf0] ss:$24 sps:$4 sm:$0xff]  }
 0x185   : > { %13206 = vmatpush3.bf16.xpose.msra.mxu0 %v1376_v25  ;;  %v14018_v25 = vld [vmem:[#allocation6 + $0xf4] ss:$24 sps:$4 sm:$0xff]  }
 0x186   : > { %13207 = vmatprep.subr.bf16.mxu0 %v16906_v0 }
 0x188   : > { %1765 = vmatpush1.bf16.xpose.msra.mxu1 %v13945_v30  ;;  %v14027_v30 = vld [vmem:[#allocation6 + $0xcc] ss:$24 sps:$4 sm:$0xff]  }
 0x189   : > { %1766 = vmatprep.subr.bf16.mxu1 %v13947_v31  ;;  %v14022_v31 = vld [vmem:[#allocation6 + $0xc0] ss:$24 sps:$4 sm:$0xff]  }
 0x18d   : > { %13208 = vmatpush3.bf16.xpose.msra.mxu0 %v1373_v29  ;;  %v14024_v29 = vld [vmem:[#allocation6 + $0xc4] ss:$24 sps:$4 sm:$0xff]  }
 0x18e   : > { %13209 = vmatprep.subr.bf16.mxu0 %v16906_v0 }
 0x190   : > { %1767 = vmatpush1.bf16.xpose.msra.mxu1 %v13949_v33  ;;  %v14030_v33 = vld [vmem:[#allocation6 + $0x94] ss:$24 sps:$4 sm:$0xff]  }
 0x191   : > { %1832 = vmatprep.subr.bf16.mxu1 %v13957_v36  ;;  %v14031_v36 = vld [vmem:[#allocation6 + $0x98] ss:$24 sps:$4 sm:$0xff]  }
 0x195   : > { %13210 = vmatpush3.bf16.xpose.msra.mxu0 %v1370_v34  ;;  %v14033_v34 = vld [vmem:[#allocation6 + $0x9c] ss:$24 sps:$4 sm:$0xff]  }
 0x196   : > { %1792 = vmatprep.subr.bf16.mxu0 %v13952_v35  ;;  %v14028_v35 = vld [vmem:[#allocation6 + $0x90] ss:$24 sps:$4 sm:$0xff]  }
 0x197   : > { %1785 = vmatmul.mubr.bf16.vlgmr.msra.gmra.mxu1 %v11608_v42  ;;  %v14045_v42 = vld [vmem:[#allocation6 + $0x3c] ss:$24 sps:$4 sm:$0xff]  }
 0x198   : > { %1833 = vmatpush1.bf16.xpose.msra.mxu1 %v13955_v40  ;;  %1864 = vmatprep.mubr.bf16.mxu1 %v11613_v47  ;;  %v14037_v40 = vld [vmem:[#allocation6 + $0x68] ss:$24 sps:$4 sm:$0xff]  }
 0x199   : > { %1834 = vmatprep.subr.bf16.mxu1 %v13963_v45  ;;  %v14048_v45 = vld [vmem:[#allocation6 + $0x4] ss:$24 sps:$4 sm:$0xff]   ;;  %v14046_v47 = vld [vmem:[#allocation6] ss:$24 sps:$4 sm:$0xff]  }
 0x19c   : > { %13212 = vmatmul.mubr.msk.bf16.vlgmr.msra.gmra.mxu0 %vm1365_vm1, %v1317_v39  ;;  %v14034_v39 = vld [vmem:[#allocation6 + $0x60] ss:$24 sps:$4 sm:$0xff]  }
 0x19d   : > { %1793 = vmatpush1.bf16.xpose.msra.mxu0 %v13950_v38  ;;  %1824 = vmatprep.mubr.bf16.mxu0 %v11611_v46  ;;  %v14039_v38 = vld [vmem:[#allocation6 + $0x6c] ss:$24 sps:$4 sm:$0xff]  }
 0x19e   : > { %1794 = vmatprep.subr.bf16.mxu0 %v13960_v44  ;;  %v14043_v44 = vld [vmem:[#allocation6 + $0x38] ss:$24 sps:$4 sm:$0xff]   ;;  %v14051_v46 = vld [vmem:[#allocation6 + $0xc] ss:$24 sps:$4 sm:$0xff]  }
 0x1a0   : > { %1835 = vmatpush1.bf16.xpose.msra.mxu1 %v13961_v49  ;;  %v14056_v49 = vld [vmem:[#allocation6 + $0x164] ss:$24 sps:$4 sm:$0xff]  }
 0x1a1   : > { %1836 = vmatprep.subr.bf16.mxu1 %v13969_v51  ;;  %v14054_v51 = vld [vmem:[#allocation6 + $0x160] ss:$24 sps:$4 sm:$0xff]  }
 0x1a5   : > { %1795 = vmatpush1.bf16.xpose.msra.mxu0 %v13958_v48  ;;  %v14049_v48 = vld [vmem:[#allocation6 + $0x8] ss:$24 sps:$4 sm:$0xff]  }
 0x1a6   : > { %1796 = vmatprep.subr.bf16.mxu0 %v13966_v50  ;;  %v1874_v50 = vld [vmem:[%s15570_s16 + $0x10] sm:$0x77]  ;;  %s1294_s16 = scalar_lea.vmem %s16973_s10, %s15551_s1 }
 0x1a8   : > { %1837 = vmatpush1.bf16.xpose.msra.mxu1 %v13967_v53  ;;  %v14061_v53 = vld [vmem:[#allocation6 + $0x134] ss:$24 sps:$4 sm:$0xff]  }
 0x1a9   : > { %1838 = vmatprep.subr.bf16.mxu1 %v13975_v55  ;;  %v11668_v55 = vcombine.high %v1874_v50, %v1874_v50 }
 0x1ad   : > { %1797 = vmatpush1.bf16.xpose.msra.mxu0 %v13964_v52  ;;  %v11663_v52 = vcombine.low %v15573_v13, %v15573_v13 }
 0x1ae   : > { %1798 = vmatprep.subr.bf16.mxu0 %v13972_v54  ;;  %v11665_v54 = vcombine.low %v15576_v15, %v15576_v15  ;;  %v14083_v15 = vld [vmem:[#allocation10 + $0x38] sm:$0xff]  }
 0x1b0   : > { %1839 = vmatpush1.bf16.xpose.msra.mxu1 %v13973_v57  ;;  %v14064_v57 = vld [vmem:[#allocation6 + $0x104] ss:$24 sps:$4 sm:$0xff]  }
 0x1b1   : > { %1840 = vmatprep.subr.bf16.mxu1 %v13981_v59  ;;  %v14067_v59 = vld [vmem:[#allocation6 + $0xd4] ss:$24 sps:$4 sm:$0xff]  }
 0x1b5   : > { %1799 = vmatpush1.bf16.xpose.msra.mxu0 %v13970_v56  ;;  %v14059_v56 = vld [vmem:[#allocation6 + $0x130] ss:$24 sps:$4 sm:$0xff]  }
 0x1b6   : > { %1800 = vmatprep.subr.bf16.mxu0 %v13978_v58  ;;  %v14062_v58 = vld [vmem:[#allocation6 + $0x100] ss:$24 sps:$4 sm:$0xff]  }
 0x1b8   : > { %1841 = vmatpush1.bf16.xpose.msra.mxu1 %v13979_v61  ;;  %v14070_v61 = vld [vmem:[#allocation6 + $0xa4] ss:$24 sps:$4 sm:$0xff]  }
 0x1b9   : > { %1842 = vmatprep.subr.bf16.mxu1 %v13987_v63  ;;  %v14073_v63 = vld [vmem:[#allocation6 + $0x74] ss:$24 sps:$4 sm:$0xff]  }
 0x1bd   : > { %1801 = vmatpush1.bf16.xpose.msra.mxu0 %v13976_v60  ;;  %v14065_v60 = vld [vmem:[#allocation6 + $0xd0] ss:$24 sps:$4 sm:$0xff]  }
 0x1be   : > { %1802 = vmatprep.subr.bf16.mxu0 %v13984_v62  ;;  %v14068_v62 = vld [vmem:[#allocation6 + $0xa0] ss:$24 sps:$4 sm:$0xff]  }
 0x1c0   : > { %1843 = vmatpush1.bf16.xpose.msra.mxu1 %v13985_v2  ;;  %v14076_v2 = vld [vmem:[#allocation6 + $0x44] ss:$24 sps:$4 sm:$0xff]  }
 0x1c1   : > { %1844 = vmatprep.subr.bf16.mxu1 %v13993_v4  ;;  %v14079_v4 = vld [vmem:[#allocation6 + $0x14] ss:$24 sps:$4 sm:$0xff]  }
 0x1c5   : > { %1803 = vmatpush1.bf16.xpose.msra.mxu0 %v13982_v1  ;;  %v14071_v1 = vld [vmem:[#allocation6 + $0x70] ss:$24 sps:$4 sm:$0xff]  }
 0x1c6   : > { %1804 = vmatprep.subr.bf16.mxu0 %v13990_v3  ;;  %v14074_v3 = vld [vmem:[#allocation6 + $0x40] ss:$24 sps:$4 sm:$0xff]  }
 0x1c8   : > { %1845 = vmatpush1.bf16.xpose.msra.mxu1 %v13991_v6  ;;  %v11667_v6 = vcombine.low %v1874_v50, %v1874_v50 }
 0x1c9   : > { %1846 = vmatprep.subr.bf16.mxu1 %v13999_v8 }
 0x1cd   : > { %1805 = vmatpush1.bf16.xpose.msra.mxu0 %v13988_v5  ;;  %v14077_v5 = vld [vmem:[#allocation6 + $0x10] ss:$24 sps:$4 sm:$0xff]  }
 0x1ce   : > { %1806 = vmatprep.subr.bf16.mxu0 %v13996_v7 }
 0x1d0   : > { %1847 = vmatpush1.bf16.xpose.msra.mxu1 %v13997_v10 }
 0x1d1   : > { %2231 = vmatprep.subr.bf16.mxu1 %v14009_v12 }
 0x1d5   : > { %1807 = vmatpush1.bf16.xpose.msra.mxu0 %v13994_v9 }
 0x1d6   : > { %2191 = vmatprep.subr.bf16.mxu0 %v14004_v11 }
 0x1d7   : > { %1865 = vmatmul.mubr.bf16.vlgmr.msra.gmra.mxu1 %v11612_v19  ;;  %v14086_v19 = vld [vmem:[#allocation10 + $0x68] sm:$0xff]  }
 0x1d8   : > { %2232 = vmatpush1.bf16.xpose.msra.mxu1 %v14007_v17  ;;  %2263 = vmatprep.mubr.bf16.mxu1 %v11666_v22  ;;  %v14089_v22 = vld [vmem:[#allocation10 + $0x20] sm:$0xff]  }
 0x1d9   : > { %2233 = vmatprep.subr.bf16.mxu1 %v14015_v20  ;;  %v14087_v20 = vld [vmem:[#allocation10 + $0x28] sm:$0xff]  }
 0x1dc   : > { %1825 = vmatmul.mubr.bf16.vlgmr.msra.gmra.mxu0 %v11610_v16  ;;  %v14084_v16 = vld [vmem:[#allocation10 + $0x70] sm:$0xff]  }
 0x1dd   : > { %2192 = vmatpush1.bf16.xpose.msra.mxu0 %v14002_v14  ;;  %2223 = vmatprep.mubr.bf16.mxu0 %v11664_v21  ;;  %v14082_v14 = vld [vmem:[#allocation10 + $0x78] sm:$0xff]   ;;  %v14088_v21 = vld [vmem:[#allocation10 + $0x60] sm:$0xff]  }
 0x1de   : > { %2193 = vmatprep.subr.bf16.mxu0 %v14012_v18  ;;  %v14085_v18 = vld [vmem:[#allocation10 + $0x30] sm:$0xff]  }
 0x1e0   : > { %2234 = vmatpush1.bf16.xpose.msra.mxu1 %v14013_v24  ;;  %v14091_v24 = vld [vmem:[#allocation10 + $0x18] sm:$0xff]  }
 0x1e1   : > { %2235 = vmatprep.subr.bf16.mxu1 %v14021_v26  ;;  %v14093_v26 = vld [vmem:[#allocation10 + $0x10] sm:$0xff]  }
 0x1e5   : > { %2194 = vmatpush1.bf16.xpose.msra.mxu0 %v14010_v23  ;;  %v14090_v23 = vld [vmem:[#allocation10 + $0x58] sm:$0xff]  }
 0x1e6   : > { %2195 = vmatprep.subr.bf16.mxu0 %v14018_v25  ;;  %v14092_v25 = vld [vmem:[#allocation10 + $0x50] sm:$0xff]  }
 0x1e8   : > { %2236 = vmatpush1.bf16.xpose.msra.mxu1 %v14019_v28  ;;  %v14095_v28 = vld [vmem:[#allocation10 + $0x8] sm:$0xff]  }
 0x1e9   : > { %2237 = vmatprep.subr.bf16.mxu1 %v14027_v30 }
 0x1ed   : > { %2196 = vmatpush1.bf16.xpose.msra.mxu0 %v14016_v27  ;;  %v14094_v27 = vld [vmem:[#allocation10 + $0x48] sm:$0xff]  }
 0x1ee   : > { %2197 = vmatprep.subr.bf16.mxu0 %v14024_v29  ;;  %v11607_v29 = vld [vmem:[#allocation4] ss:$0 sm:$0xff] }
 0x1f0   : > { %2238 = vmatpush1.bf16.xpose.msra.mxu1 %v14025_v32 }
 0x1f1   : > { %2239 = vmatprep.subr.bf16.mxu1 %v14033_v34 }
 0x1f5   : > { %2198 = vmatpush1.bf16.xpose.msra.mxu0 %v14022_v31  ;;  %v11597_v31 = vld [vmem:[%s16963_s2] ss:$0 sm:$0xff]  ;;  %s1298_s2 = scalar_lea.vmem %s15308_s13, %s15551_s1 }
 0x1f6   : > { %2199 = vmatprep.subr.bf16.mxu0 %v14030_v33 }
 0x1f8   : > { %2240 = vmatpush1.bf16.xpose.msra.mxu1 %v14031_v36  ;;  %v14096_v36 = vld [vmem:[#allocation10 + $0x40] sm:$0xff]  }
 0x1f9   : > { %2241 = vmatprep.subr.bf16.mxu1 %v14039_v38 }
 0x1fd   : > { %2200 = vmatpush1.bf16.xpose.msra.mxu0 %v14028_v35 }
 0x1fe   : > { %2201 = vmatprep.subr.bf16.mxu0 %v14036_v37 }
 0x200   : > { %2242 = vmatpush1.bf16.xpose.msra.mxu1 %v14037_v40  ;;  %v14097_v40 = vld [vmem:[#allocation10] sm:$0xff]  }
 0x201   : > { %2243 = vmatprep.subr.bf16.mxu1 %v14045_v42 }
 0x205   : > { %2202 = vmatpush1.bf16.xpose.msra.mxu0 %v14034_v39 }
 0x206   : > { %2203 = vmatprep.subr.bf16.mxu0 %v14042_v41  ;;  %v2311_v41 = vld [vmem:[#allocation9] sm:$0x1f] }
 0x208   : > { %2244 = vmatpush1.bf16.xpose.msra.mxu1 %v14043_v44 }
 0x209   : > { %2245 = vmatprep.subr.bf16.mxu1 %v14051_v46 }
 0x20d   : > { %2204 = vmatpush1.bf16.xpose.msra.mxu0 %v14040_v43 }
 0x20e   : > { %2205 = vmatprep.subr.bf16.mxu0 %v14048_v45 }
 0x210   : > { %2246 = vmatpush1.bf16.xpose.msra.mxu1 %v14049_v48 }
 0x211   : > { %12655 = vmatprep.subr.bf16.mxu1 %v14082_v14 }
 0x215   : > { %2206 = vmatpush1.bf16.xpose.msra.mxu0 %v14046_v47 }
 0x216   : > { %2271 = vmatprep.subr.bf16.mxu0 %v14056_v49 }
 0x217   : > { %2264 = vmatmul.mubr.bf16.vlgmr.msra.gmra.mxu1 %v11665_v54 }
 0x218   : > { %12656 = vmatpush3.bf16.xpose.msra.mxu1 %v14083_v15  ;;  %v15614_v15 = vld [vmem:[#allocation12] sm:$0x7] }
 0x219   : > { %12657 = vmatprep.subr.bf16.mxu1 %v14084_v16 }
 0x21c   : > { %2224 = vmatmul.mubr.bf16.vlgmr.msra.gmra.mxu0 %v11663_v52 }
 0x21d   : > { %2272 = vmatpush1.bf16.xpose.msra.mxu0 %v14054_v51  ;;  %2303 = vmatprep.mubr.bf16.mxu0 %v11668_v55 }
 0x21e   : > { %2273 = vmatprep.subr.bf16.mxu0 %v14061_v53 }
 0x220   : > { %12658 = vmatpush3.bf16.xpose.msra.mxu1 %v14085_v18 }
 0x221   : > { %12659 = vmatprep.subr.bf16.mxu1 %v14086_v19 }
 0x225   : > { %2274 = vmatpush1.bf16.xpose.msra.mxu0 %v14059_v56 }
 0x226   : > { %2275 = vmatprep.subr.bf16.mxu0 %v14064_v57 }
 0x228   : > { %12660 = vmatpush3.bf16.xpose.msra.mxu1 %v14087_v20 }
 0x229   : > { %12661 = vmatprep.subr.bf16.mxu1 %v14088_v21 }
 0x22d   : > { %2276 = vmatpush1.bf16.xpose.msra.mxu0 %v14062_v58  ;;  %v11662_v58 = vld [vmem:[#allocation7] ss:$0 sm:$0xff] }
 0x22e   : > { %2277 = vmatprep.subr.bf16.mxu0 %v14067_v59 }
 0x230   : > { %12662 = vmatpush3.bf16.xpose.msra.mxu1 %v14089_v22 }
 0x231   : > { %12663 = vmatprep.subr.bf16.mxu1 %v14090_v23 }
 0x235   : > { %2278 = vmatpush1.bf16.xpose.msra.mxu0 %v14065_v60  ;;  %v11717_v60 = vld [vmem:[%s16964_s22] ss:$0 sm:$0xff] }
 0x236   : > { %2279 = vmatprep.subr.bf16.mxu0 %v14070_v61 }
 0x238   : > { %12664 = vmatpush3.bf16.xpose.msra.mxu1 %v14091_v24 }
 0x239   : > { %12665 = vmatprep.subr.bf16.mxu1 %v14092_v25 }
 0x23d   : > { %2280 = vmatpush1.bf16.xpose.msra.mxu0 %v14068_v62 }
 0x23e   : > { %2281 = vmatprep.subr.bf16.mxu0 %v14073_v63  ;;  %v2319_v63 = vadd.f32 %v11717_v60, %v2311_v41 }
 0x240   : > { %12666 = vmatpush3.bf16.xpose.msra.mxu1 %v14093_v26 }
 0x241   : > { %12667 = vmatprep.subr.bf16.mxu1 %v14094_v27 }
 0x245   : > { %2282 = vmatpush1.bf16.xpose.msra.mxu0 %v14071_v1 }
 0x246   : > { %2283 = vmatprep.subr.bf16.mxu0 %v14076_v2 }
 0x248   : > { %12668 = vmatpush3.bf16.xpose.msra.mxu1 %v14095_v28 }
 0x249   : > { %12669 = vmatprep.subr.bf16.mxu1 %v14096_v36 }
 0x24d   : > { %2284 = vmatpush1.bf16.xpose.msra.mxu0 %v14074_v3 }
 0x24e   : > { %2285 = vmatprep.subr.bf16.mxu0 %v14079_v4 }
 0x250   : > { %12670 = vmatpush3.bf16.xpose.msra.mxu1 %v14097_v40  ;;  %v14099_v40 = vld [vmem:[#allocation10 + $0xb0] sm:$0xff]  }
 0x255   : > { %2286 = vmatpush1.bf16.xpose.msra.mxu0 %v14077_v5  ;;  %v15595_v5 = vrot.slane %v2319_v63, 1 }
 0x257   : > { %v1786_v8 = vpop.f32.mrf.mxu1 }
 0x258   : > { %v1787_v30 = vadd.f32 %v11607_v29, %v1786_v8 }
 0x259   : > { %v1788_v10 = vpop.f32.mrf.mxu1 }
 0x25b   : > { %v1789_v12 = vpop.f32.mrf.mxu1 }
 0x25c   : > { %v1427_v7 = vpop.f32.mrf.mxu0  ;;  %2304 = vmatmul.mubr.bf16.vlgmr.msra.gmra.mxu0 %v11667_v6  ;;  %v2390_v12 = vlaneseq }
 0x25d   : > { %v1790_v17 = vpop.f32.mrf.mxu1  ;;  %v1428_v37 = vadd.f32 %v11597_v31, %v1427_v7 }
 0x25e   : > { %v13213_v9 = vpop.f32.mrf.mxu0 }
 0x25f   : > { %v2320_v46 = vadd.f32 %v2311_v41, %v1428_v37 }
 0x260   : > { %v1430_v11 = vpop.f32.mrf.mxu0 }
 0x261   : > { %v15605_v11 = vpack.c.bf16 %v15595_v5, %v15595_v5 }
 0x262   : > { %v13214_v13 = vpop.f32.mrf.mxu0 }
 0x263   : > { %v15609_v13 = vshrl.u32 %v2390_v12, 7 }
 0x265   : > { %v15612_v14 = vsub.s32 0, %v15609_v13  ;;  %v15619_v21 = vsub.s32 1, %v15609_v13 }
 0x267   : > { %v2393_v17 = vrot.slane %v15614_v15, %v15612_v14  ;;  %v2397_v26 = vrot.slane %v15614_v15, %v15619_v21 }
 0x297   : > { %v1866_v34 = vpop.f32.mrf.mxu1 }
 0x299   : > { %v1868_v39 = vpop.f32.mrf.mxu1 }
 0x29a   : > { %v14098_v39 = vld [vmem:[#allocation10 + $0xb8] sm:$0xff]  }
 0x29b   : > { %v1869_v44 = vpop.f32.mrf.mxu1  ;;  %13215 = vmatprep.subr.bf16.mxu0 %v14098_v39 }
 0x29c   : > { %v1826_v32 = vpop.f32.mrf.mxu0  ;;  %13216 = vmatpush3.bf16.xpose.msra.mxu0 %v14098_v39  ;;  %v14103_v44 = vld [vmem:[#allocation10 + $0x90] sm:$0xff]  }
 0x29d   : > { %v1827_v33 = vadd.f32 %v1826_v32, %v1787_v30  ;;  %v1870_v48 = vpop.f32.mrf.mxu1  ;;  %13217 = vmatprep.subr.bf16.mxu0 %v14099_v40  ;;  %v15705_v39 = vld [vmem:[%s16965_s14 + $0x18] sm:$0xff]  }
 0x29e   : > { %v1828_v35 = vpop.f32.mrf.mxu0 }
 0x29f   : > { %v1867_v38 = vadd.f32 %v1866_v34, %v1827_v33 }
 0x2a0   : > { %v1829_v42 = vpop.f32.mrf.mxu0 }
 0x2a1   : > { %v2321_v43 = vadd.f32 %v2311_v41, %v1867_v38  ;;  %v14101_v42 = vld [vmem:[#allocation10 + $0xa0] sm:$0xff]  }
 0x2a2   : > { %v1830_v45 = vpop.f32.mrf.mxu0 }
 0x2a3   : > { %v2324_v47 = vrot.slane %v2321_v43, 3  ;;  %v14102_v43 = vld [vmem:[#allocation10 + $0x98] sm:$0xff]   ;;  %v14104_v45 = vld [vmem:[#allocation10 + $0x88] sm:$0xff]  }
 0x2a4   : > { %13218 = vmatpush3.bf16.xpose.msra.mxu0 %v14099_v40  ;;  %v3156_v40 = vsel %vm2668_vm5, %v15705_v39, 0 }
 0x2a5   : > { %v15592_v49 = vsel %vm2332_vm2, %v2320_v46, %v2324_v47  ;;  %v14105_v46 = vld [vmem:[#allocation10 + $0x80] sm:$0xff]  }
 0x2d7   : > { %v2265_v51 = vpop.f32.mrf.mxu1 }
 0x2d9   : > { %v2267_v53 = vpop.f32.mrf.mxu1 }
 0x2db   : > { %v2268_v55 = vpop.f32.mrf.mxu1 }
 0x2dc   : > { %v2225_v50 = vpop.f32.mrf.mxu0 }
 0x2dd   : > { %v2269_v57 = vpop.f32.mrf.mxu1  ;;  %v2226_v59 = vadd.f32 %v11662_v58, %v2225_v50  ;;  %v15648_v58 = vsub.s32 2, %v15609_v13 }
 0x2de   : > { %v2227_v52 = vpop.f32.mrf.mxu0 }
 0x2df   : > { %v2266_v61 = vadd.f32 %v2265_v51, %v2226_v59  ;;  %v2401_v59 = vrot.slane %v15614_v15, %v15648_v58 }
 0x2e0   : > { %v2228_v54 = vpop.f32.mrf.mxu0 }
 0x2e2   : > { %v2229_v56 = vpop.f32.mrf.mxu0 }
 0x31c   : > { %v2305_v62 = vpop.f32.mrf.mxu0 }
 0x31d   : > { %v2306_v1 = vadd.f32 %v2305_v62, %v2266_v61 }
 0x31e   : > { %v2307_v2 = vpop.f32.mrf.mxu0 }
 0x31f   : > { %v2322_v3 = vadd.f32 %v2311_v41, %v2306_v1  ;;  %v14100_v41 = vld [vmem:[#allocation10 + $0xa8] sm:$0xff]  }
 0x320   : > { %v2308_v4 = vpop.f32.mrf.mxu0  ;;  %13219 = vmatprep.subr.bf16.mxu0 %v14100_v41 }
 0x321   : > { %v2327_v6 = vrot.slane %v2322_v3, 6  ;;  %13220 = vmatpush3.bf16.xpose.msra.mxu0 %v14100_v41  ;;  %v15712_v41 = vld [vmem:[%s16965_s14 + $0x10] sm:$0xff]  }
 0x322   : > { %v2309_v7 = vpop.f32.mrf.mxu0  ;;  %13221 = vmatprep.subr.bf16.mxu0 %v14101_v42 }
 0x323   : > { %v2335_v8 = vsel %vm2334_vm3, %v2324_v47, %v2327_v6 }
 0x324   : > { %v15599_v9 = vsel %vm2336_vm4, %v2335_v8, %v15595_v5 }
 0x325   : > { %v2386_v10 = vpack.c.bf16 %v15599_v9, %v15592_v49 }
 0x327   : > { %12671 = vmatprep.mubr.bf16.mxu1 %v2386_v10  ;;  %13231 = vmatprep.mubr.bf16.mxu0 %v2386_v10 }
 0x328   : > { %12672 = vmatmul.mubr.bf16.vlgmr.msra.gmra.mxu1 %v2386_v10 }
 0x329   : > { %12673 = vmatprep.mubr.bf16.mxu1 %v15605_v11  ;;  %13222 = vmatpush3.bf16.xpose.msra.mxu0 %v14101_v42  ;;  %v3153_v42 = vsel %vm2668_vm5, %v15712_v41, 0 }
 0x32a   : > { %13223 = vmatprep.subr.bf16.mxu0 %v14102_v43 }
 0x330   : > { %12674 = vmatmul.mubr.bf16.gmra.mxu1 %v15605_v11 }
 0x331   : > { %13224 = vmatpush3.bf16.xpose.msra.mxu0 %v14102_v43  ;;  %v15719_v43 = vld [vmem:[%s16965_s14 + $0x8] sm:$0xff]  }
 0x332   : > { %13225 = vmatprep.subr.bf16.mxu0 %v14103_v44 }
 0x339   : > { %13226 = vmatpush3.bf16.xpose.msra.mxu0 %v14103_v44  ;;  %v3150_v44 = vsel %vm2668_vm5, %v15719_v43, 0 }
 0x33a   : > { %13227 = vmatprep.subr.bf16.mxu0 %v14104_v45 }
 0x341   : > { %13228 = vmatpush3.bf16.xpose.msra.mxu0 %v14104_v45 }
 0x342   : > { %13229 = vmatprep.subr.bf16.mxu0 %v14105_v46 }
 0x349   : > { %13230 = vmatpush3.bf16.xpose.msra.mxu0 %v14105_v46 }
 0x350   : > { %13232 = vmatmul.mubr.bf16.vlgmr.msra.gmra.mxu0 %v15605_v11 }
 0x3e8   : > { %v2583_v16 = vpop.f32.mrf.mxu1 }
 0x3e9   : > { %v2584_v20 = vadd.f32 %v2583_v16, %v2393_v17 }
 0x3ea   : > { %v2585_v18 = vpop.f32.mrf.mxu1 }
 0x3eb   : > { %v2586_v31 = vadd.f32 %v2585_v18, %v2397_v26 }
 0x3ec   : > { %v2587_v19 = vpop.f32.mrf.mxu1 }
 0x3ed   : > { %v2588_v22 = vadd.f32 %v2587_v19, %v2393_v17 }
 0x3ee   : > { %v2589_v23 = vpop.f32.mrf.mxu1 }
 0x3ef   : > { %v15621_v24 = vpack.c.bf16 %v2588_v22, %v2584_v20  ;;  %v2590_v28 = vadd.f32 %v2589_v23, %v2397_v26 }
 0x3f0   : > { %v2593_v25 = vpop.f32.mrf.mxu1 }
 0x3f1   : > { %13239 = vmatprep.mubr.msk.bf16.mxu1 %vm2668_vm5, %v15621_v24  ;;  %v15629_v34 = vpack.c.bf16 %v2590_v28, %v2586_v31  ;;  %v2594_v37 = vadd.f32 %v2593_v25, %v2393_v17  ;;  %v15677_v28 = vld [vmem:[%s16965_s14 + $0x38] sm:$0xff]  }
 0x3f2   : > { %v2595_v27 = vpop.f32.mrf.mxu1  ;;  %13597 = vmatprep.subr.msk.bf16.mxu0 %vm2668_vm5, %v15677_v28 }
 0x3f3   : > { %v2596_v29 = vadd.f32 %v2595_v27, %v2397_v26  ;;  %v2676_v36 = vsel %vm2668_vm5, %v15629_v34, 0  ;;  %v15639_v38 = vpack.c.bf16 %v2594_v37, %v2594_v37 }
 0x3f4   : > { %v2597_v30 = vpop.f32.mrf.mxu1 }
 0x3f5   : > { %v15627_v32 = vpack.c.bf16 %v2596_v29, %v2596_v29  ;;  %v15680_v29 = vld [vmem:[%s16965_s14 + $0x30] sm:$0xff]   ;;  %v3168_v30 = vsel %vm2668_vm5, %v15677_v28, 0 }
 0x3f6   : > { %v2598_v33 = vpop.f32.mrf.mxu1  ;;  %13288 = vmatpush3.bf16.xpose.msra.mxu0 %v3168_v30  ;;  %v3165_v31 = vsel %vm2668_vm5, %v15680_v29, 0 }
 0x3f7   : > { %13583 = vmatprep.subr.msk.bf16.mxu1 %vm2668_vm5, %v15627_v32  ;;  %v2679_v35 = vsel %vm2668_vm5, %v15627_v32, 0  ;;  %13598 = vmatprep.subr.msk.bf16.mxu0 %vm2668_vm5, %v15680_v29  ;;  %v15691_v33 = vld [vmem:[%s16965_s14 + $0x28] sm:$0xff]  }
 0x3f8   : > { %13236 = vmatpush3.bf16.xpose.msra.mxu1 %v2679_v35  ;;  %v3162_v35 = vsel %vm2668_vm5, %v15691_v33, 0 }
 0x3f9   : > { %13584 = vmatprep.subr.msk.bf16.mxu1 %vm2668_vm5, %v15629_v34 }
 0x3fe   : > { %13290 = vmatpush3.bf16.xpose.msra.mxu0 %v3165_v31 }
 0x3ff   : > { %13599 = vmatprep.subr.msk.bf16.mxu0 %vm2668_vm5, %v15691_v33 }
 0x400   : > { %13238 = vmatpush3.bf16.xpose.msra.mxu1 %v2676_v36  ;;  %v15698_v36 = vld [vmem:[%s16965_s14 + $0x20] sm:$0xff]  }
 0x401   : > { %v3159_v37 = vsel %vm2668_vm5, %v15698_v36, 0 }
 0x406   : > { %13292 = vmatpush3.bf16.xpose.msra.mxu0 %v3162_v35 }
 0x407   : > { %13240 = vmatmul.mubr.msk.bf16.vlgmr.msra.gmra.mxu1 %vm2668_vm5, %v15639_v38  ;;  %13600 = vmatprep.subr.msk.bf16.mxu0 %vm2668_vm5, %v15698_v36 }
 0x40e   : > { %13294 = vmatpush3.bf16.xpose.msra.mxu0 %v3159_v37 }
 0x40f   : > { %13601 = vmatprep.subr.msk.bf16.mxu0 %vm2668_vm5, %v15705_v39 }
 0x410   : > { %v13233_v60 = vpop.f32.mrf.mxu0 }
 0x411   : > { %v2643_v62 = vadd.f32 %v13233_v60, %v2401_v59 }
 0x412   : > { %v2634_v1 = vpop.f32.mrf.mxu0 }
 0x413   : > { %v15652_v3 = vpack.c.bf16 %v2643_v62, %v2643_v62  ;;  %v2635_v22 = vadd.f32 %v2634_v1, %v2401_v59  ;;  %v15735_v1 = vld [vmem:[%s16965_s14] sm:$0xff]  }
 0x414   : > { %v13234_v6 = vpop.f32.mrf.mxu0 }
 0x415   : > { %13585 = vmatprep.subr.msk.bf16.mxu1 %vm2334_vm3, %v15652_v3  ;;  %v2778_v25 = vsel %vm2334_vm3, %v15652_v3, 0 }
 0x416   : > { %v2637_v23 = vpop.f32.mrf.mxu0  ;;  %13244 = vmatpush3.bf16.msra.mxu1 %v2778_v25  ;;  %13296 = vmatpush3.bf16.xpose.msra.mxu0 %v3156_v40 }
 0x417   : > { %v2638_v26 = vadd.f32 %v2637_v23, %v2401_v59  ;;  %13602 = vmatprep.subr.msk.bf16.mxu0 %vm2668_vm5, %v15712_v41 }
 0x419   : > { %v15664_v27 = vpack.c.bf16 %v2638_v26, %v2635_v22 }
 0x41b   : > { %13245 = vmatprep.subr.bf16.mxu1 %v15664_v27 }
 0x41c   : > { %13246 = vmatpush3.bf16.msra.mxu1 %v15664_v27 }
 0x41e   : > { %13298 = vmatpush3.bf16.xpose.msra.mxu0 %v3153_v42 }
 0x41f   : > { %13603 = vmatprep.subr.msk.bf16.mxu0 %vm2668_vm5, %v15719_v43 }
 0x426   : > { %13300 = vmatpush3.bf16.xpose.msra.mxu0 %v3150_v44 }
 0x427   : > { %13604 = vmatprep.subr.msk.bf16.mxu0 %vm2668_vm5, %v15735_v1 }
 0x4c7   : > { %v13241_v47 = vpop.f32.mrf.mxu1 }
 0x4c8   : > { %v2731_v48 = vmul.f32 0.17677669, %v13241_v47 }
 0x4c9   : > { %v2715_v50 = vpop.f32.mrf.mxu1 }
 0x4ca   : > { %v2729_v51 = vmul.f32 0.17677669, %v2715_v50  ;;  %v2740_v52 = vsel %vm2739_vm6, %v2731_v48, -inf }
 0x4cb   : > { %2741 = vmax.xlane.f32.xlu1 %v2740_v52  ;;  %v13242_v53 = vpop.f32.mrf.mxu1 }
 0x4cc   : > { %v2733_v54 = vsel %vm2732_vm7, %v2729_v51, -inf }
 0x4cd   : > { %2734 = vmax.xlane.f32.xlu0 %v2733_v54  ;;  %v2718_v55 = vpop.f32.mrf.mxu1 }
 0x4ce   : > { %v2730_v56 = vmul.f32 0.17677669, %v2718_v55 }
 0x4d0   : > { %v2736_v57 = vsel %vm2732_vm7, %v2730_v56, -inf }
 0x4d1   : > { %2737 = vmax.xlane.f32.xlu0 %v2736_v57 }
 0x554   : > { %v2742_v61 = vpop.xlane.xlu1 %2741 }
 0x555   : > { %v2745_v63 = vsub.f32 %v2731_v48, %v2742_v61 }
 0x556   : > { %v2735_v2 = vpop.xlane.xlu0 %2734 }
 0x557   : > { %v2743_v4 = vsub.f32 %v2729_v51, %v2735_v2  ;;  %v2750_v7 = vmul.f32 1.442695, %v2745_v63  ;;  %v3147_v2 = vsel %vm2668_vm5, %v15735_v1, 0 }
 0x558   : > { %13302 = vmatpush3.bf16.xpose.msra.mxu0 %v3147_v2 }
 0x559   : > { %v2746_v8 = vmul.f32 1.442695, %v2743_v4 }
 0x55a   : > { %v2738_v10 = vpop.xlane.xlu0 %2737 }
 0x55b   : > { %14412 = vpow2.f32 %v2746_v8  ;;  %v2744_v11 = vsub.f32 %v2730_v56, %v2738_v10 }
 0x55c   : > { %14414 = vpow2.f32 %v2750_v7 }
 0x55d   : > { %v2748_v12 = vmul.f32 1.442695, %v2744_v11 }
 0x55f   : > { %14416 = vpow2.f32 %v2748_v12 }
 0x568   : > { %v15656_v15 = vpop.eup %14412 }
 0x569   : > { %v2752_v16 = vsel %vm2732_vm7, %v15656_v15, 0.0  ;;  %v14415_v17 = vpop.eup %14414 }
 0x56a   : > { %2753 = vadd.xlane.f32.xlu1 %v2752_v16  ;;  %v2758_v19 = vsel %vm2739_vm6, %v14415_v17, 0.0 }
 0x56c   : > { %v14417_v18 = vpop.eup %14416 }
 0x56d   : > { %v2755_v20 = vsel %vm2732_vm7, %v14417_v18, 0.0 }
 0x56e   : > { %2759 = vadd.xlane.f32.xlu1 %v2758_v19  ;;  %2756 = vadd.xlane.f32.xlu0 %v2755_v20 }
 0x57f   : > { %2838 = vrot.lane.b32.xlu1 %v15629_v34, %s15137_s15 }
 0x583   : > { %2832 = vrot.lane.b32.xlu1 %v15621_v24, %s15137_s15 }
 0x584   : > { %2840 = vrot.lane.b32.xlu0 %v15627_v32, %s15137_s15 }
 0x587   : > { %2834 = vrot.lane.b32.xlu1 %v15639_v38, %s15137_s15 }
 0x5f3   : > { %v2754_v45 = vpop.xlane.xlu1 %2753 }
 0x5f4   : > { %14418 = vrcp.f32 %v2754_v45 }
 0x5f7   : > { %v2760_v46 = vpop.xlane.xlu1 %2759  ;;  %v2757_v47 = vpop.xlane.xlu0 %2756 }
 0x5f8   : > { %14420 = vrcp.f32 %v2760_v46 }
 0x5f9   : > { %14422 = vrcp.f32 %v2757_v47 }
 0x5fb   : > { %v2841_v48 = vpop.permute.xlu0 %2840  ;;  %v2839_v53 = vpop.permute.xlu1 %2838 }
 0x5fc   : > { %13586 = vmatprep.subr.msk.bf16.mxu1 %vm2668_vm5, %v2841_v48  ;;  %v2852_v61 = vsel %vm2668_vm5, %v2841_v48, 0  ;;  %v2849_v62 = vsel %vm2668_vm5, %v2839_v53, 0 }
 0x5ff   : > { %v2833_v60 = vpop.permute.xlu1 %2832 }
 0x601   : > { %v14419_v50 = vpop.eup %14418 }
 0x602   : > { %v2764_v55 = vmul.f32 %v14419_v50, %v15656_v15 }
 0x603   : > { %v2835_v63 = vpop.permute.xlu1 %2834 }
 0x605   : > { %v14421_v51 = vpop.eup %14420 }
 0x606   : > { %v14423_v52 = vpop.eup %14422  ;;  %v2766_v54 = vmul.f32 %v14421_v51, %v14415_v17 }
 0x607   : > { %v2765_v56 = vmul.f32 %v14423_v52, %v14417_v18 }
 0x608   : > { %v2768_v57 = vpack.c.bf16 %v2766_v54, %v2766_v54 }
 0x609   : > { %v2767_v59 = vpack.c.bf16 %v2765_v56, %v2764_v55 }
 0x60b   : > { %13247 = vmatprep.mubr.msk.bf16.mxu1 %vm2732_vm7, %v2767_v59 }
 0x60c   : > { %13248 = vmatmul.mubr.msk.bf16.vlgmr.msra.gmra.mxu1 %vm2732_vm7, %v2768_v57 }
 0x60d   : > { %13252 = vmatpush3.bf16.xpose.msra.mxu1 %v2852_v61  ;;  %13255 = vmatprep.mubr.msk.bf16.mxu1 %vm2668_vm5, %v2833_v60 }
 0x60e   : > { %13587 = vmatprep.subr.msk.bf16.mxu1 %vm2668_vm5, %v2839_v53 }
 0x615   : > { %13254 = vmatpush3.bf16.xpose.msra.mxu1 %v2849_v62 }
 0x61c   : > { %13256 = vmatmul.mubr.msk.bf16.vlgmr.msra.gmra.mxu1 %vm2668_vm5, %v2835_v63 }
 0x6cc   : > { %v13249_v4 = vpop.f32.mrf.mxu1 }
 0x6cd   : > { %v2829_v11 = vpack.c.bf16 %v13249_v4, %v13249_v4 }
 0x6ce   : > { %v2814_v6 = vpop.f32.mrf.mxu1 }
 0x6d0   : > { %v13250_v7 = vpop.f32.mrf.mxu1 }
 0x6d2   : > { %v2817_v8 = vpop.f32.mrf.mxu1 }
 0x6d3   : > { %v2828_v10 = vpack.c.bf16 %v2817_v8, %v2814_v6 }
 0x6d5   : > { %13303 = vmatprep.mubr.msk.bf16.mxu0 %vm2668_vm5, %v2828_v10 }
 0x6d6   : > { %13304 = vmatmul.mubr.msk.bf16.vlgmr.msra.gmra.mxu0 %vm2668_vm5, %v2829_v11 }
 0x6dc   : > { %v13257_v12 = vpop.f32.mrf.mxu1 }
 0x6dd   : > { %v2904_v18 = vmul.f32 0.17677669, %v13257_v12 }
 0x6de   : > { %v2888_v15 = vpop.f32.mrf.mxu1 }
 0x6df   : > { %v2902_v16 = vmul.f32 0.17677669, %v2888_v15  ;;  %v2911_v23 = vsel %vm2739_vm6, %v2904_v18, -inf }
 0x6e0   : > { %v13258_v17 = vpop.f32.mrf.mxu1 }
 0x6e1   : > { %v2905_v19 = vsel %vm2732_vm7, %v2902_v16, -inf }
 0x6e2   : > { %2906 = vmax.xlane.f32.xlu0 %v2905_v19  ;;  %v2891_v20 = vpop.f32.mrf.mxu1 }
 0x6e3   : > { %v2903_v22 = vmul.f32 0.17677669, %v2891_v20 }
 0x6e5   : > { %v2908_v25 = vsel %vm2732_vm7, %v2903_v22, -inf }
 0x6e6   : > { %2912 = vmax.xlane.f32.xlu0 %v2911_v23  ;;  %2909 = vmax.xlane.f32.xlu1 %v2908_v25 }
 0x76b   : > { %v2907_v26 = vpop.xlane.xlu0 %2906 }
 0x76c   : > { %v2914_v30 = vsub.f32 %v2902_v16, %v2907_v26 }
 0x76e   : > { %v2917_v31 = vmul.f32 1.442695, %v2914_v30 }
 0x76f   : > { %v2913_v35 = vpop.xlane.xlu0 %2912  ;;  %v2910_v37 = vpop.xlane.xlu1 %2909 }
 0x770   : > { %14424 = vpow2.f32 %v2917_v31  ;;  %v2916_v40 = vsub.f32 %v2904_v18, %v2913_v35  ;;  %v2915_v42 = vsub.f32 %v2903_v22, %v2910_v37 }
 0x772   : > { %v2921_v44 = vmul.f32 1.442695, %v2916_v40  ;;  %v2919_v45 = vmul.f32 1.442695, %v2915_v42 }
 0x774   : > { %14426 = vpow2.f32 %v2921_v44 }
 0x775   : > { %14428 = vpow2.f32 %v2919_v45 }
 0x77d   : > { %v14425_v46 = vpop.eup %14424 }
 0x77e   : > { %v2923_v47 = vsel %vm2732_vm7, %v14425_v46, 0.0 }
 0x77f   : > { %2924 = vadd.xlane.f32.xlu0 %v2923_v47 }
 0x781   : > { %v14427_v48 = vpop.eup %14426 }
 0x782   : > { %v14429_v50 = vpop.eup %14428  ;;  %v2929_v51 = vsel %vm2739_vm6, %v14427_v48, 0.0 }
 0x783   : > { %2930 = vadd.xlane.f32.xlu1 %v2929_v51  ;;  %v2926_v52 = vsel %vm2732_vm7, %v14429_v50, 0.0 }
 0x784   : > { %2927 = vadd.xlane.f32.xlu0 %v2926_v52 }
 0x794   : > { %2942 = vrot.lane.b32.xlu1 %v15664_v27, %s15137_s15 }
 0x796   : > { %v15751_v53 = vpop.f32.mrf.mxu0 }
 0x798   : > { %3060 = vrot.lane.b32.xlu1 %v15677_v28, %s15137_s15  ;;  %v15755_v54 = vpop.f32.mrf.mxu0 }
 0x79a   : > { %2944 = vrot.lane.b32.xlu0 %v15652_v3, %s15137_s15  ;;  %v13306_v55 = vpop.f32.mrf.mxu0 }
 0x79c   : > { %3058 = vrot.lane.b32.xlu1 %v15680_v29, %s15137_s15 }
 0x79e   : > { %3056 = vrot.lane.b32.xlu0 %v15691_v33, %s15137_s15 }
 0x7a0   : > { %3054 = vrot.lane.b32.xlu1 %v15698_v36, %s15137_s15 }
 0x7a2   : > { %3052 = vrot.lane.b32.xlu0 %v15705_v39, %s15137_s15 }
 0x7a4   : > { %3050 = vrot.lane.b32.xlu1 %v15712_v41, %s15137_s15 }
 0x7a6   : > { %3048 = vrot.lane.b32.xlu0 %v15719_v43, %s15137_s15 }
 0x7a8   : > { %3046 = vrot.lane.b32.xlu1 %v15735_v1, %s15137_s15 }
 0x7aa   : > { %3224 = vrot.lane.b32.xlu0 %v15627_v32, %s15138_s3 }
 0x7ac   : > { %3222 = vrot.lane.b32.xlu1 %v15629_v34, %s15138_s3 }
 0x7ae   : > { %3218 = vrot.lane.b32.xlu0 %v15621_v24, %s15138_s3 }
 0x7b0   : > { %3220 = vrot.lane.b32.xlu1 %v15639_v38, %s15138_s3 }
 0x808   : > { %v2925_v56 = vpop.xlane.xlu0 %2924 }
 0x809   : > { %14430 = vrcp.f32 %v2925_v56 }
 0x80c   : > { %v2931_v57 = vpop.xlane.xlu1 %2930 }
 0x80d   : > { %v2928_v59 = vpop.xlane.xlu0 %2927  ;;  %14432 = vrcp.f32 %v2931_v57 }
 0x80e   : > { %14434 = vrcp.f32 %v2928_v59 }
 0x810   : > { %v2943_v61 = vpop.permute.xlu1 %2942 }
 0x811   : > { %v2945_v60 = vpop.permute.xlu0 %2944 }
 0x812   : > { %13588 = vmatprep.subr.msk.bf16.mxu1 %vm2334_vm3, %v2945_v60  ;;  %v2954_v62 = vsel %vm2334_vm3, %v2945_v60, 0 }
 0x813   : > { %13260 = vmatpush3.bf16.msra.mxu1 %v2954_v62 }
 0x814   : > { %13261 = vmatprep.subr.bf16.mxu1 %v2943_v61  ;;  %v3061_v63 = vpop.permute.xlu1 %3060 }
 0x815   : > { %v3090_v15 = vsel %vm2668_vm5, %v3061_v63, 0  ;;  %v3057_v18 = vpop.permute.xlu0 %3056 }
 0x816   : > { %v14431_v2 = vpop.eup %14430  ;;  %v3084_v19 = vsel %vm2668_vm5, %v3057_v18, 0 }
 0x817   : > { %13262 = vmatpush3.bf16.msra.mxu1 %v2943_v61  ;;  %v2935_v8 = vmul.f32 %v14431_v2, %v14425_v46 }
 0x818   : > { %13589 = vmatprep.subr.msk.bf16.mxu1 %vm2668_vm5, %v3061_v63  ;;  %v3059_v16 = vpop.permute.xlu1 %3058 }
 0x819   : > { %v3087_v17 = vsel %vm2668_vm5, %v3059_v16, 0  ;;  %v3053_v23 = vpop.permute.xlu0 %3052 }
 0x81a   : > { %v14433_v4 = vpop.eup %14432  ;;  %v3078_v25 = vsel %vm2668_vm5, %v3053_v23, 0 }
 0x81b   : > { %v14435_v6 = vpop.eup %14434  ;;  %v2937_v7 = vmul.f32 %v14433_v4, %v14427_v48 }
 0x81c   : > { %v2936_v10 = vmul.f32 %v14435_v6, %v14429_v50  ;;  %v3055_v20 = vpop.permute.xlu1 %3054 }
 0x81d   : > { %v2939_v11 = vpack.c.bf16 %v2937_v7, %v2937_v7  ;;  %v3081_v22 = vsel %vm2668_vm5, %v3055_v20, 0  ;;  %v3049_v31 = vpop.permute.xlu0 %3048 }
 0x81e   : > { %v2938_v12 = vpack.c.bf16 %v2936_v10, %v2935_v8  ;;  %v3072_v35 = vsel %vm2668_vm5, %v3049_v31, 0 }
 0x820   : > { %13263 = vmatprep.mubr.msk.bf16.mxu1 %vm2732_vm7, %v2938_v12  ;;  %v3051_v26 = vpop.permute.xlu1 %3050 }
 0x821   : > { %13264 = vmatmul.mubr.msk.bf16.vlgmr.msra.gmra.mxu1 %vm2732_vm7, %v2939_v11  ;;  %v3075_v30 = vsel %vm2668_vm5, %v3051_v26, 0  ;;  %v3225_v42 = vpop.permute.xlu0 %3224 }
 0x822   : > { %13268 = vmatpush3.bf16.xpose.msra.mxu1 %v3090_v15  ;;  %v3236_v52 = vsel %vm2668_vm5, %v3225_v42, 0 }
 0x823   : > { %13590 = vmatprep.subr.msk.bf16.mxu1 %vm2668_vm5, %v3059_v16 }
 0x824   : > { %v3047_v37 = vpop.permute.xlu1 %3046 }
 0x825   : > { %v3069_v40 = vsel %vm2668_vm5, %v3047_v37, 0  ;;  %v3219_v51 = vpop.permute.xlu0 %3218 }
 0x828   : > { %v3223_v55 = vpop.permute.xlu1 %3222 }
 0x829   : > { %v3233_v56 = vsel %vm2668_vm5, %v3223_v55, 0 }
 0x82a   : > { %13270 = vmatpush3.bf16.xpose.msra.mxu1 %v3087_v17 }
 0x82b   : > { %13591 = vmatprep.subr.msk.bf16.mxu1 %vm2668_vm5, %v3057_v18 }
 0x82c   : > { %v3221_v57 = vpop.permute.xlu1 %3220 }
 0x832   : > { %13272 = vmatpush3.bf16.xpose.msra.mxu1 %v3084_v19 }
 0x833   : > { %13592 = vmatprep.subr.msk.bf16.mxu1 %vm2668_vm5, %v3055_v20 }
 0x83a   : > { %13274 = vmatpush3.bf16.xpose.msra.mxu1 %v3081_v22 }
 0x83b   : > { %13593 = vmatprep.subr.msk.bf16.mxu1 %vm2668_vm5, %v3053_v23 }
 0x842   : > { %13276 = vmatpush3.bf16.xpose.msra.mxu1 %v3078_v25 }
 0x843   : > { %13594 = vmatprep.subr.msk.bf16.mxu1 %vm2668_vm5, %v3051_v26 }
 0x84a   : > { %13278 = vmatpush3.bf16.xpose.msra.mxu1 %v3075_v30 }
 0x84b   : > { %13595 = vmatprep.subr.msk.bf16.mxu1 %vm2668_vm5, %v3049_v31 }
 0x852   : > { %13280 = vmatpush3.bf16.xpose.msra.mxu1 %v3072_v35 }
 0x853   : > { %13596 = vmatprep.subr.msk.bf16.mxu1 %vm2668_vm5, %v3047_v37 }
 0x85a   : > { %13282 = vmatpush3.bf16.xpose.msra.mxu1 %v3069_v40 }
 0x85b   : > { %13605 = vmatprep.subr.msk.bf16.mxu1 %vm2668_vm5, %v3225_v42 }
 0x8e1   : > { %v13265_v44 = vpop.f32.mrf.mxu1 }
 0x8e2   : > { %v3005_v50 = vpack.c.bf16 %v13265_v44, %v13265_v44 }
 0x8e3   : > { %v2990_v45 = vpop.f32.mrf.mxu1 }
 0x8e5   : > { %v13266_v46 = vpop.f32.mrf.mxu1 }
 0x8e7   : > { %v2993_v47 = vpop.f32.mrf.mxu1 }
 0x8e8   : > { %v3004_v48 = vpack.c.bf16 %v2993_v47, %v2990_v45 }
 0x8ea   : > { %13283 = vmatprep.mubr.msk.bf16.mxu1 %vm2668_vm5, %v3004_v48 }
 0x8eb   : > { %13284 = vmatmul.mubr.msk.bf16.vlgmr.msra.gmra.mxu1 %vm2668_vm5, %v3005_v50 }
 0x8ec   : > { %13308 = vmatpush3.bf16.xpose.msra.mxu1 %v3236_v52  ;;  %13311 = vmatprep.mubr.msk.bf16.mxu1 %vm2668_vm5, %v3219_v51 }
 0x8ed   : > { %13606 = vmatprep.subr.msk.bf16.mxu1 %vm2668_vm5, %v3223_v55 }
 0x8f4   : > { %13310 = vmatpush3.bf16.xpose.msra.mxu1 %v3233_v56 }
 0x8fb   : > { %13312 = vmatmul.mubr.msk.bf16.vlgmr.msra.gmra.mxu1 %vm2668_vm5, %v3221_v57 }
 0x9ab   : > { %v15809_v59 = vpop.f32.mrf.mxu1 }
 0x9ad   : > { %v15811_v60 = vpop.f32.mrf.mxu1 }
 0x9af   : > { %v13286_v61 = vpop.f32.mrf.mxu1 }
 0x9b1   : > { %v15813_v62 = vpop.f32.mrf.mxu1 }
 0x9bb   : > { %v13313_v63 = vpop.f32.mrf.mxu1 }
 0x9bc   : > { %v3288_v7 = vmul.f32 0.17677669, %v13313_v63 }
 0x9bd   : > { %v3272_v2 = vpop.f32.mrf.mxu1 }
 0x9be   : > { %v3286_v4 = vmul.f32 0.17677669, %v3272_v2  ;;  %v3295_v12 = vsel %vm2739_vm6, %v3288_v7, -inf }
 0x9bf   : > { %v13314_v6 = vpop.f32.mrf.mxu1 }
 0x9c0   : > { %v3289_v8 = vsel %vm2732_vm7, %v3286_v4, -inf }
 0x9c1   : > { %3290 = vmax.xlane.f32.xlu0 %v3289_v8  ;;  %v3275_v10 = vpop.f32.mrf.mxu1 }
 0x9c2   : > { %v3287_v11 = vmul.f32 0.17677669, %v3275_v10 }
 0x9c4   : > { %v3292_v15 = vsel %vm2732_vm7, %v3287_v11, -inf }
 0x9c5   : > { %3296 = vmax.xlane.f32.xlu0 %v3295_v12  ;;  %3293 = vmax.xlane.f32.xlu1 %v3292_v15 }
 0xa4a   : > { %v3291_v16 = vpop.xlane.xlu0 %3290 }
 0xa4b   : > { %v3298_v17 = vsub.f32 %v3286_v4, %v3291_v16 }
 0xa4d   : > { %v3301_v18 = vmul.f32 1.442695, %v3298_v17 }
 0xa4e   : > { %v3297_v19 = vpop.xlane.xlu0 %3296  ;;  %v3294_v20 = vpop.xlane.xlu1 %3293 }
 0xa4f   : > { %14436 = vpow2.f32 %v3301_v18  ;;  %v3300_v22 = vsub.f32 %v3288_v7, %v3297_v19  ;;  %v3299_v23 = vsub.f32 %v3287_v11, %v3294_v20  ;;  %v15843_v7 = vpop.f32.mrf.mxu0 }
 0xa51   : > { %v3305_v25 = vmul.f32 1.442695, %v3300_v22  ;;  %v3303_v26 = vmul.f32 1.442695, %v3299_v23 }
 0xa53   : > { %14438 = vpow2.f32 %v3305_v25 }
 0xa54   : > { %14440 = vpow2.f32 %v3303_v26 }
 0xa5c   : > { %v14437_v30 = vpop.eup %14436 }
 0xa5d   : > { %v3307_v31 = vsel %vm2732_vm7, %v14437_v30, 0.0 }
 0xa5e   : > { %3308 = vadd.xlane.f32.xlu0 %v3307_v31 }
 0xa60   : > { %v14439_v35 = vpop.eup %14438 }
 0xa61   : > { %v14441_v37 = vpop.eup %14440  ;;  %v3313_v40 = vsel %vm2739_vm6, %v14439_v35, 0.0 }
 0xa62   : > { %3314 = vadd.xlane.f32.xlu1 %v3313_v40  ;;  %v3310_v42 = vsel %vm2732_vm7, %v14441_v37, 0.0 }
 0xa63   : > { %3311 = vadd.xlane.f32.xlu0 %v3310_v42 }
 0xa73   : > { %3324 = vrot.lane.b32.xlu1 %v15664_v27, %s15138_s3 }
 0xa77   : > { %3491 = vrot.lane.b32.xlu1 %v15627_v32, %s15139_s0 }
 0xa79   : > { %3326 = vrot.lane.b32.xlu0 %v15652_v3, %s15138_s3 }
 0xa7b   : > { %3489 = vrot.lane.b32.xlu1 %v15629_v34, %s15139_s0 }
 0xa7d   : > { %3485 = vrot.lane.b32.xlu0 %v15621_v24, %s15139_s0 }
 0xa7f   : > { %3487 = vrot.lane.b32.xlu1 %v15639_v38, %s15139_s0 }
 0xae7   : > { %v3309_v44 = vpop.xlane.xlu0 %3308 }
 0xae8   : > { %14442 = vrcp.f32 %v3309_v44 }
 0xaeb   : > { %v3315_v45 = vpop.xlane.xlu1 %3314 }
 0xaec   : > { %v3312_v46 = vpop.xlane.xlu0 %3311  ;;  %14444 = vrcp.f32 %v3315_v45 }
 0xaed   : > { %14446 = vrcp.f32 %v3312_v46 }
 0xaef   : > { %v3325_v32 = vpop.permute.xlu1 %3324 }
 0xaf0   : > { %v3327_v47 = vpop.permute.xlu0 %3326 }
 0xaf1   : > { %13607 = vmatprep.subr.msk.bf16.mxu0 %vm2334_vm3, %v3327_v47  ;;  %v3336_v48 = vsel %vm2334_vm3, %v3327_v47, 0 }
 0xaf2   : > { %13316 = vmatpush3.bf16.msra.mxu0 %v3336_v48 }
 0xaf3   : > { %13317 = vmatprep.subr.bf16.mxu0 %v3325_v32  ;;  %v3492_v34 = vpop.permute.xlu1 %3491 }
 0xaf4   : > { %v3486_v61 = vpop.permute.xlu0 %3485  ;;  %v3503_v63 = vsel %vm2668_vm5, %v3492_v34, 0 }
 0xaf5   : > { %v14443_v24 = vpop.eup %14442 }
 0xaf6   : > { %13318 = vmatpush3.bf16.msra.mxu0 %v3325_v32  ;;  %v3319_v52 = vmul.f32 %v14443_v24, %v14437_v30 }
 0xaf7   : > { %13616 = vmatprep.subr.msk.bf16.mxu0 %vm2668_vm5, %v3492_v34  ;;  %v3490_v2 = vpop.permute.xlu1 %3489 }
 0xaf8   : > { %v3500_v4 = vsel %vm2668_vm5, %v3490_v2, 0 }
 0xaf9   : > { %v14445_v38 = vpop.eup %14444 }
 0xafa   : > { %v14447_v50 = vpop.eup %14446  ;;  %v3321_v51 = vmul.f32 %v14445_v38, %v14439_v35 }
 0xafb   : > { %v3320_v55 = vmul.f32 %v14447_v50, %v14441_v37  ;;  %v3488_v6 = vpop.permute.xlu1 %3487 }
 0xafc   : > { %v3323_v56 = vpack.c.bf16 %v3321_v51, %v3321_v51 }
 0xafd   : > { %v3322_v57 = vpack.c.bf16 %v3320_v55, %v3319_v52 }
 0xaff   : > { %13319 = vmatprep.mubr.msk.bf16.mxu0 %vm2732_vm7, %v3322_v57 }
 0xb00   : > { %13320 = vmatmul.mubr.msk.bf16.vlgmr.msra.gmra.mxu0 %vm2732_vm7, %v3323_v56 }
 0xb01   : > { %13344 = vmatpush3.bf16.xpose.msra.mxu0 %v3503_v63  ;;  %13347 = vmatprep.mubr.msk.bf16.mxu0 %vm2668_vm5, %v3486_v61 }
 0xb02   : > { %13617 = vmatprep.subr.msk.bf16.mxu0 %vm2668_vm5, %v3490_v2 }
 0xb09   : > { %13346 = vmatpush3.bf16.xpose.msra.mxu0 %v3500_v4 }
 0xb10   : > { %13348 = vmatmul.mubr.msk.bf16.vlgmr.msra.gmra.mxu0 %vm2668_vm5, %v3488_v6 }
 0xbc0   : > { %v15845_v8 = vpop.f32.mrf.mxu0 }
 0xbc2   : > { %v3372_v10 = vpop.f32.mrf.mxu0 }
 0xbc4   : > { %v13322_v11 = vpop.f32.mrf.mxu0 }
 0xbc6   : > { %v3375_v12 = vpop.f32.mrf.mxu0 }
 0xbc7   : > { %v3386_v15 = vpack.c.bf16 %v3375_v12, %v3372_v10 }
 0xbc9   : > { %13339 = vmatprep.mubr.msk.bf16.mxu1 %vm2668_vm5, %v3386_v15 }
 0xbd0   : > { %v13349_v16 = vpop.f32.mrf.mxu0 }
 0xbd1   : > { %v3555_v20 = vmul.f32 0.17677669, %v13349_v16 }
 0xbd2   : > { %v3539_v17 = vpop.f32.mrf.mxu0 }
 0xbd3   : > { %v3553_v18 = vmul.f32 0.17677669, %v3539_v17  ;;  %v3562_v26 = vsel %vm2739_vm6, %v3555_v20, -inf }
 0xbd4   : > { %v13350_v19 = vpop.f32.mrf.mxu0 }
 0xbd5   : > { %v3556_v22 = vsel %vm2732_vm7, %v3553_v18, -inf }
 0xbd6   : > { %3557 = vmax.xlane.f32.xlu0 %v3556_v22  ;;  %v3542_v23 = vpop.f32.mrf.mxu0 }
 0xbd7   : > { %v3554_v25 = vmul.f32 0.17677669, %v3542_v23 }
 0xbd9   : > { %v3559_v30 = vsel %vm2732_vm7, %v3554_v25, -inf }
 0xbda   : > { %3563 = vmax.xlane.f32.xlu0 %v3562_v26  ;;  %3560 = vmax.xlane.f32.xlu1 %v3559_v30 }
 0xc5f   : > { %v3558_v31 = vpop.xlane.xlu0 %3557 }
 0xc60   : > { %v3565_v35 = vsub.f32 %v3553_v18, %v3558_v31 }
 0xc62   : > { %v3568_v37 = vmul.f32 1.442695, %v3565_v35 }
 0xc63   : > { %v3564_v40 = vpop.xlane.xlu0 %3563  ;;  %v3561_v42 = vpop.xlane.xlu1 %3560 }
 0xc64   : > { %14448 = vpow2.f32 %v3568_v37  ;;  %v3567_v44 = vsub.f32 %v3555_v20, %v3564_v40  ;;  %v3566_v45 = vsub.f32 %v3554_v25, %v3561_v42 }
 0xc66   : > { %v3572_v46 = vmul.f32 1.442695, %v3567_v44  ;;  %v3570_v47 = vmul.f32 1.442695, %v3566_v45 }
 0xc68   : > { %14450 = vpow2.f32 %v3572_v46 }
 0xc69   : > { %14452 = vpow2.f32 %v3570_v47 }
 0xc71   : > { %v14449_v32 = vpop.eup %14448 }
 0xc72   : > { %v3574_v48 = vsel %vm2732_vm7, %v14449_v32, 0.0 }
 0xc73   : > { %3575 = vadd.xlane.f32.xlu0 %v3574_v48  ;;  %v3387_v48 = vpack.c.bf16 %v15845_v8, %v15845_v8  ;;  %v3213_v8 = vadd.f32 %v15751_v53, %v15809_v59 }
 0xc75   : > { %v14451_v34 = vpop.eup %14450 }
 0xc76   : > { %v14453_v24 = vpop.eup %14452  ;;  %v3580_v38 = vsel %vm2739_vm6, %v14451_v34, 0.0 }
 0xc77   : > { %3581 = vadd.xlane.f32.xlu1 %v3580_v38  ;;  %v3577_v50 = vsel %vm2732_vm7, %v14453_v24, 0.0 }
 0xc78   : > { %3578 = vadd.xlane.f32.xlu0 %v3577_v50 }
 0xc88   : > { %3591 = vrot.lane.b32.xlu1 %v15664_v27, %s15139_s0 }
 0xc8c   : > { %3402 = vrot.lane.b32.xlu1 %v15677_v28, %s15138_s3 }
 0xc8e   : > { %3593 = vrot.lane.b32.xlu0 %v15652_v3, %s15139_s0 }
 0xc90   : > { %3669 = vrot.lane.b32.xlu1 %v15677_v28, %s15139_s0 }
 0xc92   : > { %3400 = vrot.lane.b32.xlu0 %v15680_v29, %s15138_s3 }
 0xc94   : > { %3667 = vrot.lane.b32.xlu1 %v15680_v29, %s15139_s0 }
 0xc96   : > { %3398 = vrot.lane.b32.xlu0 %v15691_v33, %s15138_s3 }
 0xc98   : > { %3665 = vrot.lane.b32.xlu1 %v15691_v33, %s15139_s0 }
 0xc9a   : > { %3396 = vrot.lane.b32.xlu0 %v15698_v36, %s15138_s3 }
 0xc9c   : > { %3663 = vrot.lane.b32.xlu1 %v15698_v36, %s15139_s0 }
 0xc9e   : > { %3394 = vrot.lane.b32.xlu0 %v15705_v39, %s15138_s3 }
 0xca0   : > { %3661 = vrot.lane.b32.xlu1 %v15705_v39, %s15139_s0 }
 0xca2   : > { %3392 = vrot.lane.b32.xlu0 %v15712_v41, %s15138_s3 }
 0xca4   : > { %3659 = vrot.lane.b32.xlu1 %v15712_v41, %s15139_s0 }
 0xca6   : > { %3390 = vrot.lane.b32.xlu0 %v15719_v43, %s15138_s3 }
 0xca8   : > { %3657 = vrot.lane.b32.xlu1 %v15719_v43, %s15139_s0 }
 0xcaa   : > { %3388 = vrot.lane.b32.xlu0 %v15735_v1, %s15138_s3 }
 0xcac   : > { %3655 = vrot.lane.b32.xlu1 %v15735_v1, %s15139_s0 }
 0xcfc   : > { %v3576_v3 = vpop.xlane.xlu0 %3575 }
 0xcfd   : > { %14454 = vrcp.f32 %v3576_v3 }
 0xd00   : > { %v3582_v27 = vpop.xlane.xlu1 %3581 }
 0xd01   : > { %v3579_v28 = vpop.xlane.xlu0 %3578  ;;  %14456 = vrcp.f32 %v3582_v27 }
 0xd02   : > { %14458 = vrcp.f32 %v3579_v28 }
 0xd04   : > { %v3592_v29 = vpop.permute.xlu1 %3591 }
 0xd05   : > { %v3594_v33 = vpop.permute.xlu0 %3593 }
 0xd06   : > { %13618 = vmatprep.subr.msk.bf16.mxu0 %vm2334_vm3, %v3594_v33  ;;  %v3603_v36 = vsel %vm2334_vm3, %v3594_v33, 0 }
 0xd07   : > { %13352 = vmatpush3.bf16.msra.mxu0 %v3603_v36  ;;  %v3205_v36 = vadd.f32 %v15755_v54, %v15811_v60  ;;  %v11774_v60 = vld [vmem:[%s16966_s18] ss:$0 sm:$0xff] }
 0xd08   : > { %13353 = vmatprep.subr.bf16.mxu0 %v3592_v29  ;;  %v3403_v39 = vpop.permute.xlu1 %3402 }
 0xd09   : > { %13608 = vmatprep.subr.msk.bf16.mxu1 %vm2668_vm5, %v3403_v39  ;;  %v3432_v41 = vsel %vm2668_vm5, %v3403_v39, 0  ;;  %v3401_v43 = vpop.permute.xlu0 %3400 }
 0xd0a   : > { %13324 = vmatpush3.bf16.xpose.msra.mxu1 %v3432_v41  ;;  %v14455_v51 = vpop.eup %14454  ;;  %v3429_v56 = vsel %vm2668_vm5, %v3401_v43, 0 }
 0xd0b   : > { %13354 = vmatpush3.bf16.msra.mxu0 %v3592_v29  ;;  %13609 = vmatprep.subr.msk.bf16.mxu1 %vm2668_vm5, %v3401_v43  ;;  %v3586_v61 = vmul.f32 %v14455_v51, %v14449_v32 }
 0xd0c   : > { %v3670_v1 = vpop.permute.xlu1 %3669 }
 0xd0d   : > { %13619 = vmatprep.subr.msk.bf16.mxu0 %vm2668_vm5, %v3670_v1  ;;  %v3399_v2 = vpop.permute.xlu0 %3398  ;;  %v3699_v10 = vsel %vm2668_vm5, %v3670_v1, 0 }
 0xd0e   : > { %v14457_v52 = vpop.eup %14456  ;;  %v3426_v12 = vsel %vm2668_vm5, %v3399_v2, 0 }
 0xd0f   : > { %v14459_v55 = vpop.eup %14458  ;;  %v3588_v57 = vmul.f32 %v14457_v52, %v14451_v34 }
 0xd10   : > { %v3587_v63 = vmul.f32 %v14459_v55, %v14453_v24  ;;  %v3668_v11 = vpop.permute.xlu1 %3667 }
 0xd11   : > { %v3590_v4 = vpack.c.bf16 %v3588_v57, %v3588_v57  ;;  %v3397_v15 = vpop.permute.xlu0 %3396  ;;  %v3696_v16 = vsel %vm2668_vm5, %v3668_v11, 0  ;;  %v3208_v57 = vadd.f32 %v15843_v7, %v15813_v62 }
 0xd12   : > { %13326 = vmatpush3.bf16.xpose.msra.mxu1 %v3429_v56  ;;  %v3589_v6 = vpack.c.bf16 %v3587_v63, %v3586_v61  ;;  %v3423_v18 = vsel %vm2668_vm5, %v3397_v15, 0 }
 0xd13   : > { %13610 = vmatprep.subr.msk.bf16.mxu1 %vm2668_vm5, %v3399_v2 }
 0xd14   : > { %13355 = vmatprep.mubr.msk.bf16.mxu0 %vm2732_vm7, %v3589_v6  ;;  %v3666_v17 = vpop.permute.xlu1 %3665 }
 0xd15   : > { %13356 = vmatmul.mubr.msk.bf16.vlgmr.msra.gmra.mxu0 %vm2732_vm7, %v3590_v4  ;;  %v3395_v19 = vpop.permute.xlu0 %3394  ;;  %v3693_v20 = vsel %vm2668_vm5, %v3666_v17, 0 }
 0xd16   : > { %13360 = vmatpush3.bf16.xpose.msra.mxu0 %v3699_v10  ;;  %v3420_v23 = vsel %vm2668_vm5, %v3395_v19, 0 }
 0xd17   : > { %13620 = vmatprep.subr.msk.bf16.mxu0 %vm2668_vm5, %v3668_v11  ;;  %v14115_v11 = vld [vmem:[%s16967_s26 + $0xf8] sm:$0xff]  }
 0xd18   : > { %v3664_v22 = vpop.permute.xlu1 %3663 }
 0xd19   : > { %v3393_v25 = vpop.permute.xlu0 %3392  ;;  %v3690_v26 = vsel %vm2668_vm5, %v3664_v22, 0 }
 0xd1a   : > { %13328 = vmatpush3.bf16.xpose.msra.mxu1 %v3426_v12  ;;  %v3417_v31 = vsel %vm2668_vm5, %v3393_v25, 0  ;;  %v14116_v12 = vld [vmem:[%s16967_s26 + $0x38] sm:$0xff]  }
 0xd1b   : > { %13611 = vmatprep.subr.msk.bf16.mxu1 %vm2668_vm5, %v3397_v15  ;;  %v14117_v15 = vld [vmem:[%s16967_s26 + $0xb8] sm:$0xff]  }
 0xd1c   : > { %v3662_v30 = vpop.permute.xlu1 %3661 }
 0xd1d   : > { %v3391_v35 = vpop.permute.xlu0 %3390  ;;  %v3687_v37 = vsel %vm2668_vm5, %v3662_v30, 0 }
 0xd1e   : > { %13362 = vmatpush3.bf16.xpose.msra.mxu0 %v3696_v16  ;;  %v3414_v42 = vsel %vm2668_vm5, %v3391_v35, 0  ;;  %v14118_v16 = vld [vmem:[%s16967_s26 + $0x70] sm:$0xff]  }
 0xd1f   : > { %13621 = vmatprep.subr.msk.bf16.mxu0 %vm2668_vm5, %v3666_v17  ;;  %v14119_v17 = vld [vmem:[%s16967_s26 + $0xf0] sm:$0xff]  }
 0xd20   : > { %v3660_v40 = vpop.permute.xlu1 %3659 }
 0xd21   : > { %v3389_v44 = vpop.permute.xlu0 %3388  ;;  %v3684_v45 = vsel %vm2668_vm5, %v3660_v40, 0 }
 0xd22   : > { %13330 = vmatpush3.bf16.xpose.msra.mxu1 %v3423_v18  ;;  %v3411_v47 = vsel %vm2668_vm5, %v3389_v44, 0  ;;  %v14121_v18 = vld [vmem:[%s16967_s26 + $0xb0] sm:$0xff]  }
 0xd23   : > { %13612 = vmatprep.subr.msk.bf16.mxu1 %vm2668_vm5, %v3395_v19  ;;  %v14122_v19 = vld [vmem:[%s16967_s26 + $0x68] sm:$0xff]  }
 0xd24   : > { %v3658_v46 = vpop.permute.xlu1 %3657 }
 0xd25   : > { %v3681_v32 = vsel %vm2668_vm5, %v3658_v46, 0 }
 0xd26   : > { %13364 = vmatpush3.bf16.xpose.msra.mxu0 %v3693_v20  ;;  %v14123_v20 = vld [vmem:[%s16967_s26 + $0xe8] sm:$0xff]  }
 0xd27   : > { %13622 = vmatprep.subr.msk.bf16.mxu0 %vm2668_vm5, %v3664_v22  ;;  %v14124_v22 = vld [vmem:[%s16967_s26 + $0x28] sm:$0xff]  }
 0xd28   : > { %v3656_v34 = vpop.permute.xlu1 %3655 }
 0xd29   : > { %v3678_v24 = vsel %vm2668_vm5, %v3656_v34, 0 }
 0xd2a   : > { %13332 = vmatpush3.bf16.xpose.msra.mxu1 %v3420_v23  ;;  %v14125_v23 = vld [vmem:[%s16967_s26 + $0xa8] sm:$0xff]  }
 0xd2b   : > { %13613 = vmatprep.subr.msk.bf16.mxu1 %vm2668_vm5, %v3393_v25  ;;  %v14126_v25 = vld [vmem:[%s16967_s26 + $0x60] sm:$0xff]  }
 0xd2e   : > { %13366 = vmatpush3.bf16.xpose.msra.mxu0 %v3690_v26  ;;  %v14127_v26 = vld [vmem:[%s16967_s26 + $0xe0] sm:$0xff]  }
 0xd2f   : > { %13623 = vmatprep.subr.msk.bf16.mxu0 %vm2668_vm5, %v3662_v30  ;;  %v14128_v30 = vld [vmem:[%s16967_s26 + $0x20] sm:$0xff]  }
 0xd32   : > { %13334 = vmatpush3.bf16.xpose.msra.mxu1 %v3417_v31  ;;  %v14129_v31 = vld [vmem:[%s16967_s26 + $0xa0] sm:$0xff]  }
 0xd33   : > { %13614 = vmatprep.subr.msk.bf16.mxu1 %vm2668_vm5, %v3391_v35  ;;  %v14130_v35 = vld [vmem:[%s16967_s26 + $0x58] sm:$0xff]  }
 0xd36   : > { %13368 = vmatpush3.bf16.xpose.msra.mxu0 %v3687_v37  ;;  %v14131_v37 = vld [vmem:[%s16967_s26 + $0xd8] sm:$0xff]  }
 0xd37   : > { %13624 = vmatprep.subr.msk.bf16.mxu0 %vm2668_vm5, %v3660_v40  ;;  %v14132_v40 = vld [vmem:[%s16967_s26 + $0x18] sm:$0xff]  }
 0xd3a   : > { %13336 = vmatpush3.bf16.xpose.msra.mxu1 %v3414_v42  ;;  %v14133_v42 = vld [vmem:[%s16967_s26 + $0x98] sm:$0xff]  }
 0xd3b   : > { %13615 = vmatprep.subr.msk.bf16.mxu1 %vm2668_vm5, %v3389_v44 }
 0xd3e   : > { %13370 = vmatpush3.bf16.xpose.msra.mxu0 %v3684_v45 }
 0xd3f   : > { %13625 = vmatprep.subr.msk.bf16.mxu0 %vm2668_vm5, %v3658_v46 }
 0xd42   : > { %13338 = vmatpush3.bf16.xpose.msra.mxu1 %v3411_v47 }
 0xd46   : > { %13372 = vmatpush3.bf16.xpose.msra.mxu0 %v3681_v32 }
 0xd47   : > { %13626 = vmatprep.subr.msk.bf16.mxu0 %vm2668_vm5, %v3656_v34 }
 0xd49   : > { %13340 = vmatmul.mubr.msk.bf16.vlgmr.msra.gmra.mxu1 %vm2668_vm5, %v3387_v48 }
 0xd4e   : > { %13374 = vmatpush3.bf16.xpose.msra.mxu0 %v3678_v24 }
 0xd4f   : > { %12777 = vmatprep.subr.bf16.mxu0 %v14115_v11 }
 0xdd5   : > { %v13357_v38 = vpop.f32.mrf.mxu0 }
 0xdd6   : > { %v3654_v29 = vpack.c.bf16 %v13357_v38, %v13357_v38 }
 0xdd7   : > { %v3639_v50 = vpop.f32.mrf.mxu0 }
 0xdd9   : > { %v13358_v3 = vpop.f32.mrf.mxu0 }
 0xddb   : > { %v3642_v27 = vpop.f32.mrf.mxu0 }
 0xddc   : > { %v3653_v28 = vpack.c.bf16 %v3642_v27, %v3639_v50 }
 0xdde   : > { %13375 = vmatprep.mubr.msk.bf16.mxu0 %vm2668_vm5, %v3653_v28 }
 0xddf   : > { %13376 = vmatmul.mubr.msk.bf16.vlgmr.msra.gmra.mxu0 %vm2668_vm5, %v3654_v29  ;;  %v14134_v29 = vld [vmem:[%s16967_s26 + $0x50] sm:$0xff]  }
 0xde0   : > { %12778 = vmatpush3.bf16.xpose.msra.mxu0 %v14117_v15 }
 0xde1   : > { %12779 = vmatprep.subr.bf16.mxu0 %v14119_v17 }
 0xde8   : > { %12780 = vmatpush3.bf16.xpose.msra.mxu0 %v14121_v18 }
 0xde9   : > { %12781 = vmatprep.subr.bf16.mxu0 %v14123_v20 }
 0xdf0   : > { %12782 = vmatpush3.bf16.xpose.msra.mxu0 %v14125_v23 }
 0xdf1   : > { %12783 = vmatprep.subr.bf16.mxu0 %v14127_v26  ;;  %v14149_v26 = vld [vmem:[%s16967_s26 + $0x1b8] sm:$0xff]  }
 0xdf8   : > { %12784 = vmatpush3.bf16.xpose.msra.mxu0 %v14129_v31  ;;  %v14150_v31 = vld [vmem:[%s16967_s26 + $0x170] sm:$0xff]  }
 0xdf9   : > { %12785 = vmatprep.subr.bf16.mxu0 %v14131_v37  ;;  %v14152_v37 = vld [vmem:[%s16967_s26 + $0x130] sm:$0xff]  }
 0xe00   : > { %12786 = vmatpush3.bf16.xpose.msra.mxu0 %v14133_v42  ;;  %v14154_v42 = vld [vmem:[%s16967_s26 + $0x168] sm:$0xff]  }
 0xe09   : > { %v13341_v33 = vpop.f32.mrf.mxu1 }
 0xe0a   : > { %v3484_v39 = vadd.f32 %v13341_v33, %v3213_v8  ;;  %v14135_v8 = vld [vmem:[%s16967_s26 + $0xd0] sm:$0xff]  }
 0xe0b   : > { %v3468_v41 = vpop.f32.mrf.mxu1  ;;  %v14136_v33 = vld [vmem:[%s16967_s26 + $0x10] sm:$0xff]   ;;  %12787 = vmatprep.subr.bf16.mxu0 %v14135_v8 }
 0xe0c   : > { %v3482_v43 = vadd.f32 %v3468_v41, %v3205_v36  ;;  %v14137_v36 = vld [vmem:[%s16967_s26 + $0x90] sm:$0xff]   ;;  %v14139_v41 = vld [vmem:[%s16967_s26 + $0xc8] sm:$0xff]  }
 0xe0d   : > { %v13342_v1 = vpop.f32.mrf.mxu1  ;;  %12788 = vmatpush3.bf16.xpose.msra.mxu0 %v14137_v36  ;;  %v14169_v8 = vld [vmem:[%s16967_s26 + $0x190] sm:$0xff]   ;;  %v14171_v36 = vld [vmem:[%s16967_s26 + $0x1c8] sm:$0xff]  }
 0xe0e   : > { %v14141_v1 = vld [vmem:[%s16967_s26 + $0x88] sm:$0xff]   ;;  %12789 = vmatprep.subr.bf16.mxu0 %v14139_v41 }
 0xe0f   : > { %v3471_v55 = vpop.f32.mrf.mxu1  ;;  %v14173_v41 = vld [vmem:[%s16967_s26 + $0x188] sm:$0xff]  }
 0xe10   : > { %v3483_v59 = vadd.f32 %v3471_v55, %v3208_v57  ;;  %v14144_v55 = vld [vmem:[%s16967_s26] sm:$0xff]   ;;  %v14146_v57 = vld [vmem:[%s16967_s26 + $0x178] sm:$0xff]  }
 0xe15   : > { %12790 = vmatpush3.bf16.xpose.msra.mxu0 %v14141_v1  ;;  %v14175_v1 = vld [vmem:[%s16967_s26 + $0x1c0] sm:$0xff]  }
 0xe9f   : > { %v13377_v51 = vpop.f32.mrf.mxu0 }
 0xea0   : > { %v3751_v52 = vadd.f32 %v13377_v51, %v3484_v39  ;;  %v14138_v39 = vld [vmem:[%s16967_s26 + $0x48] sm:$0xff]   ;;  %v14142_v51 = vld [vmem:[%s16967_s26 + $0x40] sm:$0xff]  }
 0xea1   : > { %v3735_v56 = vpop.f32.mrf.mxu0 }
 0xea2   : > { %v3749_v61 = vadd.f32 %v3735_v56, %v3482_v43  ;;  %v3754_v63 = vadd.f32 %v3751_v52, %v15595_v5  ;;  %v14140_v43 = vld [vmem:[%s16967_s26 + $0x8] sm:$0xff]   ;;  %v14143_v52 = vld [vmem:[%s16967_s26 + $0xc0] sm:$0xff]  }
 0xea3   : > { %v13378_v53 = vpop.f32.mrf.mxu0  ;;  %v14145_v56 = vld [vmem:[%s16967_s26 + $0x80] sm:$0xff]   ;;  %12791 = vmatprep.subr.bf16.mxu0 %v14143_v52 }
 0xea4   : > { %v3752_v54 = vadd.f32 %v3749_v61, %v15592_v49  ;;  %v3764_v10 = vadd.f32 %v11774_v60, %v3754_v63  ;;  %v14114_v49 = vld [vmem:[%s16967_s26 + $0x78] sm:$0xff]   ;;  %12792 = vmatpush3.bf16.xpose.msra.mxu0 %v14145_v56  ;;  %v14177_v52 = vld [vmem:[%s16967_s26 + $0x180] sm:$0xff]  }
 0xea5   : > { %v3738_v2 = vpop.f32.mrf.mxu0  ;;  %12757 = vmatprep.subr.bf16.mxu1 %v14114_v49  ;;  %v14147_v61 = vld [vmem:[%s16967_s26 + $0x1f8] sm:$0xff]   ;;  %v4678_v56 = vld [vmem:[#allocation18 + $0x3d0] sm:$0xff] }
 0xea6   : > { %v3750_v4 = vadd.f32 %v3738_v2, %v3483_v59  ;;  %v3762_v6 = vadd.f32 %v11774_v60, %v3752_v54  ;;  %v3772_v7 = vsel %vm3771_vm8, %v3764_v10, 0.0  ;;  %12758 = vmatpush3.bf16.xpose.msra.mxu1 %v14116_v12  ;;  %12817 = vmatprep.subr.bf16.mxu0 %v14147_v61 }
 0xea7   : > { %12759 = vmatprep.subr.bf16.mxu1 %v14118_v16  ;;  %v11776_v16 = vld [vmem:[#allocation15] ss:$0 sm:$0xff] }
 0xea8   : > { %3767 = vadd.xlane.f32.xlu0 %v3762_v6  ;;  %v3753_v62 = vadd.f32 %v3750_v4, %v15599_v9  ;;  %v14120_v9 = vld [vmem:[%s16967_s26 + $0x30] sm:$0xff]  }
 0xeaa   : > { %v3763_v5 = vadd.f32 %v11774_v60, %v3753_v62 }
 0xeac   : > { %3773 = vadd.xlane.f32.xlu0 %v3772_v7  ;;  %3769 = vadd.xlane.f32.xlu1 %v3763_v5  ;;  %v11775_v7 = vld [vmem:[#allocation13] ss:$0 sm:$0xff] }
 0xeae   : > { %12760 = vmatpush3.bf16.xpose.msra.mxu1 %v14120_v9 }
 0xeaf   : > { %12761 = vmatprep.subr.bf16.mxu1 %v14122_v19 }
 0xeb6   : > { %12762 = vmatpush3.bf16.xpose.msra.mxu1 %v14124_v22 }
 0xeb7   : > { %12763 = vmatprep.subr.bf16.mxu1 %v14126_v25  ;;  %v14148_v25 = vld [vmem:[%s16967_s26 + $0x138] sm:$0xff]  }
 0xebe   : > { %12764 = vmatpush3.bf16.xpose.msra.mxu1 %v14128_v30 }
 0xebf   : > { %12765 = vmatprep.subr.bf16.mxu1 %v14130_v35  ;;  %v14151_v35 = vld [vmem:[%s16967_s26 + $0x1f0] sm:$0xff]  }
 0xec6   : > { %12766 = vmatpush3.bf16.xpose.msra.mxu1 %v14132_v40  ;;  %v14153_v40 = vld [vmem:[%s16967_s26 + $0x1b0] sm:$0xff]  }
 0xec7   : > { %12767 = vmatprep.subr.bf16.mxu1 %v14134_v29  ;;  %v14168_v29 = vld [vmem:[%s16967_s26 + $0x110] sm:$0xff]  }
 0xece   : > { %12768 = vmatpush3.bf16.xpose.msra.mxu1 %v14136_v33  ;;  %v14170_v33 = vld [vmem:[%s16967_s26 + $0x148] sm:$0xff]  }
 0xecf   : > { %12769 = vmatprep.subr.bf16.mxu1 %v14138_v39  ;;  %v14172_v39 = vld [vmem:[%s16967_s26 + $0x108] sm:$0xff]  }
 0xed6   : > { %12770 = vmatpush3.bf16.xpose.msra.mxu1 %v14140_v43  ;;  %v14174_v43 = vld [vmem:[%s16967_s26 + $0x140] sm:$0xff]  }
 0xed7   : > { %12771 = vmatprep.subr.bf16.mxu1 %v14142_v51  ;;  %v14176_v51 = vld [vmem:[%s16967_s26 + $0x100] sm:$0xff]  }
 0xede   : > { %12772 = vmatpush3.bf16.xpose.msra.mxu1 %v14144_v55  ;;  %v4676_v55 = vld [vmem:[#allocation18 + $0x390] sm:$0xff] }
 0xedf   : > { %12797 = vmatprep.subr.bf16.mxu1 %v14146_v57  ;;  %v4677_v57 = vld [vmem:[#allocation18 + $0x398] sm:$0xff]  ;;  %v11870_v61 = vcombine.high %v4676_v55, %v4678_v56 }
 0xf31   : > { %v3768_v44 = vpop.xlane.xlu0 %3767 }
 0xf32   : > { %v3776_v45 = vmul.f32 0.0078125, %v3768_v44  ;;  %v14155_v44 = vld [vmem:[%s16967_s26 + $0x1e8] sm:$0xff]  }
 0xf34   : > { %v3779_v46 = vsub.f32 %v3762_v6, %v3776_v45  ;;  %v14156_v45 = vld [vmem:[%s16967_s26 + $0x128] sm:$0xff]  }
 0xf35   : > { %v3774_v47 = vpop.xlane.xlu0 %3773  ;;  %v3770_v32 = vpop.xlane.xlu1 %3769 }
 0xf36   : > { %v3778_v48 = vmul.f32 0.0078125, %v3774_v47  ;;  %v3777_v34 = vmul.f32 0.0078125, %v3770_v32  ;;  %v3782_v24 = vmul.f32 %v3779_v46, %v3779_v46  ;;  %v14158_v47 = vld [vmem:[%s16967_s26 + $0x160] sm:$0xff]  }
 0xf37   : > { %v14159_v32 = vld [vmem:[%s16967_s26 + $0x1e0] sm:$0xff]  }
 0xf38   : > { %v3781_v38 = vsub.f32 %v3764_v10, %v3778_v48  ;;  %v3780_v50 = vsub.f32 %v3763_v5, %v3777_v34  ;;  %3785 = vadd.xlane.f32.xlu0 %v3782_v24  ;;  %v14160_v48 = vld [vmem:[%s16967_s26 + $0x120] sm:$0xff]   ;;  %v14162_v24 = vld [vmem:[%s16967_s26 + $0x158] sm:$0xff]  }
 0xf39   : > { %v14161_v34 = vld [vmem:[%s16967_s26 + $0x1a0] sm:$0xff]  }
 0xf3a   : > { %v3783_v3 = vmul.f32 %v3780_v50, %v3780_v50  ;;  %v3784_v27 = vmul.f32 %v3781_v38, %v3781_v38 }
 0xf3c   : > { %3787 = vadd.xlane.f32.xlu0 %v3783_v3  ;;  %v3789_v28 = vsel %vm3771_vm8, %v3784_v27, 0.0  ;;  %v14165_v3 = vld [vmem:[%s16967_s26 + $0x198] sm:$0xff]   ;;  %v14166_v27 = vld [vmem:[%s16967_s26 + $0x150] sm:$0xff]  }
 0xf3d   : > { %3790 = vadd.xlane.f32.xlu1 %v3789_v28  ;;  %v14167_v28 = vld [vmem:[%s16967_s26 + $0x1d0] sm:$0xff]  }
 0xfc1   : > { %v3786_v63 = vpop.xlane.xlu0 %3785 }
 0xfc2   : > { %v3792_v53 = vmul.f32 0.0078125, %v3786_v63  ;;  %v4679_v63 = vld [vmem:[#allocation18 + $0x3d8] sm:$0xff] }
 0xfc4   : > { %v3795_v59 = vadd.f32 1e-05, %v3792_v53  ;;  %v11869_v53 = vcombine.low %v4676_v55, %v4678_v56 }
 0xfc5   : > { %v3788_v54 = vpop.xlane.xlu0 %3787 }
 0xfc6   : > { %14460 = vrsqrt.f32 %v3795_v59  ;;  %v3793_v60 = vmul.f32 0.0078125, %v3788_v54  ;;  %v3791_v2 = vpop.xlane.xlu1 %3790  ;;  %v11871_v59 = vcombine.low %v4677_v57, %v4679_v63  ;;  %v11872_v54 = vcombine.high %v4677_v57, %v4679_v63  ;;  %v4648_v57 = vld [vmem:[#allocation18 + $0x10] sm:$0xff]  ;;  %v4649_v63 = vld [vmem:[#allocation18 + $0x18] sm:$0xff] }
 0xfc7   : > { %v3794_v4 = vmul.f32 0.0078125, %v3791_v2  ;;  %v4674_v2 = vld [vmem:[#allocation18 + $0x350] sm:$0xff] }
 0xfc8   : > { %v3796_v6 = vadd.f32 1e-05, %v3793_v60  ;;  %v4672_v60 = vld [vmem:[#allocation18 + $0x310] sm:$0xff] }
 0xfc9   : > { %v3797_v10 = vadd.f32 1e-05, %v3794_v4  ;;  %v4673_v4 = vld [vmem:[#allocation18 + $0x318] sm:$0xff] }
 0xfca   : > { %14462 = vrsqrt.f32 %v3796_v6  ;;  %v11866_v6 = vcombine.high %v4672_v60, %v4674_v2 }
 0xfcb   : > { %14464 = vrsqrt.f32 %v3797_v10  ;;  %v4675_v10 = vld [vmem:[#allocation18 + $0x358] sm:$0xff] }
 0xfd3   : > { %v14461_v62 = vpop.eup %14460 }
 0xfd4   : > { %v3801_v5 = vmul.f32 %v14461_v62, %v3779_v46  ;;  %v14157_v46 = vld [vmem:[%s16967_s26 + $0x1a8] sm:$0xff]  }
 0xfd5   : > { %v4668_v62 = vld [vmem:[#allocation18 + $0x290] sm:$0xff] }
 0xfd6   : > { %v3810_v12 = vmul.f32 %v11775_v7, %v3801_v5  ;;  %v4670_v5 = vld [vmem:[#allocation18 + $0x2d0] sm:$0xff] }
 0xfd7   : > { %v14463_v49 = vpop.eup %14462 }
 0xfd8   : > { %v14465_v11 = vpop.eup %14464  ;;  %v3802_v15 = vmul.f32 %v14463_v49, %v3780_v50  ;;  %v15977_v19 = vadd.f32 %v11776_v16, %v3810_v12  ;;  %v14164_v50 = vld [vmem:[%s16967_s26 + $0x118] sm:$0xff]   ;;  %v4669_v49 = vld [vmem:[#allocation18 + $0x298] sm:$0xff]  ;;  %v11865_v12 = vcombine.low %v4672_v60, %v4674_v2 }
 0xfd9   : > { %v3803_v17 = vmul.f32 %v14465_v11, %v3781_v38  ;;  %v14163_v38 = vld [vmem:[%s16967_s26 + $0x1d8] sm:$0xff]   ;;  %v4671_v11 = vld [vmem:[#allocation18 + $0x2d8] sm:$0xff] }
 0xfda   : > { %v3811_v9 = vmul.f32 %v11775_v7, %v3802_v15  ;;  %v11867_v15 = vcombine.low %v4673_v4, %v4675_v10 }
 0xfdb   : > { %v3812_v18 = vmul.f32 %v11775_v7, %v3803_v17  ;;  %v11868_v7 = vcombine.high %v4673_v4, %v4675_v10  ;;  %v11864_v17 = vcombine.high %v4669_v49, %v4671_v11  ;;  %v16037_v4 = vld [vmem:[#allocation18 + $0x380] sm:$0xff]  ;;  %v16041_v10 = vld [vmem:[#allocation18 + $0x388] sm:$0xff] }
 0xfdc   : > { %v15979_v20 = vadd.f32 %v11776_v16, %v3811_v9  ;;  %v4664_v9 = vld [vmem:[#allocation18 + $0x210] sm:$0xff] }
 0xfdd   : > { %v15981_v22 = vadd.f32 %v11776_v16, %v3812_v18  ;;  %v11862_v16 = vcombine.high %v4668_v62, %v4670_v5  ;;  %v4666_v18 = vld [vmem:[#allocation18 + $0x250] sm:$0xff] }
 0xfde   : > { %v15985_v23 = vpack.c.bf16 %v15979_v20, %v15977_v19 }
 0xfdf   : > { %v15991_v30 = vpack.c.bf16 %v15981_v22, %v15981_v22 }
 0xfe0   : > { %12773 = vmatprep.mubr.bf16.mxu1 %v15985_v23  ;;  %12793 = vmatprep.mubr.bf16.mxu0 %v15985_v23 }
 0xfe1   : > { %12774 = vmatmul.mubr.bf16.vlgmr.msra.gmra.mxu1 %v15985_v23  ;;  %12794 = vmatmul.mubr.bf16.vlgmr.msra.gmra.mxu0 %v15985_v23 }
 0xfe2   : > { %12798 = vmatpush3.bf16.xpose.msra.mxu1 %v14148_v25  ;;  %12818 = vmatpush3.bf16.xpose.msra.mxu0 %v14149_v26  ;;  %v4665_v25 = vld [vmem:[#allocation18 + $0x218] sm:$0xff] }
 0xfe3   : > { %12775 = vmatprep.mubr.bf16.mxu1 %v15991_v30  ;;  %12795 = vmatprep.mubr.bf16.mxu0 %v15991_v30  ;;  %v4667_v26 = vld [vmem:[#allocation18 + $0x258] sm:$0xff] }
 0xfe4   : > { %12799 = vmatprep.subr.bf16.mxu1 %v14150_v31  ;;  %12819 = vmatprep.subr.bf16.mxu0 %v14151_v35  ;;  %v11861_v31 = vcombine.low %v4668_v62, %v4670_v5  ;;  %v11863_v35 = vcombine.low %v4669_v49, %v4671_v11  ;;  %v16045_v5 = vld [vmem:[#allocation18 + $0x3c8] sm:$0xff] }
 0xfe5   : > { %v11904_v11 = vcombine.high %v16041_v10, %v16045_v5 }
 0xfe9   : > { %12776 = vmatmul.mubr.bf16.gmra.mxu1 %v15991_v30  ;;  %12796 = vmatmul.mubr.bf16.gmra.mxu0 %v15991_v30 }
 0xfea   : > { %12800 = vmatpush3.bf16.xpose.msra.mxu1 %v14152_v37  ;;  %12820 = vmatpush3.bf16.xpose.msra.mxu0 %v14153_v40  ;;  %v11858_v37 = vcombine.high %v4664_v9, %v4666_v18  ;;  %v11860_v40 = vcombine.high %v4665_v25, %v4667_v26 }
 0xfeb   : > { %12813 = vmatprep.mubr.bf16.mxu1 %v15985_v23  ;;  %12833 = vmatprep.mubr.bf16.mxu0 %v15985_v23 }
 0xfec   : > { %12801 = vmatprep.subr.bf16.mxu1 %v14154_v42  ;;  %12821 = vmatprep.subr.bf16.mxu0 %v14155_v44  ;;  %v4660_v42 = vld [vmem:[#allocation18 + $0x190] sm:$0xff] }
 0xfed   : > { %v4662_v44 = vld [vmem:[#allocation18 + $0x1d0] sm:$0xff] }
 0xff2   : > { %12802 = vmatpush3.bf16.xpose.msra.mxu1 %v14156_v45  ;;  %12822 = vmatpush3.bf16.xpose.msra.mxu0 %v14157_v46  ;;  %v4661_v45 = vld [vmem:[#allocation18 + $0x198] sm:$0xff] }
 0xff3   : > { %12803 = vmatprep.subr.bf16.mxu1 %v14158_v47  ;;  %12823 = vmatprep.subr.bf16.mxu0 %v14159_v32  ;;  %v4663_v46 = vld [vmem:[#allocation18 + $0x1d8] sm:$0xff]  ;;  %v11857_v47 = vcombine.low %v4664_v9, %v4666_v18  ;;  %v11859_v32 = vcombine.low %v4665_v25, %v4667_v26 }
 0xffa   : > { %12804 = vmatpush3.bf16.xpose.msra.mxu1 %v14160_v48  ;;  %12824 = vmatpush3.bf16.xpose.msra.mxu0 %v14161_v34  ;;  %v11854_v48 = vcombine.high %v4660_v42, %v4662_v44  ;;  %v11856_v34 = vcombine.high %v4661_v45, %v4663_v46 }
 0xffb   : > { %12805 = vmatprep.subr.bf16.mxu1 %v14162_v24  ;;  %12825 = vmatprep.subr.bf16.mxu0 %v14163_v38  ;;  %v4656_v24 = vld [vmem:[#allocation18 + $0x110] sm:$0xff] }
 0xffc   : > { %v4658_v38 = vld [vmem:[#allocation18 + $0x150] sm:$0xff] }
0x1002   : > { %12806 = vmatpush3.bf16.xpose.msra.mxu1 %v14164_v50  ;;  %12826 = vmatpush3.bf16.xpose.msra.mxu0 %v14165_v3  ;;  %v4657_v50 = vld [vmem:[#allocation18 + $0x118] sm:$0xff] }
0x1003   : > { %12807 = vmatprep.subr.bf16.mxu1 %v14166_v27  ;;  %12827 = vmatprep.subr.bf16.mxu0 %v14167_v28  ;;  %v4659_v3 = vld [vmem:[#allocation18 + $0x158] sm:$0xff]  ;;  %v11853_v27 = vcombine.low %v4660_v42, %v4662_v44  ;;  %v11855_v28 = vcombine.low %v4661_v45, %v4663_v46 }
0x100a   : > { %12808 = vmatpush3.bf16.xpose.msra.mxu1 %v14168_v29  ;;  %12828 = vmatpush3.bf16.xpose.msra.mxu0 %v14169_v8  ;;  %v11850_v29 = vcombine.high %v4656_v24, %v4658_v38  ;;  %v11852_v8 = vcombine.high %v4657_v50, %v4659_v3 }
0x100b   : > { %12809 = vmatprep.subr.bf16.mxu1 %v14170_v33  ;;  %12829 = vmatprep.subr.bf16.mxu0 %v14171_v36  ;;  %v4652_v33 = vld [vmem:[#allocation18 + $0x90] sm:$0xff] }
0x100c   : > { %v4654_v36 = vld [vmem:[#allocation18 + $0xd0] sm:$0xff] }
0x100d   : > { %v11845_v55 = vcombine.low %v4652_v33, %v4654_v36 }
0x1012   : > { %12810 = vmatpush3.bf16.xpose.msra.mxu1 %v14172_v39  ;;  %12830 = vmatpush3.bf16.xpose.msra.mxu0 %v14173_v41  ;;  %v4653_v39 = vld [vmem:[#allocation18 + $0x98] sm:$0xff] }
0x1013   : > { %12811 = vmatprep.subr.bf16.mxu1 %v14174_v43  ;;  %12831 = vmatprep.subr.bf16.mxu0 %v14175_v1  ;;  %v4655_v41 = vld [vmem:[#allocation18 + $0xd8] sm:$0xff]  ;;  %v11849_v43 = vcombine.low %v4656_v24, %v4658_v38  ;;  %v11851_v1 = vcombine.low %v4657_v50, %v4659_v3 }
0x1014   : > { %v11847_v56 = vcombine.low %v4653_v39, %v4655_v41 }
0x101a   : > { %12812 = vmatpush3.bf16.xpose.msra.mxu1 %v14176_v51  ;;  %12832 = vmatpush3.bf16.xpose.msra.mxu0 %v14177_v52  ;;  %v11846_v51 = vcombine.high %v4652_v33, %v4654_v36  ;;  %v11848_v52 = vcombine.high %v4653_v39, %v4655_v41  ;;  %v16084_v36 = vsub.s32 3, %v15609_v13  ;;  %v4320_v39 = vld [vmem:[#allocation16 + $0x4] sm:$0xf] }
0x101b   : > { %4848 = vmatprep.subr.bf16.mxu1 %v11870_v61  ;;  %4896 = vmatprep.subr.bf16.mxu0 %v11872_v54  ;;  %v4650_v61 = vld [vmem:[#allocation18 + $0x50] sm:$0xff] }
0x101c   : > { %v11841_v54 = vcombine.low %v4648_v57, %v4650_v61 }
0x1021   : > { %12814 = vmatmul.mubr.bf16.vlgmr.msra.gmra.mxu1 %v15985_v23  ;;  %12834 = vmatmul.mubr.bf16.vlgmr.msra.gmra.mxu0 %v15985_v23 }
0x1022   : > { %12815 = vmatprep.mubr.bf16.mxu1 %v15991_v30  ;;  %12835 = vmatprep.mubr.bf16.mxu0 %v15991_v30 }
0x1023   : > { %4849 = vmatpush1.bf16.xpose.msra.mxu1 %v11869_v53  ;;  %4897 = vmatpush1.bf16.xpose.msra.mxu0 %v11871_v59  ;;  %v11842_v53 = vcombine.high %v4648_v57, %v4650_v61  ;;  %v4651_v59 = vld [vmem:[#allocation18 + $0x58] sm:$0xff] }
0x1024   : > { %4850 = vmatprep.subr.bf16.mxu1 %v11866_v6  ;;  %4898 = vmatprep.subr.bf16.mxu0 %v11868_v7  ;;  %v11843_v60 = vcombine.low %v4649_v63, %v4651_v59  ;;  %v11844_v2 = vcombine.high %v4649_v63, %v4651_v59  ;;  %v16039_v6 = vld [vmem:[#allocation18 + $0x3c0] sm:$0xff] }
0x1025   : > { %v11902_v62 = vcombine.high %v16037_v4, %v16039_v6  ;;  %v11901_v7 = vcombine.low %v16037_v4, %v16039_v6  ;;  %v4238_v6 = vld [vmem:[#allocation18 + $0x2c0] sm:$0xff] }
0x1029   : > { %12816 = vmatmul.mubr.bf16.gmra.mxu1 %v15991_v30  ;;  %12836 = vmatmul.mubr.bf16.gmra.mxu0 %v15991_v30 }
0x102b   : > { %4851 = vmatpush1.bf16.xpose.msra.mxu1 %v11865_v12  ;;  %4899 = vmatpush1.bf16.xpose.msra.mxu0 %v11867_v15  ;;  %v3888_v12 = vld [vmem:[#allocation16] sm:$0xf] }
0x102c   : > { %4852 = vmatprep.subr.bf16.mxu1 %v11862_v16  ;;  %4900 = vmatprep.subr.bf16.mxu0 %v11864_v17  ;;  %v16054_v15 = vrot.slane %v3888_v12, %v15612_v14  ;;  %v16057_v16 = vrot.slane %v3888_v12, %v15648_v58 }
0x1033   : > { %4853 = vmatpush1.bf16.xpose.msra.mxu1 %v11861_v31  ;;  %4901 = vmatpush1.bf16.xpose.msra.mxu0 %v11863_v35 }
0x1034   : > { %4854 = vmatprep.subr.bf16.mxu1 %v11858_v37  ;;  %4902 = vmatprep.subr.bf16.mxu0 %v11860_v40 }
0x103b   : > { %4855 = vmatpush1.bf16.xpose.msra.mxu1 %v11857_v47  ;;  %4903 = vmatpush1.bf16.xpose.msra.mxu0 %v11859_v32 }
0x103c   : > { %4856 = vmatprep.subr.bf16.mxu1 %v11854_v48  ;;  %4904 = vmatprep.subr.bf16.mxu0 %v11856_v34 }
0x1043   : > { %4857 = vmatpush1.bf16.xpose.msra.mxu1 %v11853_v27  ;;  %4905 = vmatpush1.bf16.xpose.msra.mxu0 %v11855_v28 }
0x1044   : > { %4858 = vmatprep.subr.bf16.mxu1 %v11850_v29  ;;  %4906 = vmatprep.subr.bf16.mxu0 %v11852_v8 }
0x104b   : > { %4859 = vmatpush1.bf16.xpose.msra.mxu1 %v11849_v43  ;;  %4907 = vmatpush1.bf16.xpose.msra.mxu0 %v11851_v1  ;;  %v4329_v1 = vrot.slane %v4320_v39, %v15619_v21 }
0x104c   : > { %4860 = vmatprep.subr.bf16.mxu1 %v11846_v51  ;;  %4908 = vmatprep.subr.bf16.mxu0 %v11848_v52  ;;  %v4337_v51 = vrot.slane %v4320_v39, %v16084_v36  ;;  %v4325_v52 = vrot.slane %v4320_v39, %v15612_v14 }
0x1053   : > { %4861 = vmatpush1.bf16.xpose.msra.mxu1 %v11845_v55  ;;  %4909 = vmatpush1.bf16.xpose.msra.mxu0 %v11847_v56  ;;  %v4333_v55 = vrot.slane %v4320_v39, %v15648_v58 }
0x1054   : > { %4862 = vmatprep.subr.bf16.mxu1 %v11842_v53  ;;  %4910 = vmatprep.subr.bf16.mxu0 %v11844_v2 }
0x105b   : > { %4863 = vmatpush1.bf16.xpose.msra.mxu1 %v11841_v54  ;;  %4911 = vmatpush1.bf16.xpose.msra.mxu0 %v11843_v60 }
0x105c   : > { %5104 = vmatprep.subr.bf16.mxu1 %v11902_v62  ;;  %5152 = vmatprep.subr.bf16.mxu0 %v11904_v11 }
0x10a1   : > { %v4136_v17 = vpop.f32.mrf.mxu1  ;;  %v4187_v9 = vpop.f32.mrf.mxu0 }
0x10a2   : > { %v4137_v26 = vadd.f32 %v4136_v17, %v16054_v15  ;;  %v4188_v31 = vadd.f32 %v4187_v9, %v16057_v16  ;;  %v16090_v17 = vld [vmem:[#allocation18 + $0x300] sm:$0xff] }
0x10a3   : > { %v16059_v18 = vpop.f32.mrf.mxu1  ;;  %v16061_v25 = vpop.f32.mrf.mxu0 }
0x10a4   : > { %v4204_v46 = vmax.f32 %v4137_v26, 0.0  ;;  %v4206_v47 = vmax.f32 %v4188_v31, 0.0  ;;  %v16092_v31 = vld [vmem:[#allocation18 + $0x340] sm:$0xff] }
0x10a5   : > { %v4140_v35 = vpop.f32.mrf.mxu1  ;;  %v4191_v37 = vpop.f32.mrf.mxu0 }
0x10a6   : > { %v4141_v40 = vadd.f32 %v4140_v35, %v16054_v15  ;;  %v4192_v42 = vadd.f32 %v4191_v37, %v16057_v16  ;;  %v16094_v35 = vld [vmem:[#allocation18 + $0x308] sm:$0xff] }
0x10a7   : > { %v16067_v44 = vpop.f32.mrf.mxu1  ;;  %v16069_v45 = vpop.f32.mrf.mxu0  ;;  %v16096_v37 = vld [vmem:[#allocation18 + $0x348] sm:$0xff] }
0x10a8   : > { %v4208_v32 = vmax.f32 %v4141_v40, 0.0  ;;  %v4210_v48 = vmax.f32 %v4192_v42, 0.0  ;;  %v16099_v40 = vrot.slane %v3888_v12, %v15619_v21  ;;  %v16102_v42 = vrot.slane %v3888_v12, %v16084_v36 }
0x10a9   : > { %v16071_v34 = vpop.f32.mrf.mxu1  ;;  %v16073_v24 = vpop.f32.mrf.mxu0 }
0x10aa   : > { %v16075_v38 = vpack.c.bf16 %v4208_v32, %v4204_v46  ;;  %v16077_v50 = vpack.c.bf16 %v4210_v48, %v4206_v47  ;;  %v4143_v0 = vadd.f32 %v16067_v44, %v16099_v40  ;;  %v4194_v49 = vadd.f32 %v16069_v45, %v16102_v42 }
0x10ab   : > { %v16079_v3 = vpop.f32.mrf.mxu1  ;;  %v16081_v27 = vpop.f32.mrf.mxu0  ;;  %v4139_v44 = vadd.f32 %v16059_v18, %v16099_v40  ;;  %v4190_v45 = vadd.f32 %v16061_v25, %v16102_v42 }
0x10ac   : > { %v4211_v4 = vmax.f32 %v4194_v49, 0.0  ;;  %v4232_v49 = vld [vmem:[#allocation18 + $0x200] sm:$0xff] }
0x10ad   : > { %v4150_v28 = vpop.f32.mrf.mxu1  ;;  %v4201_v29 = vpop.f32.mrf.mxu0  ;;  %v4205_v18 = vmax.f32 %v4139_v44, 0.0  ;;  %v4207_v25 = vmax.f32 %v4190_v45, 0.0  ;;  %v4222_v44 = vld [vmem:[#allocation18 + $0xc0] sm:$0xff]  ;;  %v4221_v45 = vld [vmem:[#allocation18 + $0x88] sm:$0xff] }
0x10af   : > { %v4151_v8 = vpop.f32.mrf.mxu1  ;;  %v4202_v33 = vpop.f32.mrf.mxu0 }
0x10e1   : > { %v4568_v41 = vpop.f32.mrf.mxu1  ;;  %v4619_v43 = vpop.f32.mrf.mxu0 }
0x10e2   : > { %v4569_v60 = vadd.f32 %v4568_v41, %v4325_v52  ;;  %v4620_v2 = vadd.f32 %v4619_v43, %v4333_v55 }
0x10e3   : > { %v4570_v56 = vpop.f32.mrf.mxu1  ;;  %v4621_v57 = vpop.f32.mrf.mxu0 }
0x10e4   : > { %v4571_v53 = vadd.f32 %v4570_v56, %v4329_v1  ;;  %v4622_v59 = vadd.f32 %v4621_v57, %v4337_v51  ;;  %v4636_v39 = vmax.f32 %v4569_v60, 0.0  ;;  %v4638_v41 = vmax.f32 %v4620_v2, 0.0 }
0x10e5   : > { %v4572_v61 = vpop.f32.mrf.mxu1  ;;  %v4623_v63 = vpop.f32.mrf.mxu0  ;;  %v11898_v57 = vcombine.high %v16090_v17, %v16092_v31 }
0x10e6   : > { %v4573_v54 = vadd.f32 %v4572_v61, %v4325_v52  ;;  %v4624_v13 = vadd.f32 %v4623_v63, %v4333_v55  ;;  %v4637_v28 = vmax.f32 %v4571_v53, 0.0  ;;  %v4639_v29 = vmax.f32 %v4622_v59, 0.0 }
0x10e7   : > { %v4574_v62 = vpop.f32.mrf.mxu1  ;;  %v4625_v11 = vpop.f32.mrf.mxu0  ;;  %v11900_v61 = vcombine.high %v16094_v35, %v16096_v37 }
0x10e8   : > { %v4575_v9 = vadd.f32 %v4574_v62, %v4329_v1  ;;  %v4626_v26 = vadd.f32 %v4625_v11, %v4337_v51  ;;  %v4640_v46 = vmax.f32 %v4573_v54, 0.0  ;;  %v4642_v47 = vmax.f32 %v4624_v13, 0.0 }
0x10e9   : > { %v4578_v32 = vpop.f32.mrf.mxu1  ;;  %v4629_v48 = vpop.f32.mrf.mxu0 }
0x10ea   : > { %v4641_v8 = vmax.f32 %v4575_v9, 0.0  ;;  %v4643_v33 = vmax.f32 %v4626_v26, 0.0  ;;  %v4680_v62 = vpack.c.bf16 %v4640_v46, %v4636_v39  ;;  %v4682_v11 = vpack.c.bf16 %v4642_v47, %v4638_v41 }
0x10eb   : > { %v4580_v43 = vpop.f32.mrf.mxu1  ;;  %v4631_v56 = vpop.f32.mrf.mxu0  ;;  %v4579_v53 = vadd.f32 %v4578_v32, %v4325_v52  ;;  %v4630_v59 = vadd.f32 %v4629_v48, %v4333_v55  ;;  %v16968_v52 = vcombine.low %v16041_v10, %v16045_v5  ;;  %v4236_v48 = vld [vmem:[#allocation18 + $0x280] sm:$0xff]  ;;  %v11897_v10 = vcombine.low %v16090_v17, %v16092_v31  ;;  %v4233_v31 = vld [vmem:[#allocation18 + $0x208] sm:$0xff] }
0x10ec   : > { %v4581_v12 = vadd.f32 %v4580_v43, %v4329_v1  ;;  %v4632_v63 = vadd.f32 %v4631_v56, %v4337_v51  ;;  %v4681_v54 = vpack.c.bf16 %v4641_v8, %v4637_v28  ;;  %v4683_v13 = vpack.c.bf16 %v4643_v33, %v4639_v29  ;;  %v4239_v29 = vld [vmem:[#allocation18 + $0x2c8] sm:$0xff]  ;;  %v4234_v17 = vld [vmem:[#allocation18 + $0x240] sm:$0xff] }
0x10ed   : > { %v4582_v9 = vpop.f32.mrf.mxu1  ;;  %v4633_v26 = vpop.f32.mrf.mxu0  ;;  %v4644_v55 = vmax.f32 %v4579_v53, 0.0  ;;  %v4646_v32 = vmax.f32 %v4630_v59, 0.0  ;;  %v4209_v28 = vmax.f32 %v4143_v0, 0.0  ;;  %v11899_v5 = vcombine.low %v16094_v35, %v16096_v37  ;;  %v4235_v35 = vld [vmem:[#allocation18 + $0x248] sm:$0xff] }
0x10ee   : > { %v4645_v60 = vmax.f32 %v4581_v12, 0.0  ;;  %v4647_v2 = vmax.f32 %v4632_v63, 0.0  ;;  %4880 = vmatprep.mubr.bf16.mxu1 %v4681_v54  ;;  %4928 = vmatprep.mubr.bf16.mxu0 %v4683_v13  ;;  %v11894_v39 = vcombine.high %v4236_v48, %v4238_v6  ;;  %v4251_v0 = vpack.c.bf16 %v4211_v4, %v4207_v25  ;;  %v4228_v12 = vld [vmem:[#allocation18 + $0x180] sm:$0xff]  ;;  %v4229_v54 = vld [vmem:[#allocation18 + $0x188] sm:$0xff] }
0x10ef   : > { %v4583_v1 = vpop.f32.mrf.mxu1  ;;  %v4634_v51 = vpop.f32.mrf.mxu0  ;;  %4881 = vmatmul.mubr.bf16.vlgmr.msra.gmra.mxu1 %v4680_v62  ;;  %4929 = vmatmul.mubr.bf16.vlgmr.msra.gmra.mxu0 %v4682_v11  ;;  %v4684_v8 = vpack.c.bf16 %v4644_v55, %v4644_v55  ;;  %v4686_v33 = vpack.c.bf16 %v4646_v32, %v4646_v32  ;;  %v4249_v43 = vpack.c.bf16 %v4209_v28, %v4205_v18  ;;  %v4230_v63 = vld [vmem:[#allocation18 + $0x1c0] sm:$0xff]  ;;  %v4231_v13 = vld [vmem:[#allocation18 + $0x1c8] sm:$0xff] }
0x10f0   : > { %v4685_v46 = vpack.c.bf16 %v4645_v60, %v4645_v60  ;;  %v4687_v47 = vpack.c.bf16 %v4647_v2, %v4647_v2  ;;  %5105 = vmatpush1.bf16.xpose.msra.mxu1 %v11901_v7  ;;  %5153 = vmatpush1.bf16.xpose.msra.mxu0 %v16968_v52  ;;  %v4237_v7 = vld [vmem:[#allocation18 + $0x288] sm:$0xff]  ;;  %v11893_v37 = vcombine.low %v4236_v48, %v4238_v6  ;;  %v4224_v9 = vld [vmem:[#allocation18 + $0x100] sm:$0xff] }
0x10f1   : > { %5106 = vmatprep.subr.bf16.mxu1 %v11898_v57  ;;  %5154 = vmatprep.subr.bf16.mxu0 %v11900_v61  ;;  %v11896_v41 = vcombine.high %v4237_v7, %v4239_v29  ;;  %v11895_v56 = vcombine.low %v4237_v7, %v4239_v29  ;;  %v11890_v57 = vcombine.high %v4232_v49, %v4234_v17  ;;  %v4226_v26 = vld [vmem:[#allocation18 + $0x140] sm:$0xff]  ;;  %v4225_v60 = vld [vmem:[#allocation18 + $0x108] sm:$0xff] }
0x10f2   : > { %4888 = vmatprep.mubr.bf16.mxu1 %v4685_v46  ;;  %4936 = vmatprep.mubr.bf16.mxu0 %v4687_v47  ;;  %v11892_v61 = vcombine.high %v4233_v31, %v4235_v35  ;;  %v11889_v62 = vcombine.low %v4232_v49, %v4234_v17  ;;  %v11891_v11 = vcombine.low %v4233_v31, %v4235_v35  ;;  %v4227_v2 = vld [vmem:[#allocation18 + $0x148] sm:$0xff]  ;;  %v4220_v52 = vld [vmem:[#allocation18 + $0x80] sm:$0xff] }
0x10f3   : > { %v11886_v53 = vcombine.high %v4228_v12, %v4230_v63  ;;  %v11888_v59 = vcombine.high %v4229_v54, %v4231_v13  ;;  %v11885_v1 = vcombine.low %v4228_v12, %v4230_v63  ;;  %v11887_v51 = vcombine.low %v4229_v54, %v4231_v13  ;;  %v4223_v55 = vld [vmem:[#allocation18 + $0xc8] sm:$0xff]  ;;  %v4216_v6 = vld [vmem:[#allocation18] sm:$0xff]  ;;  %v14186_v63 = vld [vmem:[%s16967_s26 + $0x268] sm:$0xff]  }
0x10f4   : > { %v11882_v46 = vcombine.high %v4224_v9, %v4226_v26  ;;  %v11884_v47 = vcombine.high %v4225_v60, %v4227_v2  ;;  %v11881_v32 = vcombine.low %v4224_v9, %v4226_v26  ;;  %v11883_v48 = vcombine.low %v4225_v60, %v4227_v2  ;;  %v4218_v7 = vld [vmem:[#allocation18 + $0x40] sm:$0xff]  ;;  %v4217_v29 = vld [vmem:[#allocation18 + $0x8] sm:$0xff]  ;;  %v14189_v54 = vld [vmem:[%s16967_s26 + $0x2a8] sm:$0xff]  }
0x10f5   : > { %v11878_v28 = vcombine.high %v4220_v52, %v4222_v44  ;;  %v11880_v4 = vcombine.high %v4221_v45, %v4223_v55  ;;  %v11879_v18 = vcombine.low %v4221_v45, %v4223_v55  ;;  %v11874_v25 = vcombine.high %v4216_v6, %v4218_v7  ;;  %v14185_v12 = vld [vmem:[%s16967_s26 + $0x2b0] sm:$0xff]   ;;  %v14190_v13 = vld [vmem:[%s16967_s26 + $0x260] sm:$0xff]   ;;  %v14195_v9 = vld [vmem:[%s16967_s26 + $0x2d8] sm:$0xff]  }
0x10f6   : > { %v4200_v49 = vadd.f32 %v16081_v27, %v16102_v42  ;;  %v4147_v35 = vadd.f32 %v16071_v34, %v16054_v15  ;;  %v14183_v27 = vld [vmem:[%s16967_s26 + $0x2f0] sm:$0xff]   ;;  %v14196_v26 = vld [vmem:[%s16967_s26 + $0x218] sm:$0xff]   ;;  %v14205_v45 = vld [vmem:[%s16967_s26 + $0x288] sm:$0xff]  }
0x10f7   : > { %4889 = vmatmul.mubr.bf16.gmra.mxu1 %v4684_v8  ;;  %4937 = vmatmul.mubr.bf16.gmra.mxu0 %v4686_v33  ;;  %v11873_v33 = vcombine.low %v4216_v6, %v4218_v7  ;;  %v14184_v42 = vld [vmem:[%s16967_s26 + $0x230] sm:$0xff]   ;;  %v14197_v60 = vld [vmem:[%s16967_s26 + $0x298] sm:$0xff]   ;;  %v14206_v55 = vld [vmem:[%s16967_s26 + $0x240] sm:$0xff]  }
0x10f8   : > { %5107 = vmatpush1.bf16.xpose.msra.mxu1 %v11897_v10  ;;  %5155 = vmatpush1.bf16.xpose.msra.mxu0 %v11899_v5  ;;  %v4219_v10 = vld [vmem:[#allocation18 + $0x48] sm:$0xff]  ;;  %v11877_v5 = vcombine.low %v4220_v52, %v4222_v44  ;;  %v4215_v31 = vmax.f32 %v4200_v49, 0.0  ;;  %v4212_v15 = vmax.f32 %v4147_v35, 0.0  ;;  %v14198_v2 = vld [vmem:[%s16967_s26 + $0x250] sm:$0xff]   ;;  %v14203_v52 = vld [vmem:[%s16967_s26 + $0x2c8] sm:$0xff]  }
0x10f9   : > { %5136 = vmatprep.mubr.bf16.mxu1 %v4249_v43  ;;  %5184 = vmatprep.mubr.bf16.mxu0 %v4251_v0  ;;  %v11876_v8 = vcombine.high %v4217_v29, %v4219_v10  ;;  %v14179_v43 = vld [vmem:[%s16967_s26 + $0x2f8] sm:$0xff]   ;;  %v4149_v0 = vadd.f32 %v16079_v3, %v16099_v40  ;;  %v14182_v40 = vld [vmem:[%s16967_s26 + $0x270] sm:$0xff]   ;;  %v14204_v44 = vld [vmem:[%s16967_s26 + $0x208] sm:$0xff]  }
0x10fa   : > { %5108 = vmatprep.subr.bf16.mxu1 %v11894_v39  ;;  %5156 = vmatprep.subr.bf16.mxu0 %v11896_v41  ;;  %v11875_v39 = vcombine.low %v4217_v29, %v4219_v10  ;;  %v14178_v41 = vld [vmem:[%s16967_s26 + $0x278] sm:$0xff]   ;;  %v4255_v3 = vpack.c.bf16 %v4215_v31, %v4215_v31 }
0x10fb   : > { %v4213_v17 = vmax.f32 %v4149_v0, 0.0  ;;  %v5622_v6 = vld [vmem:[#allocation18 + $0x3e0] sm:$0xff]  ;;  %v5621_v7 = vld [vmem:[#allocation18 + $0x3a8] sm:$0xff] }
0x10fc   : > { %v5612_v49 = vld [vmem:[#allocation18 + $0x2a0] sm:$0xff]  ;;  %v5613_v31 = vld [vmem:[#allocation18 + $0x2a8] sm:$0xff] }
0x10fd   : > { %v5615_v35 = vld [vmem:[#allocation18 + $0x2e8] sm:$0xff] }
0x1100   : > { %5109 = vmatpush1.bf16.xpose.msra.mxu1 %v11893_v37  ;;  %5157 = vmatpush1.bf16.xpose.msra.mxu0 %v11895_v56  ;;  %v4198_v37 = vadd.f32 %v16073_v24, %v16057_v16  ;;  %v14180_v56 = vld [vmem:[%s16967_s26 + $0x238] sm:$0xff]   ;;  %v4252_v16 = vpack.c.bf16 %v4212_v15, %v4212_v15 }
0x1101   : > { %5110 = vmatprep.subr.bf16.mxu1 %v11890_v57  ;;  %5158 = vmatprep.subr.bf16.mxu0 %v11892_v61  ;;  %v14181_v57 = vld [vmem:[%s16967_s26 + $0x2b8] sm:$0xff]   ;;  %v4253_v61 = vpack.c.bf16 %v4213_v17, %v4213_v17 }
0x1102   : > { %v4214_v34 = vmax.f32 %v4198_v37, 0.0  ;;  %v5614_v17 = vld [vmem:[#allocation18 + $0x2e0] sm:$0xff]  ;;  %v5611_v15 = vld [vmem:[#allocation18 + $0x268] sm:$0xff] }
0x1104   : > { %v4254_v24 = vpack.c.bf16 %v4214_v34, %v4214_v34  ;;  %v11957_v34 = vcombine.low %v5612_v49, %v5614_v17 }
0x1108   : > { %5111 = vmatpush1.bf16.xpose.msra.mxu1 %v11889_v62  ;;  %5159 = vmatpush1.bf16.xpose.msra.mxu0 %v11891_v11  ;;  %v14191_v62 = vld [vmem:[%s16967_s26 + $0x2e0] sm:$0xff]  }
0x1109   : > { %5112 = vmatprep.subr.bf16.mxu1 %v11886_v53  ;;  %5160 = vmatprep.subr.bf16.mxu0 %v11888_v59  ;;  %v14192_v11 = vld [vmem:[%s16967_s26 + $0x220] sm:$0xff]   ;;  %v14194_v59 = vld [vmem:[%s16967_s26 + $0x258] sm:$0xff]  }
0x110a   : > { %v14193_v53 = vld [vmem:[%s16967_s26 + $0x2a0] sm:$0xff]  }
0x1110   : > { %5113 = vmatpush1.bf16.xpose.msra.mxu1 %v11885_v1  ;;  %5161 = vmatpush1.bf16.xpose.msra.mxu0 %v11887_v51  ;;  %v14199_v1 = vld [vmem:[%s16967_s26 + $0x2d0] sm:$0xff]  }
0x1111   : > { %5114 = vmatprep.subr.bf16.mxu1 %v11882_v46  ;;  %5162 = vmatprep.subr.bf16.mxu0 %v11884_v47  ;;  %v14200_v51 = vld [vmem:[%s16967_s26 + $0x210] sm:$0xff]   ;;  %v14202_v47 = vld [vmem:[%s16967_s26 + $0x248] sm:$0xff]  }
0x1112   : > { %v14201_v46 = vld [vmem:[%s16967_s26 + $0x290] sm:$0xff]  }
0x1118   : > { %5115 = vmatpush1.bf16.xpose.msra.mxu1 %v11881_v32  ;;  %5163 = vmatpush1.bf16.xpose.msra.mxu0 %v11883_v48  ;;  %v14207_v32 = vld [vmem:[%s16967_s26 + $0x2c0] sm:$0xff]  }
0x1119   : > { %5116 = vmatprep.subr.bf16.mxu1 %v11878_v28  ;;  %5164 = vmatprep.subr.bf16.mxu0 %v11880_v4  ;;  %v14208_v48 = vld [vmem:[%s16967_s26 + $0x200] sm:$0xff]   ;;  %v5620_v4 = vld [vmem:[#allocation18 + $0x3a0] sm:$0xff] }
0x111a   : > { %v14209_v28 = vld [vmem:[%s16967_s26 + $0x280] sm:$0xff]   ;;  %v11965_v29 = vcombine.low %v5620_v4, %v5622_v6  ;;  %v11966_v10 = vcombine.high %v5620_v4, %v5622_v6 }
0x1120   : > { %5117 = vmatpush1.bf16.xpose.msra.mxu1 %v11877_v5  ;;  %5165 = vmatpush1.bf16.xpose.msra.mxu0 %v11879_v18  ;;  %v5623_v5 = vld [vmem:[#allocation18 + $0x3e8] sm:$0xff] }
0x1121   : > { %5118 = vmatprep.subr.bf16.mxu1 %v11874_v25  ;;  %5166 = vmatprep.subr.bf16.mxu0 %v11876_v8  ;;  %v11967_v18 = vcombine.low %v5621_v7, %v5623_v5  ;;  %v11968_v25 = vcombine.high %v5621_v7, %v5623_v5  ;;  %v5616_v8 = vld [vmem:[#allocation18 + $0x320] sm:$0xff] }
0x1128   : > { %5119 = vmatpush1.bf16.xpose.msra.mxu1 %v11873_v33  ;;  %5167 = vmatpush1.bf16.xpose.msra.mxu0 %v11875_v39  ;;  %v5618_v33 = vld [vmem:[#allocation18 + $0x360] sm:$0xff]  ;;  %v5617_v39 = vld [vmem:[#allocation18 + $0x328] sm:$0xff] }
0x1129   : > { %12837 = vmatprep.subr.bf16.mxu1 %v14178_v41  ;;  %12857 = vmatprep.subr.bf16.mxu0 %v14179_v43  ;;  %v11962_v41 = vcombine.high %v5616_v8, %v5618_v33  ;;  %v5619_v43 = vld [vmem:[#allocation18 + $0x368] sm:$0xff]  ;;  %v11961_v37 = vcombine.low %v5616_v8, %v5618_v33 }
0x112a   : > { %v11964_v0 = vcombine.high %v5617_v39, %v5619_v43  ;;  %v5593_v8 = vld [vmem:[#allocation18 + $0x28] sm:$0xff] }
0x112f   : > { %5137 = vmatmul.mubr.bf16.vlgmr.msra.gmra.mxu1 %v16075_v38  ;;  %5185 = vmatmul.mubr.bf16.vlgmr.msra.gmra.mxu0 %v16077_v50  ;;  %v14187_v38 = vld [vmem:[%s16967_s26 + $0x2e8] sm:$0xff]  }
0x1130   : > { %5144 = vmatprep.mubr.bf16.mxu1 %v4253_v61  ;;  %5192 = vmatprep.mubr.bf16.mxu0 %v4255_v3  ;;  %v14188_v50 = vld [vmem:[%s16967_s26 + $0x228] sm:$0xff]   ;;  %v11960_v61 = vcombine.high %v5613_v31, %v5615_v35  ;;  %v5608_v3 = vld [vmem:[#allocation18 + $0x220] sm:$0xff] }
0x1131   : > { %12838 = vmatpush3.bf16.xpose.msra.mxu1 %v14180_v56  ;;  %12858 = vmatpush3.bf16.xpose.msra.mxu0 %v14181_v57  ;;  %v11963_v56 = vcombine.low %v5617_v39, %v5619_v43  ;;  %v11958_v57 = vcombine.high %v5612_v49, %v5614_v17  ;;  %v5595_v43 = vld [vmem:[#allocation18 + $0x68] sm:$0xff] }
0x1132   : > { %12839 = vmatprep.subr.bf16.mxu1 %v14182_v40  ;;  %12859 = vmatprep.subr.bf16.mxu0 %v14183_v27  ;;  %v5610_v40 = vld [vmem:[#allocation18 + $0x260] sm:$0xff]  ;;  %v5609_v27 = vld [vmem:[#allocation18 + $0x228] sm:$0xff]  ;;  %v11939_v17 = vcombine.low %v5593_v8, %v5595_v43 }
0x1137   : > { %5145 = vmatmul.mubr.bf16.gmra.mxu1 %v4252_v16  ;;  %5193 = vmatmul.mubr.bf16.gmra.mxu0 %v4254_v24  ;;  %v11959_v16 = vcombine.low %v5613_v31, %v5615_v35  ;;  %v11954_v24 = vcombine.high %v5608_v3, %v5610_v40  ;;  %v11940_v31 = vcombine.high %v5593_v8, %v5595_v43 }
0x1138   : > { %12853 = vmatprep.mubr.bf16.mxu1 %v15985_v23  ;;  %12873 = vmatprep.mubr.bf16.mxu0 %v15985_v23 }
0x1139   : > { %12840 = vmatpush3.bf16.xpose.msra.mxu1 %v14184_v42  ;;  %12860 = vmatpush3.bf16.xpose.msra.mxu0 %v14185_v12  ;;  %v11956_v42 = vcombine.high %v5609_v27, %v5611_v15  ;;  %v5604_v12 = vld [vmem:[#allocation18 + $0x1a0] sm:$0xff] }
0x113a   : > { %12841 = vmatprep.subr.bf16.mxu1 %v14186_v63  ;;  %12861 = vmatprep.subr.bf16.mxu0 %v14187_v38  ;;  %v5606_v63 = vld [vmem:[#allocation18 + $0x1e0] sm:$0xff]  ;;  %v5605_v38 = vld [vmem:[#allocation18 + $0x1a8] sm:$0xff] }
0x1141   : > { %12842 = vmatpush3.bf16.xpose.msra.mxu1 %v14188_v50  ;;  %12862 = vmatpush3.bf16.xpose.msra.mxu0 %v14189_v54  ;;  %v5607_v50 = vld [vmem:[#allocation18 + $0x1e8] sm:$0xff]  ;;  %v11953_v54 = vcombine.low %v5608_v3, %v5610_v40 }
0x1142   : > { %12843 = vmatprep.subr.bf16.mxu1 %v14190_v13  ;;  %12863 = vmatprep.subr.bf16.mxu0 %v14191_v62  ;;  %v11955_v13 = vcombine.low %v5609_v27, %v5611_v15  ;;  %v11950_v62 = vcombine.high %v5604_v12, %v5606_v63 }
0x1149   : > { %12844 = vmatpush3.bf16.xpose.msra.mxu1 %v14192_v11  ;;  %12864 = vmatpush3.bf16.xpose.msra.mxu0 %v14193_v53  ;;  %v11952_v11 = vcombine.high %v5605_v38, %v5607_v50  ;;  %v5600_v53 = vld [vmem:[#allocation18 + $0x120] sm:$0xff] }
0x114a   : > { %12845 = vmatprep.subr.bf16.mxu1 %v14194_v59  ;;  %12865 = vmatprep.subr.bf16.mxu0 %v14195_v9  ;;  %v5602_v59 = vld [vmem:[#allocation18 + $0x160] sm:$0xff]  ;;  %v5601_v9 = vld [vmem:[#allocation18 + $0x128] sm:$0xff] }
0x1151   : > { %12846 = vmatpush3.bf16.xpose.msra.mxu1 %v14196_v26  ;;  %12866 = vmatpush3.bf16.xpose.msra.mxu0 %v14197_v60  ;;  %v5603_v26 = vld [vmem:[#allocation18 + $0x168] sm:$0xff]  ;;  %v11949_v60 = vcombine.low %v5604_v12, %v5606_v63 }
0x1152   : > { %12847 = vmatprep.subr.bf16.mxu1 %v14198_v2  ;;  %12867 = vmatprep.subr.bf16.mxu0 %v14199_v1  ;;  %v11951_v2 = vcombine.low %v5605_v38, %v5607_v50  ;;  %v11946_v1 = vcombine.high %v5600_v53, %v5602_v59 }
0x1159   : > { %12848 = vmatpush3.bf16.xpose.msra.mxu1 %v14200_v51  ;;  %12868 = vmatpush3.bf16.xpose.msra.mxu0 %v14201_v46  ;;  %v11948_v51 = vcombine.high %v5601_v9, %v5603_v26  ;;  %v5596_v46 = vld [vmem:[#allocation18 + $0xa0] sm:$0xff] }
0x115a   : > { %12849 = vmatprep.subr.bf16.mxu1 %v14202_v47  ;;  %12869 = vmatprep.subr.bf16.mxu0 %v14203_v52  ;;  %v5598_v47 = vld [vmem:[#allocation18 + $0xe0] sm:$0xff]  ;;  %v5597_v52 = vld [vmem:[#allocation18 + $0xa8] sm:$0xff] }
0x1161   : > { %12850 = vmatpush3.bf16.xpose.msra.mxu1 %v14204_v44  ;;  %12870 = vmatpush3.bf16.xpose.msra.mxu0 %v14205_v45  ;;  %v5599_v44 = vld [vmem:[#allocation18 + $0xe8] sm:$0xff]  ;;  %v11945_v45 = vcombine.low %v5600_v53, %v5602_v59 }
0x1162   : > { %12851 = vmatprep.subr.bf16.mxu1 %v14206_v55  ;;  %12871 = vmatprep.subr.bf16.mxu0 %v14207_v32  ;;  %v11947_v55 = vcombine.low %v5601_v9, %v5603_v26  ;;  %v11942_v32 = vcombine.high %v5596_v46, %v5598_v47  ;;  %v11943_v4 = vcombine.low %v5597_v52, %v5599_v44 }
0x1169   : > { %12852 = vmatpush3.bf16.xpose.msra.mxu1 %v14208_v48  ;;  %12872 = vmatpush3.bf16.xpose.msra.mxu0 %v14209_v28  ;;  %v11944_v48 = vcombine.high %v5597_v52, %v5599_v44  ;;  %v11941_v28 = vcombine.low %v5596_v46, %v5598_v47 }
0x116a   : > { %5792 = vmatprep.subr.bf16.mxu1 %v11966_v10  ;;  %5840 = vmatprep.subr.bf16.mxu0 %v11968_v25  ;;  %v5594_v25 = vld [vmem:[#allocation18 + $0x60] sm:$0xff] }
0x1170   : > { %12854 = vmatmul.mubr.bf16.vlgmr.msra.gmra.mxu1 %v15985_v23  ;;  %12874 = vmatmul.mubr.bf16.vlgmr.msra.gmra.mxu0 %v15985_v23 }
0x1171   : > { %12855 = vmatprep.mubr.bf16.mxu1 %v15991_v30  ;;  %12875 = vmatprep.mubr.bf16.mxu0 %v15991_v30 }
0x1172   : > { %5793 = vmatpush1.bf16.xpose.msra.mxu1 %v11965_v29  ;;  %5841 = vmatpush1.bf16.xpose.msra.mxu0 %v11967_v18  ;;  %v5592_v18 = vld [vmem:[#allocation18 + $0x20] sm:$0xff] }
0x1173   : > { %5794 = vmatprep.subr.bf16.mxu1 %v11962_v41  ;;  %5842 = vmatprep.subr.bf16.mxu0 %v11964_v0  ;;  %v11938_v41 = vcombine.high %v5592_v18, %v5594_v25  ;;  %v11937_v49 = vcombine.low %v5592_v18, %v5594_v25 }
0x1178   : > { %12856 = vmatmul.mubr.bf16.gmra.mxu1 %v15991_v30  ;;  %12876 = vmatmul.mubr.bf16.gmra.mxu0 %v15991_v30 }
0x117a   : > { %5795 = vmatpush1.bf16.xpose.msra.mxu1 %v11961_v37  ;;  %5843 = vmatpush1.bf16.xpose.msra.mxu0 %v11963_v56 }
0x117b   : > { %5796 = vmatprep.subr.bf16.mxu1 %v11958_v57  ;;  %5844 = vmatprep.subr.bf16.mxu0 %v11960_v61 }
0x1182   : > { %5797 = vmatpush1.bf16.xpose.msra.mxu1 %v11957_v34  ;;  %5845 = vmatpush1.bf16.xpose.msra.mxu0 %v11959_v16  ;;  %v14210_v34 = vld [vmem:[%s16967_s26 + $0x378] sm:$0xff]  }
0x1183   : > { %5798 = vmatprep.subr.bf16.mxu1 %v11954_v24  ;;  %5846 = vmatprep.subr.bf16.mxu0 %v11956_v42  ;;  %v14211_v16 = vld [vmem:[%s16967_s26 + $0x3f8] sm:$0xff]  }
0x118a   : > { %5799 = vmatpush1.bf16.xpose.msra.mxu1 %v11953_v54  ;;  %5847 = vmatpush1.bf16.xpose.msra.mxu0 %v11955_v13 }
0x118b   : > { %5800 = vmatprep.subr.bf16.mxu1 %v11950_v62  ;;  %5848 = vmatprep.subr.bf16.mxu0 %v11952_v11 }
0x1192   : > { %5801 = vmatpush1.bf16.xpose.msra.mxu1 %v11949_v60  ;;  %5849 = vmatpush1.bf16.xpose.msra.mxu0 %v11951_v2 }
0x1193   : > { %5802 = vmatprep.subr.bf16.mxu1 %v11946_v1  ;;  %5850 = vmatprep.subr.bf16.mxu0 %v11948_v51 }
0x119a   : > { %5803 = vmatpush1.bf16.xpose.msra.mxu1 %v11945_v45  ;;  %5851 = vmatpush1.bf16.xpose.msra.mxu0 %v11947_v55 }
0x119b   : > { %5804 = vmatprep.subr.bf16.mxu1 %v11942_v32  ;;  %5852 = vmatprep.subr.bf16.mxu0 %v11944_v48  ;;  %v5264_v32 = vld [vmem:[#allocation16 + $0x8] sm:$0xf] }
0x11a2   : > { %5805 = vmatpush1.bf16.xpose.msra.mxu1 %v11941_v28  ;;  %5853 = vmatpush1.bf16.xpose.msra.mxu0 %v11943_v4  ;;  %v5273_v4 = vrot.slane %v5264_v32, %v15619_v21 }
0x11a3   : > { %5806 = vmatprep.subr.bf16.mxu1 %v11938_v41  ;;  %5854 = vmatprep.subr.bf16.mxu0 %v11940_v31 }
0x11aa   : > { %5807 = vmatpush1.bf16.xpose.msra.mxu1 %v11937_v49  ;;  %5855 = vmatpush1.bf16.xpose.msra.mxu0 %v11939_v17 }
0x11ab   : > { %12877 = vmatprep.subr.bf16.mxu1 %v14210_v34  ;;  %12897 = vmatprep.subr.bf16.mxu0 %v14211_v16 }
0x11af   : > { %v4882_v6 = vpop.f32.mrf.mxu1  ;;  %v4930_v7 = vpop.f32.mrf.mxu0 }
0x11b0   : > { %v4931_v29 = vadd.f32 %v4930_v7, %v4882_v6  ;;  %v5281_v6 = vrot.slane %v5264_v32, %v16084_v36  ;;  %v5269_v7 = vrot.slane %v5264_v32, %v15612_v14 }
0x11b1   : > { %v4884_v10 = vpop.f32.mrf.mxu1  ;;  %v4932_v5 = vpop.f32.mrf.mxu0 }
0x11b3   : > { %v4885_v33 = vpop.f32.mrf.mxu1  ;;  %v4933_v39 = vpop.f32.mrf.mxu0 }
0x11b4   : > { %v4934_v0 = vadd.f32 %v4933_v39, %v4885_v33 }
0x11b5   : > { %v4887_v35 = vpop.f32.mrf.mxu1  ;;  %v4935_v37 = vpop.f32.mrf.mxu0 }
0x11b7   : > { %v4890_v56 = vpop.f32.mrf.mxu1  ;;  %v4938_v57 = vpop.f32.mrf.mxu0 }
0x11b8   : > { %v4939_v61 = vadd.f32 %v4938_v57, %v4890_v56 }
0x11b9   : > { %v4892_v3 = vpop.f32.mrf.mxu1  ;;  %v4940_v40 = vpop.f32.mrf.mxu0 }
0x11bb   : > { %v4893_v27 = vpop.f32.mrf.mxu1  ;;  %v4941_v15 = vpop.f32.mrf.mxu0 }
0x11bd   : > { %v4894_v24 = vpop.f32.mrf.mxu1  ;;  %v4942_v42 = vpop.f32.mrf.mxu0 }
0x11ef   : > { %v5138_v12 = vpop.f32.mrf.mxu1  ;;  %v5186_v63 = vpop.f32.mrf.mxu0 }
0x11f0   : > { %v5139_v38 = vadd.f32 %v5138_v12, %v4931_v29  ;;  %v5277_v29 = vrot.slane %v5264_v32, %v15648_v58 }
0x11f1   : > { %v5140_v50 = vpop.f32.mrf.mxu1  ;;  %v5188_v54 = vpop.f32.mrf.mxu0 }
0x11f2   : > { %v16178_v13 = vadd.f32 %v5186_v63, %v5139_v38  ;;  %v14212_v54 = vld [vmem:[%s16967_s26 + $0x338] sm:$0xff]  }
0x11f3   : > { %v5141_v62 = vpop.f32.mrf.mxu1  ;;  %v5189_v11 = vpop.f32.mrf.mxu0 }
0x11f4   : > { %v5142_v53 = vadd.f32 %v5141_v62, %v4934_v0  ;;  %v14213_v62 = vld [vmem:[%s16967_s26 + $0x3b8] sm:$0xff]  }
0x11f5   : > { %v5143_v59 = vpop.f32.mrf.mxu1  ;;  %v5191_v9 = vpop.f32.mrf.mxu0 }
0x11f6   : > { %v16180_v26 = vadd.f32 %v5189_v11, %v5142_v53 }
0x11f7   : > { %v5146_v60 = vpop.f32.mrf.mxu1  ;;  %v5194_v2 = vpop.f32.mrf.mxu0 }
0x11f8   : > { %v5147_v1 = vadd.f32 %v5146_v60, %v4939_v61 }
0x11f9   : > { %v5148_v51 = vpop.f32.mrf.mxu1  ;;  %v5196_v46 = vpop.f32.mrf.mxu0 }
0x11fa   : > { %v16182_v47 = vadd.f32 %v5194_v2, %v5147_v1  ;;  %v14214_v1 = vld [vmem:[%s16967_s26 + $0x370] sm:$0xff]  }
0x11fb   : > { %v5149_v52 = vpop.f32.mrf.mxu1  ;;  %v5197_v44 = vpop.f32.mrf.mxu0  ;;  %v14215_v51 = vld [vmem:[%s16967_s26 + $0x3f0] sm:$0xff]  }
0x11fd   : > { %v5150_v45 = vpop.f32.mrf.mxu1  ;;  %v5198_v55 = vpop.f32.mrf.mxu0 }
0x1230   : > { %v5512_v48 = vpop.f32.mrf.mxu1  ;;  %v5563_v28 = vpop.f32.mrf.mxu0 }
0x1231   : > { %v5513_v43 = vadd.f32 %v5512_v48, %v5269_v7  ;;  %v5564_v0 = vadd.f32 %v5563_v28, %v5277_v29 }
0x1232   : > { %v5514_v10 = vpop.f32.mrf.mxu1  ;;  %v5565_v5 = vpop.f32.mrf.mxu0 }
0x1233   : > { %v5515_v8 = vadd.f32 %v5514_v10, %v5273_v4  ;;  %v5566_v33 = vadd.f32 %v5565_v5, %v5281_v6  ;;  %v5580_v34 = vmax.f32 %v5513_v43, 0.0  ;;  %v5582_v16 = vmax.f32 %v5564_v0, 0.0  ;;  %v14218_v10 = vld [vmem:[%s16967_s26 + $0x368] sm:$0xff]   ;;  %v14226_v43 = vld [vmem:[%s16967_s26 + $0x358] sm:$0xff]  }
0x1234   : > { %v5516_v18 = vpop.f32.mrf.mxu1  ;;  %v5567_v25 = vpop.f32.mrf.mxu0  ;;  %v14219_v5 = vld [vmem:[%s16967_s26 + $0x3e8] sm:$0xff]   ;;  %v14227_v0 = vld [vmem:[%s16967_s26 + $0x3d8] sm:$0xff]  }
0x1235   : > { %v5517_v39 = vadd.f32 %v5516_v18, %v5269_v7  ;;  %v5568_v41 = vadd.f32 %v5567_v25, %v5277_v29  ;;  %v5581_v3 = vmax.f32 %v5515_v8, 0.0  ;;  %v5583_v40 = vmax.f32 %v5566_v33, 0.0  ;;  %v14220_v18 = vld [vmem:[%s16967_s26 + $0x328] sm:$0xff]   ;;  %v14222_v8 = vld [vmem:[%s16967_s26 + $0x360] sm:$0xff]  }
0x1236   : > { %v5518_v49 = vpop.f32.mrf.mxu1  ;;  %v5569_v17 = vpop.f32.mrf.mxu0  ;;  %v14221_v25 = vld [vmem:[%s16967_s26 + $0x3a8] sm:$0xff]   ;;  %v14223_v33 = vld [vmem:[%s16967_s26 + $0x3e0] sm:$0xff]  }
0x1237   : > { %v5519_v31 = vadd.f32 %v5518_v49, %v5273_v4  ;;  %v5570_v35 = vadd.f32 %v5569_v17, %v5281_v6  ;;  %v5584_v37 = vmax.f32 %v5517_v39, 0.0  ;;  %v5586_v56 = vmax.f32 %v5568_v41, 0.0  ;;  %v14224_v39 = vld [vmem:[%s16967_s26 + $0x320] sm:$0xff]   ;;  %v14228_v49 = vld [vmem:[%s16967_s26 + $0x318] sm:$0xff]  }
0x1238   : > { %v5522_v57 = vpop.f32.mrf.mxu1  ;;  %v5573_v61 = vpop.f32.mrf.mxu0  ;;  %v14225_v41 = vld [vmem:[%s16967_s26 + $0x3a0] sm:$0xff]   ;;  %v14229_v17 = vld [vmem:[%s16967_s26 + $0x398] sm:$0xff]  }
0x1239   : > { %v5585_v27 = vmax.f32 %v5519_v31, 0.0  ;;  %v5587_v15 = vmax.f32 %v5570_v35, 0.0  ;;  %v5624_v11 = vpack.c.bf16 %v5584_v37, %v5580_v34  ;;  %v5626_v53 = vpack.c.bf16 %v5586_v56, %v5582_v16  ;;  %v14230_v31 = vld [vmem:[%s16967_s26 + $0x350] sm:$0xff]   ;;  %v14240_v34 = vld [vmem:[%s16967_s26 + $0x300] sm:$0xff]  }
0x123a   : > { %v5524_v24 = vpop.f32.mrf.mxu1  ;;  %v5575_v42 = vpop.f32.mrf.mxu0  ;;  %v5523_v59 = vadd.f32 %v5522_v57, %v5269_v7  ;;  %v5574_v9 = vadd.f32 %v5573_v61, %v5277_v29  ;;  %v14231_v35 = vld [vmem:[%s16967_s26 + $0x3d0] sm:$0xff]   ;;  %v14234_v57 = vld [vmem:[%s16967_s26 + $0x348] sm:$0xff]   ;;  %v14241_v16 = vld [vmem:[%s16967_s26 + $0x380] sm:$0xff]  }
0x123b   : > { %v5525_v12 = vadd.f32 %v5524_v24, %v5273_v4  ;;  %v5576_v63 = vadd.f32 %v5575_v42, %v5281_v6  ;;  %v5625_v38 = vpack.c.bf16 %v5585_v27, %v5581_v3  ;;  %v5627_v50 = vpack.c.bf16 %v5587_v15, %v5583_v40  ;;  %v14216_v4 = vld [vmem:[%s16967_s26 + $0x330] sm:$0xff]   ;;  %v14235_v61 = vld [vmem:[%s16967_s26 + $0x3c8] sm:$0xff]   ;;  %v14238_v27 = vld [vmem:[%s16967_s26 + $0x340] sm:$0xff]  }
0x123c   : > { %v5526_v60 = vpop.f32.mrf.mxu1  ;;  %v5577_v2 = vpop.f32.mrf.mxu0  ;;  %v5588_v48 = vmax.f32 %v5523_v59, 0.0  ;;  %v5590_v28 = vmax.f32 %v5574_v9, 0.0  ;;  %v14217_v6 = vld [vmem:[%s16967_s26 + $0x3b0] sm:$0xff]   ;;  %v14236_v3 = vld [vmem:[%s16967_s26 + $0x308] sm:$0xff]   ;;  %v14239_v15 = vld [vmem:[%s16967_s26 + $0x3c0] sm:$0xff]  }
0x123d   : > { %v5589_v46 = vmax.f32 %v5525_v12, 0.0  ;;  %v5591_v52 = vmax.f32 %v5576_v63, 0.0  ;;  %5824 = vmatprep.mubr.bf16.mxu1 %v5625_v38  ;;  %5872 = vmatprep.mubr.bf16.mxu0 %v5627_v50  ;;  %v14232_v37 = vld [vmem:[%s16967_s26 + $0x310] sm:$0xff]   ;;  %v14237_v40 = vld [vmem:[%s16967_s26 + $0x388] sm:$0xff]  }
0x123e   : > { %v5527_v44 = vpop.f32.mrf.mxu1  ;;  %v5578_v45 = vpop.f32.mrf.mxu0  ;;  %5825 = vmatmul.mubr.bf16.vlgmr.msra.gmra.mxu1 %v5624_v11  ;;  %5873 = vmatmul.mubr.bf16.vlgmr.msra.gmra.mxu0 %v5626_v53  ;;  %v5628_v7 = vpack.c.bf16 %v5588_v48, %v5588_v48  ;;  %v5630_v29 = vpack.c.bf16 %v5590_v28, %v5590_v28  ;;  %v14233_v56 = vld [vmem:[%s16967_s26 + $0x390] sm:$0xff]   ;;  %v6311_v24 = vld [vmem:[#allocation18 + $0x3b0] sm:$0xff] }
0x123f   : > { %v5629_v55 = vpack.c.bf16 %v5589_v46, %v5589_v46  ;;  %v5631_v32 = vpack.c.bf16 %v5591_v52, %v5591_v52  ;;  %12878 = vmatpush3.bf16.xpose.msra.mxu1 %v14212_v54  ;;  %12898 = vmatpush3.bf16.xpose.msra.mxu0 %v14213_v62  ;;  %v6313_v42 = vld [vmem:[#allocation18 + $0x3f0] sm:$0xff]  ;;  %v6312_v12 = vld [vmem:[#allocation18 + $0x3b8] sm:$0xff] }
0x1240   : > { %12879 = vmatprep.subr.bf16.mxu1 %v14214_v1  ;;  %12899 = vmatprep.subr.bf16.mxu0 %v14215_v51  ;;  %v12029_v63 = vcombine.low %v6311_v24, %v6313_v42  ;;  %v12030_v38 = vcombine.high %v6311_v24, %v6313_v42  ;;  %v6314_v50 = vld [vmem:[#allocation18 + $0x3f8] sm:$0xff]  ;;  %v6307_v11 = vld [vmem:[#allocation18 + $0x330] sm:$0xff] }
0x1241   : > { %5832 = vmatprep.mubr.bf16.mxu1 %v5629_v55  ;;  %5880 = vmatprep.mubr.bf16.mxu0 %v5631_v32  ;;  %v12031_v54 = vcombine.low %v6312_v12, %v6314_v50  ;;  %v12032_v62 = vcombine.high %v6312_v12, %v6314_v50  ;;  %v6309_v53 = vld [vmem:[#allocation18 + $0x370] sm:$0xff]  ;;  %v6310_v9 = vld [vmem:[#allocation18 + $0x378] sm:$0xff] }
0x1242   : > { %v12026_v59 = vcombine.high %v6307_v11, %v6309_v53  ;;  %v6305_v2 = vld [vmem:[#allocation18 + $0x2f0] sm:$0xff]  ;;  %v6304_v1 = vld [vmem:[#allocation18 + $0x2b8] sm:$0xff]  ;;  %v12025_v46 = vcombine.low %v6307_v11, %v6309_v53 }
0x1243   : > { %v6306_v51 = vld [vmem:[#allocation18 + $0x2f8] sm:$0xff]  ;;  %v6299_v55 = vld [vmem:[#allocation18 + $0x230] sm:$0xff] }
0x1244   : > { %v12024_v45 = vcombine.high %v6304_v1, %v6306_v51  ;;  %v6301_v32 = vld [vmem:[#allocation18 + $0x270] sm:$0xff]  ;;  %v6300_v48 = vld [vmem:[#allocation18 + $0x238] sm:$0xff] }
0x1245   : > { %v6302_v28 = vld [vmem:[#allocation18 + $0x278] sm:$0xff]  ;;  %v6283_v12 = vld [vmem:[#allocation18 + $0x30] sm:$0xff] }
0x1246   : > { %5833 = vmatmul.mubr.bf16.gmra.mxu1 %v5628_v7  ;;  %5881 = vmatmul.mubr.bf16.gmra.mxu0 %v5630_v29  ;;  %v12018_v7 = vcombine.high %v6299_v55, %v6301_v32  ;;  %v12020_v29 = vcombine.high %v6300_v48, %v6302_v28 }
0x1247   : > { %12880 = vmatpush3.bf16.xpose.msra.mxu1 %v14216_v4  ;;  %12900 = vmatpush3.bf16.xpose.msra.mxu0 %v14217_v6  ;;  %v12023_v6 = vcombine.low %v6304_v1, %v6306_v51 }
0x1248   : > { %12893 = vmatprep.mubr.bf16.mxu1 %v15985_v23  ;;  %12913 = vmatprep.mubr.bf16.mxu0 %v15985_v23 }
0x1249   : > { %12881 = vmatprep.subr.bf16.mxu1 %v14218_v10  ;;  %12901 = vmatprep.subr.bf16.mxu0 %v14219_v5  ;;  %v6295_v10 = vld [vmem:[#allocation18 + $0x1b0] sm:$0xff] }
0x124a   : > { %v6297_v5 = vld [vmem:[#allocation18 + $0x1f0] sm:$0xff] }
0x124f   : > { %12882 = vmatpush3.bf16.xpose.msra.mxu1 %v14220_v18  ;;  %12902 = vmatpush3.bf16.xpose.msra.mxu0 %v14221_v25  ;;  %v6296_v18 = vld [vmem:[#allocation18 + $0x1b8] sm:$0xff] }
0x1250   : > { %12883 = vmatprep.subr.bf16.mxu1 %v14222_v8  ;;  %12903 = vmatprep.subr.bf16.mxu0 %v14223_v33  ;;  %v6298_v25 = vld [vmem:[#allocation18 + $0x1f8] sm:$0xff]  ;;  %v12017_v8 = vcombine.low %v6299_v55, %v6301_v32  ;;  %v12019_v33 = vcombine.low %v6300_v48, %v6302_v28 }
0x1257   : > { %12884 = vmatpush3.bf16.xpose.msra.mxu1 %v14224_v39  ;;  %12904 = vmatpush3.bf16.xpose.msra.mxu0 %v14225_v41  ;;  %v12014_v39 = vcombine.high %v6295_v10, %v6297_v5  ;;  %v12016_v41 = vcombine.high %v6296_v18, %v6298_v25 }
0x1258   : > { %12885 = vmatprep.subr.bf16.mxu1 %v14226_v43  ;;  %12905 = vmatprep.subr.bf16.mxu0 %v14227_v0  ;;  %v6291_v43 = vld [vmem:[#allocation18 + $0x130] sm:$0xff] }
0x1259   : > { %v6293_v0 = vld [vmem:[#allocation18 + $0x170] sm:$0xff] }
0x125f   : > { %12886 = vmatpush3.bf16.xpose.msra.mxu1 %v14228_v49  ;;  %12906 = vmatpush3.bf16.xpose.msra.mxu0 %v14229_v17  ;;  %v6292_v49 = vld [vmem:[#allocation18 + $0x138] sm:$0xff] }
0x1260   : > { %12887 = vmatprep.subr.bf16.mxu1 %v14230_v31  ;;  %12907 = vmatprep.subr.bf16.mxu0 %v14231_v35  ;;  %v6294_v17 = vld [vmem:[#allocation18 + $0x178] sm:$0xff]  ;;  %v12013_v31 = vcombine.low %v6295_v10, %v6297_v5  ;;  %v12015_v35 = vcombine.low %v6296_v18, %v6298_v25  ;;  %v5955_v5 = vld [vmem:[#allocation16 + $0xc] sm:$0xf] }
0x1267   : > { %12888 = vmatpush3.bf16.xpose.msra.mxu1 %v14232_v37  ;;  %12908 = vmatpush3.bf16.xpose.msra.mxu0 %v14233_v56  ;;  %v12010_v37 = vcombine.high %v6291_v43, %v6293_v0  ;;  %v12012_v56 = vcombine.high %v6292_v49, %v6294_v17 }
0x1268   : > { %12889 = vmatprep.subr.bf16.mxu1 %v14234_v57  ;;  %12909 = vmatprep.subr.bf16.mxu0 %v14235_v61  ;;  %v6287_v57 = vld [vmem:[#allocation18 + $0xb0] sm:$0xff] }
0x1269   : > { %v6289_v61 = vld [vmem:[#allocation18 + $0xf0] sm:$0xff] }
0x126a   : > { %v12005_v24 = vcombine.low %v6287_v57, %v6289_v61 }
0x126f   : > { %12890 = vmatpush3.bf16.xpose.msra.mxu1 %v14236_v3  ;;  %12910 = vmatpush3.bf16.xpose.msra.mxu0 %v14237_v40  ;;  %v6288_v3 = vld [vmem:[#allocation18 + $0xb8] sm:$0xff] }
0x1270   : > { %12891 = vmatprep.subr.bf16.mxu1 %v14238_v27  ;;  %12911 = vmatprep.subr.bf16.mxu0 %v14239_v15  ;;  %v6290_v40 = vld [vmem:[#allocation18 + $0xf8] sm:$0xff]  ;;  %v12009_v27 = vcombine.low %v6291_v43, %v6293_v0  ;;  %v12011_v15 = vcombine.low %v6292_v49, %v6294_v17 }
0x1271   : > { %v12007_v42 = vcombine.low %v6288_v3, %v6290_v40 }
0x1277   : > { %12892 = vmatpush3.bf16.xpose.msra.mxu1 %v14240_v34  ;;  %12912 = vmatpush3.bf16.xpose.msra.mxu0 %v14241_v16  ;;  %v12006_v34 = vcombine.high %v6287_v57, %v6289_v61  ;;  %v12008_v16 = vcombine.high %v6288_v3, %v6290_v40 }
0x1278   : > { %6483 = vmatprep.subr.bf16.mxu1 %v12030_v38  ;;  %6531 = vmatprep.subr.bf16.mxu0 %v12032_v62  ;;  %v6284_v38 = vld [vmem:[#allocation18 + $0x38] sm:$0xff] }
0x127e   : > { %12894 = vmatmul.mubr.bf16.vlgmr.msra.gmra.mxu1 %v15985_v23  ;;  %12914 = vmatmul.mubr.bf16.vlgmr.msra.gmra.mxu0 %v15985_v23  ;;  %v6308_v23 = vld [vmem:[#allocation18 + $0x338] sm:$0xff] }
0x127f   : > { %12895 = vmatprep.mubr.bf16.mxu1 %v15991_v30  ;;  %12915 = vmatprep.mubr.bf16.mxu0 %v15991_v30  ;;  %v12028_v60 = vcombine.high %v6308_v23, %v6310_v9  ;;  %v12027_v52 = vcombine.low %v6308_v23, %v6310_v9 }
0x1280   : > { %6484 = vmatpush1.bf16.xpose.msra.mxu1 %v12029_v63  ;;  %6532 = vmatpush1.bf16.xpose.msra.mxu0 %v12031_v54  ;;  %v6285_v63 = vld [vmem:[#allocation18 + $0x70] sm:$0xff]  ;;  %v6286_v54 = vld [vmem:[#allocation18 + $0x78] sm:$0xff] }
0x1281   : > { %6485 = vmatprep.subr.bf16.mxu1 %v12026_v59  ;;  %6533 = vmatprep.subr.bf16.mxu0 %v12028_v60  ;;  %v12002_v50 = vcombine.high %v6283_v12, %v6285_v63  ;;  %v12001_v62 = vcombine.low %v6283_v12, %v6285_v63  ;;  %v12003_v11 = vcombine.low %v6284_v38, %v6286_v54 }
0x1282   : > { %v12004_v53 = vcombine.high %v6284_v38, %v6286_v54 }
0x1286   : > { %12896 = vmatmul.mubr.bf16.gmra.mxu1 %v15991_v30  ;;  %12916 = vmatmul.mubr.bf16.gmra.mxu0 %v15991_v30  ;;  %v6303_v30 = vld [vmem:[#allocation18 + $0x2b0] sm:$0xff] }
0x1287   : > { %v12022_v44 = vcombine.high %v6303_v30, %v6305_v2  ;;  %v12021_v4 = vcombine.low %v6303_v30, %v6305_v2 }
0x1288   : > { %6486 = vmatpush1.bf16.xpose.msra.mxu1 %v12025_v46  ;;  %6534 = vmatpush1.bf16.xpose.msra.mxu0 %v12027_v52 }
0x1289   : > { %6487 = vmatprep.subr.bf16.mxu1 %v12022_v44  ;;  %6535 = vmatprep.subr.bf16.mxu0 %v12024_v45 }
0x1290   : > { %6488 = vmatpush1.bf16.xpose.msra.mxu1 %v12021_v4  ;;  %6536 = vmatpush1.bf16.xpose.msra.mxu0 %v12023_v6 }
0x1291   : > { %6489 = vmatprep.subr.bf16.mxu1 %v12018_v7  ;;  %6537 = vmatprep.subr.bf16.mxu0 %v12020_v29 }
0x1298   : > { %6490 = vmatpush1.bf16.xpose.msra.mxu1 %v12017_v8  ;;  %6538 = vmatpush1.bf16.xpose.msra.mxu0 %v12019_v33  ;;  %v5964_v8 = vrot.slane %v5955_v5, %v15619_v21  ;;  %v5960_v33 = vrot.slane %v5955_v5, %v15612_v14 }
0x1299   : > { %6491 = vmatprep.subr.bf16.mxu1 %v12014_v39  ;;  %6539 = vmatprep.subr.bf16.mxu0 %v12016_v41  ;;  %v5968_v39 = vrot.slane %v5955_v5, %v15648_v58 }
0x12a0   : > { %6492 = vmatpush1.bf16.xpose.msra.mxu1 %v12013_v31  ;;  %6540 = vmatpush1.bf16.xpose.msra.mxu0 %v12015_v35 }
0x12a1   : > { %6493 = vmatprep.subr.bf16.mxu1 %v12010_v37  ;;  %6541 = vmatprep.subr.bf16.mxu0 %v12012_v56 }
0x12a8   : > { %6494 = vmatpush1.bf16.xpose.msra.mxu1 %v12009_v27  ;;  %6542 = vmatpush1.bf16.xpose.msra.mxu0 %v12011_v15 }
0x12a9   : > { %6495 = vmatprep.subr.bf16.mxu1 %v12006_v34  ;;  %6543 = vmatprep.subr.bf16.mxu0 %v12008_v16 }
0x12b0   : > { %6496 = vmatpush1.bf16.xpose.msra.mxu1 %v12005_v24  ;;  %6544 = vmatpush1.bf16.xpose.msra.mxu0 %v12007_v42 }
0x12b1   : > { %6497 = vmatprep.subr.bf16.mxu1 %v12002_v50  ;;  %6545 = vmatprep.subr.bf16.mxu0 %v12004_v53 }
0x12b8   : > { %6498 = vmatpush1.bf16.xpose.msra.mxu1 %v12001_v62  ;;  %6546 = vmatpush1.bf16.xpose.msra.mxu0 %v12003_v11 }
0x12fe   : > { %v5826_v23 = vpop.f32.mrf.mxu1  ;;  %v5874_v59 = vpop.f32.mrf.mxu0 }
0x12ff   : > { %v5875_v9 = vadd.f32 %v5874_v59, %v5826_v23 }
0x1300   : > { %v5828_v60 = vpop.f32.mrf.mxu1  ;;  %v5876_v30 = vpop.f32.mrf.mxu0 }
0x1301   : > { %v16227_v2 = vadd.f32 %v5875_v9, %v16178_v13 }
0x1302   : > { %v5829_v1 = vpop.f32.mrf.mxu1  ;;  %v5877_v51 = vpop.f32.mrf.mxu0 }
0x1303   : > { %v5878_v46 = vadd.f32 %v5877_v51, %v5829_v1 }
0x1304   : > { %v5831_v52 = vpop.f32.mrf.mxu1  ;;  %v5879_v44 = vpop.f32.mrf.mxu0 }
0x1305   : > { %v16230_v45 = vadd.f32 %v5878_v46, %v16180_v26  ;;  %v5972_v26 = vrot.slane %v5955_v5, %v16084_v36 }
0x1306   : > { %v5834_v55 = vpop.f32.mrf.mxu1  ;;  %v5882_v32 = vpop.f32.mrf.mxu0 }
0x1307   : > { %v5883_v48 = vadd.f32 %v5882_v32, %v5834_v55 }
0x1308   : > { %v5836_v28 = vpop.f32.mrf.mxu1  ;;  %v5884_v4 = vpop.f32.mrf.mxu0 }
0x1309   : > { %v16233_v6 = vadd.f32 %v5883_v48, %v16182_v47 }
0x130a   : > { %v5837_v7 = vpop.f32.mrf.mxu1  ;;  %v5885_v29 = vpop.f32.mrf.mxu0 }
0x130c   : > { %v5838_v13 = vpop.f32.mrf.mxu1  ;;  %v5886_v10 = vpop.f32.mrf.mxu0 }
0x133e   : > { %v6203_v18 = vpop.f32.mrf.mxu1  ;;  %v6254_v25 = vpop.f32.mrf.mxu0 }
0x133f   : > { %v6204_v37 = vadd.f32 %v6203_v18, %v5960_v33  ;;  %v6255_v56 = vadd.f32 %v6254_v25, %v5968_v39 }
0x1340   : > { %v6205_v41 = vpop.f32.mrf.mxu1  ;;  %v6256_v43 = vpop.f32.mrf.mxu0 }
0x1341   : > { %v6206_v49 = vadd.f32 %v6205_v41, %v5964_v8  ;;  %v6257_v17 = vadd.f32 %v6256_v43, %v5972_v26  ;;  %v6271_v38 = vmax.f32 %v6204_v37, 0.0  ;;  %v6273_v50 = vmax.f32 %v6255_v56, 0.0  ;;  %v12033_v41 = vld [vmem:[%s16969_s11] ss:$0 sm:$0xff] }
0x1342   : > { %v6207_v0 = vpop.f32.mrf.mxu1  ;;  %v6258_v47 = vpop.f32.mrf.mxu0 }
0x1343   : > { %v6208_v31 = vadd.f32 %v6207_v0, %v5960_v33  ;;  %v6259_v35 = vadd.f32 %v6258_v47, %v5968_v39  ;;  %v6272_v24 = vmax.f32 %v6206_v49, 0.0  ;;  %v6274_v42 = vmax.f32 %v6257_v17, 0.0 }
0x1344   : > { %v6209_v57 = vpop.f32.mrf.mxu1  ;;  %v6260_v61 = vpop.f32.mrf.mxu0 }
0x1345   : > { %v6210_v3 = vadd.f32 %v6209_v57, %v5964_v8  ;;  %v6261_v40 = vadd.f32 %v6260_v61, %v5972_v26  ;;  %v6275_v27 = vmax.f32 %v6208_v31, 0.0  ;;  %v6277_v15 = vmax.f32 %v6259_v35, 0.0 }
0x1346   : > { %v6213_v34 = vpop.f32.mrf.mxu1  ;;  %v6264_v16 = vpop.f32.mrf.mxu0 }
0x1347   : > { %v6276_v12 = vmax.f32 %v6210_v3, 0.0  ;;  %v6278_v63 = vmax.f32 %v6261_v40, 0.0  ;;  %v6315_v9 = vpack.c.bf16 %v6275_v27, %v6271_v38  ;;  %v6317_v60 = vpack.c.bf16 %v6277_v15, %v6273_v50  ;;  %v14247_v38 = vld [vmem:[#allocation10 + $0x170] sm:$0xff]   ;;  %v14248_v50 = vld [vmem:[#allocation10 + $0x128] sm:$0xff]  }
0x1348   : > { %v6215_v54 = vpop.f32.mrf.mxu1  ;;  %v6266_v62 = vpop.f32.mrf.mxu0  ;;  %v6214_v30 = vadd.f32 %v6213_v34, %v5960_v33  ;;  %v6265_v1 = vadd.f32 %v6264_v16, %v5968_v39 }
0x1349   : > { %v6216_v11 = vadd.f32 %v6215_v54, %v5964_v8  ;;  %v6267_v53 = vadd.f32 %v6266_v62, %v5972_v26  ;;  %v6316_v23 = vpack.c.bf16 %v6276_v12, %v6272_v24  ;;  %v6318_v59 = vpack.c.bf16 %v6278_v63, %v6274_v42  ;;  %v14242_v42 = vld [vmem:[#allocation10 + $0x138] sm:$0xff]   ;;  %v14249_v54 = vld [vmem:[#allocation10 + $0xe8] sm:$0xff]   ;;  %v14251_v62 = vld [vmem:[#allocation10 + $0x120] sm:$0xff]  }
0x134a   : > { %v6217_v51 = vpop.f32.mrf.mxu1  ;;  %v6268_v46 = vpop.f32.mrf.mxu0  ;;  %v6279_v4 = vmax.f32 %v6214_v30, 0.0  ;;  %v6281_v7 = vmax.f32 %v6265_v1, 0.0  ;;  %v14243_v12 = vld [vmem:[#allocation10 + $0xf8] sm:$0xff]   ;;  %12917 = vmatprep.subr.bf16.mxu1 %v14242_v42 }
0x134b   : > { %v6280_v52 = vmax.f32 %v6216_v11, 0.0  ;;  %v6282_v44 = vmax.f32 %v6267_v53, 0.0  ;;  %6515 = vmatprep.mubr.bf16.mxu1 %v6316_v23  ;;  %6563 = vmatprep.mubr.bf16.mxu0 %v6318_v59  ;;  %v14244_v63 = vld [vmem:[#allocation10 + $0x178] sm:$0xff]   ;;  %v14253_v11 = vld [vmem:[#allocation10 + $0x160] sm:$0xff]  }
0x134c   : > { %v6218_v55 = vpop.f32.mrf.mxu1  ;;  %v6269_v32 = vpop.f32.mrf.mxu0  ;;  %6516 = vmatmul.mubr.bf16.vlgmr.msra.gmra.mxu1 %v6315_v9  ;;  %6564 = vmatmul.mubr.bf16.vlgmr.msra.gmra.mxu0 %v6317_v60  ;;  %v6319_v29 = vpack.c.bf16 %v6279_v4, %v6279_v4  ;;  %v6321_v13 = vpack.c.bf16 %v6281_v7, %v6281_v7  ;;  %v14252_v53 = vld [vmem:[#allocation10 + $0xe0] sm:$0xff]   ;;  %v14254_v23 = vld [vmem:[#allocation10 + $0x118] sm:$0xff]  }
0x134d   : > { %v6320_v48 = vpack.c.bf16 %v6280_v52, %v6280_v52  ;;  %v6322_v28 = vpack.c.bf16 %v6282_v44, %v6282_v44  ;;  %13379 = vmatprep.subr.bf16.mxu0 %v14244_v63  ;;  %12918 = vmatpush3.bf16.xpose.msra.mxu1 %v14243_v12  ;;  %v14255_v4 = vld [vmem:[#allocation10 + $0xd8] sm:$0xff]  }
0x134e   : > { %13380 = vmatpush3.bf16.xpose.msra.mxu0 %v14244_v63  ;;  %v14256_v7 = vld [vmem:[#allocation10 + $0x158] sm:$0xff]   ;;  %v6702_v63 = vld [vmem:[#allocation12 + $0x3] sm:$0x7] }
0x134f   : > { %6523 = vmatprep.mubr.bf16.mxu1 %v6320_v48  ;;  %6571 = vmatprep.mubr.bf16.mxu0 %v6322_v28 }
0x1350   : > { %13381 = vmatprep.subr.bf16.mxu0 %v14247_v38 }
0x1354   : > { %6524 = vmatmul.mubr.bf16.gmra.mxu1 %v6319_v29  ;;  %6572 = vmatmul.mubr.bf16.gmra.mxu0 %v6321_v13  ;;  %v14257_v29 = vld [vmem:[#allocation10 + $0x110] sm:$0xff]  }
0x1355   : > { %v14258_v13 = vld [vmem:[#allocation10 + $0xd0] sm:$0xff]  }
0x1356   : > { %13382 = vmatpush3.bf16.xpose.msra.mxu0 %v14247_v38  ;;  %v6707_v38 = vrot.slane %v6702_v63, %v15612_v14 }
0x140c   : > { %v6517_v10 = vpop.f32.mrf.mxu1  ;;  %v6565_v5 = vpop.f32.mrf.mxu0 }
0x140d   : > { %v6566_v18 = vadd.f32 %v6565_v5, %v6517_v10  ;;  %v14259_v10 = vld [vmem:[#allocation10 + $0x150] sm:$0xff]   ;;  %v14260_v5 = vld [vmem:[#allocation10 + $0x108] sm:$0xff]  }
0x140e   : > { %v6519_v25 = vpop.f32.mrf.mxu1  ;;  %v6567_v8 = vpop.f32.mrf.mxu0 }
0x140f   : > { %v6579_v26 = vadd.f32 %v6566_v18, %v16227_v2  ;;  %v14261_v18 = vld [vmem:[#allocation10 + $0xc8] sm:$0xff]   ;;  %v14263_v8 = vld [vmem:[#allocation10 + $0x100] sm:$0xff]  }
0x1410   : > { %v6520_v33 = vpop.f32.mrf.mxu1  ;;  %v6568_v39 = vpop.f32.mrf.mxu0  ;;  %v14262_v25 = vld [vmem:[#allocation10 + $0x148] sm:$0xff]  }
0x1411   : > { %v6569_v43 = vadd.f32 %v6568_v39, %v6520_v33  ;;  %v6582_v0 = vadd.f32 %v6579_v26, %v15977_v19  ;;  %v14265_v26 = vld [vmem:[#allocation10 + $0x140] sm:$0xff]  }
0x1412   : > { %v6522_v47 = vpop.f32.mrf.mxu1  ;;  %v6570_v49 = vpop.f32.mrf.mxu0  ;;  %v14264_v33 = vld [vmem:[#allocation10 + $0xc0] sm:$0xff]  }
0x1413   : > { %v6580_v17 = vadd.f32 %v6569_v43, %v16230_v45  ;;  %v6592_v31 = vadd.f32 %v12033_v41, %v6582_v0 }
0x1414   : > { %v6525_v35 = vpop.f32.mrf.mxu1  ;;  %v6573_v37 = vpop.f32.mrf.mxu0 }
0x1415   : > { %v6574_v56 = vadd.f32 %v6573_v37, %v6525_v35  ;;  %6597 = vadd.xlane.f32.xlu0 %v6592_v31  ;;  %v6583_v57 = vadd.f32 %v6580_v17, %v15979_v20  ;;  %v14245_v20 = vld [vmem:[#allocation10 + $0x130] sm:$0xff]  }
0x1416   : > { %v6527_v61 = vpop.f32.mrf.mxu1  ;;  %v6575_v3 = vpop.f32.mrf.mxu0  ;;  %12919 = vmatprep.subr.bf16.mxu1 %v14245_v20 }
0x1417   : > { %v6581_v2 = vadd.f32 %v6574_v56, %v16233_v6  ;;  %v6593_v40 = vadd.f32 %v12033_v41, %v6583_v57  ;;  %v14246_v6 = vld [vmem:[#allocation10 + $0xf0] sm:$0xff]   ;;  %v12034_v57 = vld [vmem:[#allocation19] ss:$0 sm:$0xff] }
0x1418   : > { %v6528_v27 = vpop.f32.mrf.mxu1  ;;  %v6576_v15 = vpop.f32.mrf.mxu0  ;;  %12920 = vmatpush3.bf16.xpose.msra.mxu1 %v14246_v6 }
0x1419   : > { %6599 = vadd.xlane.f32.xlu1 %v6593_v40  ;;  %v6584_v19 = vadd.f32 %v6581_v2, %v15981_v22  ;;  %v14250_v22 = vld [vmem:[#allocation10 + $0x168] sm:$0xff]   ;;  %12921 = vmatprep.subr.bf16.mxu1 %v14248_v50 }
0x141a   : > { %v6529_v34 = vpop.f32.mrf.mxu1  ;;  %v6577_v16 = vpop.f32.mrf.mxu0  ;;  %13383 = vmatprep.subr.bf16.mxu0 %v14250_v22 }
0x141b   : > { %v6594_v45 = vadd.f32 %v12033_v41, %v6584_v19  ;;  %13384 = vmatpush3.bf16.xpose.msra.mxu0 %v14250_v22 }
0x141c   : > { %13385 = vmatprep.subr.bf16.mxu0 %v14253_v11 }
0x141d   : > { %v6601_v24 = vsel %vm3771_vm8, %v6594_v45, 0.0 }
0x141e   : > { %6602 = vadd.xlane.f32.xlu0 %v6601_v24 }
0x1420   : > { %12922 = vmatpush3.bf16.xpose.msra.mxu1 %v14249_v54 }
0x1421   : > { %12923 = vmatprep.subr.bf16.mxu1 %v14251_v62 }
0x1423   : > { %13386 = vmatpush3.bf16.xpose.msra.mxu0 %v14253_v11 }
0x1424   : > { %13387 = vmatprep.subr.bf16.mxu0 %v14256_v7 }
0x1428   : > { %12924 = vmatpush3.bf16.xpose.msra.mxu1 %v14252_v53 }
0x1429   : > { %12925 = vmatprep.subr.bf16.mxu1 %v14254_v23 }
0x142b   : > { %13388 = vmatpush3.bf16.xpose.msra.mxu0 %v14256_v7 }
0x142c   : > { %13389 = vmatprep.subr.bf16.mxu0 %v14259_v10 }
0x1430   : > { %12926 = vmatpush3.bf16.xpose.msra.mxu1 %v14255_v4 }
0x1431   : > { %12927 = vmatprep.subr.bf16.mxu1 %v14257_v29 }
0x1433   : > { %13390 = vmatpush3.bf16.xpose.msra.mxu0 %v14259_v10 }
0x1434   : > { %13391 = vmatprep.subr.bf16.mxu0 %v14262_v25 }
0x1438   : > { %12928 = vmatpush3.bf16.xpose.msra.mxu1 %v14258_v13 }
0x1439   : > { %12929 = vmatprep.subr.bf16.mxu1 %v14260_v5 }
0x143b   : > { %13392 = vmatpush3.bf16.xpose.msra.mxu0 %v14262_v25 }
0x143c   : > { %13393 = vmatprep.subr.bf16.mxu0 %v14265_v26 }
0x1440   : > { %12930 = vmatpush3.bf16.xpose.msra.mxu1 %v14261_v18 }
0x1441   : > { %12931 = vmatprep.subr.bf16.mxu1 %v14263_v8 }
0x1443   : > { %13394 = vmatpush3.bf16.xpose.msra.mxu0 %v14265_v26 }
0x1448   : > { %12932 = vmatpush3.bf16.xpose.msra.mxu1 %v14264_v33 }
0x149e   : > { %v6598_v59 = vpop.xlane.xlu0 %6597 }
0x149f   : > { %v6604_v9 = vmul.f32 0.0078125, %v6598_v59 }
0x14a1   : > { %v6607_v60 = vsub.f32 %v6592_v31, %v6604_v9  ;;  %v6711_v9 = vrot.slane %v6702_v63, %v15619_v21 }
0x14a2   : > { %v6600_v30 = vpop.xlane.xlu1 %6599 }
0x14a3   : > { %v6605_v1 = vmul.f32 0.0078125, %v6600_v30  ;;  %v6610_v51 = vmul.f32 %v6607_v60, %v6607_v60 }
0x14a5   : > { %v6608_v46 = vsub.f32 %v6593_v40, %v6605_v1  ;;  %6613 = vadd.xlane.f32.xlu1 %v6610_v51  ;;  %v12035_v40 = vld [vmem:[#allocation21] ss:$0 sm:$0xff] }
0x14a7   : > { %v6603_v52 = vpop.xlane.xlu0 %6602  ;;  %v6611_v44 = vmul.f32 %v6608_v46, %v6608_v46 }
0x14a8   : > { %v6606_v55 = vmul.f32 0.0078125, %v6603_v52 }
0x14a9   : > { %6615 = vadd.xlane.f32.xlu0 %v6611_v44 }
0x14aa   : > { %v6609_v32 = vsub.f32 %v6594_v45, %v6606_v55 }
0x14ac   : > { %v6612_v48 = vmul.f32 %v6609_v32, %v6609_v32 }
0x14ae   : > { %v6617_v28 = vsel %vm3771_vm8, %v6612_v48, 0.0 }
0x14af   : > { %6618 = vadd.xlane.f32.xlu1 %v6617_v28 }
0x152e   : > { %v6614_v39 = vpop.xlane.xlu1 %6613 }
0x152f   : > { %v6620_v41 = vmul.f32 0.0078125, %v6614_v39 }
0x1531   : > { %v6623_v43 = vadd.f32 1e-05, %v6620_v41 }
0x1532   : > { %v6616_v0 = vpop.xlane.xlu0 %6615 }
0x1533   : > { %14466 = vrsqrt.f32 %v6623_v43  ;;  %v6621_v47 = vmul.f32 0.0078125, %v6616_v0 }
0x1535   : > { %v6624_v49 = vadd.f32 1e-05, %v6621_v47 }
0x1537   : > { %14468 = vrsqrt.f32 %v6624_v49 }
0x1538   : > { %v6619_v17 = vpop.xlane.xlu1 %6618 }
0x1539   : > { %v6622_v31 = vmul.f32 0.0078125, %v6619_v17 }
0x153b   : > { %v6625_v35 = vadd.f32 1e-05, %v6622_v31 }
0x153d   : > { %14470 = vrsqrt.f32 %v6625_v35 }
0x1540   : > { %v14467_v37 = vpop.eup %14466 }
0x1541   : > { %v6629_v56 = vmul.f32 %v14467_v37, %v6607_v60 }
0x1543   : > { %v6638_v2 = vmul.f32 %v12034_v57, %v6629_v56 }
0x1544   : > { %v14469_v61 = vpop.eup %14468 }
0x1545   : > { %v6630_v3 = vmul.f32 %v14469_v61, %v6608_v46  ;;  %v16248_v15 = vadd.f32 %v12035_v40, %v6638_v2 }
0x1547   : > { %v6639_v27 = vmul.f32 %v12034_v57, %v6630_v3 }
0x1549   : > { %v16250_v19 = vadd.f32 %v12035_v40, %v6639_v27 }
0x154a   : > { %v14471_v34 = vpop.eup %14470 }
0x154b   : > { %v6699_v16 = vpack.c.bf16 %v16250_v19, %v16248_v15  ;;  %v6631_v45 = vmul.f32 %v14471_v34, %v6609_v32  ;;  %v6715_v32 = vrot.slane %v6702_v63, %v15648_v58 }
0x154d   : > { %12933 = vmatprep.mubr.bf16.mxu1 %v6699_v16  ;;  %13395 = vmatprep.mubr.bf16.mxu0 %v6699_v16  ;;  %v6640_v24 = vmul.f32 %v12034_v57, %v6631_v45 }
0x154e   : > { %12934 = vmatmul.mubr.bf16.vlgmr.msra.gmra.mxu1 %v6699_v16 }
0x154f   : > { %v16254_v42 = vadd.f32 %v12035_v40, %v6640_v24 }
0x1551   : > { %v6700_v12 = vpack.c.bf16 %v16254_v42, %v16254_v42 }
0x1553   : > { %12935 = vmatprep.mubr.bf16.mxu1 %v6700_v12  ;;  %13396 = vmatmul.mubr.bf16.vlgmr.msra.gmra.mxu0 %v6700_v12 }
0x1556   : > { %12936 = vmatmul.mubr.bf16.gmra.mxu1 %v6700_v12 }
0x160e   : > { %v6897_v20 = vpop.f32.mrf.mxu1 }
0x160f   : > { %v6898_v22 = vadd.f32 %v6897_v20, %v6707_v38 }
0x1610   : > { %v6899_v6 = vpop.f32.mrf.mxu1 }
0x1611   : > { %v6900_v52 = vadd.f32 %v6899_v6, %v6711_v9 }
0x1612   : > { %v6901_v50 = vpop.f32.mrf.mxu1 }
0x1613   : > { %v6902_v54 = vadd.f32 %v6901_v50, %v6707_v38  ;;  %v13397_v62 = vpop.f32.mrf.mxu0 }
0x1614   : > { %v6903_v11 = vpop.f32.mrf.mxu1  ;;  %v6957_v4 = vadd.f32 %v13397_v62, %v6715_v32 }
0x1615   : > { %v16259_v53 = vpack.c.bf16 %v6902_v54, %v6898_v22  ;;  %v6948_v23 = vpop.f32.mrf.mxu0  ;;  %v6904_v1 = vadd.f32 %v6903_v11, %v6711_v9 }
0x1616   : > { %v6907_v59 = vpop.f32.mrf.mxu1  ;;  %v16275_v7 = vpack.c.bf16 %v6957_v4, %v6957_v4  ;;  %v6949_v18 = vadd.f32 %v6948_v23, %v6715_v32 }
0x1617   : > { %v13398_v60 = vpop.f32.mrf.mxu0  ;;  %13403 = vmatprep.mubr.msk.bf16.mxu1 %vm2668_vm5, %v16259_v53  ;;  %v16267_v48 = vpack.c.bf16 %v6904_v1, %v6900_v52  ;;  %v6908_v10 = vadd.f32 %v6907_v59, %v6707_v38  ;;  %v16312_v52 = vld [vmem:[%s16965_s14 + $0x78] sm:$0xff]  }
0x1618   : > { %v6909_v30 = vpop.f32.mrf.mxu1  ;;  %v7090_v26 = vsel %vm2334_vm3, %v16275_v7, 0 }
0x1619   : > { %v6910_v51 = vadd.f32 %v6909_v30, %v6711_v9  ;;  %v6990_v29 = vsel %vm2668_vm5, %v16267_v48, 0  ;;  %v6951_v13 = vpop.f32.mrf.mxu0  ;;  %v16281_v25 = vpack.c.bf16 %v6908_v10, %v6908_v10 }
0x161a   : > { %v6911_v46 = vpop.f32.mrf.mxu1  ;;  %v6952_v5 = vadd.f32 %v6951_v13, %v6715_v32  ;;  %v7480_v32 = vsel %vm2668_vm5, %v16312_v52, 0  ;;  %v16328_v13 = vld [vmem:[%s16965_s14 + $0x68] sm:$0xff]  }
0x161b   : > { %v16264_v44 = vpack.c.bf16 %v6910_v51, %v6910_v51  ;;  %v7474_v10 = vsel %vm2668_vm5, %v16328_v13, 0 }
0x161c   : > { %v6912_v55 = vpop.f32.mrf.mxu1  ;;  %v16283_v8 = vpack.c.bf16 %v6952_v5, %v6949_v18  ;;  %v16335_v5 = vld [vmem:[%s16965_s14 + $0x60] sm:$0xff]  }
0x161d   : > { %13627 = vmatprep.subr.msk.bf16.mxu1 %vm2668_vm5, %v16264_v44  ;;  %v6993_v28 = vsel %vm2668_vm5, %v16264_v44, 0  ;;  %v7471_v18 = vsel %vm2668_vm5, %v16335_v5, 0 }
0x161e   : > { %13400 = vmatpush3.bf16.xpose.msra.mxu1 %v6993_v28  ;;  %v16320_v28 = vld [vmem:[%s16965_s14 + $0x70] sm:$0xff]  }
0x161f   : > { %13628 = vmatprep.subr.msk.bf16.mxu1 %vm2668_vm5, %v16267_v48 }
0x1626   : > { %13402 = vmatpush3.bf16.xpose.msra.mxu1 %v6990_v29  ;;  %v7477_v29 = vsel %vm2668_vm5, %v16320_v28, 0 }
0x1627   : > { %13629 = vmatprep.subr.msk.bf16.mxu1 %vm2334_vm3, %v16275_v7 }
0x162d   : > { %13404 = vmatmul.mubr.msk.bf16.vlgmr.msra.gmra.mxu1 %vm2668_vm5, %v16281_v25 }
0x162e   : > { %13408 = vmatpush3.bf16.msra.mxu1 %v7090_v26  ;;  %v16342_v26 = vld [vmem:[%s16965_s14 + $0x58] sm:$0xff]  }
0x162f   : > { %13409 = vmatprep.subr.bf16.mxu1 %v16283_v8 }
0x1632   : > { %13410 = vmatpush3.bf16.msra.mxu1 %v16283_v8 }
0x16ed   : > { %v13405_v33 = vpop.f32.mrf.mxu1 }
0x16ee   : > { %v7045_v0 = vmul.f32 0.17677669, %v13405_v33  ;;  %v7468_v33 = vsel %vm2668_vm5, %v16342_v26, 0 }
0x16ef   : > { %v7029_v39 = vpop.f32.mrf.mxu1 }
0x16f0   : > { %v7043_v41 = vmul.f32 0.17677669, %v7029_v39  ;;  %v7052_v31 = vsel %vm2739_vm6, %v7045_v0, -inf  ;;  %v16349_v39 = vld [vmem:[%s16965_s14 + $0x50] sm:$0xff]  }
0x16f1   : > { %v13406_v43 = vpop.f32.mrf.mxu1 }
0x16f2   : > { %v7046_v47 = vsel %vm2732_vm7, %v7043_v41, -inf  ;;  %v16356_v43 = vld [vmem:[%s16965_s14 + $0x48] sm:$0xff]  }
0x16f3   : > { %7047 = vmax.xlane.f32.xlu0 %v7046_v47  ;;  %v7032_v49 = vpop.f32.mrf.mxu1  ;;  %v16363_v47 = vld [vmem:[%s16965_s14 + $0x40] sm:$0xff]  }
0x16f4   : > { %v7044_v17 = vmul.f32 0.17677669, %v7032_v49  ;;  %v7459_v49 = vsel %vm2668_vm5, %v16363_v47, 0 }
0x16f6   : > { %v7049_v35 = vsel %vm2732_vm7, %v7044_v17, -inf }
0x16f7   : > { %7053 = vmax.xlane.f32.xlu0 %v7052_v31  ;;  %7050 = vmax.xlane.f32.xlu1 %v7049_v35 }
0x177c   : > { %v7048_v37 = vpop.xlane.xlu0 %7047 }
0x177d   : > { %v7055_v56 = vsub.f32 %v7043_v41, %v7048_v37  ;;  %v7465_v41 = vsel %vm2668_vm5, %v16349_v39, 0 }
0x177f   : > { %v7058_v57 = vmul.f32 1.442695, %v7055_v56 }
0x1780   : > { %v7054_v61 = vpop.xlane.xlu0 %7053  ;;  %v7051_v3 = vpop.xlane.xlu1 %7050 }
0x1781   : > { %14472 = vpow2.f32 %v7058_v57  ;;  %v7057_v2 = vsub.f32 %v7045_v0, %v7054_v61  ;;  %v7056_v40 = vsub.f32 %v7044_v17, %v7051_v3  ;;  %v7462_v0 = vsel %vm2668_vm5, %v16356_v43, 0 }
0x1783   : > { %v7062_v27 = vmul.f32 1.442695, %v7057_v2  ;;  %v7060_v34 = vmul.f32 1.442695, %v7056_v40 }
0x1785   : > { %14474 = vpow2.f32 %v7062_v27 }
0x1786   : > { %14476 = vpow2.f32 %v7060_v34 }
0x178e   : > { %v14473_v16 = vpop.eup %14472 }
0x178f   : > { %v7064_v45 = vsel %vm2732_vm7, %v14473_v16, 0.0 }
0x1790   : > { %7065 = vadd.xlane.f32.xlu1 %v7064_v45 }
0x1792   : > { %v14475_v24 = vpop.eup %14474 }
0x1793   : > { %v14477_v12 = vpop.eup %14476  ;;  %v7070_v63 = vsel %vm2739_vm6, %v14475_v24, 0.0 }
0x1794   : > { %7071 = vadd.xlane.f32.xlu1 %v7070_v63  ;;  %v7067_v20 = vsel %vm2732_vm7, %v14477_v12, 0.0 }
0x1795   : > { %7068 = vadd.xlane.f32.xlu0 %v7067_v20 }
0x17a5   : > { %7150 = vrot.lane.b32.xlu1 %v16267_v48, %s15137_s15 }
0x17a9   : > { %7144 = vrot.lane.b32.xlu1 %v16259_v53, %s15137_s15 }
0x17ab   : > { %7152 = vrot.lane.b32.xlu0 %v16264_v44, %s15137_s15 }
0x17ad   : > { %7146 = vrot.lane.b32.xlu1 %v16281_v25, %s15137_s15 }
0x1819   : > { %v7066_v38 = vpop.xlane.xlu1 %7065 }
0x181a   : > { %14478 = vrcp.f32 %v7066_v38 }
0x181d   : > { %v7072_v6 = vpop.xlane.xlu1 %7071 }
0x181e   : > { %v7069_v50 = vpop.xlane.xlu0 %7068  ;;  %14480 = vrcp.f32 %v7072_v6 }
0x181f   : > { %14482 = vrcp.f32 %v7069_v50 }
0x1821   : > { %v7151_v59 = vpop.permute.xlu1 %7150 }
0x1822   : > { %v7153_v22 = vpop.permute.xlu0 %7152  ;;  %v7161_v55 = vsel %vm2668_vm5, %v7151_v59, 0 }
0x1823   : > { %13630 = vmatprep.subr.msk.bf16.mxu1 %vm2668_vm5, %v7153_v22  ;;  %v7164_v51 = vsel %vm2668_vm5, %v7153_v22, 0 }
0x1825   : > { %v7145_v46 = vpop.permute.xlu1 %7144 }
0x1827   : > { %v14479_v54 = vpop.eup %14478 }
0x1828   : > { %v7076_v9 = vmul.f32 %v14479_v54, %v14473_v16 }
0x1829   : > { %v7147_v4 = vpop.permute.xlu1 %7146 }
0x182b   : > { %v14481_v62 = vpop.eup %14480 }
0x182c   : > { %v14483_v11 = vpop.eup %14482  ;;  %v7078_v23 = vmul.f32 %v14481_v62, %v14475_v24 }
0x182d   : > { %v7077_v60 = vmul.f32 %v14483_v11, %v14477_v12 }
0x182e   : > { %v7080_v30 = vpack.c.bf16 %v7078_v23, %v7078_v23 }
0x182f   : > { %v7079_v1 = vpack.c.bf16 %v7077_v60, %v7076_v9 }
0x1831   : > { %13411 = vmatprep.mubr.msk.bf16.mxu1 %vm2732_vm7, %v7079_v1 }
0x1832   : > { %13412 = vmatmul.mubr.msk.bf16.vlgmr.msra.gmra.mxu1 %vm2732_vm7, %v7080_v30 }
0x1833   : > { %13416 = vmatpush3.bf16.xpose.msra.mxu1 %v7164_v51  ;;  %13419 = vmatprep.mubr.msk.bf16.mxu1 %vm2668_vm5, %v7145_v46 }
0x1834   : > { %13631 = vmatprep.subr.msk.bf16.mxu1 %vm2668_vm5, %v7151_v59 }
0x183b   : > { %13418 = vmatpush3.bf16.xpose.msra.mxu1 %v7161_v55 }
0x183c   : > { %13641 = vmatprep.subr.msk.bf16.mxu1 %vm2668_vm5, %v16312_v52 }
0x1842   : > { %13420 = vmatmul.mubr.msk.bf16.vlgmr.msra.gmra.mxu1 %vm2668_vm5, %v7147_v4 }
0x1843   : > { %13452 = vmatpush3.bf16.xpose.msra.mxu1 %v7480_v32 }
0x1844   : > { %13642 = vmatprep.subr.msk.bf16.mxu1 %vm2668_vm5, %v16320_v28 }
0x184b   : > { %13454 = vmatpush3.bf16.xpose.msra.mxu1 %v7477_v29 }
0x184c   : > { %13643 = vmatprep.subr.msk.bf16.mxu1 %vm2668_vm5, %v16328_v13 }
0x1853   : > { %13456 = vmatpush3.bf16.xpose.msra.mxu1 %v7474_v10 }
0x1854   : > { %13644 = vmatprep.subr.msk.bf16.mxu1 %vm2668_vm5, %v16335_v5 }
0x185b   : > { %13458 = vmatpush3.bf16.xpose.msra.mxu1 %v7471_v18 }
0x185c   : > { %13645 = vmatprep.subr.msk.bf16.mxu1 %vm2668_vm5, %v16342_v26 }
0x1863   : > { %13460 = vmatpush3.bf16.xpose.msra.mxu1 %v7468_v33 }
0x1864   : > { %13646 = vmatprep.subr.msk.bf16.mxu1 %vm2668_vm5, %v16349_v39 }
0x186b   : > { %13462 = vmatpush3.bf16.xpose.msra.mxu1 %v7465_v41 }
0x186c   : > { %13647 = vmatprep.subr.msk.bf16.mxu1 %vm2668_vm5, %v16356_v43 }
0x1873   : > { %13464 = vmatpush3.bf16.xpose.msra.mxu1 %v7462_v0 }
0x1874   : > { %13648 = vmatprep.subr.msk.bf16.mxu1 %vm2668_vm5, %v16363_v47 }
0x187b   : > { %13466 = vmatpush3.bf16.xpose.msra.mxu1 %v7459_v49 }
0x18f2   : > { %v13413_v17 = vpop.f32.mrf.mxu1 }
0x18f3   : > { %v7141_v57 = vpack.c.bf16 %v13413_v17, %v13413_v17 }
0x18f4   : > { %v7126_v31 = vpop.f32.mrf.mxu1 }
0x18f6   : > { %v13414_v35 = vpop.f32.mrf.mxu1 }
0x18f8   : > { %v7129_v37 = vpop.f32.mrf.mxu1 }
0x18f9   : > { %v7140_v56 = vpack.c.bf16 %v7129_v37, %v7126_v31 }
0x18fb   : > { %13467 = vmatprep.mubr.msk.bf16.mxu1 %vm2668_vm5, %v7140_v56 }
0x18fc   : > { %13468 = vmatmul.mubr.msk.bf16.vlgmr.msra.gmra.mxu1 %vm2668_vm5, %v7141_v57 }
0x1902   : > { %v13421_v61 = vpop.f32.mrf.mxu1 }
0x1903   : > { %v7216_v27 = vmul.f32 0.17677669, %v13421_v61 }
0x1904   : > { %v7200_v3 = vpop.f32.mrf.mxu1 }
0x1905   : > { %v7214_v2 = vmul.f32 0.17677669, %v7200_v3  ;;  %v7223_v24 = vsel %vm2739_vm6, %v7216_v27, -inf }
0x1906   : > { %v13422_v40 = vpop.f32.mrf.mxu1 }
0x1907   : > { %v7217_v34 = vsel %vm2732_vm7, %v7214_v2, -inf }
0x1908   : > { %7218 = vmax.xlane.f32.xlu0 %v7217_v34  ;;  %v7203_v16 = vpop.f32.mrf.mxu1 }
0x1909   : > { %v7215_v45 = vmul.f32 0.17677669, %v7203_v16 }
0x190b   : > { %v7220_v12 = vsel %vm2732_vm7, %v7215_v45, -inf }
0x190c   : > { %7224 = vmax.xlane.f32.xlu0 %v7223_v24  ;;  %7221 = vmax.xlane.f32.xlu1 %v7220_v12 }
0x1991   : > { %v7219_v63 = vpop.xlane.xlu0 %7218 }
0x1992   : > { %v7226_v20 = vsub.f32 %v7214_v2, %v7219_v63 }
0x1994   : > { %v7229_v38 = vmul.f32 1.442695, %v7226_v20 }
0x1995   : > { %v7225_v6 = vpop.xlane.xlu0 %7224  ;;  %v7222_v50 = vpop.xlane.xlu1 %7221 }
0x1996   : > { %14484 = vpow2.f32 %v7229_v38  ;;  %v7228_v22 = vsub.f32 %v7216_v27, %v7225_v6  ;;  %v7227_v54 = vsub.f32 %v7215_v45, %v7222_v50 }
0x1998   : > { %v7233_v62 = vmul.f32 1.442695, %v7228_v22  ;;  %v7231_v11 = vmul.f32 1.442695, %v7227_v54 }
0x199a   : > { %14486 = vpow2.f32 %v7233_v62 }
0x199b   : > { %14488 = vpow2.f32 %v7231_v11 }
0x19a3   : > { %v14485_v23 = vpop.eup %14484 }
0x19a4   : > { %v7235_v59 = vsel %vm2732_vm7, %v14485_v23, 0.0 }
0x19a5   : > { %7236 = vadd.xlane.f32.xlu0 %v7235_v59 }
0x19a7   : > { %v14487_v9 = vpop.eup %14486 }
0x19a8   : > { %v14489_v60 = vpop.eup %14488  ;;  %v7241_v30 = vsel %vm2739_vm6, %v14487_v9, 0.0 }
0x19a9   : > { %7242 = vadd.xlane.f32.xlu1 %v7241_v30  ;;  %v7238_v1 = vsel %vm2732_vm7, %v14489_v60, 0.0 }
0x19aa   : > { %7239 = vadd.xlane.f32.xlu0 %v7238_v1 }
0x19ba   : > { %7254 = vrot.lane.b32.xlu1 %v16283_v8, %s15137_s15 }
0x19bc   : > { %v16379_v51 = vpop.f32.mrf.mxu1 }
0x19be   : > { %7372 = vrot.lane.b32.xlu1 %v16312_v52, %s15137_s15  ;;  %v16383_v46 = vpop.f32.mrf.mxu1 }
0x19c0   : > { %7256 = vrot.lane.b32.xlu0 %v16275_v7, %s15137_s15  ;;  %v13470_v55 = vpop.f32.mrf.mxu1 }
0x19c2   : > { %7370 = vrot.lane.b32.xlu1 %v16320_v28, %s15137_s15 }
0x19c4   : > { %7368 = vrot.lane.b32.xlu0 %v16328_v13, %s15137_s15 }
0x19c6   : > { %7366 = vrot.lane.b32.xlu1 %v16335_v5, %s15137_s15 }
0x19c8   : > { %7364 = vrot.lane.b32.xlu0 %v16342_v26, %s15137_s15 }
0x19ca   : > { %7362 = vrot.lane.b32.xlu1 %v16349_v39, %s15137_s15 }
0x19cc   : > { %7360 = vrot.lane.b32.xlu0 %v16356_v43, %s15137_s15 }
0x19ce   : > { %7358 = vrot.lane.b32.xlu1 %v16363_v47, %s15137_s15 }
0x19d0   : > { %7536 = vrot.lane.b32.xlu0 %v16264_v44, %s15138_s3 }
0x19d2   : > { %7534 = vrot.lane.b32.xlu1 %v16267_v48, %s15138_s3 }
0x19d4   : > { %7530 = vrot.lane.b32.xlu0 %v16259_v53, %s15138_s3 }
0x19d6   : > { %7803 = vrot.lane.b32.xlu1 %v16264_v44, %s15139_s0 }
0x19d8   : > { %7532 = vrot.lane.b32.xlu0 %v16281_v25, %s15138_s3 }
0x19da   : > { %7801 = vrot.lane.b32.xlu1 %v16267_v48, %s15139_s0 }
0x19dc   : > { %7797 = vrot.lane.b32.xlu0 %v16259_v53, %s15139_s0 }
0x19de   : > { %7799 = vrot.lane.b32.xlu1 %v16281_v25, %s15139_s0 }
0x1a2e   : > { %v7237_v32 = vpop.xlane.xlu0 %7236 }
0x1a2f   : > { %14490 = vrcp.f32 %v7237_v32 }
0x1a32   : > { %v7243_v4 = vpop.xlane.xlu1 %7242 }
0x1a33   : > { %v7240_v29 = vpop.xlane.xlu0 %7239  ;;  %14492 = vrcp.f32 %v7243_v4 }
0x1a34   : > { %14494 = vrcp.f32 %v7240_v29 }
0x1a36   : > { %v7255_v44 = vpop.permute.xlu1 %7254 }
0x1a37   : > { %v7257_v10 = vpop.permute.xlu0 %7256 }
0x1a38   : > { %v7266_v18 = vsel %vm2334_vm3, %v7257_v10, 0  ;;  %13632 = vmatprep.subr.msk.bf16.mxu0 %vm2334_vm3, %v7257_v10 }
0x1a39   : > { %13424 = vmatpush3.bf16.msra.mxu0 %v7266_v18 }
0x1a3a   : > { %13425 = vmatprep.subr.bf16.mxu0 %v7255_v44  ;;  %v7373_v48 = vpop.permute.xlu1 %7372 }
0x1a3b   : > { %v7402_v35 = vsel %vm2668_vm5, %v7373_v48, 0  ;;  %v7369_v57 = vpop.permute.xlu0 %7368 }
0x1a3c   : > { %v14491_v53 = vpop.eup %14490  ;;  %v7396_v61 = vsel %vm2668_vm5, %v7369_v57, 0 }
0x1a3d   : > { %13426 = vmatpush3.bf16.msra.mxu0 %v7255_v44  ;;  %v7247_v0 = vmul.f32 %v14491_v53, %v14485_v23 }
0x1a3e   : > { %13633 = vmatprep.subr.msk.bf16.mxu0 %vm2668_vm5, %v7373_v48  ;;  %v7371_v37 = vpop.permute.xlu1 %7370 }
0x1a3f   : > { %v7399_v56 = vsel %vm2668_vm5, %v7371_v37, 0  ;;  %v7365_v40 = vpop.permute.xlu0 %7364 }
0x1a40   : > { %v14493_v25 = vpop.eup %14492  ;;  %v7390_v27 = vsel %vm2668_vm5, %v7365_v40, 0 }
0x1a41   : > { %v14495_v33 = vpop.eup %14494  ;;  %v7249_v41 = vmul.f32 %v14493_v25, %v14487_v9 }
0x1a42   : > { %v7248_v49 = vmul.f32 %v14495_v33, %v14489_v60  ;;  %v7367_v3 = vpop.permute.xlu1 %7366 }
0x1a43   : > { %v7251_v17 = vpack.c.bf16 %v7249_v41, %v7249_v41  ;;  %v7393_v2 = vsel %vm2668_vm5, %v7367_v3, 0  ;;  %v7361_v45 = vpop.permute.xlu0 %7360 }
0x1a44   : > { %v7250_v31 = vpack.c.bf16 %v7248_v49, %v7247_v0  ;;  %v7384_v24 = vsel %vm2668_vm5, %v7361_v45, 0 }
0x1a46   : > { %13427 = vmatprep.mubr.msk.bf16.mxu0 %vm2732_vm7, %v7250_v31  ;;  %v7363_v34 = vpop.permute.xlu1 %7362 }
0x1a47   : > { %13428 = vmatmul.mubr.msk.bf16.vlgmr.msra.gmra.mxu0 %vm2732_vm7, %v7251_v17  ;;  %v7387_v16 = vsel %vm2668_vm5, %v7363_v34, 0  ;;  %v7537_v20 = vpop.permute.xlu0 %7536 }
0x1a48   : > { %13432 = vmatpush3.bf16.xpose.msra.mxu0 %v7402_v35  ;;  %v7548_v11 = vsel %vm2668_vm5, %v7537_v20, 0 }
0x1a49   : > { %13634 = vmatprep.subr.msk.bf16.mxu0 %vm2668_vm5, %v7371_v37 }
0x1a4a   : > { %v7359_v12 = vpop.permute.xlu1 %7358 }
0x1a4b   : > { %v7381_v63 = vsel %vm2668_vm5, %v7359_v12, 0  ;;  %v7531_v23 = vpop.permute.xlu0 %7530 }
0x1a4e   : > { %v7535_v59 = vpop.permute.xlu1 %7534 }
0x1a4f   : > { %v7545_v9 = vsel %vm2668_vm5, %v7535_v59, 0  ;;  %v7533_v30 = vpop.permute.xlu0 %7532 }
0x1a50   : > { %13434 = vmatpush3.bf16.xpose.msra.mxu0 %v7399_v56 }
0x1a51   : > { %13635 = vmatprep.subr.msk.bf16.mxu0 %vm2668_vm5, %v7369_v57 }
0x1a52   : > { %v7804_v60 = vpop.permute.xlu1 %7803 }
0x1a53   : > { %v7798_v1 = vpop.permute.xlu0 %7797  ;;  %v7815_v55 = vsel %vm2668_vm5, %v7804_v60, 0 }
0x1a56   : > { %v7802_v32 = vpop.permute.xlu1 %7801 }
0x1a57   : > { %v7812_v4 = vsel %vm2668_vm5, %v7802_v32, 0 }
0x1a58   : > { %13436 = vmatpush3.bf16.xpose.msra.mxu0 %v7396_v61 }
0x1a59   : > { %13636 = vmatprep.subr.msk.bf16.mxu0 %vm2668_vm5, %v7367_v3 }
0x1a5a   : > { %v7800_v29 = vpop.permute.xlu1 %7799 }
0x1a60   : > { %13438 = vmatpush3.bf16.xpose.msra.mxu0 %v7393_v2 }
0x1a61   : > { %13637 = vmatprep.subr.msk.bf16.mxu0 %vm2668_vm5, %v7365_v40 }
0x1a68   : > { %13440 = vmatpush3.bf16.xpose.msra.mxu0 %v7390_v27 }
0x1a69   : > { %13638 = vmatprep.subr.msk.bf16.mxu0 %vm2668_vm5, %v7363_v34 }
0x1a70   : > { %13442 = vmatpush3.bf16.xpose.msra.mxu0 %v7387_v16 }
0x1a71   : > { %13639 = vmatprep.subr.msk.bf16.mxu0 %vm2668_vm5, %v7361_v45 }
0x1a78   : > { %13444 = vmatpush3.bf16.xpose.msra.mxu0 %v7384_v24 }
0x1a79   : > { %13640 = vmatprep.subr.msk.bf16.mxu0 %vm2668_vm5, %v7359_v12 }
0x1a80   : > { %13446 = vmatpush3.bf16.xpose.msra.mxu0 %v7381_v63 }
0x1a81   : > { %13649 = vmatprep.subr.msk.bf16.mxu0 %vm2668_vm5, %v7537_v20 }
0x1b07   : > { %v13429_v38 = vpop.f32.mrf.mxu0 }
0x1b08   : > { %v7317_v62 = vpack.c.bf16 %v13429_v38, %v13429_v38 }
0x1b09   : > { %v7302_v6 = vpop.f32.mrf.mxu0 }
0x1b0b   : > { %v13430_v50 = vpop.f32.mrf.mxu0 }
0x1b0d   : > { %v7305_v22 = vpop.f32.mrf.mxu0 }
0x1b0e   : > { %v7316_v54 = vpack.c.bf16 %v7305_v22, %v7302_v6 }
0x1b10   : > { %13447 = vmatprep.mubr.msk.bf16.mxu0 %vm2668_vm5, %v7316_v54 }
0x1b11   : > { %13448 = vmatmul.mubr.msk.bf16.vlgmr.msra.gmra.mxu0 %vm2668_vm5, %v7317_v62 }
0x1b12   : > { %13472 = vmatpush3.bf16.xpose.msra.mxu0 %v7548_v11  ;;  %13475 = vmatprep.mubr.msk.bf16.mxu0 %vm2668_vm5, %v7531_v23 }
0x1b13   : > { %13650 = vmatprep.subr.msk.bf16.mxu0 %vm2668_vm5, %v7535_v59 }
0x1b1a   : > { %13474 = vmatpush3.bf16.xpose.msra.mxu0 %v7545_v9 }
0x1b1b   : > { %13660 = vmatprep.subr.msk.bf16.mxu0 %vm2668_vm5, %v7804_v60 }
0x1b21   : > { %13476 = vmatmul.mubr.msk.bf16.vlgmr.msra.gmra.mxu0 %vm2668_vm5, %v7533_v30 }
0x1b22   : > { %13508 = vmatpush3.bf16.xpose.msra.mxu0 %v7815_v55  ;;  %13511 = vmatprep.mubr.msk.bf16.mxu0 %vm2668_vm5, %v7798_v1 }
0x1b23   : > { %13661 = vmatprep.subr.msk.bf16.mxu0 %vm2668_vm5, %v7802_v32 }
0x1b2a   : > { %13510 = vmatpush3.bf16.xpose.msra.mxu0 %v7812_v4 }
0x1b31   : > { %13512 = vmatmul.mubr.msk.bf16.vlgmr.msra.gmra.mxu0 %vm2668_vm5, %v7800_v29 }
0x1bd1   : > { %v16451_v10 = vpop.f32.mrf.mxu0 }
0x1bd3   : > { %v16453_v44 = vpop.f32.mrf.mxu0 }
0x1bd5   : > { %v13450_v18 = vpop.f32.mrf.mxu0 }
0x1bd7   : > { %v16455_v48 = vpop.f32.mrf.mxu0 }
0x1be1   : > { %v13477_v53 = vpop.f32.mrf.mxu0 }
0x1be2   : > { %v7600_v25 = vmul.f32 0.17677669, %v13477_v53 }
0x1be3   : > { %v7584_v33 = vpop.f32.mrf.mxu0 }
0x1be4   : > { %v7598_v41 = vmul.f32 0.17677669, %v7584_v33  ;;  %v7607_v0 = vsel %vm2739_vm6, %v7600_v25, -inf }
0x1be5   : > { %7608 = vmax.xlane.f32.xlu0 %v7607_v0  ;;  %v13478_v49 = vpop.f32.mrf.mxu0 }
0x1be6   : > { %v7601_v35 = vsel %vm2732_vm7, %v7598_v41, -inf }
0x1be7   : > { %v7587_v17 = vpop.f32.mrf.mxu0 }
0x1be8   : > { %v7599_v31 = vmul.f32 0.17677669, %v7587_v17 }
0x1be9   : > { %7602 = vmax.xlane.f32.xlu0 %v7601_v35 }
0x1bea   : > { %v7604_v37 = vsel %vm2732_vm7, %v7599_v31, -inf }
0x1beb   : > { %7605 = vmax.xlane.f32.xlu1 %v7604_v37 }
0x1bf1   : > { %v13513_v56 = vpop.f32.mrf.mxu0 }
0x1bf2   : > { %v7867_v57 = vmul.f32 0.17677669, %v13513_v56 }
0x1bf3   : > { %v7851_v61 = vpop.f32.mrf.mxu0 }
0x1bf4   : > { %v7865_v3 = vmul.f32 0.17677669, %v7851_v61  ;;  %v7874_v2 = vsel %vm2739_vm6, %v7867_v57, -inf }
0x1bf5   : > { %7875 = vmax.xlane.f32.xlu1 %v7874_v2  ;;  %v13514_v40 = vpop.f32.mrf.mxu0 }
0x1bf6   : > { %v7868_v27 = vsel %vm2732_vm7, %v7865_v3, -inf }
0x1bf7   : > { %7869 = vmax.xlane.f32.xlu0 %v7868_v27  ;;  %v7854_v34 = vpop.f32.mrf.mxu0 }
0x1bf8   : > { %v7866_v16 = vmul.f32 0.17677669, %v7854_v34 }
0x1bfa   : > { %v7871_v45 = vsel %vm2732_vm7, %v7866_v16, -inf }
0x1bfb   : > { %7872 = vmax.xlane.f32.xlu0 %v7871_v45 }
0x1c6e   : > { %v7609_v24 = vpop.xlane.xlu0 %7608 }
0x1c6f   : > { %v7612_v12 = vsub.f32 %v7600_v25, %v7609_v24 }
0x1c71   : > { %v7617_v63 = vmul.f32 1.442695, %v7612_v12 }
0x1c72   : > { %v7603_v20 = vpop.xlane.xlu0 %7602 }
0x1c73   : > { %14496 = vpow2.f32 %v7617_v63  ;;  %v7610_v38 = vsub.f32 %v7598_v41, %v7603_v20 }
0x1c74   : > { %v7606_v6 = vpop.xlane.xlu1 %7605 }
0x1c75   : > { %v7613_v50 = vmul.f32 1.442695, %v7610_v38  ;;  %v7611_v22 = vsub.f32 %v7599_v31, %v7606_v6 }
0x1c77   : > { %14498 = vpow2.f32 %v7613_v50  ;;  %v7615_v54 = vmul.f32 1.442695, %v7611_v22 }
0x1c79   : > { %14500 = vpow2.f32 %v7615_v54 }
0x1c7e   : > { %v7876_v62 = vpop.xlane.xlu1 %7875 }
0x1c7f   : > { %v7879_v11 = vsub.f32 %v7867_v57, %v7876_v62 }
0x1c80   : > { %v16463_v23 = vpop.eup %14496  ;;  %v7870_v59 = vpop.xlane.xlu0 %7869 }
0x1c81   : > { %v7884_v9 = vmul.f32 1.442695, %v7879_v11  ;;  %v7877_v60 = vsub.f32 %v7865_v3, %v7870_v59  ;;  %v7625_v30 = vsel %vm2739_vm6, %v16463_v23, 0.0 }
0x1c82   : > { %7626 = vadd.xlane.f32.xlu0 %v7625_v30 }
0x1c83   : > { %14502 = vpow2.f32 %v7884_v9  ;;  %v7880_v1 = vmul.f32 1.442695, %v7877_v60 }
0x1c84   : > { %v14499_v55 = vpop.eup %14498  ;;  %v7873_v32 = vpop.xlane.xlu0 %7872 }
0x1c85   : > { %14504 = vpow2.f32 %v7880_v1  ;;  %v7878_v4 = vsub.f32 %v7866_v16, %v7873_v32  ;;  %v7619_v29 = vsel %vm2732_vm7, %v14499_v55, 0.0 }
0x1c86   : > { %v14501_v18 = vpop.eup %14500  ;;  %7620 = vadd.xlane.f32.xlu0 %v7619_v29 }
0x1c87   : > { %v7882_v53 = vmul.f32 1.442695, %v7878_v4  ;;  %v7622_v25 = vsel %vm2732_vm7, %v14501_v18, 0.0 }
0x1c88   : > { %7623 = vadd.xlane.f32.xlu1 %v7622_v25 }
0x1c89   : > { %14506 = vpow2.f32 %v7882_v53 }
0x1c90   : > { %v16469_v33 = vpop.eup %14502 }
0x1c91   : > { %v7892_v41 = vsel %vm2739_vm6, %v16469_v33, 0.0 }
0x1c92   : > { %v16473_v0 = vpop.eup %14504  ;;  %7893 = vadd.xlane.f32.xlu1 %v7892_v41 }
0x1c93   : > { %v7886_v49 = vsel %vm2732_vm7, %v16473_v0, 0.0 }
0x1c96   : > { %v16477_v17 = vpop.eup %14506  ;;  %7887 = vadd.xlane.f32.xlu1 %v7886_v49 }
0x1c97   : > { %v7889_v31 = vsel %vm2732_vm7, %v16477_v17, 0.0 }
0x1c98   : > { %7890 = vadd.xlane.f32.xlu0 %v7889_v31 }
0x1ca7   : > { %7905 = vrot.lane.b32.xlu1 %v16275_v7, %s15139_s0 }
0x1cab   : > { %7636 = vrot.lane.b32.xlu1 %v16283_v8, %s15138_s3 }
0x1cae   : > { %7638 = vrot.lane.b32.xlu0 %v16275_v7, %s15138_s3 }
0x1caf   : > { %7903 = vrot.lane.b32.xlu1 %v16283_v8, %s15139_s0 }
0x1cb2   : > { %7714 = vrot.lane.b32.xlu0 %v16312_v52, %s15138_s3 }
0x1cb3   : > { %7981 = vrot.lane.b32.xlu1 %v16312_v52, %s15139_s0 }
0x1cb6   : > { %7712 = vrot.lane.b32.xlu0 %v16320_v28, %s15138_s3 }
0x1cb7   : > { %7979 = vrot.lane.b32.xlu1 %v16320_v28, %s15139_s0 }
0x1cba   : > { %7710 = vrot.lane.b32.xlu0 %v16328_v13, %s15138_s3 }
0x1cbb   : > { %7977 = vrot.lane.b32.xlu1 %v16328_v13, %s15139_s0 }
0x1cbe   : > { %7708 = vrot.lane.b32.xlu0 %v16335_v5, %s15138_s3 }
0x1cbf   : > { %7975 = vrot.lane.b32.xlu1 %v16335_v5, %s15139_s0 }
0x1cc2   : > { %7706 = vrot.lane.b32.xlu0 %v16342_v26, %s15138_s3 }
0x1cc3   : > { %7973 = vrot.lane.b32.xlu1 %v16342_v26, %s15139_s0 }
0x1cc6   : > { %7704 = vrot.lane.b32.xlu0 %v16349_v39, %s15138_s3 }
0x1cc7   : > { %7971 = vrot.lane.b32.xlu1 %v16349_v39, %s15139_s0 }
0x1cca   : > { %7702 = vrot.lane.b32.xlu0 %v16356_v43, %s15138_s3 }
0x1ccb   : > { %7969 = vrot.lane.b32.xlu1 %v16356_v43, %s15139_s0 }
0x1cce   : > { %7700 = vrot.lane.b32.xlu0 %v16363_v47, %s15138_s3 }
0x1ccf   : > { %7967 = vrot.lane.b32.xlu1 %v16363_v47, %s15139_s0 }
0x1d0b   : > { %v7627_v7 = vpop.xlane.xlu0 %7626 }
0x1d0f   : > { %v7621_v8 = vpop.xlane.xlu0 %7620 }
0x1d10   : > { %14508 = vrcp.f32 %v7621_v8 }
0x1d11   : > { %v7624_v52 = vpop.xlane.xlu1 %7623 }
0x1d12   : > { %14510 = vrcp.f32 %v7624_v52 }
0x1d13   : > { %14512 = vrcp.f32 %v7627_v7 }
0x1d1b   : > { %v7894_v28 = vpop.xlane.xlu1 %7893 }
0x1d1c   : > { %14514 = vrcp.f32 %v7894_v28 }
0x1d1d   : > { %v14509_v13 = vpop.eup %14508 }
0x1d1e   : > { %v7631_v39 = vmul.f32 %v14509_v13, %v14499_v55 }
0x1d1f   : > { %v14511_v5 = vpop.eup %14510  ;;  %v7888_v26 = vpop.xlane.xlu1 %7887 }
0x1d20   : > { %14516 = vrcp.f32 %v7888_v26  ;;  %v7632_v43 = vmul.f32 %v14511_v5, %v14501_v18  ;;  %v14513_v57 = vpop.eup %14512 }
0x1d21   : > { %v7891_v35 = vpop.xlane.xlu0 %7890  ;;  %v7633_v40 = vmul.f32 %v14513_v57, %v16463_v23 }
0x1d22   : > { %14518 = vrcp.f32 %v7891_v35  ;;  %v7634_v37 = vpack.c.bf16 %v7632_v43, %v7631_v39  ;;  %v7519_v43 = vpop.f32.mrf.mxu1 }
0x1d23   : > { %v7906_v56 = vpop.permute.xlu1 %7905  ;;  %v7635_v45 = vpack.c.bf16 %v7633_v40, %v7633_v40 }
0x1d24   : > { %v7915_v47 = vsel %vm2334_vm3, %v7906_v56, 0  ;;  %13483 = vmatprep.mubr.msk.bf16.mxu1 %vm2732_vm7, %v7634_v37  ;;  %13662 = vmatprep.subr.msk.bf16.mxu0 %vm2334_vm3, %v7906_v56 }
0x1d25   : > { %v7639_v61 = vpop.permute.xlu0 %7638  ;;  %13516 = vmatpush3.bf16.msra.mxu0 %v7915_v47 }
0x1d26   : > { %v7648_v3 = vsel %vm2334_vm3, %v7639_v61, 0  ;;  %13651 = vmatprep.subr.msk.bf16.mxu1 %vm2334_vm3, %v7639_v61 }
0x1d27   : > { %13480 = vmatpush3.bf16.msra.mxu1 %v7648_v3  ;;  %v7637_v2 = vpop.permute.xlu1 %7636 }
0x1d28   : > { %13481 = vmatprep.subr.bf16.mxu1 %v7637_v2 }
0x1d29   : > { %v7715_v27 = vpop.permute.xlu0 %7714  ;;  %v14515_v16 = vpop.eup %14514 }
0x1d2a   : > { %v7744_v24 = vsel %vm2668_vm5, %v7715_v27, 0  ;;  %v7900_v38 = vmul.f32 %v14515_v16, %v16469_v33 }
0x1d2b   : > { %13482 = vmatpush3.bf16.msra.mxu1 %v7637_v2  ;;  %v7904_v34 = vpop.permute.xlu1 %7903 }
0x1d2c   : > { %13517 = vmatprep.subr.bf16.mxu0 %v7904_v34  ;;  %13652 = vmatprep.subr.msk.bf16.mxu1 %vm2668_vm5, %v7715_v27  ;;  %v7902_v62 = vpack.c.bf16 %v7900_v38, %v7900_v38 }
0x1d2d   : > { %v14517_v12 = vpop.eup %14516  ;;  %13518 = vmatpush3.bf16.msra.mxu0 %v7904_v34  ;;  %v7713_v63 = vpop.permute.xlu0 %7712 }
0x1d2e   : > { %13484 = vmatmul.mubr.msk.bf16.vlgmr.msra.gmra.mxu1 %vm2732_vm7, %v7635_v45  ;;  %v7898_v50 = vmul.f32 %v14517_v12, %v16473_v0  ;;  %v7741_v23 = vsel %vm2668_vm5, %v7713_v63, 0  ;;  %v7525_v12 = vadd.f32 %v16379_v51, %v16451_v10 }
0x1d2f   : > { %v14519_v20 = vpop.eup %14518  ;;  %13488 = vmatpush3.bf16.xpose.msra.mxu1 %v7744_v24  ;;  %v7982_v6 = vpop.permute.xlu1 %7981 }
0x1d30   : > { %v7899_v22 = vmul.f32 %v14519_v20, %v16477_v17  ;;  %13663 = vmatprep.subr.msk.bf16.mxu0 %vm2668_vm5, %v7982_v6  ;;  %13653 = vmatprep.subr.msk.bf16.mxu1 %vm2668_vm5, %v7713_v63  ;;  %v8011_v11 = vsel %vm2668_vm5, %v7982_v6, 0  ;;  %v7517_v20 = vadd.f32 %v16383_v46, %v16453_v44  ;;  %v12109_v46 = vld [vmem:[%s16966_s18 + $0x1] ss:$0 sm:$0xff] }
0x1d31   : > { %v7711_v9 = vpop.permute.xlu0 %7710 }
0x1d32   : > { %v7901_v54 = vpack.c.bf16 %v7899_v22, %v7898_v50  ;;  %v7738_v30 = vsel %vm2668_vm5, %v7711_v9, 0 }
0x1d33   : > { %v7980_v59 = vpop.permute.xlu1 %7979 }
0x1d34   : > { %13519 = vmatprep.mubr.msk.bf16.mxu0 %vm2732_vm7, %v7901_v54  ;;  %v8008_v60 = vsel %vm2668_vm5, %v7980_v59, 0 }
0x1d35   : > { %13520 = vmatmul.mubr.msk.bf16.vlgmr.msra.gmra.mxu0 %vm2732_vm7, %v7902_v62  ;;  %v7709_v55 = vpop.permute.xlu0 %7708 }
0x1d36   : > { %13524 = vmatpush3.bf16.xpose.msra.mxu0 %v8011_v11  ;;  %v7735_v4 = vsel %vm2668_vm5, %v7709_v55, 0  ;;  %v7520_v11 = vadd.f32 %v7519_v43, %v16455_v48 }
0x1d37   : > { %13490 = vmatpush3.bf16.xpose.msra.mxu1 %v7741_v23  ;;  %13664 = vmatprep.subr.msk.bf16.mxu0 %vm2668_vm5, %v7980_v59  ;;  %v7978_v1 = vpop.permute.xlu1 %7977 }
0x1d38   : > { %13654 = vmatprep.subr.msk.bf16.mxu1 %vm2668_vm5, %v7711_v9  ;;  %v8005_v32 = vsel %vm2668_vm5, %v7978_v1, 0 }
0x1d39   : > { %v7707_v18 = vpop.permute.xlu0 %7706 }
0x1d3a   : > { %v7732_v25 = vsel %vm2668_vm5, %v7707_v18, 0 }
0x1d3b   : > { %v7976_v29 = vpop.permute.xlu1 %7975 }
0x1d3c   : > { %v8002_v53 = vsel %vm2668_vm5, %v7976_v29, 0 }
0x1d3d   : > { %v7705_v41 = vpop.permute.xlu0 %7704 }
0x1d3e   : > { %13526 = vmatpush3.bf16.xpose.msra.mxu0 %v8008_v60  ;;  %v7729_v49 = vsel %vm2668_vm5, %v7705_v41, 0 }
0x1d3f   : > { %13492 = vmatpush3.bf16.xpose.msra.mxu1 %v7738_v30  ;;  %13665 = vmatprep.subr.msk.bf16.mxu0 %vm2668_vm5, %v7978_v1  ;;  %v7974_v33 = vpop.permute.xlu1 %7973 }
0x1d40   : > { %13655 = vmatprep.subr.msk.bf16.mxu1 %vm2668_vm5, %v7709_v55  ;;  %v7999_v0 = vsel %vm2668_vm5, %v7974_v33, 0 }
0x1d41   : > { %v7703_v31 = vpop.permute.xlu0 %7702 }
0x1d42   : > { %v7726_v8 = vsel %vm2668_vm5, %v7703_v31, 0 }
0x1d43   : > { %v7972_v17 = vpop.permute.xlu1 %7971 }
0x1d44   : > { %v7996_v7 = vsel %vm2668_vm5, %v7972_v17, 0 }
0x1d45   : > { %v7701_v13 = vpop.permute.xlu0 %7700 }
0x1d46   : > { %13528 = vmatpush3.bf16.xpose.msra.mxu0 %v8005_v32  ;;  %v7723_v5 = vsel %vm2668_vm5, %v7701_v13, 0  ;;  %v14275_v32 = vld [vmem:[%s16967_s26 + $0x4f8] sm:$0xff]  }
0x1d47   : > { %13494 = vmatpush3.bf16.xpose.msra.mxu1 %v7735_v4  ;;  %13666 = vmatprep.subr.msk.bf16.mxu0 %vm2668_vm5, %v7976_v29  ;;  %v7970_v52 = vpop.permute.xlu1 %7969  ;;  %v14276_v4 = vld [vmem:[%s16967_s26 + $0x438] sm:$0xff]  }
0x1d48   : > { %13656 = vmatprep.subr.msk.bf16.mxu1 %vm2668_vm5, %v7707_v18  ;;  %v7993_v28 = vsel %vm2668_vm5, %v7970_v52, 0  ;;  %v14277_v29 = vld [vmem:[%s16967_s26 + $0x4b8] sm:$0xff]   ;;  %v14278_v18 = vld [vmem:[%s16967_s26 + $0x470] sm:$0xff]  }
0x1d4b   : > { %v7968_v26 = vpop.permute.xlu1 %7967 }
0x1d4c   : > { %v7990_v39 = vsel %vm2668_vm5, %v7968_v26, 0 }
0x1d4e   : > { %13530 = vmatpush3.bf16.xpose.msra.mxu0 %v8002_v53  ;;  %v14279_v53 = vld [vmem:[%s16967_s26 + $0x4f0] sm:$0xff]  }
0x1d4f   : > { %13496 = vmatpush3.bf16.xpose.msra.mxu1 %v7732_v25  ;;  %13667 = vmatprep.subr.msk.bf16.mxu0 %vm2668_vm5, %v7974_v33  ;;  %v14281_v25 = vld [vmem:[%s16967_s26 + $0x4b0] sm:$0xff]   ;;  %v14282_v33 = vld [vmem:[%s16967_s26 + $0x468] sm:$0xff]  }
0x1d50   : > { %13657 = vmatprep.subr.msk.bf16.mxu1 %vm2668_vm5, %v7705_v41  ;;  %v14283_v41 = vld [vmem:[%s16967_s26 + $0x4e8] sm:$0xff]  }
0x1d56   : > { %13532 = vmatpush3.bf16.xpose.msra.mxu0 %v7999_v0  ;;  %v14284_v0 = vld [vmem:[%s16967_s26 + $0x428] sm:$0xff]  }
0x1d57   : > { %13498 = vmatpush3.bf16.xpose.msra.mxu1 %v7729_v49  ;;  %13668 = vmatprep.subr.msk.bf16.mxu0 %vm2668_vm5, %v7972_v17  ;;  %v14285_v49 = vld [vmem:[%s16967_s26 + $0x4a8] sm:$0xff]   ;;  %v14286_v17 = vld [vmem:[%s16967_s26 + $0x460] sm:$0xff]  }
0x1d58   : > { %13658 = vmatprep.subr.msk.bf16.mxu1 %vm2668_vm5, %v7703_v31  ;;  %v14287_v31 = vld [vmem:[%s16967_s26 + $0x4e0] sm:$0xff]  }
0x1d5e   : > { %13534 = vmatpush3.bf16.xpose.msra.mxu0 %v7996_v7  ;;  %v14288_v7 = vld [vmem:[%s16967_s26 + $0x420] sm:$0xff]  }
0x1d5f   : > { %13500 = vmatpush3.bf16.xpose.msra.mxu1 %v7726_v8  ;;  %13669 = vmatprep.subr.msk.bf16.mxu0 %vm2668_vm5, %v7970_v52  ;;  %v14289_v8 = vld [vmem:[%s16967_s26 + $0x4a0] sm:$0xff]   ;;  %v14290_v52 = vld [vmem:[%s16967_s26 + $0x458] sm:$0xff]  }
0x1d60   : > { %13659 = vmatprep.subr.msk.bf16.mxu1 %vm2668_vm5, %v7701_v13  ;;  %v14292_v13 = vld [vmem:[%s16967_s26 + $0x418] sm:$0xff]  }
0x1d66   : > { %13536 = vmatpush3.bf16.xpose.msra.mxu0 %v7993_v28  ;;  %v14291_v28 = vld [vmem:[%s16967_s26 + $0x4d8] sm:$0xff]  }
0x1d67   : > { %13502 = vmatpush3.bf16.xpose.msra.mxu1 %v7723_v5  ;;  %13670 = vmatprep.subr.msk.bf16.mxu0 %vm2668_vm5, %v7968_v26  ;;  %v14293_v5 = vld [vmem:[%s16967_s26 + $0x498] sm:$0xff]  }
0x1d6e   : > { %13538 = vmatpush3.bf16.xpose.msra.mxu0 %v7990_v39 }
0x1d6f   : > { %13039 = vmatprep.subr.bf16.mxu0 %v14275_v32 }
0x1dee   : > { %v13485_v35 = vpop.f32.mrf.mxu1 }
0x1def   : > { %v7699_v3 = vpack.c.bf16 %v13485_v35, %v13485_v35 }
0x1df0   : > { %v7684_v37 = vpop.f32.mrf.mxu1 }
0x1df2   : > { %v13486_v56 = vpop.f32.mrf.mxu1 }
0x1df4   : > { %v7687_v47 = vpop.f32.mrf.mxu1 }
0x1df5   : > { %v7698_v57 = vpack.c.bf16 %v7687_v47, %v7684_v37  ;;  %v13521_v61 = vpop.f32.mrf.mxu0 }
0x1df6   : > { %v7966_v16 = vpack.c.bf16 %v13521_v61, %v13521_v61 }
0x1df7   : > { %13503 = vmatprep.mubr.msk.bf16.mxu1 %vm2668_vm5, %v7698_v57  ;;  %v7951_v2 = vpop.f32.mrf.mxu0 }
0x1df8   : > { %13504 = vmatmul.mubr.msk.bf16.vlgmr.msra.gmra.mxu1 %vm2668_vm5, %v7699_v3 }
0x1df9   : > { %v13522_v40 = vpop.f32.mrf.mxu0 }
0x1dfb   : > { %v7954_v27 = vpop.f32.mrf.mxu0 }
0x1dfc   : > { %v7965_v34 = vpack.c.bf16 %v7954_v27, %v7951_v2 }
0x1dfe   : > { %13539 = vmatprep.mubr.msk.bf16.mxu0 %vm2668_vm5, %v7965_v34  ;;  %v14294_v34 = vld [vmem:[%s16967_s26 + $0x450] sm:$0xff]  }
0x1dff   : > { %13540 = vmatmul.mubr.msk.bf16.vlgmr.msra.gmra.mxu0 %vm2668_vm5, %v7966_v16  ;;  %v14295_v16 = vld [vmem:[%s16967_s26 + $0x4d0] sm:$0xff]  }
0x1e00   : > { %13040 = vmatpush3.bf16.xpose.msra.mxu0 %v14277_v29  ;;  %v12111_v29 = vld [vmem:[#allocation15 + $0x1] ss:$0 sm:$0xff] }
0x1e01   : > { %13041 = vmatprep.subr.bf16.mxu0 %v14279_v53 }
0x1e08   : > { %13042 = vmatpush3.bf16.xpose.msra.mxu0 %v14281_v25 }
0x1e09   : > { %13043 = vmatprep.subr.bf16.mxu0 %v14283_v41 }
0x1e10   : > { %13044 = vmatpush3.bf16.xpose.msra.mxu0 %v14285_v49  ;;  %v14308_v49 = vld [vmem:[%s16967_s26 + $0x538] sm:$0xff]  }
0x1e11   : > { %13045 = vmatprep.subr.bf16.mxu0 %v14287_v31 }
0x1e18   : > { %13046 = vmatpush3.bf16.xpose.msra.mxu0 %v14289_v8  ;;  %v14311_v8 = vld [vmem:[%s16967_s26 + $0x5f0] sm:$0xff]  }
0x1e19   : > { %13047 = vmatprep.subr.bf16.mxu0 %v14291_v28  ;;  %v14313_v28 = vld [vmem:[%s16967_s26 + $0x5b0] sm:$0xff]  }
0x1e20   : > { %13048 = vmatpush3.bf16.xpose.msra.mxu0 %v14293_v5  ;;  %v14315_v5 = vld [vmem:[%s16967_s26 + $0x5e8] sm:$0xff]  }
0x1e21   : > { %13049 = vmatprep.subr.bf16.mxu0 %v14295_v16  ;;  %v14330_v16 = vld [vmem:[%s16967_s26 + $0x548] sm:$0xff]  }
0x1eb8   : > { %v13505_v45 = vpop.f32.mrf.mxu1 }
0x1eb9   : > { %v7796_v38 = vadd.f32 %v13505_v45, %v7525_v12  ;;  %v14296_v45 = vld [vmem:[%s16967_s26 + $0x410] sm:$0xff]   ;;  %v14298_v12 = vld [vmem:[%s16967_s26 + $0x448] sm:$0xff]  }
0x1eba   : > { %v7780_v24 = vpop.f32.mrf.mxu1 }
0x1ebb   : > { %v7794_v50 = vadd.f32 %v7780_v24, %v7517_v20  ;;  %v14297_v24 = vld [vmem:[%s16967_s26 + $0x490] sm:$0xff]   ;;  %v14300_v20 = vld [vmem:[%s16967_s26 + $0x408] sm:$0xff]  }
0x1ebc   : > { %v13506_v63 = vpop.f32.mrf.mxu1  ;;  %13050 = vmatpush3.bf16.xpose.msra.mxu0 %v14297_v24  ;;  %v14332_v24 = vld [vmem:[%s16967_s26 + $0x508] sm:$0xff]  }
0x1ebd   : > { %v14299_v63 = vld [vmem:[%s16967_s26 + $0x4c8] sm:$0xff]  }
0x1ebe   : > { %v7783_v54 = vpop.f32.mrf.mxu1  ;;  %13051 = vmatprep.subr.bf16.mxu0 %v14299_v63  ;;  %v14334_v63 = vld [vmem:[%s16967_s26 + $0x540] sm:$0xff]  }
0x1ebf   : > { %v13541_v6 = vpop.f32.mrf.mxu0  ;;  %v7795_v51 = vadd.f32 %v7783_v54, %v7520_v11  ;;  %v14305_v54 = vld [vmem:[%s16967_s26 + $0x480] sm:$0xff]   ;;  %v14307_v11 = vld [vmem:[%s16967_s26 + $0x5f8] sm:$0xff]  }
0x1ec0   : > { %v8063_v22 = vadd.f32 %v13541_v6, %v7796_v38  ;;  %v14301_v38 = vld [vmem:[%s16967_s26 + $0x488] sm:$0xff]   ;;  %v14302_v6 = vld [vmem:[%s16967_s26 + $0x440] sm:$0xff]  }
0x1ec1   : > { %v8047_v62 = vpop.f32.mrf.mxu0 }
0x1ec2   : > { %v8061_v23 = vadd.f32 %v8047_v62, %v7794_v50  ;;  %v8066_v59 = vadd.f32 %v8063_v22, %v16254_v42  ;;  %v14303_v50 = vld [vmem:[%s16967_s26 + $0x4c0] sm:$0xff]   ;;  %v14306_v62 = vld [vmem:[%s16967_s26 + $0x578] sm:$0xff]  }
0x1ec3   : > { %v13542_v9 = vpop.f32.mrf.mxu0  ;;  %v14304_v22 = vld [vmem:[%s16967_s26 + $0x400] sm:$0xff]  }
0x1ec4   : > { %v8064_v10 = vadd.f32 %v8061_v23, %v16248_v15  ;;  %v8077_v1 = vadd.f32 %v12109_v46, %v8066_v59  ;;  %v14274_v15 = vld [vmem:[%s16967_s26 + $0x478] sm:$0xff]   ;;  %13052 = vmatpush3.bf16.xpose.msra.mxu0 %v14301_v38  ;;  %v14336_v38 = vld [vmem:[%s16967_s26 + $0x500] sm:$0xff]  }
0x1ec5   : > { %v8050_v44 = vpop.f32.mrf.mxu0  ;;  %13019 = vmatprep.subr.bf16.mxu1 %v14274_v15  ;;  %13053 = vmatprep.subr.bf16.mxu0 %v14303_v50  ;;  %v8992_v50 = vld [vmem:[#allocation18 + $0x790] sm:$0xff] }
0x1ec6   : > { %v8062_v60 = vadd.f32 %v8050_v44, %v7795_v51  ;;  %v8075_v30 = vadd.f32 %v12109_v46, %v8064_v10  ;;  %v8086_v42 = vsel %vm3771_vm8, %v8077_v1, 0.0  ;;  %13020 = vmatpush3.bf16.xpose.msra.mxu1 %v14276_v4 }
0x1ec7   : > { %13021 = vmatprep.subr.bf16.mxu1 %v14278_v18 }
0x1ec8   : > { %v8065_v48 = vadd.f32 %v8062_v60, %v16250_v19  ;;  %8082 = vadd.xlane.f32.xlu0 %v8075_v30  ;;  %v14280_v19 = vld [vmem:[%s16967_s26 + $0x430] sm:$0xff]  }
0x1eca   : > { %v8076_v55 = vadd.f32 %v12109_v46, %v8065_v48 }
0x1ecc   : > { %8087 = vadd.xlane.f32.xlu0 %v8086_v42  ;;  %8084 = vadd.xlane.f32.xlu1 %v8076_v55 }
0x1ecd   : > { %13054 = vmatpush3.bf16.xpose.msra.mxu0 %v14305_v54  ;;  %v8993_v54 = vld [vmem:[#allocation18 + $0x798] sm:$0xff] }
0x1ece   : > { %13022 = vmatpush3.bf16.xpose.msra.mxu1 %v14280_v19  ;;  %13079 = vmatprep.subr.bf16.mxu0 %v14307_v11  ;;  %v8995_v11 = vld [vmem:[#allocation18 + $0x7d8] sm:$0xff] }
0x1ecf   : > { %13023 = vmatprep.subr.bf16.mxu1 %v14282_v33 }
0x1ed6   : > { %13024 = vmatpush3.bf16.xpose.msra.mxu1 %v14284_v0 }
0x1ed7   : > { %13025 = vmatprep.subr.bf16.mxu1 %v14286_v17  ;;  %v14309_v17 = vld [vmem:[%s16967_s26 + $0x5b8] sm:$0xff]  }
0x1ede   : > { %13026 = vmatpush3.bf16.xpose.msra.mxu1 %v14288_v7  ;;  %v14310_v7 = vld [vmem:[%s16967_s26 + $0x570] sm:$0xff]  }
0x1edf   : > { %13027 = vmatprep.subr.bf16.mxu1 %v14290_v52  ;;  %v14312_v52 = vld [vmem:[%s16967_s26 + $0x530] sm:$0xff]  }
0x1ee6   : > { %13028 = vmatpush3.bf16.xpose.msra.mxu1 %v14292_v13  ;;  %v14314_v13 = vld [vmem:[%s16967_s26 + $0x568] sm:$0xff]  }
0x1ee7   : > { %13029 = vmatprep.subr.bf16.mxu1 %v14294_v34  ;;  %v14329_v34 = vld [vmem:[%s16967_s26 + $0x590] sm:$0xff]  }
0x1eee   : > { %13030 = vmatpush3.bf16.xpose.msra.mxu1 %v14296_v45  ;;  %v14331_v45 = vld [vmem:[%s16967_s26 + $0x5c8] sm:$0xff]  }
0x1eef   : > { %13031 = vmatprep.subr.bf16.mxu1 %v14298_v12  ;;  %v14333_v12 = vld [vmem:[%s16967_s26 + $0x588] sm:$0xff]  }
0x1ef6   : > { %13032 = vmatpush3.bf16.xpose.msra.mxu1 %v14300_v20  ;;  %v14335_v20 = vld [vmem:[%s16967_s26 + $0x5c0] sm:$0xff]  }
0x1ef7   : > { %13033 = vmatprep.subr.bf16.mxu1 %v14302_v6  ;;  %v14337_v6 = vld [vmem:[%s16967_s26 + $0x580] sm:$0xff]  }
0x1efe   : > { %13034 = vmatpush3.bf16.xpose.msra.mxu1 %v14304_v22  ;;  %v8994_v22 = vld [vmem:[#allocation18 + $0x7d0] sm:$0xff] }
0x1eff   : > { %13059 = vmatprep.subr.bf16.mxu1 %v14306_v62  ;;  %v12333_v62 = vcombine.high %v8992_v50, %v8994_v22 }
0x1f51   : > { %v8083_v26 = vpop.xlane.xlu0 %8082 }
0x1f52   : > { %v8089_v39 = vmul.f32 0.0078125, %v8083_v26  ;;  %v14316_v26 = vld [vmem:[%s16967_s26 + $0x528] sm:$0xff]  }
0x1f54   : > { %v8092_v43 = vsub.f32 %v8075_v30, %v8089_v39  ;;  %v14317_v39 = vld [vmem:[%s16967_s26 + $0x5a8] sm:$0xff]  }
0x1f55   : > { %v8088_v35 = vpop.xlane.xlu0 %8087  ;;  %v8085_v37 = vpop.xlane.xlu1 %8084 }
0x1f56   : > { %v8091_v56 = vmul.f32 0.0078125, %v8088_v35  ;;  %v8090_v47 = vmul.f32 0.0078125, %v8085_v37  ;;  %v8095_v57 = vmul.f32 %v8092_v43, %v8092_v43  ;;  %v14319_v35 = vld [vmem:[%s16967_s26 + $0x5e0] sm:$0xff]  }
0x1f57   : > { %v14320_v37 = vld [vmem:[%s16967_s26 + $0x520] sm:$0xff]  }
0x1f58   : > { %v8094_v61 = vsub.f32 %v8077_v1, %v8091_v56  ;;  %v8093_v3 = vsub.f32 %v8076_v55, %v8090_v47  ;;  %8098 = vadd.xlane.f32.xlu0 %v8095_v57  ;;  %v12110_v55 = vld [vmem:[#allocation13 + $0x1] ss:$0 sm:$0xff]  ;;  %v14321_v56 = vld [vmem:[%s16967_s26 + $0x5a0] sm:$0xff]   ;;  %v14322_v47 = vld [vmem:[%s16967_s26 + $0x558] sm:$0xff]  }
0x1f59   : > { %v14323_v57 = vld [vmem:[%s16967_s26 + $0x5d8] sm:$0xff]  }
0x1f5a   : > { %v8096_v2 = vmul.f32 %v8093_v3, %v8093_v3  ;;  %v8097_v40 = vmul.f32 %v8094_v61, %v8094_v61 }
0x1f5c   : > { %8100 = vadd.xlane.f32.xlu0 %v8096_v2  ;;  %v8102_v27 = vsel %vm3771_vm8, %v8097_v40, 0.0  ;;  %v14326_v2 = vld [vmem:[%s16967_s26 + $0x550] sm:$0xff]  }
0x1f5d   : > { %8103 = vadd.xlane.f32.xlu1 %v8102_v27  ;;  %v14327_v40 = vld [vmem:[%s16967_s26 + $0x5d0] sm:$0xff]  }
0x1f5e   : > { %v14328_v27 = vld [vmem:[%s16967_s26 + $0x510] sm:$0xff]  }
0x1fe1   : > { %v8099_v23 = vpop.xlane.xlu0 %8098 }
0x1fe2   : > { %v8105_v59 = vmul.f32 0.0078125, %v8099_v23  ;;  %v12332_v23 = vcombine.low %v8992_v50, %v8994_v22  ;;  %v8964_v50 = vld [vmem:[#allocation18 + $0x410] sm:$0xff] }
0x1fe3   : > { %v8966_v22 = vld [vmem:[#allocation18 + $0x450] sm:$0xff] }
0x1fe4   : > { %v8108_v9 = vadd.f32 1e-05, %v8105_v59  ;;  %v12334_v59 = vcombine.low %v8993_v54, %v8995_v11 }
0x1fe5   : > { %v8101_v51 = vpop.xlane.xlu0 %8100 }
0x1fe6   : > { %14520 = vrsqrt.f32 %v8108_v9  ;;  %v8106_v10 = vmul.f32 0.0078125, %v8101_v51  ;;  %v8104_v46 = vpop.xlane.xlu1 %8103  ;;  %v12335_v9 = vcombine.high %v8993_v54, %v8995_v11  ;;  %v8988_v51 = vld [vmem:[#allocation18 + $0x710] sm:$0xff]  ;;  %v8965_v54 = vld [vmem:[#allocation18 + $0x418] sm:$0xff] }
0x1fe7   : > { %v8107_v44 = vmul.f32 0.0078125, %v8104_v46  ;;  %v8989_v46 = vld [vmem:[#allocation18 + $0x718] sm:$0xff] }
0x1fe8   : > { %v8109_v60 = vadd.f32 1e-05, %v8106_v10  ;;  %v8990_v10 = vld [vmem:[#allocation18 + $0x750] sm:$0xff]  ;;  %v8967_v11 = vld [vmem:[#allocation18 + $0x458] sm:$0xff] }
0x1fe9   : > { %v8110_v30 = vadd.f32 1e-05, %v8107_v44  ;;  %v12329_v44 = vcombine.high %v8988_v51, %v8990_v10 }
0x1fea   : > { %14522 = vrsqrt.f32 %v8109_v60  ;;  %v8991_v60 = vld [vmem:[#allocation18 + $0x758] sm:$0xff] }
0x1feb   : > { %14524 = vrsqrt.f32 %v8110_v30  ;;  %v8984_v30 = vld [vmem:[#allocation18 + $0x690] sm:$0xff] }
0x1ff3   : > { %v14521_v1 = vpop.eup %14520 }
0x1ff4   : > { %v8114_v48 = vmul.f32 %v14521_v1, %v8092_v43  ;;  %v14318_v43 = vld [vmem:[%s16967_s26 + $0x560] sm:$0xff]  }
0x1ff5   : > { %v8986_v1 = vld [vmem:[#allocation18 + $0x6d0] sm:$0xff] }
0x1ff6   : > { %v8123_v32 = vmul.f32 %v12110_v55, %v8114_v48  ;;  %v12331_v48 = vcombine.high %v8989_v46, %v8991_v60 }
0x1ff7   : > { %v14523_v42 = vpop.eup %14522 }
0x1ff8   : > { %v14525_v15 = vpop.eup %14524  ;;  %v8115_v4 = vmul.f32 %v14523_v42, %v8093_v3  ;;  %v8132_v25 = vadd.f32 %v12111_v29, %v8123_v32  ;;  %v14325_v3 = vld [vmem:[%s16967_s26 + $0x598] sm:$0xff]   ;;  %v8987_v42 = vld [vmem:[#allocation18 + $0x6d8] sm:$0xff]  ;;  %v12330_v32 = vcombine.low %v8989_v46, %v8991_v60 }
0x1ff9   : > { %v8116_v18 = vmul.f32 %v14525_v15, %v8094_v61  ;;  %v14324_v61 = vld [vmem:[%s16967_s26 + $0x518] sm:$0xff]   ;;  %v12328_v15 = vcombine.low %v8988_v51, %v8990_v10 }
0x1ffa   : > { %v8124_v53 = vmul.f32 %v12110_v55, %v8115_v4  ;;  %v12325_v4 = vcombine.high %v8984_v30, %v8986_v1  ;;  %v16671_v51 = vld [vmem:[#allocation18 + $0x780] sm:$0xff]  ;;  %v16675_v46 = vld [vmem:[#allocation18 + $0x788] sm:$0xff] }
0x1ffb   : > { %v8125_v19 = vmul.f32 %v12110_v55, %v8116_v18  ;;  %v8985_v55 = vld [vmem:[#allocation18 + $0x698] sm:$0xff]  ;;  %v8980_v18 = vld [vmem:[#allocation18 + $0x610] sm:$0xff]  ;;  %v16673_v10 = vld [vmem:[#allocation18 + $0x7c0] sm:$0xff] }
0x1ffc   : > { %v16614_v33 = vadd.f32 %v12111_v29, %v8124_v53  ;;  %v8982_v53 = vld [vmem:[#allocation18 + $0x650] sm:$0xff]  ;;  %v16679_v60 = vld [vmem:[#allocation18 + $0x7c8] sm:$0xff] }
0x1ffd   : > { %v16616_v41 = vadd.f32 %v12111_v29, %v8125_v19  ;;  %v12327_v29 = vcombine.high %v8985_v55, %v8987_v42  ;;  %v8981_v19 = vld [vmem:[#allocation18 + $0x618] sm:$0xff] }
0x1ffe   : > { %v16619_v0 = vpack.c.bf16 %v16614_v33, %v8132_v25  ;;  %v8983_v25 = vld [vmem:[#allocation18 + $0x658] sm:$0xff] }
0x1fff   : > { %v16625_v31 = vpack.c.bf16 %v16616_v41, %v16616_v41 }
0x2000   : > { %13035 = vmatprep.mubr.bf16.mxu1 %v16619_v0  ;;  %13055 = vmatprep.mubr.bf16.mxu0 %v16619_v0 }
0x2001   : > { %13036 = vmatmul.mubr.bf16.vlgmr.msra.gmra.mxu1 %v16619_v0  ;;  %13056 = vmatmul.mubr.bf16.vlgmr.msra.gmra.mxu0 %v16619_v0 }
0x2002   : > { %13060 = vmatpush3.bf16.xpose.msra.mxu1 %v14308_v49  ;;  %13080 = vmatpush3.bf16.xpose.msra.mxu0 %v14309_v17  ;;  %v12324_v49 = vcombine.low %v8984_v30, %v8986_v1  ;;  %v12326_v17 = vcombine.low %v8985_v55, %v8987_v42  ;;  %v12364_v30 = vcombine.low %v16671_v51, %v16673_v10  ;;  %v8203_v55 = vld [vmem:[#allocation16 + $0x10] sm:$0xf] }
0x2003   : > { %13037 = vmatprep.mubr.bf16.mxu1 %v16625_v31  ;;  %13057 = vmatprep.mubr.bf16.mxu0 %v16625_v31  ;;  %v12366_v1 = vcombine.low %v16675_v46, %v16679_v60  ;;  %v16688_v42 = vrot.slane %v8203_v55, %v15612_v14 }
0x2004   : > { %13061 = vmatprep.subr.bf16.mxu1 %v14310_v7  ;;  %13081 = vmatprep.subr.bf16.mxu0 %v14311_v8  ;;  %v12321_v7 = vcombine.high %v8980_v18, %v8982_v53  ;;  %v12323_v8 = vcombine.high %v8981_v19, %v8983_v25 }
0x2009   : > { %13038 = vmatmul.mubr.bf16.gmra.mxu1 %v16625_v31  ;;  %13058 = vmatmul.mubr.bf16.gmra.mxu0 %v16625_v31 }
0x200a   : > { %13062 = vmatpush3.bf16.xpose.msra.mxu1 %v14312_v52  ;;  %13082 = vmatpush3.bf16.xpose.msra.mxu0 %v14313_v28  ;;  %v8976_v52 = vld [vmem:[#allocation18 + $0x590] sm:$0xff] }
0x200b   : > { %13075 = vmatprep.mubr.bf16.mxu1 %v16619_v0  ;;  %13095 = vmatprep.mubr.bf16.mxu0 %v16619_v0  ;;  %v8978_v28 = vld [vmem:[#allocation18 + $0x5d0] sm:$0xff] }
0x200c   : > { %13063 = vmatprep.subr.bf16.mxu1 %v14314_v13  ;;  %13083 = vmatprep.subr.bf16.mxu0 %v14315_v5  ;;  %v8977_v13 = vld [vmem:[#allocation18 + $0x598] sm:$0xff] }
0x200d   : > { %v8979_v5 = vld [vmem:[#allocation18 + $0x5d8] sm:$0xff] }
0x2012   : > { %13064 = vmatpush3.bf16.xpose.msra.mxu1 %v14316_v26  ;;  %13084 = vmatpush3.bf16.xpose.msra.mxu0 %v14317_v39  ;;  %v12320_v26 = vcombine.low %v8980_v18, %v8982_v53  ;;  %v12322_v39 = vcombine.low %v8981_v19, %v8983_v25  ;;  %v16697_v18 = vrot.slane %v8203_v55, %v16084_v36 }
0x2013   : > { %13065 = vmatprep.subr.bf16.mxu1 %v14318_v43  ;;  %13085 = vmatprep.subr.bf16.mxu0 %v14319_v35  ;;  %v12317_v43 = vcombine.high %v8976_v52, %v8978_v28  ;;  %v12319_v35 = vcombine.high %v8977_v13, %v8979_v5 }
0x201a   : > { %13066 = vmatpush3.bf16.xpose.msra.mxu1 %v14320_v37  ;;  %13086 = vmatpush3.bf16.xpose.msra.mxu0 %v14321_v56  ;;  %v8972_v37 = vld [vmem:[#allocation18 + $0x510] sm:$0xff] }
0x201b   : > { %13067 = vmatprep.subr.bf16.mxu1 %v14322_v47  ;;  %13087 = vmatprep.subr.bf16.mxu0 %v14323_v57  ;;  %v8974_v56 = vld [vmem:[#allocation18 + $0x550] sm:$0xff]  ;;  %v8973_v47 = vld [vmem:[#allocation18 + $0x518] sm:$0xff] }
0x201c   : > { %v8975_v57 = vld [vmem:[#allocation18 + $0x558] sm:$0xff] }
0x2022   : > { %13068 = vmatpush3.bf16.xpose.msra.mxu1 %v14324_v61  ;;  %13088 = vmatpush3.bf16.xpose.msra.mxu0 %v14325_v3  ;;  %v12316_v61 = vcombine.low %v8976_v52, %v8978_v28  ;;  %v12318_v3 = vcombine.low %v8977_v13, %v8979_v5 }
0x2023   : > { %13069 = vmatprep.subr.bf16.mxu1 %v14326_v2  ;;  %13089 = vmatprep.subr.bf16.mxu0 %v14327_v40  ;;  %v12313_v2 = vcombine.high %v8972_v37, %v8974_v56  ;;  %v12315_v40 = vcombine.high %v8973_v47, %v8975_v57 }
0x202a   : > { %13070 = vmatpush3.bf16.xpose.msra.mxu1 %v14328_v27  ;;  %13090 = vmatpush3.bf16.xpose.msra.mxu0 %v14329_v34  ;;  %v8968_v27 = vld [vmem:[#allocation18 + $0x490] sm:$0xff] }
0x202b   : > { %13071 = vmatprep.subr.bf16.mxu1 %v14330_v16  ;;  %13091 = vmatprep.subr.bf16.mxu0 %v14331_v45  ;;  %v8970_v34 = vld [vmem:[#allocation18 + $0x4d0] sm:$0xff]  ;;  %v8969_v16 = vld [vmem:[#allocation18 + $0x498] sm:$0xff] }
0x202c   : > { %v8971_v45 = vld [vmem:[#allocation18 + $0x4d8] sm:$0xff] }
0x2032   : > { %13072 = vmatpush3.bf16.xpose.msra.mxu1 %v14332_v24  ;;  %13092 = vmatpush3.bf16.xpose.msra.mxu0 %v14333_v12  ;;  %v12312_v24 = vcombine.low %v8972_v37, %v8974_v56  ;;  %v12314_v12 = vcombine.low %v8973_v47, %v8975_v57 }
0x2033   : > { %13073 = vmatprep.subr.bf16.mxu1 %v14334_v63  ;;  %13093 = vmatprep.subr.bf16.mxu0 %v14335_v20  ;;  %v12309_v63 = vcombine.high %v8968_v27, %v8970_v34  ;;  %v12311_v20 = vcombine.high %v8969_v16, %v8971_v45 }
0x203a   : > { %13074 = vmatpush3.bf16.xpose.msra.mxu1 %v14336_v38  ;;  %13094 = vmatpush3.bf16.xpose.msra.mxu0 %v14337_v6  ;;  %v12308_v38 = vcombine.low %v8968_v27, %v8970_v34  ;;  %v12310_v6 = vcombine.low %v8969_v16, %v8971_v45 }
0x203b   : > { %9164 = vmatprep.subr.bf16.mxu1 %v12333_v62  ;;  %9211 = vmatprep.subr.bf16.mxu0 %v12335_v9  ;;  %v12305_v62 = vcombine.high %v8964_v50, %v8966_v22  ;;  %v12307_v9 = vcombine.high %v8965_v54, %v8967_v11 }
0x2041   : > { %13076 = vmatmul.mubr.bf16.vlgmr.msra.gmra.mxu1 %v16619_v0  ;;  %13096 = vmatmul.mubr.bf16.vlgmr.msra.gmra.mxu0 %v16619_v0 }
0x2042   : > { %13077 = vmatprep.mubr.bf16.mxu1 %v16625_v31  ;;  %13097 = vmatprep.mubr.bf16.mxu0 %v16625_v31 }
0x2043   : > { %9165 = vmatpush1.bf16.xpose.msra.mxu1 %v12332_v23  ;;  %9212 = vmatpush1.bf16.xpose.msra.mxu0 %v12334_v59  ;;  %v12304_v23 = vcombine.low %v8964_v50, %v8966_v22  ;;  %v12306_v59 = vcombine.low %v8965_v54, %v8967_v11  ;;  %v8636_v22 = vld [vmem:[#allocation16 + $0x14] sm:$0xf] }
0x2044   : > { %9166 = vmatprep.subr.bf16.mxu1 %v12329_v44  ;;  %9213 = vmatprep.subr.bf16.mxu0 %v12331_v48  ;;  %v12365_v44 = vcombine.high %v16671_v51, %v16673_v10  ;;  %v12367_v48 = vcombine.high %v16675_v46, %v16679_v60  ;;  %v8645_v11 = vrot.slane %v8636_v22, %v15619_v21  ;;  %v8548_v46 = vld [vmem:[#allocation18 + $0x600] sm:$0xff] }
0x2045   : > { %v8550_v60 = vld [vmem:[#allocation18 + $0x640] sm:$0xff] }
0x2049   : > { %13078 = vmatmul.mubr.bf16.gmra.mxu1 %v16625_v31  ;;  %13098 = vmatmul.mubr.bf16.gmra.mxu0 %v16625_v31 }
0x204b   : > { %9167 = vmatpush1.bf16.xpose.msra.mxu1 %v12328_v15  ;;  %9214 = vmatpush1.bf16.xpose.msra.mxu0 %v12330_v32  ;;  %v16691_v15 = vrot.slane %v8203_v55, %v15648_v58 }
0x204c   : > { %9168 = vmatprep.subr.bf16.mxu1 %v12325_v4  ;;  %9215 = vmatprep.subr.bf16.mxu0 %v12327_v29  ;;  %v16694_v29 = vrot.slane %v8203_v55, %v15619_v21 }
0x2053   : > { %9169 = vmatpush1.bf16.xpose.msra.mxu1 %v12324_v49  ;;  %9216 = vmatpush1.bf16.xpose.msra.mxu0 %v12326_v17 }
0x2054   : > { %9170 = vmatprep.subr.bf16.mxu1 %v12321_v7  ;;  %9217 = vmatprep.subr.bf16.mxu0 %v12323_v8 }
0x205b   : > { %9171 = vmatpush1.bf16.xpose.msra.mxu1 %v12320_v26  ;;  %9218 = vmatpush1.bf16.xpose.msra.mxu0 %v12322_v39 }
0x205c   : > { %9172 = vmatprep.subr.bf16.mxu1 %v12317_v43  ;;  %9219 = vmatprep.subr.bf16.mxu0 %v12319_v35 }
0x2063   : > { %9173 = vmatpush1.bf16.xpose.msra.mxu1 %v12316_v61  ;;  %9220 = vmatpush1.bf16.xpose.msra.mxu0 %v12318_v3 }
0x2064   : > { %9174 = vmatprep.subr.bf16.mxu1 %v12313_v2  ;;  %9221 = vmatprep.subr.bf16.mxu0 %v12315_v40 }
0x206b   : > { %9175 = vmatpush1.bf16.xpose.msra.mxu1 %v12312_v24  ;;  %9222 = vmatpush1.bf16.xpose.msra.mxu0 %v12314_v12 }
0x206c   : > { %9176 = vmatprep.subr.bf16.mxu1 %v12309_v63  ;;  %9223 = vmatprep.subr.bf16.mxu0 %v12311_v20 }
0x2073   : > { %9177 = vmatpush1.bf16.xpose.msra.mxu1 %v12308_v38  ;;  %9224 = vmatpush1.bf16.xpose.msra.mxu0 %v12310_v6 }
0x2074   : > { %9178 = vmatprep.subr.bf16.mxu1 %v12305_v62  ;;  %9225 = vmatprep.subr.bf16.mxu0 %v12307_v9  ;;  %v8649_v9 = vrot.slane %v8636_v22, %v15648_v58 }
0x207b   : > { %9179 = vmatpush1.bf16.xpose.msra.mxu1 %v12304_v23  ;;  %9226 = vmatpush1.bf16.xpose.msra.mxu0 %v12306_v59  ;;  %v8653_v23 = vrot.slane %v8636_v22, %v16084_v36  ;;  %v8641_v59 = vrot.slane %v8636_v22, %v15612_v14 }
0x207c   : > { %9418 = vmatprep.subr.bf16.mxu1 %v12365_v44  ;;  %9465 = vmatprep.subr.bf16.mxu0 %v12367_v48 }
0x20c1   : > { %v8451_v32 = vpop.f32.mrf.mxu1  ;;  %v8502_v4 = vpop.f32.mrf.mxu0 }
0x20c2   : > { %v8452_v53 = vadd.f32 %v8451_v32, %v16688_v42  ;;  %v8503_v19 = vadd.f32 %v8502_v4, %v16691_v15 }
0x20c3   : > { %v8453_v25 = vpop.f32.mrf.mxu1  ;;  %v8504_v49 = vpop.f32.mrf.mxu0 }
0x20c4   : > { %v8454_v17 = vadd.f32 %v8453_v25, %v16694_v29  ;;  %v8505_v7 = vadd.f32 %v8504_v49, %v16697_v18  ;;  %v8519_v5 = vmax.f32 %v8452_v53, 0.0  ;;  %v8521_v26 = vmax.f32 %v8503_v19, 0.0 }
0x20c5   : > { %v8455_v8 = vpop.f32.mrf.mxu1  ;;  %v8506_v52 = vpop.f32.mrf.mxu0 }
0x20c6   : > { %v8456_v28 = vadd.f32 %v8455_v8, %v16688_v42  ;;  %v8507_v13 = vadd.f32 %v8506_v52, %v16691_v15  ;;  %v8520_v57 = vmax.f32 %v8454_v17, 0.0  ;;  %v8522_v61 = vmax.f32 %v8505_v7, 0.0  ;;  %v8556_v52 = vld [vmem:[#allocation18 + $0x700] sm:$0xff] }
0x20c7   : > { %v8457_v39 = vpop.f32.mrf.mxu1  ;;  %v8508_v43 = vpop.f32.mrf.mxu0 }
0x20c8   : > { %v8523_v35 = vmax.f32 %v8456_v28, 0.0  ;;  %v8525_v37 = vmax.f32 %v8507_v13, 0.0  ;;  %v8458_v56 = vadd.f32 %v8457_v39, %v16694_v29  ;;  %v8509_v47 = vadd.f32 %v8508_v43, %v16697_v18  ;;  %v8559_v39 = vld [vmem:[#allocation18 + $0x748] sm:$0xff] }
0x20c9   : > { %v16707_v3 = vpop.f32.mrf.mxu1  ;;  %v16709_v2 = vpop.f32.mrf.mxu0 }
0x20ca   : > { %v16711_v40 = vpack.c.bf16 %v8523_v35, %v8519_v5  ;;  %v16713_v27 = vpack.c.bf16 %v8525_v37, %v8521_v26  ;;  %v8524_v34 = vmax.f32 %v8458_v56, 0.0  ;;  %v8526_v16 = vmax.f32 %v8509_v47, 0.0  ;;  %v8558_v5 = vld [vmem:[#allocation18 + $0x740] sm:$0xff]  ;;  %v8557_v26 = vld [vmem:[#allocation18 + $0x708] sm:$0xff] }
0x20cb   : > { %v16715_v45 = vpop.f32.mrf.mxu1  ;;  %v16717_v24 = vpop.f32.mrf.mxu0  ;;  %v12363_v22 = vcombine.high %v8557_v26, %v8559_v39 }
0x20cc   : > { %v16719_v12 = vpack.c.bf16 %v8524_v34, %v8520_v57  ;;  %v16721_v63 = vpack.c.bf16 %v8526_v16, %v8522_v61 }
0x20cd   : > { %v8465_v20 = vpop.f32.mrf.mxu1  ;;  %v8516_v38 = vpop.f32.mrf.mxu0 }
0x20cf   : > { %v8466_v6 = vpop.f32.mrf.mxu1  ;;  %v8517_v50 = vpop.f32.mrf.mxu0 }
0x20d0   : > { %v12361_v50 = vcombine.high %v8556_v52, %v8558_v5 }
0x2101   : > { %v8884_v54 = vpop.f32.mrf.mxu1  ;;  %v8935_v62 = vpop.f32.mrf.mxu0 }
0x2102   : > { %v8885_v49 = vadd.f32 %v8884_v54, %v8641_v59  ;;  %v8936_v17 = vadd.f32 %v8935_v62, %v8649_v9 }
0x2103   : > { %v8886_v44 = vpop.f32.mrf.mxu1  ;;  %v8937_v48 = vpop.f32.mrf.mxu0 }
0x2104   : > { %v8887_v4 = vadd.f32 %v8886_v44, %v8645_v11  ;;  %v8938_v53 = vadd.f32 %v8937_v48, %v8653_v23  ;;  %v8952_v16 = vmax.f32 %v8885_v49, 0.0  ;;  %v8954_v20 = vmax.f32 %v8936_v17, 0.0 }
0x2105   : > { %v8888_v55 = vpop.f32.mrf.mxu1  ;;  %v8939_v32 = vpop.f32.mrf.mxu0 }
0x2106   : > { %v8889_v19 = vadd.f32 %v8888_v55, %v8641_v59  ;;  %v8940_v25 = vadd.f32 %v8939_v32, %v8649_v9  ;;  %v8953_v47 = vmax.f32 %v8887_v4, 0.0  ;;  %v8955_v57 = vmax.f32 %v8938_v53, 0.0 }
0x2107   : > { %v8890_v7 = vpop.f32.mrf.mxu1  ;;  %v8941_v8 = vpop.f32.mrf.mxu0 }
0x2108   : > { %v8891_v28 = vadd.f32 %v8890_v7, %v8645_v11  ;;  %v8942_v13 = vadd.f32 %v8941_v8, %v8653_v23  ;;  %v8956_v43 = vmax.f32 %v8889_v19, 0.0  ;;  %v8958_v35 = vmax.f32 %v8940_v25, 0.0 }
0x2109   : > { %v8894_v37 = vpop.f32.mrf.mxu1  ;;  %v8945_v56 = vpop.f32.mrf.mxu0 }
0x210a   : > { %v8957_v61 = vmax.f32 %v8891_v28, 0.0  ;;  %v8959_v34 = vmax.f32 %v8942_v13, 0.0  ;;  %v8996_v55 = vpack.c.bf16 %v8956_v43, %v8952_v16  ;;  %v8998_v32 = vpack.c.bf16 %v8958_v35, %v8954_v20  ;;  %v8553_v43 = vld [vmem:[#allocation18 + $0x688] sm:$0xff] }
0x210b   : > { %v8896_v38 = vpop.f32.mrf.mxu1  ;;  %v8947_v6 = vpop.f32.mrf.mxu0  ;;  %v8895_v19 = vadd.f32 %v8894_v37, %v8641_v59  ;;  %v8946_v25 = vadd.f32 %v8945_v56, %v8649_v9  ;;  %v8552_v59 = vld [vmem:[#allocation18 + $0x680] sm:$0xff]  ;;  %v8555_v35 = vld [vmem:[#allocation18 + $0x6c8] sm:$0xff]  ;;  %v12360_v37 = vcombine.low %v8556_v52, %v8558_v5  ;;  %v12362_v56 = vcombine.low %v8557_v26, %v8559_v39 }
0x210c   : > { %v8997_v54 = vpack.c.bf16 %v8957_v61, %v8953_v47  ;;  %v8999_v62 = vpack.c.bf16 %v8959_v34, %v8955_v57  ;;  %v8897_v44 = vadd.f32 %v8896_v38, %v8645_v11  ;;  %v8948_v48 = vadd.f32 %v8947_v6, %v8653_v23  ;;  %v8554_v9 = vld [vmem:[#allocation18 + $0x6c0] sm:$0xff]  ;;  %v8545_v16 = vld [vmem:[#allocation18 + $0x588] sm:$0xff] }
0x210d   : > { %v8898_v7 = vpop.f32.mrf.mxu1  ;;  %v8949_v8 = vpop.f32.mrf.mxu0  ;;  %v8960_v11 = vmax.f32 %v8895_v19, 0.0  ;;  %v8962_v23 = vmax.f32 %v8946_v25, 0.0  ;;  %v12357_v51 = vcombine.high %v8552_v59, %v8554_v9  ;;  %v12359_v10 = vcombine.high %v8553_v43, %v8555_v35  ;;  %v8544_v61 = vld [vmem:[#allocation18 + $0x580] sm:$0xff] }
0x210e   : > { %v8961_v4 = vmax.f32 %v8897_v44, 0.0  ;;  %v8963_v53 = vmax.f32 %v8948_v48, 0.0  ;;  %9196 = vmatprep.mubr.bf16.mxu1 %v8997_v54  ;;  %9243 = vmatprep.mubr.bf16.mxu0 %v8999_v62  ;;  %v12356_v52 = vcombine.low %v8552_v59, %v8554_v9  ;;  %v12358_v5 = vcombine.low %v8553_v43, %v8555_v35  ;;  %v8546_v34 = vld [vmem:[#allocation18 + $0x5c0] sm:$0xff]  ;;  %v8541_v54 = vld [vmem:[#allocation18 + $0x508] sm:$0xff] }
0x210f   : > { %v8899_v49 = vpop.f32.mrf.mxu1  ;;  %v8950_v17 = vpop.f32.mrf.mxu0  ;;  %9197 = vmatmul.mubr.bf16.vlgmr.msra.gmra.mxu1 %v8996_v55  ;;  %9244 = vmatmul.mubr.bf16.vlgmr.msra.gmra.mxu0 %v8998_v32  ;;  %v9000_v47 = vpack.c.bf16 %v8960_v11, %v8960_v11  ;;  %v9002_v57 = vpack.c.bf16 %v8962_v23, %v8962_v23  ;;  %v12353_v26 = vcombine.high %v8548_v46, %v8550_v60  ;;  %v8543_v62 = vld [vmem:[#allocation18 + $0x548] sm:$0xff]  ;;  %v8536_v19 = vld [vmem:[#allocation18 + $0x480] sm:$0xff] }
0x2110   : > { %v9001_v28 = vpack.c.bf16 %v8961_v4, %v8961_v4  ;;  %v9003_v13 = vpack.c.bf16 %v8963_v53, %v8963_v53  ;;  %9419 = vmatpush1.bf16.xpose.msra.mxu1 %v12364_v30  ;;  %9466 = vmatpush1.bf16.xpose.msra.mxu0 %v12366_v1  ;;  %v8549_v30 = vld [vmem:[#allocation18 + $0x608] sm:$0xff]  ;;  %v12352_v20 = vcombine.low %v8548_v46, %v8550_v60  ;;  %v8538_v25 = vld [vmem:[#allocation18 + $0x4c0] sm:$0xff] }
0x2111   : > { %9420 = vmatprep.subr.bf16.mxu1 %v12361_v50  ;;  %9467 = vmatprep.subr.bf16.mxu0 %v12363_v22  ;;  %v8551_v1 = vld [vmem:[#allocation18 + $0x648] sm:$0xff]  ;;  %v12349_v38 = vcombine.high %v8544_v61, %v8546_v34  ;;  %v8540_v50 = vld [vmem:[#allocation18 + $0x500] sm:$0xff]  ;;  %v12348_v44 = vcombine.low %v8544_v61, %v8546_v34  ;;  %v12347_v32 = vcombine.high %v8541_v54, %v8543_v62  ;;  %v14346_v61 = vld [vmem:[%s16967_s26 + $0x668] sm:$0xff]  }
0x2112   : > { %9203 = vmatprep.mubr.bf16.mxu1 %v9001_v28  ;;  %9250 = vmatprep.mubr.bf16.mxu0 %v9003_v13  ;;  %v12355_v39 = vcombine.high %v8549_v30, %v8551_v1  ;;  %v8542_v22 = vld [vmem:[#allocation18 + $0x540] sm:$0xff]  ;;  %v8537_v7 = vld [vmem:[#allocation18 + $0x488] sm:$0xff]  ;;  %v12346_v53 = vcombine.low %v8541_v54, %v8543_v62  ;;  %v12341_v49 = vcombine.high %v8536_v19, %v8538_v25  ;;  %v14349_v34 = vld [vmem:[%s16967_s26 + $0x6a8] sm:$0xff]  }
0x2113   : > { %v12345_v55 = vcombine.high %v8540_v50, %v8542_v22  ;;  %v8539_v8 = vld [vmem:[#allocation18 + $0x4c8] sm:$0xff]  ;;  %v12344_v4 = vcombine.low %v8540_v50, %v8542_v22  ;;  %v8532_v28 = vld [vmem:[#allocation18 + $0x400] sm:$0xff]  ;;  %v12340_v59 = vcombine.low %v8536_v19, %v8538_v25  ;;  %v14364_v19 = vld [vmem:[%s16967_s26 + $0x608] sm:$0xff]  }
0x2114   : > { %v12343_v17 = vcombine.high %v8537_v7, %v8539_v8  ;;  %v8534_v13 = vld [vmem:[#allocation18 + $0x440] sm:$0xff]  ;;  %v8533_v11 = vld [vmem:[#allocation18 + $0x408] sm:$0xff]  ;;  %v12342_v9 = vcombine.low %v8537_v7, %v8539_v8  ;;  %v14365_v25 = vld [vmem:[%s16967_s26 + $0x688] sm:$0xff]  }
0x2115   : > { %v8535_v23 = vld [vmem:[#allocation18 + $0x448] sm:$0xff]  ;;  %v12337_v43 = vcombine.high %v8532_v28, %v8534_v13  ;;  %v14358_v54 = vld [vmem:[%s16967_s26 + $0x650] sm:$0xff]  }
0x2116   : > { %v12339_v35 = vcombine.high %v8533_v11, %v8535_v23  ;;  %v14356_v50 = vld [vmem:[%s16967_s26 + $0x618] sm:$0xff]   ;;  %v14359_v62 = vld [vmem:[%s16967_s26 + $0x6d0] sm:$0xff]   ;;  %v14366_v7 = vld [vmem:[%s16967_s26 + $0x640] sm:$0xff]  }
0x2117   : > { %9204 = vmatmul.mubr.bf16.gmra.mxu1 %v9000_v47  ;;  %9251 = vmatmul.mubr.bf16.gmra.mxu0 %v9002_v57  ;;  %v14338_v47 = vld [vmem:[%s16967_s26 + $0x678] sm:$0xff]   ;;  %v14367_v8 = vld [vmem:[%s16967_s26 + $0x6c0] sm:$0xff]  }
0x2118   : > { %9421 = vmatpush1.bf16.xpose.msra.mxu1 %v12360_v37  ;;  %9468 = vmatpush1.bf16.xpose.msra.mxu0 %v12362_v56  ;;  %v12336_v37 = vcombine.low %v8532_v28, %v8534_v13  ;;  %v12338_v56 = vcombine.low %v8533_v11, %v8535_v23  ;;  %v14339_v57 = vld [vmem:[%s16967_s26 + $0x6f8] sm:$0xff]  }
0x2119   : > { %9450 = vmatprep.mubr.bf16.mxu1 %v16719_v12  ;;  %9497 = vmatprep.mubr.bf16.mxu0 %v16721_v63  ;;  %v8547_v12 = vld [vmem:[#allocation18 + $0x5c8] sm:$0xff]  ;;  %v12354_v63 = vcombine.low %v8549_v30, %v8551_v1  ;;  %v8462_v30 = vadd.f32 %v16707_v3, %v16688_v42  ;;  %v8513_v1 = vadd.f32 %v16709_v2, %v16691_v15 }
0x211a   : > { %9422 = vmatprep.subr.bf16.mxu1 %v12357_v51  ;;  %9469 = vmatprep.subr.bf16.mxu0 %v12359_v10  ;;  %v12351_v6 = vcombine.high %v8545_v16, %v8547_v12  ;;  %v12350_v48 = vcombine.low %v8545_v16, %v8547_v12  ;;  %v8464_v51 = vadd.f32 %v16715_v45, %v16694_v29  ;;  %v14342_v45 = vld [vmem:[%s16967_s26 + $0x670] sm:$0xff]   ;;  %v14350_v16 = vld [vmem:[%s16967_s26 + $0x660] sm:$0xff]   ;;  %v14357_v22 = vld [vmem:[%s16967_s26 + $0x698] sm:$0xff]  }
0x211b   : > { %v8515_v10 = vadd.f32 %v16717_v24, %v16697_v18  ;;  %v14343_v18 = vld [vmem:[%s16967_s26 + $0x6f0] sm:$0xff]   ;;  %v8527_v42 = vmax.f32 %v8462_v30, 0.0  ;;  %v8529_v3 = vmax.f32 %v8513_v1, 0.0  ;;  %v14351_v12 = vld [vmem:[%s16967_s26 + $0x6e0] sm:$0xff]  }
0x211c   : > { %v8528_v46 = vmax.f32 %v8464_v51, 0.0  ;;  %v14344_v24 = vld [vmem:[%s16967_s26 + $0x630] sm:$0xff]   ;;  %v9933_v28 = vld [vmem:[#allocation18 + $0x7a8] sm:$0xff] }
0x211d   : > { %v8530_v60 = vmax.f32 %v8515_v10, 0.0  ;;  %v8568_v15 = vpack.c.bf16 %v8527_v42, %v8527_v42  ;;  %v8570_v2 = vpack.c.bf16 %v8529_v3, %v8529_v3  ;;  %v9935_v23 = vld [vmem:[#allocation18 + $0x7e8] sm:$0xff]  ;;  %v9924_v51 = vld [vmem:[#allocation18 + $0x6a0] sm:$0xff] }
0x211e   : > { %v9926_v10 = vld [vmem:[#allocation18 + $0x6e0] sm:$0xff] }
0x211f   : > { %v8571_v29 = vpack.c.bf16 %v8530_v60, %v8530_v60  ;;  %v9927_v60 = vld [vmem:[#allocation18 + $0x6e8] sm:$0xff]  ;;  %v12484_v42 = vcombine.low %v9924_v51, %v9926_v10 }
0x2120   : > { %9423 = vmatpush1.bf16.xpose.msra.mxu1 %v12356_v52  ;;  %9470 = vmatpush1.bf16.xpose.msra.mxu0 %v12358_v5  ;;  %v14340_v52 = vld [vmem:[%s16967_s26 + $0x638] sm:$0xff]  }
0x2121   : > { %9424 = vmatprep.subr.bf16.mxu1 %v12353_v26  ;;  %9471 = vmatprep.subr.bf16.mxu0 %v12355_v39  ;;  %v14341_v5 = vld [vmem:[%s16967_s26 + $0x6b8] sm:$0xff]   ;;  %v8569_v26 = vpack.c.bf16 %v8528_v46, %v8528_v46  ;;  %v14345_v39 = vld [vmem:[%s16967_s26 + $0x6b0] sm:$0xff]  }
0x2122   : > { %v9925_v46 = vld [vmem:[#allocation18 + $0x6a8] sm:$0xff] }
0x2123   : > { %v12486_v3 = vcombine.low %v9925_v46, %v9927_v60 }
0x2128   : > { %9425 = vmatpush1.bf16.xpose.msra.mxu1 %v12352_v20  ;;  %9472 = vmatpush1.bf16.xpose.msra.mxu0 %v12354_v63  ;;  %v14352_v20 = vld [vmem:[%s16967_s26 + $0x620] sm:$0xff]  }
0x2129   : > { %9426 = vmatprep.subr.bf16.mxu1 %v12349_v38  ;;  %9473 = vmatprep.subr.bf16.mxu0 %v12351_v6  ;;  %v14353_v63 = vld [vmem:[%s16967_s26 + $0x6a0] sm:$0xff]   ;;  %v14354_v38 = vld [vmem:[%s16967_s26 + $0x658] sm:$0xff]  }
0x212a   : > { %v14355_v6 = vld [vmem:[%s16967_s26 + $0x6d8] sm:$0xff]  }
0x2130   : > { %9427 = vmatpush1.bf16.xpose.msra.mxu1 %v12348_v44  ;;  %9474 = vmatpush1.bf16.xpose.msra.mxu0 %v12350_v48  ;;  %v14360_v44 = vld [vmem:[%s16967_s26 + $0x610] sm:$0xff]  }
0x2131   : > { %9428 = vmatprep.subr.bf16.mxu1 %v12345_v55  ;;  %9475 = vmatprep.subr.bf16.mxu0 %v12347_v32  ;;  %v14361_v48 = vld [vmem:[%s16967_s26 + $0x690] sm:$0xff]   ;;  %v14362_v55 = vld [vmem:[%s16967_s26 + $0x648] sm:$0xff]  }
0x2132   : > { %v14363_v32 = vld [vmem:[%s16967_s26 + $0x6c8] sm:$0xff]  }
0x2138   : > { %9429 = vmatpush1.bf16.xpose.msra.mxu1 %v12344_v4  ;;  %9476 = vmatpush1.bf16.xpose.msra.mxu0 %v12346_v53  ;;  %v14368_v4 = vld [vmem:[%s16967_s26 + $0x600] sm:$0xff]  }
0x2139   : > { %9430 = vmatprep.subr.bf16.mxu1 %v12341_v49  ;;  %9477 = vmatprep.subr.bf16.mxu0 %v12343_v17  ;;  %v14369_v53 = vld [vmem:[%s16967_s26 + $0x680] sm:$0xff]   ;;  %v9932_v49 = vld [vmem:[#allocation18 + $0x7a0] sm:$0xff] }
0x213a   : > { %v9934_v17 = vld [vmem:[#allocation18 + $0x7e0] sm:$0xff] }
0x213b   : > { %v12492_v13 = vcombine.low %v9932_v49, %v9934_v17  ;;  %v12493_v11 = vcombine.high %v9932_v49, %v9934_v17 }
0x2140   : > { %9431 = vmatpush1.bf16.xpose.msra.mxu1 %v12340_v59  ;;  %9478 = vmatpush1.bf16.xpose.msra.mxu0 %v12342_v9  ;;  %v12494_v59 = vcombine.low %v9933_v28, %v9935_v23  ;;  %v12495_v9 = vcombine.high %v9933_v28, %v9935_v23  ;;  %v9906_v23 = vld [vmem:[#allocation18 + $0x460] sm:$0xff] }
0x2141   : > { %9432 = vmatprep.subr.bf16.mxu1 %v12337_v43  ;;  %9479 = vmatprep.subr.bf16.mxu0 %v12339_v35  ;;  %v9928_v43 = vld [vmem:[#allocation18 + $0x720] sm:$0xff] }
0x2142   : > { %v9930_v35 = vld [vmem:[#allocation18 + $0x760] sm:$0xff] }
0x2143   : > { %v12488_v30 = vcombine.low %v9928_v43, %v9930_v35 }
0x2148   : > { %9433 = vmatpush1.bf16.xpose.msra.mxu1 %v12336_v37  ;;  %9480 = vmatpush1.bf16.xpose.msra.mxu0 %v12338_v56  ;;  %v9929_v37 = vld [vmem:[#allocation18 + $0x728] sm:$0xff]  ;;  %v12489_v56 = vcombine.high %v9928_v43, %v9930_v35 }
0x2149   : > { %13099 = vmatprep.subr.bf16.mxu1 %v14338_v47  ;;  %13119 = vmatprep.subr.bf16.mxu0 %v14339_v57  ;;  %v9931_v47 = vld [vmem:[#allocation18 + $0x768] sm:$0xff] }
0x214a   : > { %v12491_v57 = vcombine.high %v9929_v37, %v9931_v47  ;;  %v12490_v1 = vcombine.low %v9929_v37, %v9931_v47  ;;  %v9907_v37 = vld [vmem:[#allocation18 + $0x468] sm:$0xff] }
0x214f   : > { %9451 = vmatmul.mubr.bf16.vlgmr.msra.gmra.mxu1 %v16711_v40  ;;  %9498 = vmatmul.mubr.bf16.vlgmr.msra.gmra.mxu0 %v16713_v27  ;;  %v14347_v40 = vld [vmem:[%s16967_s26 + $0x6e8] sm:$0xff]  }
0x2150   : > { %9457 = vmatprep.mubr.bf16.mxu1 %v8569_v26  ;;  %9504 = vmatprep.mubr.bf16.mxu0 %v8571_v29  ;;  %v14348_v27 = vld [vmem:[%s16967_s26 + $0x628] sm:$0xff]   ;;  %v9920_v26 = vld [vmem:[#allocation18 + $0x620] sm:$0xff] }
0x2151   : > { %13100 = vmatpush3.bf16.xpose.msra.mxu1 %v14340_v52  ;;  %13120 = vmatpush3.bf16.xpose.msra.mxu0 %v14341_v5  ;;  %v12485_v52 = vcombine.high %v9924_v51, %v9926_v10  ;;  %v12487_v5 = vcombine.high %v9925_v46, %v9927_v60  ;;  %v9922_v29 = vld [vmem:[#allocation18 + $0x660] sm:$0xff] }
0x2152   : > { %13101 = vmatprep.subr.bf16.mxu1 %v14342_v45  ;;  %13121 = vmatprep.subr.bf16.mxu0 %v14343_v18  ;;  %v9921_v45 = vld [vmem:[#allocation18 + $0x628] sm:$0xff] }
0x2153   : > { %v9923_v18 = vld [vmem:[#allocation18 + $0x668] sm:$0xff] }
0x2157   : > { %9458 = vmatmul.mubr.bf16.gmra.mxu1 %v8568_v15  ;;  %9505 = vmatmul.mubr.bf16.gmra.mxu0 %v8570_v2  ;;  %v12481_v15 = vcombine.high %v9920_v26, %v9922_v29  ;;  %v12483_v2 = vcombine.high %v9921_v45, %v9923_v18 }
0x2158   : > { %13115 = vmatprep.mubr.bf16.mxu1 %v16619_v0  ;;  %13135 = vmatprep.mubr.bf16.mxu0 %v16619_v0 }
0x2159   : > { %13102 = vmatpush3.bf16.xpose.msra.mxu1 %v14344_v24  ;;  %13122 = vmatpush3.bf16.xpose.msra.mxu0 %v14345_v39  ;;  %v9916_v24 = vld [vmem:[#allocation18 + $0x5a0] sm:$0xff] }
0x215a   : > { %13103 = vmatprep.subr.bf16.mxu1 %v14346_v61  ;;  %13123 = vmatprep.subr.bf16.mxu0 %v14347_v40  ;;  %v9918_v39 = vld [vmem:[#allocation18 + $0x5e0] sm:$0xff]  ;;  %v9917_v61 = vld [vmem:[#allocation18 + $0x5a8] sm:$0xff] }
0x215b   : > { %v9919_v40 = vld [vmem:[#allocation18 + $0x5e8] sm:$0xff] }
0x2161   : > { %13104 = vmatpush3.bf16.xpose.msra.mxu1 %v14348_v27  ;;  %13124 = vmatpush3.bf16.xpose.msra.mxu0 %v14349_v34  ;;  %v12480_v27 = vcombine.low %v9920_v26, %v9922_v29  ;;  %v12482_v34 = vcombine.low %v9921_v45, %v9923_v18  ;;  %v14370_v45 = vld [vmem:[%s16967_s26 + $0x778] sm:$0xff]  }
0x2162   : > { %13105 = vmatprep.subr.bf16.mxu1 %v14350_v16  ;;  %13125 = vmatprep.subr.bf16.mxu0 %v14351_v12  ;;  %v12477_v16 = vcombine.high %v9916_v24, %v9918_v39  ;;  %v12479_v12 = vcombine.high %v9917_v61, %v9919_v40  ;;  %v14371_v18 = vld [vmem:[%s16967_s26 + $0x7f8] sm:$0xff]  }
0x2169   : > { %13106 = vmatpush3.bf16.xpose.msra.mxu1 %v14352_v20  ;;  %13126 = vmatpush3.bf16.xpose.msra.mxu0 %v14353_v63  ;;  %v9912_v20 = vld [vmem:[#allocation18 + $0x520] sm:$0xff] }
0x216a   : > { %13107 = vmatprep.subr.bf16.mxu1 %v14354_v38  ;;  %13127 = vmatprep.subr.bf16.mxu0 %v14355_v6  ;;  %v9914_v63 = vld [vmem:[#allocation18 + $0x560] sm:$0xff]  ;;  %v9913_v38 = vld [vmem:[#allocation18 + $0x528] sm:$0xff] }
0x216b   : > { %v9915_v6 = vld [vmem:[#allocation18 + $0x568] sm:$0xff] }
0x2171   : > { %13108 = vmatpush3.bf16.xpose.msra.mxu1 %v14356_v50  ;;  %13128 = vmatpush3.bf16.xpose.msra.mxu0 %v14357_v22  ;;  %v12476_v50 = vcombine.low %v9916_v24, %v9918_v39  ;;  %v12478_v22 = vcombine.low %v9917_v61, %v9919_v40 }
0x2172   : > { %13109 = vmatprep.subr.bf16.mxu1 %v14358_v54  ;;  %13129 = vmatprep.subr.bf16.mxu0 %v14359_v62  ;;  %v12473_v54 = vcombine.high %v9912_v20, %v9914_v63  ;;  %v12475_v62 = vcombine.high %v9913_v38, %v9915_v6 }
0x2179   : > { %13110 = vmatpush3.bf16.xpose.msra.mxu1 %v14360_v44  ;;  %13130 = vmatpush3.bf16.xpose.msra.mxu0 %v14361_v48  ;;  %v9908_v44 = vld [vmem:[#allocation18 + $0x4a0] sm:$0xff] }
0x217a   : > { %13111 = vmatprep.subr.bf16.mxu1 %v14362_v55  ;;  %13131 = vmatprep.subr.bf16.mxu0 %v14363_v32  ;;  %v9910_v48 = vld [vmem:[#allocation18 + $0x4e0] sm:$0xff]  ;;  %v9909_v55 = vld [vmem:[#allocation18 + $0x4a8] sm:$0xff] }
0x217b   : > { %v9911_v32 = vld [vmem:[#allocation18 + $0x4e8] sm:$0xff] }
0x2181   : > { %13112 = vmatpush3.bf16.xpose.msra.mxu1 %v14364_v19  ;;  %13132 = vmatpush3.bf16.xpose.msra.mxu0 %v14365_v25  ;;  %v12472_v19 = vcombine.low %v9912_v20, %v9914_v63  ;;  %v12474_v25 = vcombine.low %v9913_v38, %v9915_v6 }
0x2182   : > { %13113 = vmatprep.subr.bf16.mxu1 %v14366_v7  ;;  %13133 = vmatprep.subr.bf16.mxu0 %v14367_v8  ;;  %v12469_v7 = vcombine.high %v9908_v44, %v9910_v48  ;;  %v12471_v8 = vcombine.high %v9909_v55, %v9911_v32 }
0x2189   : > { %13114 = vmatpush3.bf16.xpose.msra.mxu1 %v14368_v4  ;;  %13134 = vmatpush3.bf16.xpose.msra.mxu0 %v14369_v53  ;;  %v12468_v4 = vcombine.low %v9908_v44, %v9910_v48  ;;  %v12470_v53 = vcombine.low %v9909_v55, %v9911_v32  ;;  %v9576_v55 = vld [vmem:[#allocation16 + $0x18] sm:$0xf] }
0x218a   : > { %10104 = vmatprep.subr.bf16.mxu1 %v12493_v11  ;;  %10151 = vmatprep.subr.bf16.mxu0 %v12495_v9  ;;  %v9904_v11 = vld [vmem:[#allocation18 + $0x420] sm:$0xff] }
0x218b   : > { %v12465_v35 = vcombine.high %v9904_v11, %v9906_v23  ;;  %v12464_v47 = vcombine.low %v9904_v11, %v9906_v23 }
0x2190   : > { %13116 = vmatmul.mubr.bf16.vlgmr.msra.gmra.mxu1 %v16619_v0  ;;  %13136 = vmatmul.mubr.bf16.vlgmr.msra.gmra.mxu0 %v16619_v0 }
0x2191   : > { %13117 = vmatprep.mubr.bf16.mxu1 %v16625_v31  ;;  %13137 = vmatprep.mubr.bf16.mxu0 %v16625_v31 }
0x2192   : > { %10105 = vmatpush1.bf16.xpose.msra.mxu1 %v12492_v13  ;;  %10152 = vmatpush1.bf16.xpose.msra.mxu0 %v12494_v59  ;;  %v9905_v59 = vld [vmem:[#allocation18 + $0x428] sm:$0xff] }
0x2193   : > { %10106 = vmatprep.subr.bf16.mxu1 %v12489_v56  ;;  %10153 = vmatprep.subr.bf16.mxu0 %v12491_v57  ;;  %v12466_v57 = vcombine.low %v9905_v59, %v9907_v37  ;;  %v12467_v51 = vcombine.high %v9905_v59, %v9907_v37 }
0x2198   : > { %13118 = vmatmul.mubr.bf16.gmra.mxu1 %v16625_v31  ;;  %13138 = vmatmul.mubr.bf16.gmra.mxu0 %v16625_v31 }
0x219a   : > { %10107 = vmatpush1.bf16.xpose.msra.mxu1 %v12488_v30  ;;  %10154 = vmatpush1.bf16.xpose.msra.mxu0 %v12490_v1 }
0x219b   : > { %10108 = vmatprep.subr.bf16.mxu1 %v12485_v52  ;;  %10155 = vmatprep.subr.bf16.mxu0 %v12487_v5 }
0x21a2   : > { %10109 = vmatpush1.bf16.xpose.msra.mxu1 %v12484_v42  ;;  %10156 = vmatpush1.bf16.xpose.msra.mxu0 %v12486_v3 }
0x21a3   : > { %10110 = vmatprep.subr.bf16.mxu1 %v12481_v15  ;;  %10157 = vmatprep.subr.bf16.mxu0 %v12483_v2 }
0x21aa   : > { %10111 = vmatpush1.bf16.xpose.msra.mxu1 %v12480_v27  ;;  %10158 = vmatpush1.bf16.xpose.msra.mxu0 %v12482_v34 }
0x21ab   : > { %10112 = vmatprep.subr.bf16.mxu1 %v12477_v16  ;;  %10159 = vmatprep.subr.bf16.mxu0 %v12479_v12 }
0x21b2   : > { %10113 = vmatpush1.bf16.xpose.msra.mxu1 %v12476_v50  ;;  %10160 = vmatpush1.bf16.xpose.msra.mxu0 %v12478_v22 }
0x21b3   : > { %10114 = vmatprep.subr.bf16.mxu1 %v12473_v54  ;;  %10161 = vmatprep.subr.bf16.mxu0 %v12475_v62 }
0x21ba   : > { %10115 = vmatpush1.bf16.xpose.msra.mxu1 %v12472_v19  ;;  %10162 = vmatpush1.bf16.xpose.msra.mxu0 %v12474_v25  ;;  %v9585_v25 = vrot.slane %v9576_v55, %v15619_v21 }
0x21bb   : > { %10116 = vmatprep.subr.bf16.mxu1 %v12469_v7  ;;  %10163 = vmatprep.subr.bf16.mxu0 %v12471_v8  ;;  %v9593_v7 = vrot.slane %v9576_v55, %v16084_v36  ;;  %v9581_v8 = vrot.slane %v9576_v55, %v15612_v14 }
0x21c2   : > { %10117 = vmatpush1.bf16.xpose.msra.mxu1 %v12468_v4  ;;  %10164 = vmatpush1.bf16.xpose.msra.mxu0 %v12470_v53  ;;  %v9589_v4 = vrot.slane %v9576_v55, %v15648_v58 }
0x21c3   : > { %10118 = vmatprep.subr.bf16.mxu1 %v12465_v35  ;;  %10165 = vmatprep.subr.bf16.mxu0 %v12467_v51 }
0x21ca   : > { %10119 = vmatpush1.bf16.xpose.msra.mxu1 %v12464_v47  ;;  %10166 = vmatpush1.bf16.xpose.msra.mxu0 %v12466_v57 }
0x21cb   : > { %13139 = vmatprep.subr.bf16.mxu1 %v14370_v45  ;;  %13159 = vmatprep.subr.bf16.mxu0 %v14371_v18 }
0x21cf   : > { %v9198_v49 = vpop.f32.mrf.mxu1  ;;  %v9245_v17 = vpop.f32.mrf.mxu0 }
0x21d1   : > { %v9199_v28 = vpop.f32.mrf.mxu1  ;;  %v9246_v13 = vpop.f32.mrf.mxu0 }
0x21d3   : > { %v9200_v9 = vpop.f32.mrf.mxu1  ;;  %v9247_v43 = vpop.f32.mrf.mxu0 }
0x21d4   : > { %v9248_v56 = vadd.f32 %v9247_v43, %v9200_v9 }
0x21d5   : > { %v9202_v10 = vpop.f32.mrf.mxu1  ;;  %v9249_v46 = vpop.f32.mrf.mxu0 }
0x21d7   : > { %v9205_v60 = vpop.f32.mrf.mxu1  ;;  %v9252_v30 = vpop.f32.mrf.mxu0 }
0x21d8   : > { %v9253_v1 = vadd.f32 %v9252_v30, %v9205_v60 }
0x21d9   : > { %v9207_v52 = vpop.f32.mrf.mxu1  ;;  %v9254_v5 = vpop.f32.mrf.mxu0 }
0x21db   : > { %v9208_v26 = vpop.f32.mrf.mxu1  ;;  %v9255_v29 = vpop.f32.mrf.mxu0 }
0x21dd   : > { %v9209_v42 = vpop.f32.mrf.mxu1  ;;  %v9256_v3 = vpop.f32.mrf.mxu0 }
0x220f   : > { %v9452_v15 = vpop.f32.mrf.mxu1  ;;  %v9499_v2 = vpop.f32.mrf.mxu0 }
0x2210   : > { %v14372_v2 = vld [vmem:[%s16967_s26 + $0x738] sm:$0xff]  }
0x2211   : > { %v9453_v24 = vpop.f32.mrf.mxu1  ;;  %v9500_v39 = vpop.f32.mrf.mxu0 }
0x2212   : > { %v14373_v24 = vld [vmem:[%s16967_s26 + $0x7b8] sm:$0xff]  }
0x2213   : > { %v9454_v61 = vpop.f32.mrf.mxu1  ;;  %v9501_v40 = vpop.f32.mrf.mxu0 }
0x2214   : > { %v9455_v27 = vadd.f32 %v9454_v61, %v9248_v56 }
0x2215   : > { %v9456_v34 = vpop.f32.mrf.mxu1  ;;  %v9503_v16 = vpop.f32.mrf.mxu0 }
0x2216   : > { %v16787_v12 = vadd.f32 %v9501_v40, %v9455_v27 }
0x2217   : > { %v9459_v20 = vpop.f32.mrf.mxu1  ;;  %v9506_v63 = vpop.f32.mrf.mxu0 }
0x2218   : > { %v9460_v38 = vadd.f32 %v9459_v20, %v9253_v1  ;;  %v14374_v20 = vld [vmem:[%s16967_s26 + $0x770] sm:$0xff]  }
0x2219   : > { %v9461_v6 = vpop.f32.mrf.mxu1  ;;  %v9508_v50 = vpop.f32.mrf.mxu0 }
0x221a   : > { %v16789_v22 = vadd.f32 %v9506_v63, %v9460_v38  ;;  %v14375_v63 = vld [vmem:[%s16967_s26 + $0x7f0] sm:$0xff]  }
0x221b   : > { %v9462_v54 = vpop.f32.mrf.mxu1  ;;  %v9509_v62 = vpop.f32.mrf.mxu0 }
0x221d   : > { %v9463_v44 = vpop.f32.mrf.mxu1  ;;  %v9510_v48 = vpop.f32.mrf.mxu0 }
0x2250   : > { %v9824_v32 = vpop.f32.mrf.mxu1  ;;  %v9875_v19 = vpop.f32.mrf.mxu0 }
0x2251   : > { %v9825_v9 = vadd.f32 %v9824_v32, %v9581_v8  ;;  %v9876_v43 = vadd.f32 %v9875_v19, %v9589_v4  ;;  %v14376_v32 = vld [vmem:[%s16967_s26 + $0x730] sm:$0xff]  }
0x2252   : > { %v9826_v53 = vpop.f32.mrf.mxu1  ;;  %v9877_v49 = vpop.f32.mrf.mxu0  ;;  %v14377_v19 = vld [vmem:[%s16967_s26 + $0x7b0] sm:$0xff]  }
0x2253   : > { %v9827_v13 = vadd.f32 %v9826_v53, %v9585_v25  ;;  %v9878_v11 = vadd.f32 %v9877_v49, %v9593_v7  ;;  %v9892_v5 = vmax.f32 %v9825_v9, 0.0  ;;  %v9894_v26 = vmax.f32 %v9876_v43, 0.0  ;;  %v14380_v53 = vld [vmem:[%s16967_s26 + $0x728] sm:$0xff]   ;;  %v14388_v9 = vld [vmem:[%s16967_s26 + $0x718] sm:$0xff]  }
0x2254   : > { %v9828_v17 = vpop.f32.mrf.mxu1  ;;  %v9879_v28 = vpop.f32.mrf.mxu0  ;;  %v14381_v49 = vld [vmem:[%s16967_s26 + $0x7a8] sm:$0xff]   ;;  %v14389_v43 = vld [vmem:[%s16967_s26 + $0x798] sm:$0xff]  }
0x2255   : > { %v9829_v23 = vadd.f32 %v9828_v17, %v9581_v8  ;;  %v9880_v59 = vadd.f32 %v9879_v28, %v9589_v4  ;;  %v9893_v60 = vmax.f32 %v9827_v13, 0.0  ;;  %v9895_v30 = vmax.f32 %v9878_v11, 0.0  ;;  %v14382_v17 = vld [vmem:[%s16967_s26 + $0x760] sm:$0xff]  }
0x2256   : > { %v9830_v35 = vpop.f32.mrf.mxu1  ;;  %v9881_v37 = vpop.f32.mrf.mxu0  ;;  %v14383_v28 = vld [vmem:[%s16967_s26 + $0x7e0] sm:$0xff]  }
0x2257   : > { %v9831_v56 = vadd.f32 %v9830_v35, %v9585_v25  ;;  %v9882_v47 = vadd.f32 %v9881_v37, %v9593_v7  ;;  %v9896_v57 = vmax.f32 %v9829_v23, 0.0  ;;  %v9898_v51 = vmax.f32 %v9880_v59, 0.0  ;;  %v14384_v13 = vld [vmem:[%s16967_s26 + $0x720] sm:$0xff]   ;;  %v14386_v23 = vld [vmem:[%s16967_s26 + $0x758] sm:$0xff]   ;;  %v14390_v35 = vld [vmem:[%s16967_s26 + $0x750] sm:$0xff]  }
0x2258   : > { %v9834_v10 = vpop.f32.mrf.mxu1  ;;  %v9885_v46 = vpop.f32.mrf.mxu0  ;;  %v14385_v11 = vld [vmem:[%s16967_s26 + $0x7a0] sm:$0xff]   ;;  %v14387_v59 = vld [vmem:[%s16967_s26 + $0x7d8] sm:$0xff]   ;;  %v14391_v37 = vld [vmem:[%s16967_s26 + $0x7d0] sm:$0xff]  }
0x2259   : > { %v9897_v1 = vmax.f32 %v9831_v56, 0.0  ;;  %v9899_v52 = vmax.f32 %v9882_v47, 0.0  ;;  %v9936_v39 = vpack.c.bf16 %v9896_v57, %v9892_v5  ;;  %v9938_v61 = vpack.c.bf16 %v9898_v51, %v9894_v26  ;;  %v14392_v56 = vld [vmem:[%s16967_s26 + $0x710] sm:$0xff]   ;;  %v14394_v57 = vld [vmem:[%s16967_s26 + $0x748] sm:$0xff]  }
0x225a   : > { %v9836_v29 = vpop.f32.mrf.mxu1  ;;  %v9887_v45 = vpop.f32.mrf.mxu0  ;;  %v9835_v40 = vadd.f32 %v9834_v10, %v9581_v8  ;;  %v9886_v27 = vadd.f32 %v9885_v46, %v9589_v4  ;;  %v14378_v8 = vld [vmem:[%s16967_s26 + $0x768] sm:$0xff]   ;;  %v14393_v47 = vld [vmem:[%s16967_s26 + $0x790] sm:$0xff]  }
0x225b   : > { %v9937_v18 = vpack.c.bf16 %v9897_v1, %v9893_v60  ;;  %v9939_v42 = vpack.c.bf16 %v9899_v52, %v9895_v30  ;;  %v9837_v3 = vadd.f32 %v9836_v29, %v9585_v25  ;;  %v9888_v15 = vadd.f32 %v9887_v45, %v9593_v7  ;;  %v14379_v4 = vld [vmem:[%s16967_s26 + $0x7e8] sm:$0xff]   ;;  %v14398_v60 = vld [vmem:[%s16967_s26 + $0x740] sm:$0xff]  }
0x225c   : > { %v9838_v34 = vpop.f32.mrf.mxu1  ;;  %v9889_v16 = vpop.f32.mrf.mxu0  ;;  %v9900_v48 = vmax.f32 %v9835_v40, 0.0  ;;  %v9902_v55 = vmax.f32 %v9886_v27, 0.0  ;;  %v14395_v51 = vld [vmem:[%s16967_s26 + $0x7c8] sm:$0xff]   ;;  %v14399_v30 = vld [vmem:[%s16967_s26 + $0x7c0] sm:$0xff]  }
0x225d   : > { %v9901_v38 = vmax.f32 %v9837_v3, 0.0  ;;  %v9903_v6 = vmax.f32 %v9888_v15, 0.0  ;;  %10136 = vmatprep.mubr.bf16.mxu1 %v9937_v18  ;;  %10183 = vmatprep.mubr.bf16.mxu0 %v9939_v42  ;;  %v14396_v10 = vld [vmem:[%s16967_s26 + $0x708] sm:$0xff]   ;;  %v14400_v1 = vld [vmem:[%s16967_s26 + $0x700] sm:$0xff]  }
0x225e   : > { %v9839_v50 = vpop.f32.mrf.mxu1  ;;  %v9890_v54 = vpop.f32.mrf.mxu0  ;;  %10137 = vmatmul.mubr.bf16.vlgmr.msra.gmra.mxu1 %v9936_v39  ;;  %10184 = vmatmul.mubr.bf16.vlgmr.msra.gmra.mxu0 %v9938_v61  ;;  %v9940_v25 = vpack.c.bf16 %v9900_v48, %v9900_v48  ;;  %v9942_v7 = vpack.c.bf16 %v9902_v55, %v9902_v55  ;;  %v14397_v46 = vld [vmem:[%s16967_s26 + $0x788] sm:$0xff]   ;;  %v14401_v52 = vld [vmem:[%s16967_s26 + $0x780] sm:$0xff]  }
0x225f   : > { %v9941_v62 = vpack.c.bf16 %v9901_v38, %v9901_v38  ;;  %v9943_v44 = vpack.c.bf16 %v9903_v6, %v9903_v6  ;;  %13140 = vmatpush3.bf16.xpose.msra.mxu1 %v14372_v2  ;;  %13160 = vmatpush3.bf16.xpose.msra.mxu0 %v14373_v24  ;;  %v10620_v5 = vld [vmem:[#allocation18 + $0x7b0] sm:$0xff]  ;;  %v10621_v29 = vld [vmem:[#allocation18 + $0x7b8] sm:$0xff] }
0x2260   : > { %13141 = vmatprep.subr.bf16.mxu1 %v14374_v20  ;;  %13161 = vmatprep.subr.bf16.mxu0 %v14375_v63  ;;  %v10622_v26 = vld [vmem:[#allocation18 + $0x7f0] sm:$0xff]  ;;  %v10623_v42 = vld [vmem:[#allocation18 + $0x7f8] sm:$0xff] }
0x2261   : > { %10143 = vmatprep.mubr.bf16.mxu1 %v9941_v62  ;;  %10190 = vmatprep.mubr.bf16.mxu0 %v9943_v44  ;;  %v12620_v45 = vcombine.low %v10620_v5, %v10622_v26  ;;  %v12621_v18 = vcombine.high %v10620_v5, %v10622_v26  ;;  %v12622_v3 = vcombine.low %v10621_v29, %v10623_v42  ;;  %v10616_v2 = vld [vmem:[#allocation18 + $0x730] sm:$0xff]  ;;  %v10619_v61 = vld [vmem:[#allocation18 + $0x778] sm:$0xff] }
0x2262   : > { %v12623_v15 = vcombine.high %v10621_v29, %v10623_v42  ;;  %v10618_v24 = vld [vmem:[#allocation18 + $0x770] sm:$0xff]  ;;  %v10613_v34 = vld [vmem:[#allocation18 + $0x6b8] sm:$0xff] }
0x2263   : > { %v12617_v39 = vcombine.high %v10616_v2, %v10618_v24  ;;  %v10614_v27 = vld [vmem:[#allocation18 + $0x6f0] sm:$0xff]  ;;  %v10615_v16 = vld [vmem:[#allocation18 + $0x6f8] sm:$0xff]  ;;  %v12616_v20 = vcombine.low %v10616_v2, %v10618_v24  ;;  %v16970_v2 = vmov 0.0  }
0x2264   : > { %v12615_v6 = vcombine.high %v10613_v34, %v10615_v16  ;;  %v10608_v50 = vld [vmem:[#allocation18 + $0x630] sm:$0xff]  ;;  %v10609_v62 = vld [vmem:[#allocation18 + $0x638] sm:$0xff]  ;;  %v12614_v55 = vcombine.low %v10613_v34, %v10615_v16 }
0x2265   : > { %v10610_v54 = vld [vmem:[#allocation18 + $0x670] sm:$0xff]  ;;  %v10611_v44 = vld [vmem:[#allocation18 + $0x678] sm:$0xff] }
0x2266   : > { %10144 = vmatmul.mubr.bf16.gmra.mxu1 %v9940_v25  ;;  %10191 = vmatmul.mubr.bf16.gmra.mxu0 %v9942_v7  ;;  %v10604_v25 = vld [vmem:[#allocation18 + $0x5b0] sm:$0xff]  ;;  %v10593_v29 = vld [vmem:[#allocation18 + $0x438] sm:$0xff] }
0x2267   : > { %13142 = vmatpush3.bf16.xpose.msra.mxu1 %v14376_v32  ;;  %13162 = vmatpush3.bf16.xpose.msra.mxu0 %v14377_v19  ;;  %v12609_v32 = vcombine.high %v10608_v50, %v10610_v54  ;;  %v12611_v19 = vcombine.high %v10609_v62, %v10611_v44  ;;  %v10606_v7 = vld [vmem:[#allocation18 + $0x5f0] sm:$0xff] }
0x2268   : > { %13155 = vmatprep.mubr.bf16.mxu1 %v16619_v0  ;;  %13175 = vmatprep.mubr.bf16.mxu0 %v16619_v0  ;;  %v10592_v5 = vld [vmem:[#allocation18 + $0x430] sm:$0xff] }
0x2269   : > { %13143 = vmatprep.subr.bf16.mxu1 %v14378_v8  ;;  %13163 = vmatprep.subr.bf16.mxu0 %v14379_v4  ;;  %v10605_v8 = vld [vmem:[#allocation18 + $0x5b8] sm:$0xff]  ;;  %v10594_v26 = vld [vmem:[#allocation18 + $0x470] sm:$0xff] }
0x226a   : > { %v10607_v4 = vld [vmem:[#allocation18 + $0x5f8] sm:$0xff]  ;;  %v12592_v42 = vcombine.low %v10592_v5, %v10594_v26 }
0x226f   : > { %13144 = vmatpush3.bf16.xpose.msra.mxu1 %v14380_v53  ;;  %13164 = vmatpush3.bf16.xpose.msra.mxu0 %v14381_v49  ;;  %v12608_v53 = vcombine.low %v10608_v50, %v10610_v54  ;;  %v12610_v49 = vcombine.low %v10609_v62, %v10611_v44 }
0x2270   : > { %13145 = vmatprep.subr.bf16.mxu1 %v14382_v17  ;;  %13165 = vmatprep.subr.bf16.mxu0 %v14383_v28  ;;  %v12605_v17 = vcombine.high %v10604_v25, %v10606_v7  ;;  %v12607_v28 = vcombine.high %v10605_v8, %v10607_v4 }
0x2277   : > { %13146 = vmatpush3.bf16.xpose.msra.mxu1 %v14384_v13  ;;  %13166 = vmatpush3.bf16.xpose.msra.mxu0 %v14385_v11  ;;  %v10600_v13 = vld [vmem:[#allocation18 + $0x530] sm:$0xff] }
0x2278   : > { %13147 = vmatprep.subr.bf16.mxu1 %v14386_v23  ;;  %13167 = vmatprep.subr.bf16.mxu0 %v14387_v59  ;;  %v10602_v11 = vld [vmem:[#allocation18 + $0x570] sm:$0xff]  ;;  %v10601_v23 = vld [vmem:[#allocation18 + $0x538] sm:$0xff] }
0x2279   : > { %v10603_v59 = vld [vmem:[#allocation18 + $0x578] sm:$0xff] }
0x227f   : > { %13148 = vmatpush3.bf16.xpose.msra.mxu1 %v14388_v9  ;;  %13168 = vmatpush3.bf16.xpose.msra.mxu0 %v14389_v43  ;;  %v12604_v9 = vcombine.low %v10604_v25, %v10606_v7  ;;  %v12606_v43 = vcombine.low %v10605_v8, %v10607_v4 }
0x2280   : > { %13149 = vmatprep.subr.bf16.mxu1 %v14390_v35  ;;  %13169 = vmatprep.subr.bf16.mxu0 %v14391_v37  ;;  %v12601_v35 = vcombine.high %v10600_v13, %v10602_v11  ;;  %v12603_v37 = vcombine.high %v10601_v23, %v10603_v59 }
0x2287   : > { %13150 = vmatpush3.bf16.xpose.msra.mxu1 %v14392_v56  ;;  %13170 = vmatpush3.bf16.xpose.msra.mxu0 %v14393_v47  ;;  %v10596_v56 = vld [vmem:[#allocation18 + $0x4b0] sm:$0xff] }
0x2288   : > { %13151 = vmatprep.subr.bf16.mxu1 %v14394_v57  ;;  %13171 = vmatprep.subr.bf16.mxu0 %v14395_v51  ;;  %v10598_v47 = vld [vmem:[#allocation18 + $0x4f0] sm:$0xff]  ;;  %v10597_v57 = vld [vmem:[#allocation18 + $0x4b8] sm:$0xff] }
0x2289   : > { %v10599_v51 = vld [vmem:[#allocation18 + $0x4f8] sm:$0xff] }
0x228f   : > { %13152 = vmatpush3.bf16.xpose.msra.mxu1 %v14396_v10  ;;  %13172 = vmatpush3.bf16.xpose.msra.mxu0 %v14397_v46  ;;  %v12600_v10 = vcombine.low %v10600_v13, %v10602_v11  ;;  %v12602_v46 = vcombine.low %v10601_v23, %v10603_v59 }
0x2290   : > { %13153 = vmatprep.subr.bf16.mxu1 %v14398_v60  ;;  %13173 = vmatprep.subr.bf16.mxu0 %v14399_v30  ;;  %v12597_v60 = vcombine.high %v10596_v56, %v10598_v47  ;;  %v12599_v30 = vcombine.high %v10597_v57, %v10599_v51 }
0x2297   : > { %13154 = vmatpush3.bf16.xpose.msra.mxu1 %v14400_v1  ;;  %13174 = vmatpush3.bf16.xpose.msra.mxu0 %v14401_v52  ;;  %v12596_v1 = vcombine.low %v10596_v56, %v10598_v47  ;;  %v12598_v52 = vcombine.low %v10597_v57, %v10599_v51 }
0x2298   : > { %10792 = vmatprep.subr.bf16.mxu1 %v12621_v18  ;;  %10839 = vmatprep.subr.bf16.mxu0 %v12623_v15  ;;  %v10595_v18 = vld [vmem:[#allocation18 + $0x478] sm:$0xff] }
0x2299   : > { %v12595_v15 = vcombine.high %v10593_v29, %v10595_v18 }
0x229e   : > { %13156 = vmatmul.mubr.bf16.vlgmr.msra.gmra.mxu1 %v16619_v0  ;;  %13176 = vmatmul.mubr.bf16.vlgmr.msra.gmra.mxu0 %v16619_v0  ;;  %v10617_v0 = vld [vmem:[#allocation18 + $0x738] sm:$0xff] }
0x229f   : > { %13157 = vmatprep.mubr.bf16.mxu1 %v16625_v31  ;;  %13177 = vmatprep.mubr.bf16.mxu0 %v16625_v31  ;;  %v12619_v40 = vcombine.high %v10617_v0, %v10619_v61  ;;  %v12618_v63 = vcombine.low %v10617_v0, %v10619_v61 }
0x22a0   : > { %10793 = vmatpush1.bf16.xpose.msra.mxu1 %v12620_v45  ;;  %10840 = vmatpush1.bf16.xpose.msra.mxu0 %v12622_v3  ;;  %v12593_v45 = vcombine.high %v10592_v5, %v10594_v26  ;;  %v12594_v3 = vcombine.low %v10593_v29, %v10595_v18 }
0x22a1   : > { %10794 = vmatprep.subr.bf16.mxu1 %v12617_v39  ;;  %10841 = vmatprep.subr.bf16.mxu0 %v12619_v40 }
0x22a6   : > { %13158 = vmatmul.mubr.bf16.gmra.mxu1 %v16625_v31  ;;  %13178 = vmatmul.mubr.bf16.gmra.mxu0 %v16625_v31  ;;  %v10612_v31 = vld [vmem:[#allocation18 + $0x6b0] sm:$0xff] }
0x22a7   : > { %v12613_v38 = vcombine.high %v10612_v31, %v10614_v27  ;;  %v12612_v48 = vcombine.low %v10612_v31, %v10614_v27 }
0x22a8   : > { %10795 = vmatpush1.bf16.xpose.msra.mxu1 %v12616_v20  ;;  %10842 = vmatpush1.bf16.xpose.msra.mxu0 %v12618_v63 }
0x22a9   : > { %10796 = vmatprep.subr.bf16.mxu1 %v12613_v38  ;;  %10843 = vmatprep.subr.bf16.mxu0 %v12615_v6 }
0x22b0   : > { %10797 = vmatpush1.bf16.xpose.msra.mxu1 %v12612_v48  ;;  %10844 = vmatpush1.bf16.xpose.msra.mxu0 %v12614_v55 }
0x22b1   : > { %10798 = vmatprep.subr.bf16.mxu1 %v12609_v32  ;;  %10845 = vmatprep.subr.bf16.mxu0 %v12611_v19  ;;  %v10264_v19 = vld [vmem:[#allocation16 + $0x1c] sm:$0xf] }
0x22b2   : > { %v10273_v8 = vrot.slane %v10264_v19, %v15619_v21  ;;  %v10269_v4 = vrot.slane %v10264_v19, %v15612_v14 }
0x22b8   : > { %10799 = vmatpush1.bf16.xpose.msra.mxu1 %v12608_v53  ;;  %10846 = vmatpush1.bf16.xpose.msra.mxu0 %v12610_v49  ;;  %v10277_v53 = vrot.slane %v10264_v19, %v15648_v58 }
0x22b9   : > { %10800 = vmatprep.subr.bf16.mxu1 %v12605_v17  ;;  %10847 = vmatprep.subr.bf16.mxu0 %v12607_v28 }
0x22c0   : > { %10801 = vmatpush1.bf16.xpose.msra.mxu1 %v12604_v9  ;;  %10848 = vmatpush1.bf16.xpose.msra.mxu0 %v12606_v43 }
0x22c1   : > { %10802 = vmatprep.subr.bf16.mxu1 %v12601_v35  ;;  %10849 = vmatprep.subr.bf16.mxu0 %v12603_v37 }
0x22c8   : > { %10803 = vmatpush1.bf16.xpose.msra.mxu1 %v12600_v10  ;;  %10850 = vmatpush1.bf16.xpose.msra.mxu0 %v12602_v46 }
0x22c9   : > { %10804 = vmatprep.subr.bf16.mxu1 %v12597_v60  ;;  %10851 = vmatprep.subr.bf16.mxu0 %v12599_v30 }
0x22d0   : > { %10805 = vmatpush1.bf16.xpose.msra.mxu1 %v12596_v1  ;;  %10852 = vmatpush1.bf16.xpose.msra.mxu0 %v12598_v52 }
0x22d1   : > { %10806 = vmatprep.subr.bf16.mxu1 %v12593_v45  ;;  %10853 = vmatprep.subr.bf16.mxu0 %v12595_v15 }
0x22d8   : > { %10807 = vmatpush1.bf16.xpose.msra.mxu1 %v12592_v42  ;;  %10854 = vmatpush1.bf16.xpose.msra.mxu0 %v12594_v3 }
0x22d9   : > { %13543 = vmatprep.subr.bf16.mxu1 %v16970_v2  ;;  %13563 = vmatprep.subr.bf16.mxu0 %v16970_v2 }
0x231e   : > { %v10138_v24 = vpop.f32.mrf.mxu1  ;;  %v10185_v0 = vpop.f32.mrf.mxu0 }
0x2320   : > { %v10139_v39 = vpop.f32.mrf.mxu1  ;;  %v10186_v61 = vpop.f32.mrf.mxu0 }
0x2322   : > { %v10140_v40 = vpop.f32.mrf.mxu1  ;;  %v10187_v31 = vpop.f32.mrf.mxu0 }
0x2323   : > { %v10188_v27 = vadd.f32 %v10187_v31, %v10140_v40 }
0x2324   : > { %v10142_v34 = vpop.f32.mrf.mxu1  ;;  %v10189_v16 = vpop.f32.mrf.mxu0 }
0x2325   : > { %v16836_v20 = vadd.f32 %v10188_v27, %v16787_v12  ;;  %v10281_v12 = vrot.slane %v10264_v19, %v16084_v36 }
0x2326   : > { %v10145_v63 = vpop.f32.mrf.mxu1  ;;  %v10192_v38 = vpop.f32.mrf.mxu0 }
0x2327   : > { %v10193_v6 = vadd.f32 %v10192_v38, %v10145_v63 }
0x2328   : > { %v10147_v50 = vpop.f32.mrf.mxu1  ;;  %v10194_v54 = vpop.f32.mrf.mxu0 }
0x2329   : > { %v16839_v62 = vadd.f32 %v10193_v6, %v16789_v22 }
0x232a   : > { %v10148_v44 = vpop.f32.mrf.mxu1  ;;  %v10195_v48 = vpop.f32.mrf.mxu0 }
0x232c   : > { %v10149_v55 = vpop.f32.mrf.mxu1  ;;  %v10196_v32 = vpop.f32.mrf.mxu0 }
0x235e   : > { %v10512_v25 = vpop.f32.mrf.mxu1  ;;  %v10563_v7 = vpop.f32.mrf.mxu0 }
0x235f   : > { %v10513_v9 = vadd.f32 %v10512_v25, %v10269_v4  ;;  %v10564_v43 = vadd.f32 %v10563_v7, %v10277_v53 }
0x2360   : > { %v10514_v49 = vpop.f32.mrf.mxu1  ;;  %v10565_v17 = vpop.f32.mrf.mxu0 }
0x2361   : > { %v10515_v13 = vadd.f32 %v10514_v49, %v10273_v8  ;;  %v10566_v11 = vadd.f32 %v10565_v17, %v10281_v12  ;;  %v10580_v60 = vmax.f32 %v10513_v9, 0.0  ;;  %v10582_v30 = vmax.f32 %v10564_v43, 0.0 }
0x2362   : > { %v10516_v28 = vpop.f32.mrf.mxu1  ;;  %v10567_v22 = vpop.f32.mrf.mxu0 }
0x2363   : > { %v10517_v23 = vadd.f32 %v10516_v28, %v10269_v4  ;;  %v10568_v59 = vadd.f32 %v10567_v22, %v10277_v53  ;;  %v10581_v51 = vmax.f32 %v10515_v13, 0.0  ;;  %v10583_v58 = vmax.f32 %v10566_v11, 0.0 }
0x2364   : > { %v10518_v35 = vpop.f32.mrf.mxu1  ;;  %v10569_v37 = vpop.f32.mrf.mxu0 }
0x2365   : > { %v10519_v56 = vadd.f32 %v10518_v35, %v10273_v8  ;;  %v10570_v21 = vadd.f32 %v10569_v37, %v10281_v12  ;;  %v10584_v47 = vmax.f32 %v10517_v23, 0.0  ;;  %v10586_v36 = vmax.f32 %v10568_v59, 0.0 }
0x2366   : > { %v10522_v57 = vpop.f32.mrf.mxu1  ;;  %v10573_v14 = vpop.f32.mrf.mxu0 }
0x2367   : > { %v10585_v10 = vmax.f32 %v10519_v56, 0.0  ;;  %v10587_v46 = vmax.f32 %v10570_v21, 0.0  ;;  %v10624_v18 = vpack.c.bf16 %v10584_v47, %v10580_v60  ;;  %v10626_v42 = vpack.c.bf16 %v10586_v36, %v10582_v30  ;;  %v14403_v56 = vld [vmem:[%s16971_s4 + $0x30] sm:$0xff]   ;;  %v14406_v60 = vld [vmem:[%s16971_s4 + $0x18] sm:$0xff]  }
0x2368   : > { %v10524_v1 = vpop.f32.mrf.mxu1  ;;  %v10575_v52 = vpop.f32.mrf.mxu0  ;;  %v10523_v3 = vadd.f32 %v10522_v57, %v10269_v4  ;;  %v10574_v15 = vadd.f32 %v10573_v14, %v10277_v53  ;;  %v12625_v53 = vld [vmem:[%s16969_s11 + $0x1] ss:$0 sm:$0xff]  ;;  %v14407_v30 = vld [vmem:[%s16971_s4 + $0x10] sm:$0xff]  }
0x2369   : > { %v10625_v5 = vpack.c.bf16 %v10585_v10, %v10581_v51  ;;  %v10627_v26 = vpack.c.bf16 %v10587_v46, %v10583_v58  ;;  %v10525_v29 = vadd.f32 %v10524_v1, %v10273_v8  ;;  %v10576_v45 = vadd.f32 %v10575_v52, %v10281_v12  ;;  %v14408_v1 = vld [vmem:[%s16971_s4 + $0x8] sm:$0xff]   ;;  %v14409_v52 = vld [vmem:[%s16971_s4] sm:$0xff]  }
0x236a   : > { %v10526_v24 = vpop.f32.mrf.mxu1  ;;  %v10577_v0 = vpop.f32.mrf.mxu0  ;;  %v10588_v16 = vmax.f32 %v10523_v3, 0.0  ;;  %v10590_v63 = vmax.f32 %v10574_v15, 0.0 }
0x236b   : > { %v10589_v39 = vmax.f32 %v10525_v29, 0.0  ;;  %v10591_v61 = vmax.f32 %v10576_v45, 0.0  ;;  %10824 = vmatprep.mubr.bf16.mxu1 %v10625_v5  ;;  %10871 = vmatprep.mubr.bf16.mxu0 %v10627_v26  ;;  %v14410_v5 = vld [vmem:[#allocation24 + $0x8] sm:$0xff]   ;;  %v12626_v0 = vld [vmem:[#allocation19 + $0x1] ss:$0 sm:$0xff] }
0x236c   : > { %v10527_v40 = vpop.f32.mrf.mxu1  ;;  %v10578_v31 = vpop.f32.mrf.mxu0  ;;  %10825 = vmatmul.mubr.bf16.vlgmr.msra.gmra.mxu1 %v10624_v18  ;;  %10872 = vmatmul.mubr.bf16.vlgmr.msra.gmra.mxu0 %v10626_v42  ;;  %v10628_v38 = vpack.c.bf16 %v10588_v16, %v10588_v16  ;;  %v10630_v6 = vpack.c.bf16 %v10590_v63, %v10590_v63 }
0x236d   : > { %v10629_v27 = vpack.c.bf16 %v10589_v39, %v10589_v39  ;;  %v10631_v34 = vpack.c.bf16 %v10591_v61, %v10591_v61  ;;  %13564 = vmatpush3.bf16.xpose.msra.mxu0 %v14410_v5  ;;  %v12627_v31 = vld [vmem:[#allocation21 + $0x1] ss:$0 sm:$0xff] }
0x236e   : > { %13565 = vmatprep.subr.bf16.mxu0 %v16970_v2 }
0x236f   : > { %10831 = vmatprep.mubr.bf16.mxu1 %v10629_v27  ;;  %10878 = vmatprep.mubr.bf16.mxu0 %v10631_v34 }
0x2374   : > { %10832 = vmatmul.mubr.bf16.gmra.mxu1 %v10628_v38  ;;  %10879 = vmatmul.mubr.bf16.gmra.mxu0 %v10630_v6 }
0x2375   : > { %13559 = vmatprep.mubr.msk.bf16.mxu1 %vm15136_vm0, %v16970_v2  ;;  %13567 = vmatprep.mubr.msk.bf16.mxu0 %vm15136_vm0, %v16970_v2 }
0x242c   : > { %v10826_v50 = vpop.f32.mrf.mxu1  ;;  %v10873_v54 = vpop.f32.mrf.mxu0 }
0x242e   : > { %v10827_v44 = vpop.f32.mrf.mxu1  ;;  %v10874_v48 = vpop.f32.mrf.mxu0 }
0x242f   : > { %v14411_v48 = vld [vmem:[#allocation24] sm:$0xff]  }
0x2430   : > { %v10828_v55 = vpop.f32.mrf.mxu1  ;;  %v10875_v32 = vpop.f32.mrf.mxu0  ;;  %13566 = vmatpush3.bf16.xpose.msra.mxu0 %v14411_v48 }
0x2431   : > { %v10876_v19 = vadd.f32 %v10875_v32, %v10828_v55  ;;  %13571 = vmatprep.subr.bf16.mxu0 %v16970_v2  ;;  %v12628_v55 = vld [vmem:[#allocation22] ss:$0 sm:$0xff] }
0x2432   : > { %v10830_v25 = vpop.f32.mrf.mxu1  ;;  %v10877_v7 = vpop.f32.mrf.mxu0 }
0x2433   : > { %v10886_v8 = vadd.f32 %v10876_v19, %v16836_v20 }
0x2434   : > { %v10833_v12 = vpop.f32.mrf.mxu1  ;;  %v10880_v4 = vpop.f32.mrf.mxu0 }
0x2435   : > { %v10888_v49 = vadd.f32 %v10886_v8, %v16614_v33  ;;  %v10881_v17 = vadd.f32 %v10880_v4, %v10833_v12  ;;  %v14402_v33 = vld [vmem:[%s16971_s4 + $0x38] sm:$0xff]  }
0x2436   : > { %v10835_v28 = vpop.f32.mrf.mxu1  ;;  %v10882_v22 = vpop.f32.mrf.mxu0  ;;  %13544 = vmatpush3.bf16.xpose.msra.mxu1 %v14402_v33 }
0x2437   : > { %v10887_v13 = vadd.f32 %v10881_v17, %v16839_v62  ;;  %v10898_v11 = vadd.f32 %v12625_v53, %v10888_v49  ;;  %13545 = vmatprep.subr.bf16.mxu1 %v16970_v2  ;;  %v14404_v62 = vld [vmem:[%s16971_s4 + $0x28] sm:$0xff]  }
0x2438   : > { %v10836_v23 = vpop.f32.mrf.mxu1  ;;  %v10883_v59 = vpop.f32.mrf.mxu0  ;;  %v12637_v17 = vld [vmem:[#allocation25] ss:$0 sm:$0xff] }
0x2439   : > { %v10889_v9 = vadd.f32 %v10887_v13, %v16616_v41  ;;  %10904 = vadd.xlane.f32.xlu1 %v10898_v11  ;;  %v14405_v41 = vld [vmem:[%s16971_s4 + $0x20] sm:$0xff]  }
0x243a   : > { %v10837_v20 = vpop.f32.mrf.mxu1  ;;  %v10884_v43 = vpop.f32.mrf.mxu0 }
0x243b   : > { %v10899_v35 = vadd.f32 %v12625_v53, %v10889_v9  ;;  %v11131_v53 = vld [vmem:[%s16972_s23] sm:$0xf] }
0x243c   : > { %v11144_v49 = vsel %vm2668_vm5, %v11131_v53, 0 }
0x243d   : > { %v10906_v37 = vsel %vm3771_vm8, %v10899_v35, 0.0 }
0x243e   : > { %10907 = vadd.xlane.f32.xlu0 %v10906_v37  ;;  %13546 = vmatpush3.bf16.xpose.msra.mxu1 %v14403_v56 }
0x243f   : > { %13547 = vmatprep.subr.bf16.mxu1 %v16970_v2 }
0x2446   : > { %13548 = vmatpush3.bf16.xpose.msra.mxu1 %v14404_v62  ;;  %v12642_v62 = vld [vmem:[#allocation30] ss:$0 sm:$0xff] }
0x2447   : > { %13549 = vmatprep.subr.bf16.mxu1 %v16970_v2 }
0x244e   : > { %13550 = vmatpush3.bf16.xpose.msra.mxu1 %v14405_v41 }
0x244f   : > { %13551 = vmatprep.subr.bf16.mxu1 %v16970_v2 }
0x2456   : > { %13552 = vmatpush3.bf16.xpose.msra.mxu1 %v14406_v60 }
0x2457   : > { %13553 = vmatprep.subr.bf16.mxu1 %v16970_v2 }
0x245e   : > { %13554 = vmatpush3.bf16.xpose.msra.mxu1 %v14407_v30 }
0x245f   : > { %13555 = vmatprep.subr.bf16.mxu1 %v16970_v2 }
0x2466   : > { %13556 = vmatpush3.bf16.xpose.msra.mxu1 %v14408_v1 }
0x2467   : > { %13557 = vmatprep.subr.bf16.mxu1 %v16970_v2 }
0x246e   : > { %13558 = vmatpush3.bf16.xpose.msra.mxu1 %v14409_v52 }
0x24c2   : > { %v10905_v21 = vpop.xlane.xlu1 %10904 }
0x24c3   : > { %v10909_v47 = vmul.f32 0.0078125, %v10905_v21 }
0x24c5   : > { %v10911_v36 = vsub.f32 %v10898_v11, %v10909_v47  ;;  %v11186_v11 = vld [vmem:[#allocation28] sm:$0xf] }
0x24c6   : > { %v11195_v20 = vsel %vm2668_vm5, %v11186_v11, 0 }
0x24c7   : > { %v10908_v57 = vpop.xlane.xlu0 %10907  ;;  %v10913_v14 = vmul.f32 %v10911_v36, %v10911_v36 }
0x24c8   : > { %v10910_v51 = vmul.f32 0.0078125, %v10908_v57 }
0x24c9   : > { %10915 = vadd.xlane.f32.xlu0 %v10913_v14 }
0x24ca   : > { %v10912_v58 = vsub.f32 %v10899_v35, %v10910_v51 }
0x24cc   : > { %v10914_v10 = vmul.f32 %v10912_v58, %v10912_v58 }
0x24ce   : > { %v10917_v46 = vsel %vm3771_vm8, %v10914_v10, 0.0 }
0x24cf   : > { %10918 = vadd.xlane.f32.xlu1 %v10917_v46 }
0x2552   : > { %v10916_v26 = vpop.xlane.xlu0 %10915 }
0x2553   : > { %v10920_v29 = vmul.f32 0.0078125, %v10916_v26 }
0x2555   : > { %v10922_v45 = vadd.f32 1e-05, %v10920_v29 }
0x2557   : > { %14526 = vrsqrt.f32 %v10922_v45 }
0x2558   : > { %v10919_v18 = vpop.xlane.xlu1 %10918 }
0x2559   : > { %v10921_v42 = vmul.f32 0.0078125, %v10919_v18 }
0x255b   : > { %v10923_v3 = vadd.f32 1e-05, %v10921_v42 }
0x255d   : > { %14528 = vrsqrt.f32 %v10923_v3 }
0x2564   : > { %v14527_v15 = vpop.eup %14526 }
0x2565   : > { %v10926_v24 = vmul.f32 %v14527_v15, %v10911_v36 }
0x2567   : > { %v10934_v61 = vmul.f32 %v12626_v0, %v10926_v24 }
0x2569   : > { %v10942_v34 = vadd.f32 %v12627_v31, %v10934_v61 }
0x256a   : > { %v14529_v39 = vpop.eup %14528 }
0x256b   : > { %v10927_v40 = vmul.f32 %v14529_v39, %v10912_v58  ;;  %v11240_v58 = vld [vmem:[%s1294_s16] sm:$0x1f] }
0x256d   : > { %v10935_v27 = vmul.f32 %v12626_v0, %v10927_v40 }
0x256f   : > { %v10943_v16 = vadd.f32 %v12627_v31, %v10935_v27 }
0x2571   : > { %v10960_v63 = vpack.c.bf16 %v10943_v16, %v10942_v34 }
0x2573   : > { %v10969_v38 = vshrl.u32 %v10960_v63, 16  ;;  %v10972_v6 = vshll.u32 %v10960_v63, 16 }
0x2575   : > { %v10971_v50 = vrot.slane %v10969_v38, 3  ;;  %v10974_v54 = vrot.slane %v10972_v6, 4 }
0x2577   : > { %v10975_v44 = vor.u32 %v10974_v54, %v10971_v50 }
0x2579   : > { %13560 = vmatmul.mubr.bf16.vlgmr.msra.gmra.mxu1 %v10975_v44 }
0x2639   : > { %v11059_v32 = vpop.f32.mrf.mxu1 }
0x263a   : > { %v11060_v19 = vadd.f32 %v12628_v55, %v11059_v32 }
0x263b   : > { %v13561_v25 = vpop.f32.mrf.mxu1 }
0x263c   : > { %v11065_v7 = vmax.f32 %v11060_v19, 0.0 }
0x263d   : > { %v11062_v8 = vpop.f32.mrf.mxu1 }
0x263e   : > { %v11070_v12 = vpack.c.bf16 %v11065_v7, %v11065_v7 }
0x263f   : > { %v13562_v4 = vpop.f32.mrf.mxu1 }
0x2640   : > { %13568 = vmatmul.mubr.bf16.vlgmr.msra.gmra.mxu0 %v11070_v12 }
0x2641   : > { %13573 = vmatprep.mubr.msk.bf16.mxu0 %vm15136_vm0, %v16970_v2  ;;  %13572 = vmatpush3.bf16.xpose.msra.mxu0 %v11144_v49 }
0x2642   : > { %13577 = vmatprep.subr.bf16.mxu0 %v16970_v2 }
0x2700   : > { %v11124_v28 = vpop.f32.mrf.mxu0 }
0x2701   : > { %v11125_v22 = vadd.f32 %v12637_v17, %v11124_v28 }
0x2702   : > { %v13569_v13 = vpop.f32.mrf.mxu0 }
0x2703   : > { %v11130_v23 = vmax.f32 %v11125_v22, 0.0 }
0x2704   : > { %v11127_v59 = vpop.f32.mrf.mxu0 }
0x2705   : > { %v11132_v9 = vpack.c.bf16 %v11130_v23, %v11130_v23 }
0x2706   : > { %v13570_v43 = vpop.f32.mrf.mxu0 }
0x2707   : > { %13574 = vmatmul.mubr.msk.bf16.vlgmr.msra.gmra.mxu0 %vm2668_vm5, %v11132_v9 }
0x2708   : > { %13578 = vmatpush3.bf16.xpose.msra.mxu0 %v11195_v20  ;;  %13579 = vmatprep.mubr.msk.bf16.mxu0 %vm15136_vm0, %v16970_v2  ;;  %v12640_v2 = vld [vmem:[#allocation27] ss:$0 sm:$0xff] }
0x270f   : > { %13580 = vmatmul.mubr.msk.bf16.vlgmr.msra.gmra.mxu0 %vm2668_vm5, %v11132_v9 }
0x27c7   : > { %v11180_v35 = vpop.f32.mrf.mxu0 }
0x27c8   : > { %v11181_v46 = vadd.f32 %v12640_v2, %v11180_v35 }
0x27c9   : > { %v13575_v37 = vpop.f32.mrf.mxu0 }
0x27cb   : > { %v11183_v33 = vpop.f32.mrf.mxu0 }
0x27cd   : > { %v13576_v56 = vpop.f32.mrf.mxu0 }
0x27cf   : > { %v11231_v41 = vpop.f32.mrf.mxu0 }
0x27d0   : > { %v11232_v21 = vadd.f32 %v12642_v62, %v11231_v41 }
0x27d1   : > { %v13581_v47 = vpop.f32.mrf.mxu0 }
0x27d2   : > { %v11237_v36 = vmul.f32 0.5, %v11232_v21 }
0x27d3   : > { %v11234_v57 = vpop.f32.mrf.mxu0 }
0x27d4   : > { %v11238_v14 = vmul.f32 1.442695, %v11237_v36 }
0x27d5   : > { %v13582_v51 = vpop.f32.mrf.mxu0 }
0x27d6   : > { %14530 = vpow2.f32 %v11238_v14 }
0x27e3   : > { %v14531_v10 = vpop.eup %14530 }
0x27e4   : > { %v11241_v60 = vmul.f32 %v14531_v10, %v11240_v58 }
0x27e6   : > { %v11242_v30 = vadd.f32 %v11241_v60, %v11181_v46 }
0x27e8   : > { %11244 = vst.msk [vmem:[%s1298_s2] sm:$0x1f] %vm11243_vm9, %v11242_v30 }
0x27e9 PF: > { %s85_s28 = sadd.s32 1, %s15072_s28  }
0x27ea   : > { %p82_p12 = scmp.ge.s32.totalorder %s85_s28, 4  }
0x27ec   :  { %84 = sbr.rel (!%p82_p12) target bundleno = 64 (0x40), region = 308 }
0x27f1   :  { %11264 = vsyncpa [#allocation3], 1 }
0x27f2   :  { %11266 = vsyncpa [#allocation3 + $0x1], 1 }
0x27f3   :  { %11267 = vsyncpa [#allocation5], 1 }
0x27f4   :  { %11268 = vsyncpa [#allocation8], 1 }
0x27f5   :  { %11269 = vsyncpa [#allocation11], 1 }
0x27f6   :  { %11270 = vsyncpa [#allocation14], 1 }
0x27f7   :  { %11271 = vsyncpa [#allocation17], 1 }
0x27f8   :  { %11272 = vsyncpa [#allocation20], 1 }
0x27f9   :  { %11273 = vsyncpa [#allocation23], 1 }
0x27fa   :  { %11274 = vsyncpa [#allocation26], 1 }
0x27fb   :  { %11275 = vsyncpa [#allocation29], 1 }

</bundles_post_ra>
